<compile_context>
chip_gen: v7x
topology: tpu7x:2x2x1
jax: 0.10.0
libtpu: 0.0.40
codegen_flags: <defaults>
</compile_context>

<pallas_src>
import jax
import jax.numpy as jnp
import numpy as np
from jax import lax
from jax.experimental import pallas as pl
from jax.experimental.pallas import tpu as pltpu


def _softsign(x):
    return x / (1.0 + jnp.abs(x))


# ---------------------------------------------------------------------------
# Fused kernel: [k==0] conv1+conv2+flatten into VMEM scratch, then per grid
# step a K-tile of fc1 is accumulated, and the last step applies bias,
# Softsign, fc2, Softsign and the *10 scale (P3 accumulator pattern).
# ---------------------------------------------------------------------------
def cnet_kernel(x_ref, cw1_ref, cb1_ref, cw2_ref, cb2_ref,
                w1_ref, b1_ref, w2_ref, b2_ref,
                o_ref, hf_ref, acc_ref):
    # x_ref  : (B, ns)            input state
    # cw1_ref: (16, 3)            conv1 weight [co, k]
    # cb1_ref: (16, 1)            conv1 bias
    # cw2_ref: (32, 48)           conv2 weight [co, k*16 + ci]
    # cb2_ref: (32, 1)            conv2 bias
    # w1_ref : (tk, 8*ns)         fc1 weight K-tile (rows = channel-major flat idx)
    # b1_ref : (1, 8*ns)
    # w2_ref : (8*ns, 3*ns)
    # b2_ref : (1, 3*ns)
    # o_ref  : (B, 3*ns)
    # hf_ref : (B, 32*ns) VMEM scratch -- flattened conv activations
    # acc_ref: (B, 8*ns)  VMEM scratch -- fc1 accumulator
    k = pl.program_id(0)
    B, ns = x_ref.shape
    tk = w1_ref.shape[0]
    c_out2 = cw2_ref.shape[0]          # 32

    @pl.when(k == 0)
    def _():
        acc_ref[...] = jnp.zeros_like(acc_ref)

        # Shift matrices along the spatial (lane) axis, built once and reused
        # by both conv layers:  (v @ s_m1)[p] = v[p-1]  (0 at p=0)
        #                       (v @ s_p1)[p] = v[p+1]  (0 at p=ns-1)
        row = lax.broadcasted_iota(jnp.int32, (ns, ns), 0)
        col = lax.broadcasted_iota(jnp.int32, (ns, ns), 1)
        s_m1 = (row == col - 1).astype(jnp.float32)
        s_p1 = (row == col + 1).astype(jnp.float32)

        cw1 = cw1_ref[...]             # (16, 3)
        cb1 = cb1_ref[...]             # (16, 1)
        cw2 = cw2_ref[...]             # (32, 48)
        cb2 = cb2_ref[...]             # (32, 1)

        for b in range(B):             # B is tiny (e.g. 2): unrolled
            xb = x_ref[b:b + 1, :]                                     # (1, ns)
            xm1 = jnp.dot(xb, s_m1, preferred_element_type=jnp.float32)
            xp1 = jnp.dot(xb, s_p1, preferred_element_type=jnp.float32)

            # conv1 (1 -> 16), taps k=0,1,2 <-> p-1, p, p+1  (elementwise VPU)
            h1 = (cb1 + cw1[:, 0:1] * xm1
                      + cw1[:, 1:2] * xb
                      + cw1[:, 2:3] * xp1)
            h1 = _softsign(h1)                                         # (16, ns)

            # conv2 (16 -> 32) as ONE K=48 MXU matmul over [tap, cin]
            h1m1 = jnp.dot(h1, s_m1, preferred_element_type=jnp.float32)
            h1p1 = jnp.dot(h1, s_p1, preferred_element_type=jnp.float32)
            taps2 = jnp.concatenate([h1m1, h1, h1p1], axis=0)          # (48, ns)
            h2 = jnp.dot(cw2, taps2, preferred_element_type=jnp.float32) + cb2
            h2 = _softsign(h2)                                         # (32, ns)

            # channel-major flatten == torch .view(-1, 32*ns) on an NCL tensor
            for c in range(c_out2):
                hf_ref[b:b + 1, c * ns:(c + 1) * ns] = h2[c:c + 1, :]

    # -------- every grid step: fc1 partial accumulation over this K tile -----
    off = pl.multiple_of(k * tk, tk)
    acc_ref[...] += jnp.dot(hf_ref[:, pl.ds(off, tk)], w1_ref[...],
                            preferred_element_type=jnp.float32)

    # -------- last step: bias + Softsign, fc2, Softsign, *10 -----------------
    @pl.when(k == pl.num_programs(0) - 1)
    def _():
        h = _softsign(acc_ref[...] + b1_ref[...])
        y = jnp.dot(h, w2_ref[...], preferred_element_type=jnp.float32)
        y = _softsign(y + b2_ref[...])
        o_ref[...] = (10.0 * y).astype(o_ref.dtype)


# ---------------------------------------------------------------------------
# Wrapper: PyTorch-layout params -> kernel-friendly layouts, single pallas_call.
# (In a real deployment the fc weight transposes would be done once, offline.)
# ---------------------------------------------------------------------------
def cnet_forward(params, x, *, ns=128, tk=2048):
    B = x.shape[0]
    x = x.astype(jnp.float32)

    cw1 = params['conv1_w'][:, 0, :]                                    # (16, 3)
    cb1 = params['conv1_b'].reshape(16, 1)
    cw2 = jnp.transpose(params['conv2_w'], (0, 2, 1)).reshape(32, 48)   # [co, k*16+ci]
    cb2 = params['conv2_b'].reshape(32, 1)

    fw1 = jnp.transpose(params['fc1_w'], (1, 0))                        # (32ns, 8ns)
    fb1 = params['fc1_b'].reshape(1, -1)
    fw2 = jnp.transpose(params['fc2_w'], (1, 0))                        # (8ns, 3ns)
    fb2 = params['fc2_b'].reshape(1, -1)

    K, N1 = 32 * ns, 8 * ns
    N2 = 3 * ns
    tk = min(tk, K)
    assert K % tk == 0, (K, tk)

    y = pl.pallas_call(
        cnet_kernel,
        out_shape=jax.ShapeDtypeStruct((B, N2), jnp.float32),
        grid_spec=pltpu.PrefetchScalarGridSpec(
            num_scalar_prefetch=0,
            grid=(K // tk,),
            in_specs=[
                pl.BlockSpec((B, ns), lambda k: (0, 0)),        # x
                pl.BlockSpec((16, 3), lambda k: (0, 0)),        # conv1 w
                pl.BlockSpec((16, 1), lambda k: (0, 0)),        # conv1 b
                pl.BlockSpec((32, 48), lambda k: (0, 0)),       # conv2 w
                pl.BlockSpec((32, 1), lambda k: (0, 0)),        # conv2 b
                pl.BlockSpec((tk, N1), lambda k: (k, 0)),       # fc1 w  (K-tiled)
                pl.BlockSpec((1, N1), lambda k: (0, 0)),        # fc1 b
                pl.BlockSpec((N1, N2), lambda k: (0, 0)),       # fc2 w
                pl.BlockSpec((1, N2), lambda k: (0, 0)),        # fc2 b
            ],
            out_specs=pl.BlockSpec((B, N2), lambda k: (0, 0)),
            scratch_shapes=[
                pltpu.VMEM((B, K), jnp.float32),     # flattened conv activations
                pltpu.VMEM((B, N1), jnp.float32),    # fc1 accumulator
            ],
        ),
        compiler_params=pltpu.CompilerParams(
            dimension_semantics=("arbitrary",),
            vmem_limit_bytes=40 * 1024 * 1024,   # tk=2048 double-buffered fits on v5e/v6e/v7x
        ),
    )(x, cw1, cb1, cw2, cb2, fw1, fb1, fw2, fb2)
    return y.reshape(B, 3, ns)


# ---------------------------------------------------------------------------
# Parameter init (deterministic, PyTorch-style fan-in uniform).
# ---------------------------------------------------------------------------
def init_params(key, ns=128):
    ks = jax.random.split(key, 8)

    def u(k, shape, fan_in):
        bound = 1.0 / float(np.sqrt(fan_in))
        return jax.random.uniform(k, shape, jnp.float32, -bound, bound)

    return {
        'conv1_w': u(ks[0], (16, 1, 3), 1 * 3),
        'conv1_b': u(ks[1], (16,), 1 * 3),
        'conv2_w': u(ks[2], (32, 16, 3), 16 * 3),
        'conv2_b': u(ks[3], (32,), 16 * 3),
        'fc1_w': u(ks[4], (8 * ns, 32 * ns), 32 * ns),
        'fc1_b': u(ks[5], (8 * ns,), 32 * ns),
        'fc2_w': u(ks[6], (3 * ns, 8 * ns), 8 * ns),
        'fc2_b': u(ks[7], (3 * ns,), 8 * ns),
    }


# ---------------------------------------------------------------------------
# Pure-JAX reference (mirrors the PyTorch module) for a correctness check.
# ---------------------------------------------------------------------------
def ref_forward(params, x, ns=128):
    B = x.shape[0]
    h = x[:, None, :]
    h = lax.conv_general_dilated(h, params['conv1_w'], (1,), [(1, 1)],
                                 dimension_numbers=('NCH', 'OIH', 'NCH'),
                                 precision=lax.Precision.HIGHEST)
    h = h + params['conv1_b'][None, :, None]
    h = h / (1.0 + jnp.abs(h))
    h = lax.conv_general_dilated(h, params['conv2_w'], (1,), [(1, 1)],
                                 dimension_numbers=('NCH', 'OIH', 'NCH'),
                                 precision=lax.Precision.HIGHEST)
    h = h + params['conv2_b'][None, :, None]
    h = h / (1.0 + jnp.abs(h))
    h = h.reshape(B, 32 * ns)
    h = jnp.dot(h, params['fc1_w'].T, precision=lax.Precision.HIGHEST) + params['fc1_b']
    h = h / (1.0 + jnp.abs(h))
    h = jnp.dot(h, params['fc2_w'].T, precision=lax.Precision.HIGHEST) + params['fc2_b']
    h = h / (1.0 + jnp.abs(h))
    return (h * 10.0).reshape(B, 3, ns)


if __name__ == "__main__":
    ns = 128          # cNet default; fc shapes are tied to ns
    batch = 2

    key = jax.random.PRNGKey(0)
    k_param, k_x = jax.random.split(key)
    params = init_params(k_param, ns=ns)
    x = jax.random.normal(k_x, (batch, ns), dtype=jnp.float32)

    fwd = jax.jit(lambda p, xx: cnet_forward(p, xx, ns=ns))
    out = jax.block_until_ready(fwd(params, x))
    assert out.shape == (batch, 3, ns), out.shape

    ref = jax.block_until_ready(ref_forward(params, x, ns=ns))
    np.testing.assert_allclose(np.asarray(out), np.asarray(ref),
                               atol=5e-3, rtol=5e-3)
    print("KERNEL_OK")
</pallas_src>

<mosaic_0001>
module attributes {stable_mosaic.version = 11 : i64} {
  func.func @cnet_kernel(%arg0: i32, %arg1: memref<2x128xf32, #tpu.memory_space<vmem>>, %arg2: memref<16x3xf32, #tpu.memory_space<vmem>>, %arg3: memref<16x1xf32, #tpu.memory_space<vmem>>, %arg4: memref<32x48xf32, #tpu.memory_space<vmem>>, %arg5: memref<32x1xf32, #tpu.memory_space<vmem>>, %arg6: memref<2048x1024xf32, #tpu.memory_space<vmem>>, %arg7: memref<1x1024xf32, #tpu.memory_space<vmem>>, %arg8: memref<1024x384xf32, #tpu.memory_space<vmem>>, %arg9: memref<1x384xf32, #tpu.memory_space<vmem>>, %arg10: memref<2x384xf32, #tpu.memory_space<vmem>>, %arg11: memref<2x4096xf32, #tpu.memory_space<vmem>>, %arg12: memref<2x1024xf32, #tpu.memory_space<vmem>>) attributes {dimension_semantics = [#tpu.dimension_semantics<arbitrary>], iteration_bounds = array<i64: 2>, scalar_prefetch = 0 : i64, scratch_operands = 2 : i64, tpu.core_type = #tpu.core_type<tc>, window_params = [{pipeline_mode = #tpu.pipeline_mode<synchronous>, transform_indices = @transform_0, window_bounds = array<i64: 2, 128>}, {pipeline_mode = #tpu.pipeline_mode<synchronous>, transform_indices = @transform_1, window_bounds = array<i64: 16, 3>}, {pipeline_mode = #tpu.pipeline_mode<synchronous>, transform_indices = @transform_2, window_bounds = array<i64: 16, 1>}, {pipeline_mode = #tpu.pipeline_mode<synchronous>, transform_indices = @transform_3, window_bounds = array<i64: 32, 48>}, {pipeline_mode = #tpu.pipeline_mode<synchronous>, transform_indices = @transform_4, window_bounds = array<i64: 32, 1>}, {transform_indices = @transform_5, window_bounds = array<i64: 2048, 1024>}, {pipeline_mode = #tpu.pipeline_mode<synchronous>, transform_indices = @transform_6, window_bounds = array<i64: 1, 1024>}, {pipeline_mode = #tpu.pipeline_mode<synchronous>, transform_indices = @transform_7, window_bounds = array<i64: 1024, 384>}, {pipeline_mode = #tpu.pipeline_mode<synchronous>, transform_indices = @transform_8, window_bounds = array<i64: 1, 384>}, {pipeline_mode = #tpu.pipeline_mode<synchronous>, transform_indices = @transform_9, window_bounds = array<i64: 2, 384>}]} {
    %c0_i32 = arith.constant 0 : i32
    %0 = arith.cmpi eq, %arg0, %c0_i32 : i32
    %1 = arith.extui %0 : i1 to i32
    %c0_i32_0 = arith.constant 0 : i32
    %2 = arith.cmpi ne, %1, %c0_i32_0 : i32
    scf.if %2 {
      %cst_8 = arith.constant 0.000000e+00 : f32
      %15 = vector.broadcast %cst_8 : f32 to vector<2x1024xf32>
      %c0_9 = arith.constant 0 : index
      %c0_10 = arith.constant 0 : index
      %16 = vector.load %arg12[%c0_9, %c0_10] : memref<2x1024xf32, #tpu.memory_space<vmem>>, vector<2x1024xf32>
      tpu.vector_store %arg12[%c0_9, %c0_10], %15 {strides = array<i32>} : memref<2x1024xf32, #tpu.memory_space<vmem>>, vector<2x1024xf32>,
      %17 = tpu.iota {dimensions = array<i32: 0>} : vector<128x128xi32>
      %18 = tpu.iota {dimensions = array<i32: 1>} : vector<128x128xi32>
      %c1_i32_11 = arith.constant 1 : i32
      %19 = vector.broadcast %c1_i32_11 : i32 to vector<128x128xi32>
      %20 = arith.subi %18, %19 : vector<128x128xi32>
      %21 = arith.cmpi eq, %17, %20 : vector<128x128xi32>
      %22 = arith.extui %21 : vector<128x128xi1> to vector<128x128xi32>
      %23 = arith.sitofp %22 : vector<128x128xi32> to vector<128x128xf32>
      %c1_i32_12 = arith.constant 1 : i32
      %24 = vector.broadcast %c1_i32_12 : i32 to vector<128x128xi32>
      %25 = arith.addi %18, %24 : vector<128x128xi32>
      %26 = arith.cmpi eq, %17, %25 : vector<128x128xi32>
      %27 = arith.extui %26 : vector<128x128xi1> to vector<128x128xi32>
      %28 = arith.sitofp %27 : vector<128x128xi32> to vector<128x128xf32>
      %c0_13 = arith.constant 0 : index
      %c0_14 = arith.constant 0 : index
      %29 = vector.load %arg2[%c0_13, %c0_14] : memref<16x3xf32, #tpu.memory_space<vmem>>, vector<16x3xf32>
      %c0_15 = arith.constant 0 : index
      %c0_16 = arith.constant 0 : index
      %30 = vector.load %arg3[%c0_15, %c0_16] : memref<16x1xf32, #tpu.memory_space<vmem>>, vector<16x1xf32>
      %c0_17 = arith.constant 0 : index
      %c0_18 = arith.constant 0 : index
      %31 = vector.load %arg4[%c0_17, %c0_18] : memref<32x48xf32, #tpu.memory_space<vmem>>, vector<32x48xf32>
      %c0_19 = arith.constant 0 : index
      %c0_20 = arith.constant 0 : index
      %32 = vector.load %arg5[%c0_19, %c0_20] : memref<32x1xf32, #tpu.memory_space<vmem>>, vector<32x1xf32>
      %c0_21 = arith.constant 0 : index
      %c0_22 = arith.constant 0 : index
      %33 = vector.load %arg1[%c0_21, %c0_22] : memref<2x128xf32, #tpu.memory_space<vmem>>, vector<1x128xf32>
      %cst_23 = arith.constant dense<0.000000e+00> : vector<1x128xf32>
      %34 = tpu.matmul %33, %23, %cst_23 {dimension_numbers = #tpu.dot_dimension_numbers<[1], [0], [0], [1], [0, 0, 1, 1], [], []>} : vector<1x128xf32>, vector<128x128xf32>, vector<1x128xf32> -> vector<1x128xf32>
      %cst_24 = arith.constant dense<0.000000e+00> : vector<1x128xf32>
      %35 = tpu.matmul %33, %28, %cst_24 {dimension_numbers = #tpu.dot_dimension_numbers<[1], [0], [0], [1], [0, 0, 1, 1], [], []>} : vector<1x128xf32>, vector<128x128xf32>, vector<1x128xf32> -> vector<1x128xf32>
      %36 = vector.extract_strided_slice %29 {offsets = [0, 0], sizes = [16, 1], strides = [1, 1]} : vector<16x3xf32> to vector<16x1xf32>
      %37 = vector.broadcast %36 : vector<16x1xf32> to vector<16x128xf32>
      %38 = vector.broadcast %34 : vector<1x128xf32> to vector<16x128xf32>
      %39 = arith.mulf %37, %38 : vector<16x128xf32>
      %40 = vector.broadcast %30 : vector<16x1xf32> to vector<16x128xf32>
      %41 = arith.addf %40, %39 : vector<16x128xf32>
      %42 = vector.extract_strided_slice %29 {offsets = [0, 1], sizes = [16, 1], strides = [1, 1]} : vector<16x3xf32> to vector<16x1xf32>
      %43 = vector.broadcast %42 : vector<16x1xf32> to vector<16x128xf32>
      %44 = vector.broadcast %33 : vector<1x128xf32> to vector<16x128xf32>
      %45 = arith.mulf %43, %44 : vector<16x128xf32>
      %46 = arith.addf %41, %45 : vector<16x128xf32>
      %47 = vector.extract_strided_slice %29 {offsets = [0, 2], sizes = [16, 1], strides = [1, 1]} : vector<16x3xf32> to vector<16x1xf32>
      %48 = vector.broadcast %47 : vector<16x1xf32> to vector<16x128xf32>
      %49 = vector.broadcast %35 : vector<1x128xf32> to vector<16x128xf32>
      %50 = arith.mulf %48, %49 : vector<16x128xf32>
      %51 = arith.addf %46, %50 : vector<16x128xf32>
      %52 = math.absf %51 : vector<16x128xf32>
      %cst_25 = arith.constant 1.000000e+00 : f32
      %53 = vector.broadcast %cst_25 : f32 to vector<16x128xf32>
      %54 = arith.addf %53, %52 : vector<16x128xf32>
      %55 = arith.divf %51, %54 : vector<16x128xf32>
      %cst_26 = arith.constant dense<0.000000e+00> : vector<16x128xf32>
      %56 = tpu.matmul %55, %23, %cst_26 {dimension_numbers = #tpu.dot_dimension_numbers<[1], [0], [0], [1], [0, 0, 1, 1], [], []>} : vector<16x128xf32>, vector<128x128xf32>, vector<16x128xf32> -> vector<16x128xf32>
      %cst_27 = arith.constant dense<0.000000e+00> : vector<16x128xf32>
      %57 = tpu.matmul %55, %28, %cst_27 {dimension_numbers = #tpu.dot_dimension_numbers<[1], [0], [0], [1], [0, 0, 1, 1], [], []>} : vector<16x128xf32>, vector<128x128xf32>, vector<16x128xf32> -> vector<16x128xf32>
      %58 = tpu.concatenate %56, %55, %57 in 0 : vector<16x128xf32>, vector<16x128xf32>, vector<16x128xf32> -> vector<48x128xf32>
      %cst_28 = arith.constant dense<0.000000e+00> : vector<32x128xf32>
      %59 = tpu.matmul %31, %58, %cst_28 {dimension_numbers = #tpu.dot_dimension_numbers<[1], [0], [0], [1], [0, 0, 1, 1], [], []>} : vector<32x48xf32>, vector<48x128xf32>, vector<32x128xf32> -> vector<32x128xf32>
      %60 = vector.broadcast %32 : vector<32x1xf32> to vector<32x128xf32>
      %61 = arith.addf %59, %60 : vector<32x128xf32>
      %62 = math.absf %61 : vector<32x128xf32>
      %cst_29 = arith.constant 1.000000e+00 : f32
      %63 = vector.broadcast %cst_29 : f32 to vector<32x128xf32>
      %64 = arith.addf %63, %62 : vector<32x128xf32>
      %65 = arith.divf %61, %64 : vector<32x128xf32>
      %66 = vector.extract_strided_slice %65 {offsets = [0, 0], sizes = [1, 128], strides = [1, 1]} : vector<32x128xf32> to vector<1x128xf32>
      %c0_30 = arith.constant 0 : index
      %c0_31 = arith.constant 0 : index
      %67 = vector.load %arg11[%c0_30, %c0_31] : memref<2x4096xf32, #tpu.memory_space<vmem>>, vector<1x128xf32>
      tpu.vector_store %arg11[%c0_30, %c0_31], %66 {strides = array<i32>} : memref<2x4096xf32, #tpu.memory_space<vmem>>, vector<1x128xf32>,
      %68 = vector.extract_strided_slice %65 {offsets = [1, 0], sizes = [1, 128], strides = [1, 1]} : vector<32x128xf32> to vector<1x128xf32>
      %c0_32 = arith.constant 0 : index
      %c128 = arith.constant 128 : index
      %69 = vector.load %arg11[%c0_32, %c128] : memref<2x4096xf32, #tpu.memory_space<vmem>>, vector<1x128xf32>
      tpu.vector_store %arg11[%c0_32, %c128], %68 {strides = array<i32>} : memref<2x4096xf32, #tpu.memory_space<vmem>>, vector<1x128xf32>,
      %70 = vector.extract_strided_slice %65 {offsets = [2, 0], sizes = [1, 128], strides = [1, 1]} : vector<32x128xf32> to vector<1x128xf32>
      %c0_33 = arith.constant 0 : index
      %c256 = arith.constant 256 : index
      %71 = vector.load %arg11[%c0_33, %c256] : memref<2x4096xf32, #tpu.memory_space<vmem>>, vector<1x128xf32>
      tpu.vector_store %arg11[%c0_33, %c256], %70 {strides = array<i32>} : memref<2x4096xf32, #tpu.memory_space<vmem>>, vector<1x128xf32>,
      %72 = vector.extract_strided_slice %65 {offsets = [3, 0], sizes = [1, 128], strides = [1, 1]} : vector<32x128xf32> to vector<1x128xf32>
      %c0_34 = arith.constant 0 : index
      %c384 = arith.constant 384 : index
      %73 = vector.load %arg11[%c0_34, %c384] : memref<2x4096xf32, #tpu.memory_space<vmem>>, vector<1x128xf32>
      tpu.vector_store %arg11[%c0_34, %c384], %72 {strides = array<i32>} : memref<2x4096xf32, #tpu.memory_space<vmem>>, vector<1x128xf32>,
      %74 = vector.extract_strided_slice %65 {offsets = [4, 0], sizes = [1, 128], strides = [1, 1]} : vector<32x128xf32> to vector<1x128xf32>
      %c0_35 = arith.constant 0 : index
      %c512 = arith.constant 512 : index
      %75 = vector.load %arg11[%c0_35, %c512] : memref<2x4096xf32, #tpu.memory_space<vmem>>, vector<1x128xf32>
      tpu.vector_store %arg11[%c0_35, %c512], %74 {strides = array<i32>} : memref<2x4096xf32, #tpu.memory_space<vmem>>, vector<1x128xf32>,
      %76 = vector.extract_strided_slice %65 {offsets = [5, 0], sizes = [1, 128], strides = [1, 1]} : vector<32x128xf32> to vector<1x128xf32>
      %c0_36 = arith.constant 0 : index
      %c640 = arith.constant 640 : index
      %77 = vector.load %arg11[%c0_36, %c640] : memref<2x4096xf32, #tpu.memory_space<vmem>>, vector<1x128xf32>
      tpu.vector_store %arg11[%c0_36, %c640], %76 {strides = array<i32>} : memref<2x4096xf32, #tpu.memory_space<vmem>>, vector<1x128xf32>,
      %78 = vector.extract_strided_slice %65 {offsets = [6, 0], sizes = [1, 128], strides = [1, 1]} : vector<32x128xf32> to vector<1x128xf32>
      %c0_37 = arith.constant 0 : index
      %c768 = arith.constant 768 : index
      %79 = vector.load %arg11[%c0_37, %c768] : memref<2x4096xf32, #tpu.memory_space<vmem>>, vector<1x128xf32>
      tpu.vector_store %arg11[%c0_37, %c768], %78 {strides = array<i32>} : memref<2x4096xf32, #tpu.memory_space<vmem>>, vector<1x128xf32>,
      %80 = vector.extract_strided_slice %65 {offsets = [7, 0], sizes = [1, 128], strides = [1, 1]} : vector<32x128xf32> to vector<1x128xf32>
      %c0_38 = arith.constant 0 : index
      %c896 = arith.constant 896 : index
      %81 = vector.load %arg11[%c0_38, %c896] : memref<2x4096xf32, #tpu.memory_space<vmem>>, vector<1x128xf32>
      tpu.vector_store %arg11[%c0_38, %c896], %80 {strides = array<i32>} : memref<2x4096xf32, #tpu.memory_space<vmem>>, vector<1x128xf32>,
      %82 = vector.extract_strided_slice %65 {offsets = [8, 0], sizes = [1, 128], strides = [1, 1]} : vector<32x128xf32> to vector<1x128xf32>
      %c0_39 = arith.constant 0 : index
      %c1024 = arith.constant 1024 : index
      %83 = vector.load %arg11[%c0_39, %c1024] : memref<2x4096xf32, #tpu.memory_space<vmem>>, vector<1x128xf32>
      tpu.vector_store %arg11[%c0_39, %c1024], %82 {strides = array<i32>} : memref<2x4096xf32, #tpu.memory_space<vmem>>, vector<1x128xf32>,
      %84 = vector.extract_strided_slice %65 {offsets = [9, 0], sizes = [1, 128], strides = [1, 1]} : vector<32x128xf32> to vector<1x128xf32>
      %c0_40 = arith.constant 0 : index
      %c1152 = arith.constant 1152 : index
      %85 = vector.load %arg11[%c0_40, %c1152] : memref<2x4096xf32, #tpu.memory_space<vmem>>, vector<1x128xf32>
      tpu.vector_store %arg11[%c0_40, %c1152], %84 {strides = array<i32>} : memref<2x4096xf32, #tpu.memory_space<vmem>>, vector<1x128xf32>,
      %86 = vector.extract_strided_slice %65 {offsets = [10, 0], sizes = [1, 128], strides = [1, 1]} : vector<32x128xf32> to vector<1x128xf32>
      %c0_41 = arith.constant 0 : index
      %c1280 = arith.constant 1280 : index
      %87 = vector.load %arg11[%c0_41, %c1280] : memref<2x4096xf32, #tpu.memory_space<vmem>>, vector<1x128xf32>
      tpu.vector_store %arg11[%c0_41, %c1280], %86 {strides = array<i32>} : memref<2x4096xf32, #tpu.memory_space<vmem>>, vector<1x128xf32>,
      %88 = vector.extract_strided_slice %65 {offsets = [11, 0], sizes = [1, 128], strides = [1, 1]} : vector<32x128xf32> to vector<1x128xf32>
      %c0_42 = arith.constant 0 : index
      %c1408 = arith.constant 1408 : index
      %89 = vector.load %arg11[%c0_42, %c1408] : memref<2x4096xf32, #tpu.memory_space<vmem>>, vector<1x128xf32>
      tpu.vector_store %arg11[%c0_42, %c1408], %88 {strides = array<i32>} : memref<2x4096xf32, #tpu.memory_space<vmem>>, vector<1x128xf32>,
      %90 = vector.extract_strided_slice %65 {offsets = [12, 0], sizes = [1, 128], strides = [1, 1]} : vector<32x128xf32> to vector<1x128xf32>
      %c0_43 = arith.constant 0 : index
      %c1536 = arith.constant 1536 : index
      %91 = vector.load %arg11[%c0_43, %c1536] : memref<2x4096xf32, #tpu.memory_space<vmem>>, vector<1x128xf32>
      tpu.vector_store %arg11[%c0_43, %c1536], %90 {strides = array<i32>} : memref<2x4096xf32, #tpu.memory_space<vmem>>, vector<1x128xf32>,
      %92 = vector.extract_strided_slice %65 {offsets = [13, 0], sizes = [1, 128], strides = [1, 1]} : vector<32x128xf32> to vector<1x128xf32>
      %c0_44 = arith.constant 0 : index
      %c1664 = arith.constant 1664 : index
      %93 = vector.load %arg11[%c0_44, %c1664] : memref<2x4096xf32, #tpu.memory_space<vmem>>, vector<1x128xf32>
      tpu.vector_store %arg11[%c0_44, %c1664], %92 {strides = array<i32>} : memref<2x4096xf32, #tpu.memory_space<vmem>>, vector<1x128xf32>,
      %94 = vector.extract_strided_slice %65 {offsets = [14, 0], sizes = [1, 128], strides = [1, 1]} : vector<32x128xf32> to vector<1x128xf32>
      %c0_45 = arith.constant 0 : index
      %c1792 = arith.constant 1792 : index
      %95 = vector.load %arg11[%c0_45, %c1792] : memref<2x4096xf32, #tpu.memory_space<vmem>>, vector<1x128xf32>
      tpu.vector_store %arg11[%c0_45, %c1792], %94 {strides = array<i32>} : memref<2x4096xf32, #tpu.memory_space<vmem>>, vector<1x128xf32>,
      %96 = vector.extract_strided_slice %65 {offsets = [15, 0], sizes = [1, 128], strides = [1, 1]} : vector<32x128xf32> to vector<1x128xf32>
      %c0_46 = arith.constant 0 : index
      %c1920 = arith.constant 1920 : index
      %97 = vector.load %arg11[%c0_46, %c1920] : memref<2x4096xf32, #tpu.memory_space<vmem>>, vector<1x128xf32>
      tpu.vector_store %arg11[%c0_46, %c1920], %96 {strides = array<i32>} : memref<2x4096xf32, #tpu.memory_space<vmem>>, vector<1x128xf32>,
      %98 = vector.extract_strided_slice %65 {offsets = [16, 0], sizes = [1, 128], strides = [1, 1]} : vector<32x128xf32> to vector<1x128xf32>
      %c0_47 = arith.constant 0 : index
      %c2048 = arith.constant 2048 : index
      %99 = vector.load %arg11[%c0_47, %c2048] : memref<2x4096xf32, #tpu.memory_space<vmem>>, vector<1x128xf32>
      tpu.vector_store %arg11[%c0_47, %c2048], %98 {strides = array<i32>} : memref<2x4096xf32, #tpu.memory_space<vmem>>, vector<1x128xf32>,
      %100 = vector.extract_strided_slice %65 {offsets = [17, 0], sizes = [1, 128], strides = [1, 1]} : vector<32x128xf32> to vector<1x128xf32>
      %c0_48 = arith.constant 0 : index
      %c2176 = arith.constant 2176 : index
      %101 = vector.load %arg11[%c0_48, %c2176] : memref<2x4096xf32, #tpu.memory_space<vmem>>, vector<1x128xf32>
      tpu.vector_store %arg11[%c0_48, %c2176], %100 {strides = array<i32>} : memref<2x4096xf32, #tpu.memory_space<vmem>>, vector<1x128xf32>,
      %102 = vector.extract_strided_slice %65 {offsets = [18, 0], sizes = [1, 128], strides = [1, 1]} : vector<32x128xf32> to vector<1x128xf32>
      %c0_49 = arith.constant 0 : index
      %c2304 = arith.constant 2304 : index
      %103 = vector.load %arg11[%c0_49, %c2304] : memref<2x4096xf32, #tpu.memory_space<vmem>>, vector<1x128xf32>
      tpu.vector_store %arg11[%c0_49, %c2304], %102 {strides = array<i32>} : memref<2x4096xf32, #tpu.memory_space<vmem>>, vector<1x128xf32>,
      %104 = vector.extract_strided_slice %65 {offsets = [19, 0], sizes = [1, 128], strides = [1, 1]} : vector<32x128xf32> to vector<1x128xf32>
      %c0_50 = arith.constant 0 : index
      %c2432 = arith.constant 2432 : index
      %105 = vector.load %arg11[%c0_50, %c2432] : memref<2x4096xf32, #tpu.memory_space<vmem>>, vector<1x128xf32>
      tpu.vector_store %arg11[%c0_50, %c2432], %104 {strides = array<i32>} : memref<2x4096xf32, #tpu.memory_space<vmem>>, vector<1x128xf32>,
      %106 = vector.extract_strided_slice %65 {offsets = [20, 0], sizes = [1, 128], strides = [1, 1]} : vector<32x128xf32> to vector<1x128xf32>
      %c0_51 = arith.constant 0 : index
      %c2560 = arith.constant 2560 : index
      %107 = vector.load %arg11[%c0_51, %c2560] : memref<2x4096xf32, #tpu.memory_space<vmem>>, vector<1x128xf32>
      tpu.vector_store %arg11[%c0_51, %c2560], %106 {strides = array<i32>} : memref<2x4096xf32, #tpu.memory_space<vmem>>, vector<1x128xf32>,
      %108 = vector.extract_strided_slice %65 {offsets = [21, 0], sizes = [1, 128], strides = [1, 1]} : vector<32x128xf32> to vector<1x128xf32>
      %c0_52 = arith.constant 0 : index
      %c2688 = arith.constant 2688 : index
      %109 = vector.load %arg11[%c0_52, %c2688] : memref<2x4096xf32, #tpu.memory_space<vmem>>, vector<1x128xf32>
      tpu.vector_store %arg11[%c0_52, %c2688], %108 {strides = array<i32>} : memref<2x4096xf32, #tpu.memory_space<vmem>>, vector<1x128xf32>,
      %110 = vector.extract_strided_slice %65 {offsets = [22, 0], sizes = [1, 128], strides = [1, 1]} : vector<32x128xf32> to vector<1x128xf32>
      %c0_53 = arith.constant 0 : index
      %c2816 = arith.constant 2816 : index
      %111 = vector.load %arg11[%c0_53, %c2816] : memref<2x4096xf32, #tpu.memory_space<vmem>>, vector<1x128xf32>
      tpu.vector_store %arg11[%c0_53, %c2816], %110 {strides = array<i32>} : memref<2x4096xf32, #tpu.memory_space<vmem>>, vector<1x128xf32>,
      %112 = vector.extract_strided_slice %65 {offsets = [23, 0], sizes = [1, 128], strides = [1, 1]} : vector<32x128xf32> to vector<1x128xf32>
      %c0_54 = arith.constant 0 : index
      %c2944 = arith.constant 2944 : index
      %113 = vector.load %arg11[%c0_54, %c2944] : memref<2x4096xf32, #tpu.memory_space<vmem>>, vector<1x128xf32>
      tpu.vector_store %arg11[%c0_54, %c2944], %112 {strides = array<i32>} : memref<2x4096xf32, #tpu.memory_space<vmem>>, vector<1x128xf32>,
      %114 = vector.extract_strided_slice %65 {offsets = [24, 0], sizes = [1, 128], strides = [1, 1]} : vector<32x128xf32> to vector<1x128xf32>
      %c0_55 = arith.constant 0 : index
      %c3072 = arith.constant 3072 : index
      %115 = vector.load %arg11[%c0_55, %c3072] : memref<2x4096xf32, #tpu.memory_space<vmem>>, vector<1x128xf32>
      tpu.vector_store %arg11[%c0_55, %c3072], %114 {strides = array<i32>} : memref<2x4096xf32, #tpu.memory_space<vmem>>, vector<1x128xf32>,
      %116 = vector.extract_strided_slice %65 {offsets = [25, 0], sizes = [1, 128], strides = [1, 1]} : vector<32x128xf32> to vector<1x128xf32>
      %c0_56 = arith.constant 0 : index
      %c3200 = arith.constant 3200 : index
      %117 = vector.load %arg11[%c0_56, %c3200] : memref<2x4096xf32, #tpu.memory_space<vmem>>, vector<1x128xf32>
      tpu.vector_store %arg11[%c0_56, %c3200], %116 {strides = array<i32>} : memref<2x4096xf32, #tpu.memory_space<vmem>>, vector<1x128xf32>,
      %118 = vector.extract_strided_slice %65 {offsets = [26, 0], sizes = [1, 128], strides = [1, 1]} : vector<32x128xf32> to vector<1x128xf32>
      %c0_57 = arith.constant 0 : index
      %c3328 = arith.constant 3328 : index
      %119 = vector.load %arg11[%c0_57, %c3328] : memref<2x4096xf32, #tpu.memory_space<vmem>>, vector<1x128xf32>
      tpu.vector_store %arg11[%c0_57, %c3328], %118 {strides = array<i32>} : memref<2x4096xf32, #tpu.memory_space<vmem>>, vector<1x128xf32>,
      %120 = vector.extract_strided_slice %65 {offsets = [27, 0], sizes = [1, 128], strides = [1, 1]} : vector<32x128xf32> to vector<1x128xf32>
      %c0_58 = arith.constant 0 : index
      %c3456 = arith.constant 3456 : index
      %121 = vector.load %arg11[%c0_58, %c3456] : memref<2x4096xf32, #tpu.memory_space<vmem>>, vector<1x128xf32>
      tpu.vector_store %arg11[%c0_58, %c3456], %120 {strides = array<i32>} : memref<2x4096xf32, #tpu.memory_space<vmem>>, vector<1x128xf32>,
      %122 = vector.extract_strided_slice %65 {offsets = [28, 0], sizes = [1, 128], strides = [1, 1]} : vector<32x128xf32> to vector<1x128xf32>
      %c0_59 = arith.constant 0 : index
      %c3584 = arith.constant 3584 : index
      %123 = vector.load %arg11[%c0_59, %c3584] : memref<2x4096xf32, #tpu.memory_space<vmem>>, vector<1x128xf32>
      tpu.vector_store %arg11[%c0_59, %c3584], %122 {strides = array<i32>} : memref<2x4096xf32, #tpu.memory_space<vmem>>, vector<1x128xf32>,
      %124 = vector.extract_strided_slice %65 {offsets = [29, 0], sizes = [1, 128], strides = [1, 1]} : vector<32x128xf32> to vector<1x128xf32>
      %c0_60 = arith.constant 0 : index
      %c3712 = arith.constant 3712 : index
      %125 = vector.load %arg11[%c0_60, %c3712] : memref<2x4096xf32, #tpu.memory_space<vmem>>, vector<1x128xf32>
      tpu.vector_store %arg11[%c0_60, %c3712], %124 {strides = array<i32>} : memref<2x4096xf32, #tpu.memory_space<vmem>>, vector<1x128xf32>,
      %126 = vector.extract_strided_slice %65 {offsets = [30, 0], sizes = [1, 128], strides = [1, 1]} : vector<32x128xf32> to vector<1x128xf32>
      %c0_61 = arith.constant 0 : index
      %c3840 = arith.constant 3840 : index
      %127 = vector.load %arg11[%c0_61, %c3840] : memref<2x4096xf32, #tpu.memory_space<vmem>>, vector<1x128xf32>
      tpu.vector_store %arg11[%c0_61, %c3840], %126 {strides = array<i32>} : memref<2x4096xf32, #tpu.memory_space<vmem>>, vector<1x128xf32>,
      %128 = vector.extract_strided_slice %65 {offsets = [31, 0], sizes = [1, 128], strides = [1, 1]} : vector<32x128xf32> to vector<1x128xf32>
      %c0_62 = arith.constant 0 : index
      %c3968 = arith.constant 3968 : index
      %129 = vector.load %arg11[%c0_62, %c3968] : memref<2x4096xf32, #tpu.memory_space<vmem>>, vector<1x128xf32>
      tpu.vector_store %arg11[%c0_62, %c3968], %128 {strides = array<i32>} : memref<2x4096xf32, #tpu.memory_space<vmem>>, vector<1x128xf32>,
      %c1 = arith.constant 1 : index
      %c0_63 = arith.constant 0 : index
      %130 = vector.load %arg1[%c1, %c0_63] : memref<2x128xf32, #tpu.memory_space<vmem>>, vector<1x128xf32>
      %cst_64 = arith.constant dense<0.000000e+00> : vector<1x128xf32>
      %131 = tpu.matmul %130, %23, %cst_64 {dimension_numbers = #tpu.dot_dimension_numbers<[1], [0], [0], [1], [0, 0, 1, 1], [], []>} : vector<1x128xf32>, vector<128x128xf32>, vector<1x128xf32> -> vector<1x128xf32>
      %cst_65 = arith.constant dense<0.000000e+00> : vector<1x128xf32>
      %132 = tpu.matmul %130, %28, %cst_65 {dimension_numbers = #tpu.dot_dimension_numbers<[1], [0], [0], [1], [0, 0, 1, 1], [], []>} : vector<1x128xf32>, vector<128x128xf32>, vector<1x128xf32> -> vector<1x128xf32>
      %133 = vector.extract_strided_slice %29 {offsets = [0, 0], sizes = [16, 1], strides = [1, 1]} : vector<16x3xf32> to vector<16x1xf32>
      %134 = vector.broadcast %133 : vector<16x1xf32> to vector<16x128xf32>
      %135 = vector.broadcast %131 : vector<1x128xf32> to vector<16x128xf32>
      %136 = arith.mulf %134, %135 : vector<16x128xf32>
      %137 = vector.broadcast %30 : vector<16x1xf32> to vector<16x128xf32>
      %138 = arith.addf %137, %136 : vector<16x128xf32>
      %139 = vector.extract_strided_slice %29 {offsets = [0, 1], sizes = [16, 1], strides = [1, 1]} : vector<16x3xf32> to vector<16x1xf32>
      %140 = vector.broadcast %139 : vector<16x1xf32> to vector<16x128xf32>
      %141 = vector.broadcast %130 : vector<1x128xf32> to vector<16x128xf32>
      %142 = arith.mulf %140, %141 : vector<16x128xf32>
      %143 = arith.addf %138, %142 : vector<16x128xf32>
      %144 = vector.extract_strided_slice %29 {offsets = [0, 2], sizes = [16, 1], strides = [1, 1]} : vector<16x3xf32> to vector<16x1xf32>
      %145 = vector.broadcast %144 : vector<16x1xf32> to vector<16x128xf32>
      %146 = vector.broadcast %132 : vector<1x128xf32> to vector<16x128xf32>
      %147 = arith.mulf %145, %146 : vector<16x128xf32>
      %148 = arith.addf %143, %147 : vector<16x128xf32>
      %149 = math.absf %148 : vector<16x128xf32>
      %cst_66 = arith.constant 1.000000e+00 : f32
      %150 = vector.broadcast %cst_66 : f32 to vector<16x128xf32>
      %151 = arith.addf %150, %149 : vector<16x128xf32>
      %152 = arith.divf %148, %151 : vector<16x128xf32>
      %cst_67 = arith.constant dense<0.000000e+00> : vector<16x128xf32>
      %153 = tpu.matmul %152, %23, %cst_67 {dimension_numbers = #tpu.dot_dimension_numbers<[1], [0], [0], [1], [0, 0, 1, 1], [], []>} : vector<16x128xf32>, vector<128x128xf32>, vector<16x128xf32> -> vector<16x128xf32>
      %cst_68 = arith.constant dense<0.000000e+00> : vector<16x128xf32>
      %154 = tpu.matmul %152, %28, %cst_68 {dimension_numbers = #tpu.dot_dimension_numbers<[1], [0], [0], [1], [0, 0, 1, 1], [], []>} : vector<16x128xf32>, vector<128x128xf32>, vector<16x128xf32> -> vector<16x128xf32>
      %155 = tpu.concatenate %153, %152, %154 in 0 : vector<16x128xf32>, vector<16x128xf32>, vector<16x128xf32> -> vector<48x128xf32>
      %cst_69 = arith.constant dense<0.000000e+00> : vector<32x128xf32>
      %156 = tpu.matmul %31, %155, %cst_69 {dimension_numbers = #tpu.dot_dimension_numbers<[1], [0], [0], [1], [0, 0, 1, 1], [], []>} : vector<32x48xf32>, vector<48x128xf32>, vector<32x128xf32> -> vector<32x128xf32>
      %157 = vector.broadcast %32 : vector<32x1xf32> to vector<32x128xf32>
      %158 = arith.addf %156, %157 : vector<32x128xf32>
      %159 = math.absf %158 : vector<32x128xf32>
      %cst_70 = arith.constant 1.000000e+00 : f32
      %160 = vector.broadcast %cst_70 : f32 to vector<32x128xf32>
      %161 = arith.addf %160, %159 : vector<32x128xf32>
      %162 = arith.divf %158, %161 : vector<32x128xf32>
      %163 = vector.extract_strided_slice %162 {offsets = [0, 0], sizes = [1, 128], strides = [1, 1]} : vector<32x128xf32> to vector<1x128xf32>
      %c1_71 = arith.constant 1 : index
      %c0_72 = arith.constant 0 : index
      %164 = vector.load %arg11[%c1_71, %c0_72] : memref<2x4096xf32, #tpu.memory_space<vmem>>, vector<1x128xf32>
      tpu.vector_store %arg11[%c1_71, %c0_72], %163 {strides = array<i32>} : memref<2x4096xf32, #tpu.memory_space<vmem>>, vector<1x128xf32>,
      %165 = vector.extract_strided_slice %162 {offsets = [1, 0], sizes = [1, 128], strides = [1, 1]} : vector<32x128xf32> to vector<1x128xf32>
      %c1_73 = arith.constant 1 : index
      %c128_74 = arith.constant 128 : index
      %166 = vector.load %arg11[%c1_73, %c128_74] : memref<2x4096xf32, #tpu.memory_space<vmem>>, vector<1x128xf32>
      tpu.vector_store %arg11[%c1_73, %c128_74], %165 {strides = array<i32>} : memref<2x4096xf32, #tpu.memory_space<vmem>>, vector<1x128xf32>,
      %167 = vector.extract_strided_slice %162 {offsets = [2, 0], sizes = [1, 128], strides = [1, 1]} : vector<32x128xf32> to vector<1x128xf32>
      %c1_75 = arith.constant 1 : index
      %c256_76 = arith.constant 256 : index
      %168 = vector.load %arg11[%c1_75, %c256_76] : memref<2x4096xf32, #tpu.memory_space<vmem>>, vector<1x128xf32>
      tpu.vector_store %arg11[%c1_75, %c256_76], %167 {strides = array<i32>} : memref<2x4096xf32, #tpu.memory_space<vmem>>, vector<1x128xf32>,
      %169 = vector.extract_strided_slice %162 {offsets = [3, 0], sizes = [1, 128], strides = [1, 1]} : vector<32x128xf32> to vector<1x128xf32>
      %c1_77 = arith.constant 1 : index
      %c384_78 = arith.constant 384 : index
      %170 = vector.load %arg11[%c1_77, %c384_78] : memref<2x4096xf32, #tpu.memory_space<vmem>>, vector<1x128xf32>
      tpu.vector_store %arg11[%c1_77, %c384_78], %169 {strides = array<i32>} : memref<2x4096xf32, #tpu.memory_space<vmem>>, vector<1x128xf32>,
      %171 = vector.extract_strided_slice %162 {offsets = [4, 0], sizes = [1, 128], strides = [1, 1]} : vector<32x128xf32> to vector<1x128xf32>
      %c1_79 = arith.constant 1 : index
      %c512_80 = arith.constant 512 : index
      %172 = vector.load %arg11[%c1_79, %c512_80] : memref<2x4096xf32, #tpu.memory_space<vmem>>, vector<1x128xf32>
      tpu.vector_store %arg11[%c1_79, %c512_80], %171 {strides = array<i32>} : memref<2x4096xf32, #tpu.memory_space<vmem>>, vector<1x128xf32>,
      %173 = vector.extract_strided_slice %162 {offsets = [5, 0], sizes = [1, 128], strides = [1, 1]} : vector<32x128xf32> to vector<1x128xf32>
      %c1_81 = arith.constant 1 : index
      %c640_82 = arith.constant 640 : index
      %174 = vector.load %arg11[%c1_81, %c640_82] : memref<2x4096xf32, #tpu.memory_space<vmem>>, vector<1x128xf32>
      tpu.vector_store %arg11[%c1_81, %c640_82], %173 {strides = array<i32>} : memref<2x4096xf32, #tpu.memory_space<vmem>>, vector<1x128xf32>,
      %175 = vector.extract_strided_slice %162 {offsets = [6, 0], sizes = [1, 128], strides = [1, 1]} : vector<32x128xf32> to vector<1x128xf32>
      %c1_83 = arith.constant 1 : index
      %c768_84 = arith.constant 768 : index
      %176 = vector.load %arg11[%c1_83, %c768_84] : memref<2x4096xf32, #tpu.memory_space<vmem>>, vector<1x128xf32>
      tpu.vector_store %arg11[%c1_83, %c768_84], %175 {strides = array<i32>} : memref<2x4096xf32, #tpu.memory_space<vmem>>, vector<1x128xf32>,
      %177 = vector.extract_strided_slice %162 {offsets = [7, 0], sizes = [1, 128], strides = [1, 1]} : vector<32x128xf32> to vector<1x128xf32>
      %c1_85 = arith.constant 1 : index
      %c896_86 = arith.constant 896 : index
      %178 = vector.load %arg11[%c1_85, %c896_86] : memref<2x4096xf32, #tpu.memory_space<vmem>>, vector<1x128xf32>
      tpu.vector_store %arg11[%c1_85, %c896_86], %177 {strides = array<i32>} : memref<2x4096xf32, #tpu.memory_space<vmem>>, vector<1x128xf32>,
      %179 = vector.extract_strided_slice %162 {offsets = [8, 0], sizes = [1, 128], strides = [1, 1]} : vector<32x128xf32> to vector<1x128xf32>
      %c1_87 = arith.constant 1 : index
      %c1024_88 = arith.constant 1024 : index
      %180 = vector.load %arg11[%c1_87, %c1024_88] : memref<2x4096xf32, #tpu.memory_space<vmem>>, vector<1x128xf32>
      tpu.vector_store %arg11[%c1_87, %c1024_88], %179 {strides = array<i32>} : memref<2x4096xf32, #tpu.memory_space<vmem>>, vector<1x128xf32>,
      %181 = vector.extract_strided_slice %162 {offsets = [9, 0], sizes = [1, 128], strides = [1, 1]} : vector<32x128xf32> to vector<1x128xf32>
      %c1_89 = arith.constant 1 : index
      %c1152_90 = arith.constant 1152 : index
      %182 = vector.load %arg11[%c1_89, %c1152_90] : memref<2x4096xf32, #tpu.memory_space<vmem>>, vector<1x128xf32>
      tpu.vector_store %arg11[%c1_89, %c1152_90], %181 {strides = array<i32>} : memref<2x4096xf32, #tpu.memory_space<vmem>>, vector<1x128xf32>,
      %183 = vector.extract_strided_slice %162 {offsets = [10, 0], sizes = [1, 128], strides = [1, 1]} : vector<32x128xf32> to vector<1x128xf32>
      %c1_91 = arith.constant 1 : index
      %c1280_92 = arith.constant 1280 : index
      %184 = vector.load %arg11[%c1_91, %c1280_92] : memref<2x4096xf32, #tpu.memory_space<vmem>>, vector<1x128xf32>
      tpu.vector_store %arg11[%c1_91, %c1280_92], %183 {strides = array<i32>} : memref<2x4096xf32, #tpu.memory_space<vmem>>, vector<1x128xf32>,
      %185 = vector.extract_strided_slice %162 {offsets = [11, 0], sizes = [1, 128], strides = [1, 1]} : vector<32x128xf32> to vector<1x128xf32>
      %c1_93 = arith.constant 1 : index
      %c1408_94 = arith.constant 1408 : index
      %186 = vector.load %arg11[%c1_93, %c1408_94] : memref<2x4096xf32, #tpu.memory_space<vmem>>, vector<1x128xf32>
      tpu.vector_store %arg11[%c1_93, %c1408_94], %185 {strides = array<i32>} : memref<2x4096xf32, #tpu.memory_space<vmem>>, vector<1x128xf32>,
      %187 = vector.extract_strided_slice %162 {offsets = [12, 0], sizes = [1, 128], strides = [1, 1]} : vector<32x128xf32> to vector<1x128xf32>
      %c1_95 = arith.constant 1 : index
      %c1536_96 = arith.constant 1536 : index
      %188 = vector.load %arg11[%c1_95, %c1536_96] : memref<2x4096xf32, #tpu.memory_space<vmem>>, vector<1x128xf32>
      tpu.vector_store %arg11[%c1_95, %c1536_96], %187 {strides = array<i32>} : memref<2x4096xf32, #tpu.memory_space<vmem>>, vector<1x128xf32>,
      %189 = vector.extract_strided_slice %162 {offsets = [13, 0], sizes = [1, 128], strides = [1, 1]} : vector<32x128xf32> to vector<1x128xf32>
      %c1_97 = arith.constant 1 : index
      %c1664_98 = arith.constant 1664 : index
      %190 = vector.load %arg11[%c1_97, %c1664_98] : memref<2x4096xf32, #tpu.memory_space<vmem>>, vector<1x128xf32>
      tpu.vector_store %arg11[%c1_97, %c1664_98], %189 {strides = array<i32>} : memref<2x4096xf32, #tpu.memory_space<vmem>>, vector<1x128xf32>,
      %191 = vector.extract_strided_slice %162 {offsets = [14, 0], sizes = [1, 128], strides = [1, 1]} : vector<32x128xf32> to vector<1x128xf32>
      %c1_99 = arith.constant 1 : index
      %c1792_100 = arith.constant 1792 : index
      %192 = vector.load %arg11[%c1_99, %c1792_100] : memref<2x4096xf32, #tpu.memory_space<vmem>>, vector<1x128xf32>
      tpu.vector_store %arg11[%c1_99, %c1792_100], %191 {strides = array<i32>} : memref<2x4096xf32, #tpu.memory_space<vmem>>, vector<1x128xf32>,
      %193 = vector.extract_strided_slice %162 {offsets = [15, 0], sizes = [1, 128], strides = [1, 1]} : vector<32x128xf32> to vector<1x128xf32>
      %c1_101 = arith.constant 1 : index
      %c1920_102 = arith.constant 1920 : index
      %194 = vector.load %arg11[%c1_101, %c1920_102] : memref<2x4096xf32, #tpu.memory_space<vmem>>, vector<1x128xf32>
      tpu.vector_store %arg11[%c1_101, %c1920_102], %193 {strides = array<i32>} : memref<2x4096xf32, #tpu.memory_space<vmem>>, vector<1x128xf32>,
      %195 = vector.extract_strided_slice %162 {offsets = [16, 0], sizes = [1, 128], strides = [1, 1]} : vector<32x128xf32> to vector<1x128xf32>
      %c1_103 = arith.constant 1 : index
      %c2048_104 = arith.constant 2048 : index
      %196 = vector.load %arg11[%c1_103, %c2048_104] : memref<2x4096xf32, #tpu.memory_space<vmem>>, vector<1x128xf32>
      tpu.vector_store %arg11[%c1_103, %c2048_104], %195 {strides = array<i32>} : memref<2x4096xf32, #tpu.memory_space<vmem>>, vector<1x128xf32>,
      %197 = vector.extract_strided_slice %162 {offsets = [17, 0], sizes = [1, 128], strides = [1, 1]} : vector<32x128xf32> to vector<1x128xf32>
      %c1_105 = arith.constant 1 : index
      %c2176_106 = arith.constant 2176 : index
      %198 = vector.load %arg11[%c1_105, %c2176_106] : memref<2x4096xf32, #tpu.memory_space<vmem>>, vector<1x128xf32>
      tpu.vector_store %arg11[%c1_105, %c2176_106], %197 {strides = array<i32>} : memref<2x4096xf32, #tpu.memory_space<vmem>>, vector<1x128xf32>,
      %199 = vector.extract_strided_slice %162 {offsets = [18, 0], sizes = [1, 128], strides = [1, 1]} : vector<32x128xf32> to vector<1x128xf32>
      %c1_107 = arith.constant 1 : index
      %c2304_108 = arith.constant 2304 : index
      %200 = vector.load %arg11[%c1_107, %c2304_108] : memref<2x4096xf32, #tpu.memory_space<vmem>>, vector<1x128xf32>
      tpu.vector_store %arg11[%c1_107, %c2304_108], %199 {strides = array<i32>} : memref<2x4096xf32, #tpu.memory_space<vmem>>, vector<1x128xf32>,
      %201 = vector.extract_strided_slice %162 {offsets = [19, 0], sizes = [1, 128], strides = [1, 1]} : vector<32x128xf32> to vector<1x128xf32>
      %c1_109 = arith.constant 1 : index
      %c2432_110 = arith.constant 2432 : index
      %202 = vector.load %arg11[%c1_109, %c2432_110] : memref<2x4096xf32, #tpu.memory_space<vmem>>, vector<1x128xf32>
      tpu.vector_store %arg11[%c1_109, %c2432_110], %201 {strides = array<i32>} : memref<2x4096xf32, #tpu.memory_space<vmem>>, vector<1x128xf32>,
      %203 = vector.extract_strided_slice %162 {offsets = [20, 0], sizes = [1, 128], strides = [1, 1]} : vector<32x128xf32> to vector<1x128xf32>
      %c1_111 = arith.constant 1 : index
      %c2560_112 = arith.constant 2560 : index
      %204 = vector.load %arg11[%c1_111, %c2560_112] : memref<2x4096xf32, #tpu.memory_space<vmem>>, vector<1x128xf32>
      tpu.vector_store %arg11[%c1_111, %c2560_112], %203 {strides = array<i32>} : memref<2x4096xf32, #tpu.memory_space<vmem>>, vector<1x128xf32>,
      %205 = vector.extract_strided_slice %162 {offsets = [21, 0], sizes = [1, 128], strides = [1, 1]} : vector<32x128xf32> to vector<1x128xf32>
      %c1_113 = arith.constant 1 : index
      %c2688_114 = arith.constant 2688 : index
      %206 = vector.load %arg11[%c1_113, %c2688_114] : memref<2x4096xf32, #tpu.memory_space<vmem>>, vector<1x128xf32>
      tpu.vector_store %arg11[%c1_113, %c2688_114], %205 {strides = array<i32>} : memref<2x4096xf32, #tpu.memory_space<vmem>>, vector<1x128xf32>,
      %207 = vector.extract_strided_slice %162 {offsets = [22, 0], sizes = [1, 128], strides = [1, 1]} : vector<32x128xf32> to vector<1x128xf32>
      %c1_115 = arith.constant 1 : index
      %c2816_116 = arith.constant 2816 : index
      %208 = vector.load %arg11[%c1_115, %c2816_116] : memref<2x4096xf32, #tpu.memory_space<vmem>>, vector<1x128xf32>
      tpu.vector_store %arg11[%c1_115, %c2816_116], %207 {strides = array<i32>} : memref<2x4096xf32, #tpu.memory_space<vmem>>, vector<1x128xf32>,
      %209 = vector.extract_strided_slice %162 {offsets = [23, 0], sizes = [1, 128], strides = [1, 1]} : vector<32x128xf32> to vector<1x128xf32>
      %c1_117 = arith.constant 1 : index
      %c2944_118 = arith.constant 2944 : index
      %210 = vector.load %arg11[%c1_117, %c2944_118] : memref<2x4096xf32, #tpu.memory_space<vmem>>, vector<1x128xf32>
      tpu.vector_store %arg11[%c1_117, %c2944_118], %209 {strides = array<i32>} : memref<2x4096xf32, #tpu.memory_space<vmem>>, vector<1x128xf32>,
      %211 = vector.extract_strided_slice %162 {offsets = [24, 0], sizes = [1, 128], strides = [1, 1]} : vector<32x128xf32> to vector<1x128xf32>
      %c1_119 = arith.constant 1 : index
      %c3072_120 = arith.constant 3072 : index
      %212 = vector.load %arg11[%c1_119, %c3072_120] : memref<2x4096xf32, #tpu.memory_space<vmem>>, vector<1x128xf32>
      tpu.vector_store %arg11[%c1_119, %c3072_120], %211 {strides = array<i32>} : memref<2x4096xf32, #tpu.memory_space<vmem>>, vector<1x128xf32>,
      %213 = vector.extract_strided_slice %162 {offsets = [25, 0], sizes = [1, 128], strides = [1, 1]} : vector<32x128xf32> to vector<1x128xf32>
      %c1_121 = arith.constant 1 : index
      %c3200_122 = arith.constant 3200 : index
      %214 = vector.load %arg11[%c1_121, %c3200_122] : memref<2x4096xf32, #tpu.memory_space<vmem>>, vector<1x128xf32>
      tpu.vector_store %arg11[%c1_121, %c3200_122], %213 {strides = array<i32>} : memref<2x4096xf32, #tpu.memory_space<vmem>>, vector<1x128xf32>,
      %215 = vector.extract_strided_slice %162 {offsets = [26, 0], sizes = [1, 128], strides = [1, 1]} : vector<32x128xf32> to vector<1x128xf32>
      %c1_123 = arith.constant 1 : index
      %c3328_124 = arith.constant 3328 : index
      %216 = vector.load %arg11[%c1_123, %c3328_124] : memref<2x4096xf32, #tpu.memory_space<vmem>>, vector<1x128xf32>
      tpu.vector_store %arg11[%c1_123, %c3328_124], %215 {strides = array<i32>} : memref<2x4096xf32, #tpu.memory_space<vmem>>, vector<1x128xf32>,
      %217 = vector.extract_strided_slice %162 {offsets = [27, 0], sizes = [1, 128], strides = [1, 1]} : vector<32x128xf32> to vector<1x128xf32>
      %c1_125 = arith.constant 1 : index
      %c3456_126 = arith.constant 3456 : index
      %218 = vector.load %arg11[%c1_125, %c3456_126] : memref<2x4096xf32, #tpu.memory_space<vmem>>, vector<1x128xf32>
      tpu.vector_store %arg11[%c1_125, %c3456_126], %217 {strides = array<i32>} : memref<2x4096xf32, #tpu.memory_space<vmem>>, vector<1x128xf32>,
      %219 = vector.extract_strided_slice %162 {offsets = [28, 0], sizes = [1, 128], strides = [1, 1]} : vector<32x128xf32> to vector<1x128xf32>
      %c1_127 = arith.constant 1 : index
      %c3584_128 = arith.constant 3584 : index
      %220 = vector.load %arg11[%c1_127, %c3584_128] : memref<2x4096xf32, #tpu.memory_space<vmem>>, vector<1x128xf32>
      tpu.vector_store %arg11[%c1_127, %c3584_128], %219 {strides = array<i32>} : memref<2x4096xf32, #tpu.memory_space<vmem>>, vector<1x128xf32>,
      %221 = vector.extract_strided_slice %162 {offsets = [29, 0], sizes = [1, 128], strides = [1, 1]} : vector<32x128xf32> to vector<1x128xf32>
      %c1_129 = arith.constant 1 : index
      %c3712_130 = arith.constant 3712 : index
      %222 = vector.load %arg11[%c1_129, %c3712_130] : memref<2x4096xf32, #tpu.memory_space<vmem>>, vector<1x128xf32>
      tpu.vector_store %arg11[%c1_129, %c3712_130], %221 {strides = array<i32>} : memref<2x4096xf32, #tpu.memory_space<vmem>>, vector<1x128xf32>,
      %223 = vector.extract_strided_slice %162 {offsets = [30, 0], sizes = [1, 128], strides = [1, 1]} : vector<32x128xf32> to vector<1x128xf32>
      %c1_131 = arith.constant 1 : index
      %c3840_132 = arith.constant 3840 : index
      %224 = vector.load %arg11[%c1_131, %c3840_132] : memref<2x4096xf32, #tpu.memory_space<vmem>>, vector<1x128xf32>
      tpu.vector_store %arg11[%c1_131, %c3840_132], %223 {strides = array<i32>} : memref<2x4096xf32, #tpu.memory_space<vmem>>, vector<1x128xf32>,
      %225 = vector.extract_strided_slice %162 {offsets = [31, 0], sizes = [1, 128], strides = [1, 1]} : vector<32x128xf32> to vector<1x128xf32>
      %c1_133 = arith.constant 1 : index
      %c3968_134 = arith.constant 3968 : index
      %226 = vector.load %arg11[%c1_133, %c3968_134] : memref<2x4096xf32, #tpu.memory_space<vmem>>, vector<1x128xf32>
      tpu.vector_store %arg11[%c1_133, %c3968_134], %225 {strides = array<i32>} : memref<2x4096xf32, #tpu.memory_space<vmem>>, vector<1x128xf32>,
    } else {
    }
    %c2048_i32 = arith.constant 2048 : i32
    %3 = arith.muli %arg0, %c2048_i32 : i32
    %4 = tpu.assume_multiple %3, 2048 : i32
    %c0 = arith.constant 0 : index
    %c0_1 = arith.constant 0 : index
    %5 = vector.load %arg12[%c0, %c0_1] : memref<2x1024xf32, #tpu.memory_space<vmem>>, vector<2x1024xf32>
    %c0_2 = arith.constant 0 : index
    %6 = arith.index_cast %4 : i32 to index
    %7 = vector.load %arg11[%c0_2, %6] : memref<2x4096xf32, #tpu.memory_space<vmem>>, vector<2x2048xf32>
    %c0_3 = arith.constant 0 : index
    %c0_4 = arith.constant 0 : index
    %8 = vector.load %arg6[%c0_3, %c0_4] : memref<2048x1024xf32, #tpu.memory_space<vmem>>, vector<2048x1024xf32>
    %cst = arith.constant dense<0.000000e+00> : vector<2x1024xf32>
    %9 = tpu.matmul %7, %8, %cst {dimension_numbers = #tpu.dot_dimension_numbers<[1], [0], [0], [1], [0, 0, 1, 1], [], []>} : vector<2x2048xf32>, vector<2048x1024xf32>, vector<2x1024xf32> -> vector<2x1024xf32>
    %10 = arith.addf %5, %9 : vector<2x1024xf32>
    %c0_5 = arith.constant 0 : index
    %c0_6 = arith.constant 0 : index
    %11 = vector.load %arg12[%c0_5, %c0_6] : memref<2x1024xf32, #tpu.memory_space<vmem>>, vector<2x1024xf32>
    tpu.vector_store %arg12[%c0_5, %c0_6], %10 {strides = array<i32>} : memref<2x1024xf32, #tpu.memory_space<vmem>>, vector<2x1024xf32>,
    %c1_i32 = arith.constant 1 : i32
    %12 = arith.cmpi eq, %arg0, %c1_i32 : i32
    %13 = arith.extui %12 : i1 to i32
    %c0_i32_7 = arith.constant 0 : i32
    %14 = arith.cmpi ne, %13, %c0_i32_7 : i32
    scf.if %14 {
      %c0_8 = arith.constant 0 : index
      %c0_9 = arith.constant 0 : index
      %15 = vector.load %arg12[%c0_8, %c0_9] : memref<2x1024xf32, #tpu.memory_space<vmem>>, vector<2x1024xf32>
      %c0_10 = arith.constant 0 : index
      %c0_11 = arith.constant 0 : index
      %16 = vector.load %arg7[%c0_10, %c0_11] : memref<1x1024xf32, #tpu.memory_space<vmem>>, vector<1x1024xf32>
      %17 = vector.broadcast %16 : vector<1x1024xf32> to vector<2x1024xf32>
      %18 = arith.addf %15, %17 : vector<2x1024xf32>
      %19 = math.absf %18 : vector<2x1024xf32>
      %cst_12 = arith.constant 1.000000e+00 : f32
      %20 = vector.broadcast %cst_12 : f32 to vector<2x1024xf32>
      %21 = arith.addf %20, %19 : vector<2x1024xf32>
      %22 = arith.divf %18, %21 : vector<2x1024xf32>
      %c0_13 = arith.constant 0 : index
      %c0_14 = arith.constant 0 : index
      %23 = vector.load %arg8[%c0_13, %c0_14] : memref<1024x384xf32, #tpu.memory_space<vmem>>, vector<1024x384xf32>
      %cst_15 = arith.constant dense<0.000000e+00> : vector<2x384xf32>
      %24 = tpu.matmul %22, %23, %cst_15 {dimension_numbers = #tpu.dot_dimension_numbers<[1], [0], [0], [1], [0, 0, 1, 1], [], []>} : vector<2x1024xf32>, vector<1024x384xf32>, vector<2x384xf32> -> vector<2x384xf32>
      %c0_16 = arith.constant 0 : index
      %c0_17 = arith.constant 0 : index
      %25 = vector.load %arg9[%c0_16, %c0_17] : memref<1x384xf32, #tpu.memory_space<vmem>>, vector<1x384xf32>
      %26 = vector.broadcast %25 : vector<1x384xf32> to vector<2x384xf32>
      %27 = arith.addf %24, %26 : vector<2x384xf32>
      %28 = math.absf %27 : vector<2x384xf32>
      %cst_18 = arith.constant 1.000000e+00 : f32
      %29 = vector.broadcast %cst_18 : f32 to vector<2x384xf32>
      %30 = arith.addf %29, %28 : vector<2x384xf32>
      %31 = arith.divf %27, %30 : vector<2x384xf32>
      %cst_19 = arith.constant 1.000000e+01 : f32
      %32 = vector.broadcast %cst_19 : f32 to vector<2x384xf32>
      %33 = arith.mulf %32, %31 : vector<2x384xf32>
      %c0_20 = arith.constant 0 : index
      %c0_21 = arith.constant 0 : index
      %34 = vector.load %arg10[%c0_20, %c0_21] : memref<2x384xf32, #tpu.memory_space<vmem>>, vector<2x384xf32>
      tpu.vector_store %arg10[%c0_20, %c0_21], %33 {strides = array<i32>} : memref<2x384xf32, #tpu.memory_space<vmem>>, vector<2x384xf32>,
    } else {
    }
    return
  }
  func.func @transform_0(%arg0: i32) -> (i32, i32) {
    %c0_i32 = arith.constant 0 : i32
    %c0_i32_0 = arith.constant 0 : i32
    %c0_i32_1 = arith.constant 0 : i32
    return %c0_i32, %c0_i32_0 : i32, i32
  }
  func.func @transform_1(%arg0: i32) -> (i32, i32) {
    %c0_i32 = arith.constant 0 : i32
    %c0_i32_0 = arith.constant 0 : i32
    %c0_i32_1 = arith.constant 0 : i32
    return %c0_i32, %c0_i32_0 : i32, i32
  }
  func.func @transform_2(%arg0: i32) -> (i32, i32) {
    %c0_i32 = arith.constant 0 : i32
    %c0_i32_0 = arith.constant 0 : i32
    %c0_i32_1 = arith.constant 0 : i32
    return %c0_i32, %c0_i32_0 : i32, i32
  }
  func.func @transform_3(%arg0: i32) -> (i32, i32) {
    %c0_i32 = arith.constant 0 : i32
    %c0_i32_0 = arith.constant 0 : i32
    %c0_i32_1 = arith.constant 0 : i32
    return %c0_i32, %c0_i32_0 : i32, i32
  }
  func.func @transform_4(%arg0: i32) -> (i32, i32) {
    %c0_i32 = arith.constant 0 : i32
    %c0_i32_0 = arith.constant 0 : i32
    %c0_i32_1 = arith.constant 0 : i32
    return %c0_i32, %c0_i32_0 : i32, i32
  }
  func.func @transform_5(%arg0: i32) -> (i32, i32) {
    %c0_i32 = arith.constant 0 : i32
    %c0_i32_0 = arith.constant 0 : i32
    return %arg0, %c0_i32 : i32, i32
  }
  func.func @transform_6(%arg0: i32) -> (i32, i32) {
    %c0_i32 = arith.constant 0 : i32
    %c0_i32_0 = arith.constant 0 : i32
    %c0_i32_1 = arith.constant 0 : i32
    return %c0_i32, %c0_i32_0 : i32, i32
  }
  func.func @transform_7(%arg0: i32) -> (i32, i32) {
    %c0_i32 = arith.constant 0 : i32
    %c0_i32_0 = arith.constant 0 : i32
    %c0_i32_1 = arith.constant 0 : i32
    return %c0_i32, %c0_i32_0 : i32, i32
  }
  func.func @transform_8(%arg0: i32) -> (i32, i32) {
    %c0_i32 = arith.constant 0 : i32
    %c0_i32_0 = arith.constant 0 : i32
    %c0_i32_1 = arith.constant 0 : i32
    return %c0_i32, %c0_i32_0 : i32, i32
  }
  func.func @transform_9(%arg0: i32) -> (i32, i32) {
    %c0_i32 = arith.constant 0 : i32
    %c0_i32_0 = arith.constant 0 : i32
    %c0_i32_1 = arith.constant 0 : i32
    return %c0_i32, %c0_i32_0 : i32, i32
  }
}

</mosaic_0001>

<bundles_post_ra>
// kernel: _lambda_.1
= control target key start
LH: loop header
LB: loop body
LE: loop exit
PB: predicated region body
PF: predicated region fallthrough
CT: control target
= control target key end

     0   :  { %14 = vsyncpa [#allocation5], 0  ;;  %s11102_s30 = smov 0   ;;  %s15214_s0 = inlined_call_operand.vmem [shape: f32[2,128], index: 0, kind: input, shape index: {}]   ;;  %s15215_s1 = inlined_call_operand.vmem [shape: f32[16,3], index: 1, kind: input, shape index: {}]   ;;  %s15216_s2 = inlined_call_operand.vmem [shape: f32[16,1], index: 2, kind: input, shape index: {}]   ;;  %s15217_s3 = inlined_call_operand.vmem [shape: f32[32,48], index: 3, kind: input, shape index: {}]   ;;  %s15218_s4 = inlined_call_operand.vmem [shape: f32[32,1], index: 4, kind: input, shape index: {}]   ;;  %s15219_s5 = inlined_call_operand.vmem [shape: f32[4096,1024], index: 5, kind: input, shape index: {}]   ;;  %s15220_s6 = inlined_call_operand.vmem [shape: f32[1,1024], index: 6, kind: input, shape index: {}]   ;;  %s15221_s7 = inlined_call_operand.vmem [shape: f32[1024,384], index: 7, kind: input, shape index: {}]   ;;  %s15222_s8 = inlined_call_operand.vmem [shape: f32[1,384], index: 8, kind: input, shape index: {}]   ;;  %s15223_s9 = inlined_call_operand.hbm [shape: f32[2,384], index: 9, kind: output, shape index: {}]  }
   0x1 LB: > { %s11108_s10 = sadd.s32 4294967295, %s11040_s30   ;;  %p7353_p0 = scmp.ge.s32.totalorder %s11040_s30, 1  ;;  %s11040_s30 = sphi %s11102_s30, %s20_s30  }
   0x2   : > { %p285_p1 = scmp.lt.s32.totalorder %s11040_s30, 3 }
   0x4   : > { %p286_p2 = pnand %p7353_p0, %p285_p1 }
   0x5   : > { %s7354_s11 = sshll.u32 (!%p286_p2), %s11108_s10, 8  ;;  %p7357_p4 = scmp.ne.s32.totalorder (!%p286_p2), %s11108_s10, 0 }
   0x6   : > { %289 = sbr.rel (%p286_p2) target bundleno = 2957 (0xb8d), region = 56  ;;  %p318_p3 = scmp.lt.s32.totalorder (!%p286_p2), %s7354_s11, 511 }
   0xd   : > { %s15281_s11 = smov (!%p318_p3, %s7354_s11), 511  ;;  %327 = sbr.rel (%p7357_p4) target bundleno = 1266 (0x4f2), region = 60 }
   0xe   : > { %s7574_s12 = sshll.u32 %s15281_s11, 6  ;;  %v330_v0 = vlaneseq (!%p7357_p4)  ;;  %v11042_v1 = vmov (!%p7357_p4), 0.0|0.0   ;;  %v11043_v2 = vmov (!%p7357_p4), 0.0   ;;  %v11126_v3 = vld [vmem:[%s15215_s1] sm:$0xff] (!%p7357_p4)  ;;  %vm15224_vm0 = vmmov (!%p7357_p4), 0   ;;  %v11166_v16 = vld [vmem:[%s15215_s1 + $0x8] sm:$0xff] (!%p7357_p4) }
   0xf   : > { %s11116_s15 = scalar_lea.vmem %s15219_s5, %s7574_s12  ;;  %8191 = vmatprep.subr.bf16.mxu0 (!%p7357_p4), %v11042_v1  ;;  %8215 = vmatprep.subr.bf16.mxu1 (!%p7357_p4), %v11042_v1  ;;  %328 = vst [vmem:[#allocation3] sm:$0xff] (!%p7357_p4), %v11043_v2  ;;  %329 = vst [vmem:[#allocation3 + $0x8] sm:$0xff] (!%p7357_p4), %v11043_v2  ;;  %v449_v4 = vld [vmem:[%s15216_s2] sm:$0xff] (!%p7357_p4)  ;;  %v11045_v7 = vmov (!%p7357_p4), 0   ;;  %v11046_v17 = vmov (!%p7357_p4), 1.0|1.0  }
  0x10   : > { %v11131_v5 = vshrl.u32 (!%p7357_p4), %v330_v0, 7  ;;  %v348_v6 = vand.u32 (!%p7357_p4), 127, %v330_v0  ;;  %7907 = vmatprep.mubr.msk.f32.mxu0 (!%p7357_p4), %vm15224_vm0, %v11043_v2  ;;  %7942 = vmatprep.mubr.msk.f32.mxu1 (!%p7357_p4), %vm15224_vm0, %v11043_v2  ;;  %v11047_v23 = vmov (!%p7357_p4), 1   ;;  %v450_v24 = vld [vmem:[%s15216_s2 + $0x8] sm:$0xff] (!%p7357_p4)  ;;  %v15250_v26 = vmov (!%p7357_p4), 0  ;;  %v11554_v15 = vld [vmem:[%s15217_s3] sm:$0xff] (!%p7357_p4) }
  0x11   : > { %10959 = vset.pattern.permute.xlu0 (!%p7357_p4), %v11045_v7  ;;  %10960 = vset.pattern.permute.xlu1 (!%p7357_p4), %v11045_v7  ;;  %v15252_v29 = vmov (!%p7357_p4), 0  ;;  %v15254_v30 = vmov (!%p7357_p4), 0  ;;  %v11048_v33 = vmov (!%p7357_p4), 2   ;;  %v15256_v34 = vmov (!%p7357_p4), 0  ;;  %v459_v46 = vld [vmem:[%s15214_s0] sm:$0x1] (!%p7357_p4) }
  0x12   : > { %v332_v8 = vadd.s32 (!%p7357_p4), 8, %v11131_v5  ;;  %v11140_v9 = vadd.s32 (!%p7357_p4), 4294967295, %v348_v6  ;;  %v11142_v10 = vadd.s32 (!%p7357_p4), 1, %v348_v6  ;;  %v333_v11 = vadd.s32 (!%p7357_p4), 16, %v11131_v5  ;;  %602 = vperm.xlu0 (!%p7357_p4), %10959, %v11126_v3   ;;  %618 = vperm.xlu1 (!%p7357_p4), %10960, %v449_v4   ;;  %v456_v19 = vld [vmem:[%s15218_s4 + $0x8] sm:$0xff] (!%p7357_p4)  ;;  %v455_v25 = vld [vmem:[%s15218_s4] sm:$0xff] (!%p7357_p4) }
  0x13   : > { %v334_v12 = vadd.s32 (!%p7357_p4), 24, %v11131_v5  ;;  %v335_v13 = vadd.s32 (!%p7357_p4), 32, %v11131_v5  ;;  %v336_v14 = vadd.s32 (!%p7357_p4), 40, %v11131_v5  ;;  %v337_v21 = vadd.s32 (!%p7357_p4), 48, %v11131_v5  ;;  %v11573_v42 = vld [vmem:[%s15217_s3 + $0x8] sm:$0xff] (!%p7357_p4)  ;;  %v11579_v44 = vld [vmem:[%s15217_s3 + $0x10] sm:$0xff] (!%p7357_p4) }
  0x14   : > { %vm350_vm1 = vcmp.eq.s32.totalorder %v11131_v5, %v11140_v9  ;;  %vm351_vm2 = vcmp.eq.s32.totalorder %v332_v8, %v11140_v9  ;;  %vm399_vm3 = vcmp.eq.s32.totalorder %v11131_v5, %v11142_v10  ;;  %vm400_vm4 = vcmp.eq.s32.totalorder %v332_v8, %v11142_v10 }
  0x15   : > { %vm11155_vm5 = vmpackc.low %vm351_vm2, %vm350_vm1  ;;  %vm352_vm6 = vcmp.eq.s32.totalorder %v333_v11, %v11140_v9  ;;  %vm353_vm7 = vcmp.eq.s32.totalorder %v334_v12, %v11140_v9  ;;  %vm401_vm8 = vcmp.eq.s32.totalorder %v333_v11, %v11142_v10  ;;  %vm402_vm9 = vcmp.eq.s32.totalorder %v334_v12, %v11142_v10 }
  0x16   : > { %8193 = vmatpush3.bf16.msk.msra.mxu0 %vm11155_vm5, %v11046_v17  ;;  %vm11171_vm10 = vmpackc.low %vm400_vm4, %vm399_vm3  ;;  %vm354_vm13 = vcmp.eq.s32.totalorder %v335_v13, %v11140_v9  ;;  %vm355_vm14 = vcmp.eq.s32.totalorder %v336_v14, %v11140_v9  ;;  %v338_v22 = vadd.s32 56, %v11131_v5  ;;  %607 = vperm.xlu0 %10959, %v11166_v16   ;;  %vm403_vm15 = vcmp.eq.s32.totalorder %v335_v13, %v11142_v10 }
  0x17   : > { %8194 = vmatprep.subr.bf16.mxu0 %v11042_v1  ;;  %8217 = vmatpush3.bf16.msk.msra.mxu1 %vm11171_vm10, %v11046_v17  ;;  %vm11179_vm11 = vmpackc.low %vm353_vm7, %vm352_vm6  ;;  %vm404_vm1 = vcmp.eq.s32.totalorder %v336_v14, %v11142_v10  ;;  %vm356_vm4 = vcmp.eq.s32.totalorder %v337_v21, %v11140_v9  ;;  %v339_v27 = vadd.s32 64, %v11131_v5  ;;  %v340_v28 = vadd.s32 72, %v11131_v5 }
  0x18   : > { %8218 = vmatprep.subr.bf16.mxu1 %v11042_v1  ;;  %vm11184_vm12 = vmpackc.low %vm402_vm9, %vm401_vm8  ;;  %10961 = vset.pattern.permute.xlu1 %v11047_v23  ;;  %vm357_vm6 = vcmp.eq.s32.totalorder %v338_v22, %v11140_v9  ;;  %vm405_vm7 = vcmp.eq.s32.totalorder %v337_v21, %v11142_v10  ;;  %vm406_vm8 = vcmp.eq.s32.totalorder %v338_v22, %v11142_v10  ;;  %v341_v31 = vadd.s32 80, %v11131_v5 }
  0x19   : > { %vm11205_vm2 = vmpackc.low %vm355_vm14, %vm354_vm13  ;;  %629 = vperm.xlu1 %10961, %v11126_v3   ;;  %vm358_vm14 = vcmp.eq.s32.totalorder %v339_v27, %v11140_v9  ;;  %v342_v32 = vadd.s32 88, %v11131_v5  ;;  %v15258_v35 = vmov 0  ;;  %v343_v36 = vadd.s32 96, %v11131_v5 }
  0x1a   : > { %8196 = vmatpush3.bf16.msk.msra.mxu0 %vm11179_vm11, %v11046_v17  ;;  %vm11210_vm3 = vmpackc.low %vm404_vm1, %vm403_vm15  ;;  %623 = vperm.xlu0 %10959, %v450_v24   ;;  %vm359_vm15 = vcmp.eq.s32.totalorder %v340_v28, %v11140_v9  ;;  %vm407_vm1 = vcmp.eq.s32.totalorder %v339_v27, %v11142_v10  ;;  %v344_v37 = vadd.s32 104, %v11131_v5  ;;  %v15260_v38 = vmov 0 }
  0x1b   : > { %8197 = vmatprep.subr.bf16.mxu0 %v11042_v1  ;;  %8220 = vmatpush3.bf16.msk.msra.mxu1 %vm11184_vm12, %v11046_v17  ;;  %v15251_v26 = vsel %vm11210_vm3, 4294967295, %v15250_v26  ;;  %vm11228_vm9 = vmpackc.low %vm357_vm6, %vm356_vm4  ;;  %vm408_vm4 = vcmp.eq.s32.totalorder %v340_v28, %v11142_v10  ;;  %vm361_vm0 = vcmp.eq.s32.totalorder %v342_v32, %v11140_v9  ;;  %v345_v40 = vadd.s32 112, %v11131_v5 }
  0x1c   : > { %8221 = vmatprep.subr.bf16.mxu1 %v11042_v1  ;;  %v15253_v29 = vsel %vm11228_vm9, 4294967295, %v15252_v29  ;;  %vm11233_vm13 = vmpackc.low %vm406_vm8, %vm405_vm7  ;;  %vm360_vm8 = vcmp.eq.s32.totalorder %v341_v31, %v11140_v9  ;;  %v346_v41 = vadd.s32 120, %v11131_v5  ;;  %v15270_v45 = vmov 0 }
  0x1d   : > { %v15255_v30 = vsel %vm11233_vm13, 4294967295, %v15254_v30  ;;  %633 = vperm.xlu1 %10961, %v11166_v16   ;;  %vm11252_vm6 = vmpackc.low %vm359_vm15, %vm358_vm14  ;;  %vm410_vm14 = vcmp.eq.s32.totalorder %v342_v32, %v11142_v10  ;;  %v11445_v52 = vsub.s32 0, %v11131_v5  ;;  %v11503_v32 = vld [vmem:[%s15214_s0 + $0x1] sm:$0x1] }
  0x1e   : > { %8199 = vmatpush3.bf16.msk.msra.mxu0 %vm11205_vm2, %v11046_v17  ;;  %10962 = vset.pattern.permute.xlu0 %v11048_v33  ;;  %v15257_v34 = vsel %vm11252_vm6, 4294967295, %v15256_v34  ;;  %vm11257_vm7 = vmpackc.low %vm408_vm4, %vm407_vm1  ;;  %vm362_vm4 = vcmp.eq.s32.totalorder %v343_v36, %v11140_v9 }
  0x1f   : > { %8200 = vmatprep.subr.bf16.mxu0 %v11042_v1  ;;  %8223 = vmatpush3.bf16.msk.msra.mxu1 %vm11210_vm3, %v11046_v17  ;;  %v15259_v35 = vsel %vm11257_vm7, 4294967295, %v15258_v35  ;;  %vm11276_vm15 = vmpackc.low %vm361_vm0, %vm360_vm8  ;;  %vm412_vm0 = vcmp.eq.s32.totalorder %v344_v37, %v11142_v10  ;;  %vm414_vm3 = vcmp.eq.s32.totalorder %v346_v41, %v11142_v10  ;;  %v639_v54 = vrot.slane %v459_v46, %v11445_v52 }
  0x20   : > { %8224 = vmatprep.subr.bf16.mxu1 %v11042_v1  ;;  %645 = vperm.xlu0 %10962, %v11126_v3   ;;  %v15261_v38 = vsel %vm11276_vm15, 4294967295, %v15260_v38 }
  0x21   : > { %10963 = vset.pattern.permute.xlu1 %v11048_v33  ;;  %v458_v33 = vld [vmem:[%s15218_s4 + $0x18] sm:$0xff] }
  0x22   : > { %8202 = vmatpush3.bf16.msk.msra.mxu0 %vm11228_vm9, %v11046_v17  ;;  %649 = vperm.xlu1 %10963, %v11166_v16   ;;  %vm413_vm9 = vcmp.eq.s32.totalorder %v345_v40, %v11142_v10 }
  0x23   : > { %8203 = vmatprep.subr.bf16.mxu0 %v11042_v1  ;;  %8226 = vmatpush3.bf16.msk.msra.mxu1 %vm11233_vm13, %v11046_v17  ;;  %vm409_vm13 = vcmp.eq.s32.totalorder %v341_v31, %v11142_v10 }
  0x24   : > { %8227 = vmatprep.subr.bf16.mxu1 %v11042_v1  ;;  %10965 = vset.pattern.permute.xlu0 %v11045_v7  ;;  %vm11281_vm1 = vmpackc.low %vm410_vm14, %vm409_vm13  ;;  %vm364_vm14 = vcmp.eq.s32.totalorder %v345_v40, %v11140_v9 }
  0x25   : > { %825 = vperm.xlu0 %10965, %v456_v19  }
  0x26   : > { %8205 = vmatpush3.bf16.msk.msra.mxu0 %vm11252_vm6, %v11046_v17  ;;  %vm363_vm6 = vcmp.eq.s32.totalorder %v344_v37, %v11140_v9  ;;  %10964 = vset.pattern.permute.xlu1 %v11045_v7 }
  0x27   : > { %8206 = vmatprep.subr.bf16.mxu0 %v11042_v1  ;;  %8229 = vmatpush3.bf16.msk.msra.mxu1 %vm11257_vm7, %v11046_v17  ;;  %vm411_vm7 = vcmp.eq.s32.totalorder %v343_v36, %v11142_v10  ;;  %vm11299_vm13 = vmpackc.low %vm363_vm6, %vm362_vm4  ;;  %vm15275_vm4 = vnez %v15257_v34 }
  0x28   : > { %8230 = vmatprep.subr.bf16.mxu1 %v11042_v1  ;;  %vm11304_vm8 = vmpackc.low %vm412_vm0, %vm411_vm7  ;;  %vm15276_vm0 = vnez %v15259_v35  ;;  %820 = vperm.xlu1 %10964, %v455_v25  }
  0x29   : > { %vm11324_vm7 = vmpackc.low %vm414_vm3, %vm413_vm9  ;;  %vm15272_vm3 = vnez %v15251_v26  ;;  %vm15273_vm9 = vnez %v15253_v29  ;;  %v457_v29 = vld [vmem:[%s15218_s4 + $0x10] sm:$0xff] }
  0x2a   : > { %8208 = vmatpush3.bf16.msk.msra.mxu0 %vm11276_vm15, %v11046_v17  ;;  %vm365_vm15 = vcmp.eq.s32.totalorder %v346_v41, %v11140_v9  ;;  %v15271_v45 = vsel %vm11324_vm7, 4294967295, %v15270_v45 }
  0x2b   : > { %8209 = vmatprep.subr.bf16.mxu0 %v11042_v1  ;;  %8232 = vmatpush3.bf16.msk.msra.mxu1 %vm11281_vm1, %v11046_v17  ;;  %vm11319_vm6 = vmpackc.low %vm365_vm15, %vm364_vm14  ;;  %vm15274_vm15 = vnez %v15255_v30  ;;  %vm15277_vm14 = vnez %v15261_v38 }
  0x2c   : > { %8233 = vmatprep.subr.bf16.mxu1 %v11042_v1  ;;  %830 = vperm.xlu1 %10964, %v457_v29  }
  0x2e   : > { %8211 = vmatpush3.bf16.msk.msra.mxu0 %vm11299_vm13, %v11046_v17 }
  0x2f   : > { %8212 = vmatprep.subr.bf16.mxu0 %v11042_v1  ;;  %8235 = vmatpush3.bf16.msk.msra.mxu1 %vm11304_vm8, %v11046_v17 }
  0x30   : > { %8236 = vmatprep.subr.bf16.mxu1 %v11042_v1  ;;  %835 = vperm.xlu1 %10964, %v458_v33  }
  0x32   : > { %8214 = vmatpush3.bf16.msk.msra.mxu0 %vm11319_vm6, %v11046_v17 }
  0x33   : > { %8238 = vmatpush3.bf16.msk.msra.mxu1 %vm11324_vm7, %v11046_v17  ;;  %8240 = vmatprep.subr.msk.bf16.mxu0 %vm11155_vm5, %v11046_v17 }
  0x34   : > { %8272 = vmatprep.subr.msk.bf16.mxu1 %vm11171_vm10, %v11046_v17 }
  0x35   : > { %7908 = vmatmul.mubr.f32.vlgmr.msra.gmra.mrb[0].mxu0 %v459_v46 }
  0x36   : > { %7943 = vmatmul.mubr.f32.vlgmr.msra.gmra.mrb[0].mxu1 %v459_v46  ;;  %8242 = vmatpush3.bf16.msk.msra.mxu0 %vm11155_vm5, %v11046_v17  ;;  %v11591_v46 = vld [vmem:[%s15217_s3 + $0x18] sm:$0xff] }
  0x37   : > { %8274 = vmatpush3.bf16.msk.msra.mxu1 %vm11171_vm10, %v11046_v17  ;;  %8244 = vmatprep.subr.msk.bf16.mxu0 %vm11179_vm11, %v11046_v17 }
  0x38   : > { %8276 = vmatprep.subr.msk.bf16.mxu1 %vm11184_vm12, %v11046_v17 }
  0x3a   : > { %8246 = vmatpush3.bf16.msk.msra.mxu0 %vm11179_vm11, %v11046_v17 }
  0x3b   : > { %8278 = vmatpush3.bf16.msk.msra.mxu1 %vm11184_vm12, %v11046_v17  ;;  %8248 = vmatprep.subr.msk.bf16.mxu0 %vm11205_vm2, %v11046_v17 }
  0x3c   : > { %8280 = vmatprep.subr.msk.bf16.mxu1 %vm15272_vm3, %v11046_v17 }
  0x3e   : > { %8250 = vmatpush3.bf16.msk.msra.mxu0 %vm11205_vm2, %v11046_v17 }
  0x3f   : > { %8282 = vmatpush3.bf16.msk.msra.mxu1 %vm15272_vm3, %v11046_v17  ;;  %8252 = vmatprep.subr.msk.bf16.mxu0 %vm15273_vm9, %v11046_v17 }
  0x40   : > { %8284 = vmatprep.subr.msk.bf16.mxu1 %vm15274_vm15, %v11046_v17 }
  0x42   : > { %8254 = vmatpush3.bf16.msk.msra.mxu0 %vm15273_vm9, %v11046_v17 }
  0x43   : > { %8286 = vmatpush3.bf16.msk.msra.mxu1 %vm15274_vm15, %v11046_v17  ;;  %8256 = vmatprep.subr.msk.bf16.mxu0 %vm15275_vm4, %v11046_v17 }
  0x44   : > { %8288 = vmatprep.subr.msk.bf16.mxu1 %vm15276_vm0, %v11046_v17 }
  0x46   : > { %8258 = vmatpush3.bf16.msk.msra.mxu0 %vm15275_vm4, %v11046_v17 }
  0x47   : > { %8290 = vmatpush3.bf16.msk.msra.mxu1 %vm15276_vm0, %v11046_v17  ;;  %8260 = vmatprep.subr.msk.bf16.mxu0 %vm15277_vm14, %v11046_v17 }
  0x48   : > { %8292 = vmatprep.subr.msk.bf16.mxu1 %vm11281_vm1, %v11046_v17 }
  0x4a   : > { %8262 = vmatpush3.bf16.msk.msra.mxu0 %vm15277_vm14, %v11046_v17 }
  0x4b   : > { %8294 = vmatpush3.bf16.msk.msra.mxu1 %vm11281_vm1, %v11046_v17  ;;  %8264 = vmatprep.subr.msk.bf16.mxu0 %vm11299_vm13, %v11046_v17 }
  0x4c   : > { %8296 = vmatprep.subr.msk.bf16.mxu1 %vm11304_vm8, %v11046_v17 }
  0x4e   : > { %8266 = vmatpush3.bf16.msk.msra.mxu0 %vm11299_vm13, %v11046_v17 }
  0x4f   : > { %8298 = vmatpush3.bf16.msk.msra.mxu1 %vm11304_vm8, %v11046_v17  ;;  %8268 = vmatprep.subr.msk.bf16.mxu0 %vm11319_vm6, %v11046_v17 }
  0x50   : > { %8300 = vmatprep.subr.msk.bf16.mxu1 %vm11324_vm7, %v11046_v17 }
  0x52   : > { %8270 = vmatpush3.bf16.msk.msra.mxu0 %vm11319_vm6, %v11046_v17 }
  0x53   : > { %8302 = vmatpush3.bf16.msk.msra.mxu1 %vm11324_vm7, %v11046_v17  ;;  %vm15278_vm7 = vmmov 0  }
  0x54   : > { %8315 = vmatprep.subr.bf16.mxu1 %v11042_v1 }
  0x91   : > { %v11434_v47 = vpop.permute.xlu0 %602  ;;  %v11436_v48 = vpop.permute.xlu1 %618 }
  0x95   : > { %v11438_v49 = vpop.permute.xlu0 %607 }
  0x98   : > { %v11440_v50 = vpop.permute.xlu1 %629 }
  0x99   : > { %v11442_v51 = vpop.permute.xlu0 %623  ;;  %v640_v3 = vmul.f32 %v639_v54, %v11440_v50 }
  0x9c   : > { %v11447_v53 = vpop.permute.xlu1 %633 }
  0x9d   : > { %v641_v4 = vmul.f32 %v639_v54, %v11447_v53 }
  0x9f   : > { %v11450_v56 = vpop.permute.xlu0 %645 }
  0xa1   : > { %v11454_v62 = vpop.permute.xlu1 %649 }
  0xa4   : > { %v11691_v20 = vpop.permute.xlu0 %825 }
 0x108   : > { %v526_v55 = vpop.f32.mrb[0].mxu0 }
 0x109   : > { %v613_v57 = vrot.slane %v526_v55, %v11445_v52  ;;  %v7909_v58 = vpop.f32.mrb[1].mxu0  ;;  %v596_v59 = vpop.f32.mrb[0].mxu1  ;;  %v1268_v55 = vrot.slane %v11503_v32, %v11445_v52 }
 0x10a   : > { %v655_v60 = vrot.slane %v596_v59, %v11445_v52  ;;  %v7944_v61 = vpop.f32.mrb[1].mxu1 }
 0x10b   : > { %v614_v63 = vmul.f32 %v613_v57, %v11434_v47  ;;  %v615_v0 = vmul.f32 %v613_v57, %v11438_v49  ;;  %v1270_v61 = vmul.f32 %v1268_v55, %v11447_v53 }
 0x10c   : > { %v657_v8 = vmul.f32 %v655_v60, %v11454_v62  ;;  %v656_v9 = vmul.f32 %v655_v60, %v11450_v56  ;;  %v1269_v60 = vmul.f32 %v1268_v55, %v11440_v50 }
 0x10d   : > { %v626_v6 = vadd.f32 %v11436_v48, %v614_v63  ;;  %v627_v7 = vadd.f32 %v11442_v51, %v615_v0 }
 0x10f   : > { %v643_v10 = vadd.f32 %v641_v4, %v627_v7  ;;  %v642_v11 = vadd.f32 %v640_v3, %v626_v6  ;;  %v11049_v7 = vmov 1983009808  }
 0x111   : > { %v659_v12 = vadd.f32 %v657_v8, %v643_v10  ;;  %v658_v13 = vadd.f32 %v656_v9, %v642_v11  ;;  %v955_v8 = vunpack.c.l.s4 %v11049_v7 }
 0x113   : > { %v661_v14 = vand.u32 2147483647, %v659_v12  ;;  %v660_v16 = vand.u32 2147483647, %v658_v13 }
 0x115   : > { %v663_v21 = vadd.f32 1.0, %v661_v14  ;;  %v662_v22 = vadd.f32 1.0, %v660_v16 }
 0x117   : > { %10966 = vrcp.f32 %v663_v21 }
 0x118   : > { %10968 = vrcp.f32 %v662_v22 }
 0x121   : > { %v10967_v23 = vpop.eup %10966 }
 0x122   : > { %v10969_v24 = vpop.eup %10968  ;;  %v667_v27 = vmul.f32 %v10967_v23, %v659_v12  ;;  %v956_v12 = vunpack.c.0.s8 %v955_v8 }
 0x123   : > { %v665_v28 = vmul.f32 %v10969_v24, %v658_v13 }
 0x124   : > { %v11700_v13 = vsub.s32 %v956_v12, %v11131_v5 }
 0x125   : > { %7977 = vmatprep.mubr.f32.mxu0 %v665_v28  ;;  %8012 = vmatprep.mubr.f32.mxu1 %v665_v28  ;;  %v8307_v31 = vpack.c.bf16 %v667_v27, %v665_v28 }
 0x126   : > { %7978 = vmatmul.mubr.f32.vlgmr.msra.gmra.mrb[2].mxu0 %v667_v27  ;;  %8013 = vmatmul.mubr.f32.vlgmr.msra.gmra.mrb[2].mxu1 %v667_v27 }
 0x127   : > { %8317 = vmatpush3.bf16.msk.msra.mxu1 %vm11155_vm5, %v11046_v17  ;;  %8065 = vmatprep.mubr.msk.f32.mxu1 %vm15278_vm7, %v11043_v2 }
 0x128   : > { %8318 = vmatprep.subr.bf16.mxu1 %v11042_v1 }
 0x12b   : > { %8320 = vmatpush3.bf16.msk.msra.mxu1 %vm11179_vm11, %v11046_v17 }
 0x12c   : > { %8321 = vmatprep.subr.bf16.mxu1 %v11042_v1 }
 0x12f   : > { %8323 = vmatpush3.bf16.msk.msra.mxu1 %vm11205_vm2, %v11046_v17 }
 0x130   : > { %8324 = vmatprep.subr.bf16.mxu1 %v11042_v1 }
 0x133   : > { %8326 = vmatpush3.bf16.msk.msra.mxu1 %vm15273_vm9, %v11046_v17 }
 0x134   : > { %8327 = vmatprep.subr.bf16.mxu1 %v11042_v1 }
 0x137   : > { %8329 = vmatpush3.bf16.msk.msra.mxu1 %vm15275_vm4, %v11046_v17 }
 0x138   : > { %8330 = vmatprep.subr.bf16.mxu1 %v11042_v1 }
 0x13b   : > { %8332 = vmatpush3.bf16.msk.msra.mxu1 %vm15277_vm14, %v11046_v17 }
 0x13c   : > { %8333 = vmatprep.subr.bf16.mxu1 %v11042_v1 }
 0x13f   : > { %8335 = vmatpush3.bf16.msk.msra.mxu1 %vm11299_vm13, %v11046_v17 }
 0x140   : > { %8336 = vmatprep.subr.bf16.mxu1 %v11042_v1 }
 0x143   : > { %8338 = vmatpush3.bf16.msk.msra.mxu1 %vm11319_vm6, %v11046_v17 }
 0x144   : > { %8364 = vmatprep.subr.msk.bf16.mxu1 %vm11155_vm5, %v11046_v17 }
 0x146   : > { %8066 = vmatmul.mubr.f32.vlgmr.msra.gmra.mrb[4].mxu1 %v11503_v32 }
 0x147   : > { %8366 = vmatpush3.bf16.msk.msra.mxu1 %vm11155_vm5, %v11046_v17  ;;  %vm838_vm5 = vcmask 392192  }
 0x148   : > { %8368 = vmatprep.subr.msk.bf16.mxu1 %vm11179_vm11, %v11046_v17  ;;  %8027 = vmatprep.mubr.msk.f32.mxu0 %vm838_vm5, %v11554_v15 }
 0x14b   : > { %8370 = vmatpush3.bf16.msk.msra.mxu1 %vm11179_vm11, %v11046_v17  ;;  %vm15279_vm11 = vnez %v15271_v45 }
 0x14c   : > { %8372 = vmatprep.subr.msk.bf16.mxu1 %vm11205_vm2, %v11046_v17 }
 0x14f   : > { %8374 = vmatpush3.bf16.msk.msra.mxu1 %vm11205_vm2, %v11046_v17 }
 0x150   : > { %8376 = vmatprep.subr.msk.bf16.mxu1 %vm15273_vm9, %v11046_v17 }
 0x153   : > { %8378 = vmatpush3.bf16.msk.msra.mxu1 %vm15273_vm9, %v11046_v17 }
 0x154   : > { %8380 = vmatprep.subr.msk.bf16.mxu1 %vm15275_vm4, %v11046_v17 }
 0x157   : > { %8382 = vmatpush3.bf16.msk.msra.mxu1 %vm15275_vm4, %v11046_v17 }
 0x158   : > { %8384 = vmatprep.subr.msk.bf16.mxu1 %vm15277_vm14, %v11046_v17 }
 0x15b   : > { %8386 = vmatpush3.bf16.msk.msra.mxu1 %vm15277_vm14, %v11046_v17 }
 0x15c   : > { %8388 = vmatprep.subr.msk.bf16.mxu1 %vm11299_vm13, %v11046_v17 }
 0x15f   : > { %8390 = vmatpush3.bf16.msk.msra.mxu1 %vm11299_vm13, %v11046_v17 }
 0x160   : > { %8392 = vmatprep.subr.msk.bf16.mxu1 %vm11319_vm6, %v11046_v17 }
 0x163   : > { %8394 = vmatpush3.bf16.msk.msra.mxu1 %vm11319_vm6, %v11046_v17 }
 0x1f9   : > { %v7979_v34 = vpop.f32.mrb[2].mxu0  ;;  %v8014_v36 = vpop.f32.mrb[2].mxu1 }
 0x1fa   : > { %v734_v37 = vpop.f32.mrb[3].mxu0  ;;  %v809_v38 = vpop.f32.mrb[3].mxu1 }
 0x1fb   : > { %v8303_v40 = vpack.c.bf16 %v7979_v34, %v734_v37  ;;  %v8311_v41 = vpack.c.bf16 %v8014_v36, %v809_v38 }
 0x1fd   : > { %8304 = vmatprep.subr.bf16.mxu0 %v8303_v40 }
 0x1fe   : > { %8306 = vmatpush3.bf16.msra.mxu0 %v8303_v40 }
 0x1ff   : > { %8308 = vmatprep.subr.bf16.mxu0 %v8307_v31 }
 0x202   : > { %8310 = vmatpush3.bf16.msra.mxu0 %v8307_v31 }
 0x203   : > { %8312 = vmatprep.subr.bf16.mxu0 %v8311_v41 }
 0x206   : > { %8314 = vmatpush3.bf16.msra.mxu0 %v8311_v41 }
 0x207   : > { %8339 = vmatprep.subr.bf16.mxu0 %v11042_v1 }
 0x209   : > { %8028 = vmatmul.mubr.msk.f32.vlgmr.msra.gmra.mrb[4].mxu0 %vm838_vm5, %v11573_v42 }
 0x20a   : > { %8341 = vmatpush3.bf16.msk.msra.mxu0 %vm11171_vm10, %v11046_v17  ;;  %8030 = vmatprep.mubr.msk.f32.mxu0 %vm838_vm5, %v11579_v44 }
 0x20b   : > { %8342 = vmatprep.subr.bf16.mxu0 %v11042_v1 }
 0x20d   : > { %8031 = vmatmul.mubr.msk.f32.gmra.mrb[6].mxu0 %vm838_vm5, %v11591_v46 }
 0x20e   : > { %8344 = vmatpush3.bf16.msk.msra.mxu0 %vm11184_vm12, %v11046_v17  ;;  %8100 = vmatprep.mubr.msk.f32.mxu0 %vm15278_vm7, %v11043_v2 }
 0x20f   : > { %8345 = vmatprep.subr.bf16.mxu0 %v11042_v1 }
 0x212   : > { %8347 = vmatpush3.bf16.msk.msra.mxu0 %vm15272_vm3, %v11046_v17 }
 0x213   : > { %8348 = vmatprep.subr.bf16.mxu0 %v11042_v1 }
 0x216   : > { %8350 = vmatpush3.bf16.msk.msra.mxu0 %vm15274_vm15, %v11046_v17 }
 0x217   : > { %8351 = vmatprep.subr.bf16.mxu0 %v11042_v1 }
 0x219   : > { %v1183_v54 = vpop.f32.mrb[4].mxu1 }
 0x21a   : > { %v1260_v2 = vrot.slane %v1183_v54, %v11445_v52  ;;  %8353 = vmatpush3.bf16.msk.msra.mxu0 %vm15276_vm0, %v11046_v17  ;;  %v8067_v57 = vpop.f32.mrb[5].mxu1 }
 0x21b   : > { %8354 = vmatprep.subr.bf16.mxu0 %v11042_v1 }
 0x21c   : > { %v1261_v58 = vmul.f32 %v1260_v2, %v11434_v47  ;;  %v1262_v59 = vmul.f32 %v1260_v2, %v11438_v49 }
 0x21e   : > { %v1263_v63 = vadd.f32 %v1261_v58, %v11436_v48  ;;  %v1264_v0 = vadd.f32 %v1262_v59, %v11442_v51  ;;  %8356 = vmatpush3.bf16.msk.msra.mxu0 %vm11281_vm1, %v11046_v17 }
 0x21f   : > { %8357 = vmatprep.subr.bf16.mxu0 %v11042_v1 }
 0x220   : > { %v11627_v3 = vadd.f32 %v1269_v60, %v1263_v63  ;;  %v11629_v4 = vadd.f32 %v1270_v61, %v1264_v0 }
 0x222   : > { %8359 = vmatpush3.bf16.msk.msra.mxu0 %vm11304_vm8, %v11046_v17 }
 0x223   : > { %8360 = vmatprep.subr.bf16.mxu0 %v11042_v1  ;;  %v11687_v1 = vpop.permute.xlu1 %820 }
 0x226   : > { %8362 = vmatpush3.bf16.msk.msra.mxu0 %vm15279_vm11, %v11046_v17 }
 0x227   : > { %8396 = vmatprep.subr.msk.bf16.mxu0 %vm11171_vm10, %v11046_v17  ;;  %v11689_v18 = vpop.permute.xlu1 %830 }
 0x229   : > { %8101 = vmatmul.mubr.f32.vlgmr.msra.gmra.mrb[8].mxu0 %v11503_v32 }
 0x22a   : > { %8398 = vmatpush3.bf16.msk.msra.mxu0 %vm11171_vm10, %v11046_v17 }
 0x22b   : > { %8400 = vmatprep.subr.msk.bf16.mxu0 %vm11184_vm12, %v11046_v17  ;;  %v11695_v43 = vpop.permute.xlu1 %835 }
 0x22e   : > { %8402 = vmatpush3.bf16.msk.msra.mxu0 %vm11184_vm12, %v11046_v17 }
 0x22f   : > { %8404 = vmatprep.subr.msk.bf16.mxu0 %vm15272_vm3, %v11046_v17 }
 0x232   : > { %8406 = vmatpush3.bf16.msk.msra.mxu0 %vm15272_vm3, %v11046_v17 }
 0x233   : > { %8408 = vmatprep.subr.msk.bf16.mxu0 %vm15274_vm15, %v11046_v17 }
 0x236   : > { %8410 = vmatpush3.bf16.msk.msra.mxu0 %vm15274_vm15, %v11046_v17 }
 0x237   : > { %8412 = vmatprep.subr.msk.bf16.mxu0 %vm15276_vm0, %v11046_v17 }
 0x23a   : > { %8414 = vmatpush3.bf16.msk.msra.mxu0 %vm15276_vm0, %v11046_v17 }
 0x23b   : > { %8416 = vmatprep.subr.msk.bf16.mxu0 %vm11281_vm1, %v11046_v17 }
 0x23e   : > { %8418 = vmatpush3.bf16.msk.msra.mxu0 %vm11281_vm1, %v11046_v17 }
 0x23f   : > { %8420 = vmatprep.subr.msk.bf16.mxu0 %vm11304_vm8, %v11046_v17 }
 0x242   : > { %8422 = vmatpush3.bf16.msk.msra.mxu0 %vm11304_vm8, %v11046_v17 }
 0x243   : > { %8424 = vmatprep.subr.msk.bf16.mxu0 %vm15279_vm11, %v11046_v17 }
 0x246   : > { %8426 = vmatpush3.bf16.msk.msra.mxu0 %vm15279_vm11, %v11046_v17 }
 0x2dc   : > { %v8029_v26 = vpop.f32.mrb[4].mxu0 }
 0x2dd   : > { %v923_v30 = vadd.f32 %v8029_v26, %v11691_v20  ;;  %v917_v35 = vpop.f32.mrb[5].mxu0 }
 0x2de   : > { %v918_v39 = vadd.f32 %v917_v35, %v11687_v1 }
 0x2df   : > { %v937_v47 = vand.u32 2147483647, %v923_v30 }
 0x2e0   : > { %v936_v48 = vand.u32 2147483647, %v918_v39  ;;  %v8032_v49 = vpop.f32.mrb[6].mxu0 }
 0x2e1   : > { %v941_v50 = vadd.f32 1.0, %v937_v47  ;;  %v933_v17 = vadd.f32 %v8032_v49, %v11695_v43  ;;  %v927_v45 = vpop.f32.mrb[7].mxu0 }
 0x2e2   : > { %v940_v51 = vadd.f32 1.0, %v936_v48  ;;  %v928_v53 = vadd.f32 %v927_v45, %v11689_v18 }
 0x2e3   : > { %10970 = vrcp.f32 %v941_v50  ;;  %v939_v6 = vand.u32 2147483647, %v933_v17 }
 0x2e4   : > { %10972 = vrcp.f32 %v940_v51  ;;  %v938_v9 = vand.u32 2147483647, %v928_v53 }
 0x2e5   : > { %v943_v10 = vadd.f32 1.0, %v939_v6 }
 0x2e6   : > { %v942_v11 = vadd.f32 1.0, %v938_v9 }
 0x2e7   : > { %10974 = vrcp.f32 %v943_v10 }
 0x2e8   : > { %10976 = vrcp.f32 %v942_v11 }
 0x2ed   : > { %v10971_v14 = vpop.eup %10970 }
 0x2ee   : > { %v10973_v16 = vpop.eup %10972  ;;  %v947_v21 = vmul.f32 %v10971_v14, %v923_v30 }
 0x2ef   : > { %v945_v22 = vmul.f32 %v10973_v16, %v918_v39 }
 0x2f0   : > { %993 = vst [vmem:[#allocation2 + $0x10] sm:$0x1] %v947_v21  ;;  %v1001_v23 = vrot.slane %v947_v21, %v11700_v13  ;;  %v1013_v24 = vcombine.high %v947_v21, %v947_v21 }
 0x2f1   : > { %v10975_v27 = vpop.eup %10974  ;;  %952 = vst [vmem:[#allocation2] sm:$0x1] %v945_v22  ;;  %v960_v28 = vrot.slane %v945_v22, %v11700_v13  ;;  %v972_v31 = vcombine.high %v945_v22, %v945_v22 }
 0x2f2   : > { %v10977_v32 = vpop.eup %10976  ;;  %v7464_v19 = vrot.slane %v1001_v23, 9  ;;  %v1006_v25 = vcombine.high %v1001_v23, %v1001_v23  ;;  %v1020_v29 = vrot.slane %v1013_v24, %v11700_v13  ;;  %7466 = vst.sshfl [vmem:[#allocation2 + $0x18] sm:$0x1 pattern:$0x76325410] %v1013_v24  ;;  %v951_v5 = vmul.f32 %v10975_v27, %v933_v17 }
 0x2f3   : > { %v7459_v33 = vrot.slane %v960_v28, 9  ;;  %v965_v34 = vcombine.high %v960_v28, %v960_v28  ;;  %v979_v36 = vrot.slane %v972_v31, %v11700_v13  ;;  %7461 = vst.sshfl [vmem:[#allocation2 + $0x8] sm:$0x1 pattern:$0x76325410] %v972_v31  ;;  %v949_v37 = vmul.f32 %v10977_v32, %v928_v53 }
 0x2f4   : > { %1005 = vst [vmem:[#allocation2 + $0x12] sm:$0x1] %v7464_v19  ;;  %1008 = vst [vmem:[#allocation2 + $0x14] sm:$0x1] %v1006_v25  ;;  %v7465_v38 = vrot.slane %v1006_v25, 9  ;;  %v7467_v40 = vrot.slane %v1020_v29, 9  ;;  %v1027_v41 = vcombine.high %v1020_v29, %v1020_v29  ;;  %v1083_v54 = vrot.slane %v951_v5, %v11700_v13 }
 0x2f5   : > { %1075 = vst [vmem:[#allocation2 + $0x30] sm:$0x1] %v951_v5  ;;  %964 = vst [vmem:[#allocation2 + $0x2] sm:$0x1] %v7459_v33  ;;  %v7460_v55 = vrot.slane %v965_v34, 9  ;;  %v7462_v2 = vrot.slane %v979_v36, 9  ;;  %v986_v57 = vcombine.high %v979_v36, %v979_v36  ;;  %v1095_v58 = vcombine.high %v951_v5, %v951_v5 }
 0x2f6   : > { %967 = vst [vmem:[#allocation2 + $0x4] sm:$0x1] %v965_v34  ;;  %1034 = vst [vmem:[#allocation2 + $0x20] sm:$0x1] %v949_v37  ;;  %v7468_v59 = vrot.slane %v1027_v41, 9  ;;  %v7474_v60 = vrot.slane %v1083_v54, 9  ;;  %v1088_v61 = vcombine.high %v1083_v54, %v1083_v54  ;;  %v1042_v63 = vrot.slane %v949_v37, %v11700_v13 }
 0x2f7   : > { %1012 = vst [vmem:[#allocation2 + $0x16] sm:$0x1] %v7465_v38  ;;  %1026 = vst [vmem:[#allocation2 + $0x1a] sm:$0x1] %v7467_v40  ;;  %v7463_v0 = vrot.slane %v986_v57, 9  ;;  %v1102_v26 = vrot.slane %v1095_v58, %v11700_v13  ;;  %v1054_v30 = vcombine.high %v949_v37, %v949_v37 }
 0x2f8   : > { %1029 = vst [vmem:[#allocation2 + $0x1c] sm:$0x1] %v1027_v41  ;;  %971 = vst [vmem:[#allocation2 + $0x6] sm:$0x1] %v7460_v55  ;;  %v7475_v35 = vrot.slane %v1088_v61, 9  ;;  %v7469_v39 = vrot.slane %v1042_v63, 9  ;;  %v1047_v47 = vcombine.high %v1042_v63, %v1042_v63 }
 0x2f9   : > { %985 = vst [vmem:[#allocation2 + $0xa] sm:$0x1] %v7462_v2  ;;  %988 = vst [vmem:[#allocation2 + $0xc] sm:$0x1] %v986_v57  ;;  %v7477_v48 = vrot.slane %v1102_v26, 9  ;;  %v1109_v49 = vcombine.high %v1102_v26, %v1102_v26  ;;  %v1061_v50 = vrot.slane %v1054_v30, %v11700_v13 }
 0x2fa   : > { %7476 = vst.sshfl [vmem:[#allocation2 + $0x38] sm:$0x1 pattern:$0x76325410] %v1095_v58  ;;  %1033 = vst [vmem:[#allocation2 + $0x1e] sm:$0x1] %v7468_v59 }
 0x2fb   : > { %1087 = vst [vmem:[#allocation2 + $0x32] sm:$0x1] %v7474_v60  ;;  %1090 = vst [vmem:[#allocation2 + $0x34] sm:$0x1] %v1088_v61  ;;  %v7470_v17 = vrot.slane %v1047_v47, 9  ;;  %v7478_v45 = vrot.slane %v1109_v49, 9  ;;  %v1068_v53 = vcombine.high %v1061_v50, %v1061_v50 }
 0x2fc   : > { %992 = vst [vmem:[#allocation2 + $0xe] sm:$0x1] %v7463_v0  ;;  %7471 = vst.sshfl [vmem:[#allocation2 + $0x28] sm:$0x1 pattern:$0x76325410] %v1054_v30 }
 0x2fd   : > { %1094 = vst [vmem:[#allocation2 + $0x36] sm:$0x1] %v7475_v35  ;;  %1046 = vst [vmem:[#allocation2 + $0x22] sm:$0x1] %v7469_v39  ;;  %v7472_v51 = vrot.slane %v1061_v50, 9  ;;  %v1253_v6 = vpop.f32.mrb[8].mxu0 }
 0x2fe   : > { %1049 = vst [vmem:[#allocation2 + $0x24] sm:$0x1] %v1047_v47  ;;  %1108 = vst [vmem:[#allocation2 + $0x3a] sm:$0x1] %v7477_v48  ;;  %v7473_v7 = vrot.slane %v1068_v53, 9  ;;  %v1276_v8 = vrot.slane %v1253_v6, %v11445_v52  ;;  %v8102_v9 = vpop.f32.mrb[9].mxu0 }
 0x2ff   : > { %1111 = vst [vmem:[#allocation2 + $0x3c] sm:$0x1] %v1109_v49  ;;  %1053 = vst [vmem:[#allocation2 + $0x26] sm:$0x1] %v7470_v17 }
 0x300   : > { %1115 = vst [vmem:[#allocation2 + $0x3e] sm:$0x1] %v7478_v45  ;;  %1067 = vst [vmem:[#allocation2 + $0x2a] sm:$0x1] %v7472_v51  ;;  %v1277_v10 = vmul.f32 %v1276_v8, %v11450_v56  ;;  %v1278_v11 = vmul.f32 %v1276_v8, %v11454_v62 }
 0x301   : > { %1070 = vst [vmem:[#allocation2 + $0x2c] sm:$0x1] %v1068_v53  ;;  %1074 = vst [vmem:[#allocation2 + $0x2e] sm:$0x1] %v7473_v7 }
 0x302   : > { %v1279_v12 = vadd.f32 %v1277_v10, %v11627_v3  ;;  %v1280_v14 = vadd.f32 %v1278_v11, %v11629_v4 }
 0x304   : > { %v1281_v16 = vand.u32 2147483647, %v1279_v12  ;;  %v1282_v21 = vand.u32 2147483647, %v1280_v14 }
 0x306   : > { %v1283_v22 = vadd.f32 1.0, %v1281_v16  ;;  %v1284_v23 = vadd.f32 1.0, %v1282_v21 }
 0x308   : > { %10978 = vrcp.f32 %v1283_v22 }
 0x309   : > { %10980 = vrcp.f32 %v1284_v23 }
 0x312   : > { %v10979_v24 = vpop.eup %10978 }
 0x313   : > { %v10981_v27 = vpop.eup %10980  ;;  %v1286_v28 = vmul.f32 %v10979_v24, %v1279_v12 }
 0x314   : > { %v1288_v52 = vmul.f32 %v10981_v27, %v1280_v14 }
 0x315   : > { %8135 = vmatprep.mubr.f32.mxu1 %v1286_v28  ;;  %8170 = vmatprep.mubr.f32.mxu0 %v1286_v28 }
 0x316   : > { %8136 = vmatmul.mubr.f32.vlgmr.msra.gmra.mrb[6].mxu1 %v1288_v52  ;;  %8171 = vmatmul.mubr.f32.vlgmr.msra.gmra.mrb[10].mxu0 %v1288_v52  ;;  %v8431_v56 = vpack.c.bf16 %v1288_v52, %v1286_v28 }
 0x317   : > { %8185 = vmatprep.mubr.msk.f32.mxu1 %vm838_vm5, %v11554_v15 }
 0x3e9   : > { %v8137_v62 = vpop.f32.mrb[6].mxu1  ;;  %v8172_v3 = vpop.f32.mrb[10].mxu0 }
 0x3ea   : > { %v1355_v4 = vpop.f32.mrb[7].mxu1  ;;  %v1430_v31 = vpop.f32.mrb[11].mxu0 }
 0x3eb   : > { %v8427_v32 = vpack.c.bf16 %v8137_v62, %v1355_v4  ;;  %v8435_v19 = vpack.c.bf16 %v8172_v3, %v1430_v31 }
 0x3ed   : > { %8428 = vmatprep.subr.bf16.mxu1 %v8427_v32 }
 0x3ee   : > { %8430 = vmatpush3.bf16.msra.mxu1 %v8427_v32 }
 0x3ef   : > { %8432 = vmatprep.subr.bf16.mxu1 %v8431_v56 }
 0x3f2   : > { %8434 = vmatpush3.bf16.msra.mxu1 %v8431_v56 }
 0x3f3   : > { %8436 = vmatprep.subr.bf16.mxu1 %v8435_v19 }
 0x3f6   : > { %8438 = vmatpush3.bf16.msra.mxu1 %v8435_v19 }
 0x3f9   : > { %8186 = vmatmul.mubr.msk.f32.vlgmr.msra.gmra.mrb[8].mxu1 %vm838_vm5, %v11573_v42 }
 0x3fa   : > { %8188 = vmatprep.mubr.msk.f32.mxu1 %vm838_vm5, %v11579_v44 }
 0x3fd   : > { %8189 = vmatmul.mubr.msk.f32.gmra.mrb[10].mxu1 %vm838_vm5, %v11591_v46 }
 0x4cc   : > { %v8187_v15 = vpop.f32.mrb[8].mxu1 }
 0x4cd   : > { %v1511_v25 = vadd.f32 %v8187_v15, %v11691_v20  ;;  %v1505_v29 = vpop.f32.mrb[9].mxu1 }
 0x4ce   : > { %v1506_v5 = vadd.f32 %v1505_v29, %v11687_v1 }
 0x4cf   : > { %v1525_v33 = vand.u32 2147483647, %v1511_v25 }
 0x4d0   : > { %v1524_v34 = vand.u32 2147483647, %v1506_v5  ;;  %v8190_v36 = vpop.f32.mrb[10].mxu1 }
 0x4d1   : > { %v1529_v37 = vadd.f32 1.0, %v1525_v33  ;;  %v1521_v38 = vadd.f32 %v8190_v36, %v11695_v43  ;;  %v1515_v40 = vpop.f32.mrb[11].mxu1 }
 0x4d2   : > { %v1528_v42 = vadd.f32 1.0, %v1524_v34  ;;  %v1516_v41 = vadd.f32 %v1515_v40, %v11689_v18 }
 0x4d3   : > { %10982 = vrcp.f32 %v1529_v37  ;;  %v1527_v44 = vand.u32 2147483647, %v1521_v38 }
 0x4d4   : > { %10984 = vrcp.f32 %v1528_v42  ;;  %v1526_v46 = vand.u32 2147483647, %v1516_v41 }
 0x4d5   : > { %v1531_v54 = vadd.f32 1.0, %v1527_v44 }
 0x4d6   : > { %v1530_v55 = vadd.f32 1.0, %v1526_v46 }
 0x4d7   : > { %10986 = vrcp.f32 %v1531_v54 }
 0x4d8   : > { %10988 = vrcp.f32 %v1530_v55 }
 0x4dd   : > { %v10983_v20 = vpop.eup %10982 }
 0x4de   : > { %v10985_v1 = vpop.eup %10984  ;;  %v1535_v2 = vmul.f32 %v10983_v20, %v1511_v25 }
 0x4df   : > { %v1533_v57 = vmul.f32 %v10985_v1, %v1506_v5 }
 0x4e0   : > { %1581 = vst [vmem:[#allocation2 + $0x11] sm:$0x1] %v1535_v2  ;;  %v1589_v58 = vrot.slane %v1535_v2, %v11700_v13  ;;  %v1601_v43 = vcombine.high %v1535_v2, %v1535_v2 }
 0x4e1   : > { %v10987_v59 = vpop.eup %10986  ;;  %1540 = vst [vmem:[#allocation2 + $0x1] sm:$0x1] %v1533_v57  ;;  %v1548_v18 = vrot.slane %v1533_v57, %v11700_v13  ;;  %v1560_v60 = vcombine.high %v1533_v57, %v1533_v57 }
 0x4e2   : > { %v10989_v61 = vpop.eup %10988  ;;  %v7552_v63 = vrot.slane %v1589_v58, 9  ;;  %v1594_v0 = vcombine.high %v1589_v58, %v1589_v58  ;;  %v1608_v26 = vrot.slane %v1601_v43, %v11700_v13  ;;  %7554 = vst.sshfl [vmem:[#allocation2 + $0x19] sm:$0x1 pattern:$0x76325410] %v1601_v43  ;;  %v1539_v30 = vmul.f32 %v10987_v59, %v1521_v38 }
 0x4e3   : > { %v7547_v35 = vrot.slane %v1548_v18, 9  ;;  %v1553_v39 = vcombine.high %v1548_v18, %v1548_v18  ;;  %v1567_v47 = vrot.slane %v1560_v60, %v11700_v13  ;;  %7549 = vst.sshfl [vmem:[#allocation2 + $0x9] sm:$0x1 pattern:$0x76325410] %v1560_v60  ;;  %v1537_v48 = vmul.f32 %v10989_v61, %v1516_v41 }
 0x4e4   : > { %1593 = vst [vmem:[#allocation2 + $0x13] sm:$0x1] %v7552_v63  ;;  %1596 = vst [vmem:[#allocation2 + $0x15] sm:$0x1] %v1594_v0  ;;  %v7553_v49 = vrot.slane %v1594_v0, 9  ;;  %v7555_v50 = vrot.slane %v1608_v26, 9  ;;  %v1615_v17 = vcombine.high %v1608_v26, %v1608_v26  ;;  %v1671_v45 = vrot.slane %v1539_v30, %v11700_v13 }
 0x4e5   : > { %1663 = vst [vmem:[#allocation2 + $0x31] sm:$0x1] %v1539_v30  ;;  %1552 = vst [vmem:[#allocation2 + $0x3] sm:$0x1] %v7547_v35  ;;  %v7548_v51 = vrot.slane %v1553_v39, 9  ;;  %v7550_v53 = vrot.slane %v1567_v47, 9  ;;  %v1574_v6 = vcombine.high %v1567_v47, %v1567_v47  ;;  %v1683_v7 = vcombine.high %v1539_v30, %v1539_v30 }
 0x4e6   : > { %1555 = vst [vmem:[#allocation2 + $0x5] sm:$0x1] %v1553_v39  ;;  %1622 = vst [vmem:[#allocation2 + $0x21] sm:$0x1] %v1537_v48  ;;  %v7556_v8 = vrot.slane %v1615_v17, 9  ;;  %v7562_v9 = vrot.slane %v1671_v45, 9  ;;  %v1676_v10 = vcombine.high %v1671_v45, %v1671_v45  ;;  %v1630_v11 = vrot.slane %v1537_v48, %v11700_v13 }
 0x4e7   : > { %1600 = vst [vmem:[#allocation2 + $0x17] sm:$0x1] %v7553_v49  ;;  %1614 = vst [vmem:[#allocation2 + $0x1b] sm:$0x1] %v7555_v50  ;;  %v7551_v12 = vrot.slane %v1574_v6, 9  ;;  %v1690_v14 = vrot.slane %v1683_v7, %v11700_v13  ;;  %v1642_v16 = vcombine.high %v1537_v48, %v1537_v48 }
 0x4e8   : > { %1617 = vst [vmem:[#allocation2 + $0x1d] sm:$0x1] %v1615_v17  ;;  %1559 = vst [vmem:[#allocation2 + $0x7] sm:$0x1] %v7548_v51  ;;  %v7563_v21 = vrot.slane %v1676_v10, 9  ;;  %v7557_v22 = vrot.slane %v1630_v11, 9  ;;  %v1635_v23 = vcombine.high %v1630_v11, %v1630_v11 }
 0x4e9   : > { %1573 = vst [vmem:[#allocation2 + $0xb] sm:$0x1] %v7550_v53  ;;  %1576 = vst [vmem:[#allocation2 + $0xd] sm:$0x1] %v1574_v6  ;;  %v7565_v24 = vrot.slane %v1690_v14, 9  ;;  %v1697_v27 = vcombine.high %v1690_v14, %v1690_v14  ;;  %v1649_v28 = vrot.slane %v1642_v16, %v11700_v13 }
 0x4ea   : > { %7564 = vst.sshfl [vmem:[#allocation2 + $0x39] sm:$0x1 pattern:$0x76325410] %v1683_v7  ;;  %1621 = vst [vmem:[#allocation2 + $0x1f] sm:$0x1] %v7556_v8 }
 0x4eb   : > { %1675 = vst [vmem:[#allocation2 + $0x33] sm:$0x1] %v7562_v9  ;;  %1678 = vst [vmem:[#allocation2 + $0x35] sm:$0x1] %v1676_v10  ;;  %v7558_v52 = vrot.slane %v1635_v23, 9  ;;  %v7566_v56 = vrot.slane %v1697_v27, 9  ;;  %v1656_v3 = vcombine.high %v1649_v28, %v1649_v28 }
 0x4ec   : > { %1580 = vst [vmem:[#allocation2 + $0xf] sm:$0x1] %v7551_v12  ;;  %7559 = vst.sshfl [vmem:[#allocation2 + $0x29] sm:$0x1 pattern:$0x76325410] %v1642_v16 }
 0x4ed   : > { %1682 = vst [vmem:[#allocation2 + $0x37] sm:$0x1] %v7563_v21  ;;  %1634 = vst [vmem:[#allocation2 + $0x23] sm:$0x1] %v7557_v22  ;;  %v7560_v62 = vrot.slane %v1649_v28, 9  ;;  %v7561_v4 = vrot.slane %v1656_v3, 9 }
 0x4ee   : > { %1637 = vst [vmem:[#allocation2 + $0x25] sm:$0x1] %v1635_v23  ;;  %1696 = vst [vmem:[#allocation2 + $0x3b] sm:$0x1] %v7565_v24 }
 0x4ef   : > { %1699 = vst [vmem:[#allocation2 + $0x3d] sm:$0x1] %v1697_v27  ;;  %1641 = vst [vmem:[#allocation2 + $0x27] sm:$0x1] %v7558_v52 }
 0x4f0   : > { %1703 = vst [vmem:[#allocation2 + $0x3f] sm:$0x1] %v7566_v56  ;;  %1655 = vst [vmem:[#allocation2 + $0x2b] sm:$0x1] %v7560_v62 }
 0x4f1   : > { %1658 = vst [vmem:[#allocation2 + $0x2d] sm:$0x1] %v1656_v3  ;;  %1662 = vst [vmem:[#allocation2 + $0x2f] sm:$0x1] %v7561_v4 }
 0x4f2 PF: > { %v1716_v13 = vld [vmem:[%s11116_s15 + $0x8] sm:$0xff]  ;;  %v1718_v32 = vld [vmem:[%s11116_s15 + $0x18] sm:$0xff]  ;;  %v1715_v25 = vld [vmem:[%s11116_s15] sm:$0xff]  ;;  %s7567_s26 = sshll.u32 %s11108_s10, 11  ;;  %p7569_p5 = scmp.ne.s32.totalorder %s11108_s10, 1 }
 0x4f3   : > { %v1724_v31 = vld [vmem:[%s11116_s15 + $0x48] sm:$0xff]  ;;  %v1726_v15 = vld [vmem:[%s11116_s15 + $0x58] sm:$0xff]  ;;  %v1723_v29 = vld [vmem:[%s11116_s15 + $0x40] sm:$0xff]  ;;  %s11815_s27 = sshra.s32 %s7567_s26, 7 }
 0x4f4   : > { %v8439_v19 = vpack.c.bf16 %v1724_v31, %v1716_v13  ;;  %v8951_v5 = vpack.c.bf16 %v1726_v15, %v1718_v32  ;;  %v8441_v33 = vpack.c.bf16 %v1723_v29, %v1715_v25  ;;  %v1717_v34 = vld [vmem:[%s11116_s15 + $0x10] sm:$0xff]  ;;  %v1732_v37 = vld [vmem:[%s11116_s15 + $0x88] sm:$0xff]  ;;  %v1734_v42 = vld [vmem:[%s11116_s15 + $0x98] sm:$0xff]  ;;  %s7568_s28 = sshll.u32 %s11815_s27, 1 }
 0x4f5   : > { %v1725_v36 = vld [vmem:[%s11116_s15 + $0x50] sm:$0xff]  ;;  %v1740_v40 = vld [vmem:[%s11116_s15 + $0xc8] sm:$0xff]  ;;  %v1742_v41 = vld [vmem:[%s11116_s15 + $0xd8] sm:$0xff]  ;;  %s11844_s29 = scalar_lea.vmem [#allocation2], %s7568_s28 }
 0x4f6   : > { %8440 = vmatprep.subr.bf16.mxu0 %v8439_v19  ;;  %v8953_v38 = vpack.c.bf16 %v1725_v36, %v1717_v34  ;;  %8952 = vmatprep.subr.bf16.mxu1 %v8951_v5  ;;  %v8443_v44 = vpack.c.bf16 %v1740_v40, %v1732_v37  ;;  %v8955_v46 = vpack.c.bf16 %v1742_v41, %v1734_v42  ;;  %v1731_v54 = vld [vmem:[%s11116_s15 + $0x80] sm:$0xff]  ;;  %v1733_v20 = vld [vmem:[%s11116_s15 + $0x90] sm:$0xff]  ;;  %v1748_v57 = vld [vmem:[%s11116_s15 + $0x108] sm:$0xff] }
 0x4f7   : > { %8442 = vmatpush1.bf16.msra.mxu0 %v8441_v33  ;;  %v1739_v55 = vld [vmem:[%s11116_s15 + $0xc0] sm:$0xff]  ;;  %v1741_v2 = vld [vmem:[%s11116_s15 + $0xd0] sm:$0xff]  ;;  %v1756_v58 = vld [vmem:[%s11116_s15 + $0x148] sm:$0xff] }
 0x4f8   : > { %8954 = vmatpush1.bf16.msra.mxu1 %v8953_v38  ;;  %v8445_v1 = vpack.c.bf16 %v1739_v55, %v1731_v54  ;;  %8444 = vmatprep.subr.bf16.mxu0 %v8443_v44  ;;  %v8957_v43 = vpack.c.bf16 %v1741_v2, %v1733_v20  ;;  %v8447_v59 = vpack.c.bf16 %v1756_v58, %v1748_v57  ;;  %v1750_v18 = vld [vmem:[%s11116_s15 + $0x118] sm:$0xff]  ;;  %v1747_v61 = vld [vmem:[%s11116_s15 + $0x100] sm:$0xff]  ;;  %v1749_v26 = vld [vmem:[%s11116_s15 + $0x110] sm:$0xff] }
 0x4f9   : > { %8956 = vmatprep.subr.bf16.mxu1 %v8955_v46  ;;  %v1758_v60 = vld [vmem:[%s11116_s15 + $0x158] sm:$0xff]  ;;  %v1755_v0 = vld [vmem:[%s11116_s15 + $0x140] sm:$0xff]  ;;  %v1757_v30 = vld [vmem:[%s11116_s15 + $0x150] sm:$0xff] }
 0x4fa   : > { %v8959_v63 = vpack.c.bf16 %v1758_v60, %v1750_v18  ;;  %v8449_v35 = vpack.c.bf16 %v1755_v0, %v1747_v61  ;;  %v1764_v39 = vld [vmem:[%s11116_s15 + $0x188] sm:$0xff]  ;;  %v1766_v48 = vld [vmem:[%s11116_s15 + $0x198] sm:$0xff]  ;;  %v8961_v49 = vpack.c.bf16 %v1757_v30, %v1749_v26  ;;  %v1763_v45 = vld [vmem:[%s11116_s15 + $0x180] sm:$0xff] }
 0x4fb   : > { %8446 = vmatpush1.bf16.msra.mxu0 %v8445_v1  ;;  %v1772_v47 = vld [vmem:[%s11116_s15 + $0x1c8] sm:$0xff]  ;;  %v1774_v17 = vld [vmem:[%s11116_s15 + $0x1d8] sm:$0xff]  ;;  %v1771_v51 = vld [vmem:[%s11116_s15 + $0x1c0] sm:$0xff] }
 0x4fc   : > { %8958 = vmatpush1.bf16.msra.mxu1 %v8957_v43  ;;  %8448 = vmatprep.subr.bf16.mxu0 %v8447_v59  ;;  %v8451_v50 = vpack.c.bf16 %v1772_v47, %v1764_v39  ;;  %v8963_v53 = vpack.c.bf16 %v1774_v17, %v1766_v48  ;;  %v1765_v6 = vld [vmem:[%s11116_s15 + $0x190] sm:$0xff]  ;;  %v1780_v8 = vld [vmem:[%s11116_s15 + $0x208] sm:$0xff]  ;;  %v1782_v10 = vld [vmem:[%s11116_s15 + $0x218] sm:$0xff]  ;;  %v8453_v12 = vpack.c.bf16 %v1771_v51, %v1763_v45 }
 0x4fd   : > { %8960 = vmatprep.subr.bf16.mxu1 %v8959_v63  ;;  %v1773_v7 = vld [vmem:[%s11116_s15 + $0x1d0] sm:$0xff]  ;;  %v1788_v9 = vld [vmem:[%s11116_s15 + $0x248] sm:$0xff]  ;;  %v1790_v11 = vld [vmem:[%s11116_s15 + $0x258] sm:$0xff] }
 0x4fe   : > { %v8965_v14 = vpack.c.bf16 %v1773_v7, %v1765_v6  ;;  %v8455_v16 = vpack.c.bf16 %v1788_v9, %v1780_v8  ;;  %v1779_v21 = vld [vmem:[%s11116_s15 + $0x200] sm:$0xff]  ;;  %v1781_v23 = vld [vmem:[%s11116_s15 + $0x210] sm:$0xff]  ;;  %v8967_v24 = vpack.c.bf16 %v1790_v11, %v1782_v10  ;;  %v1796_v28 = vld [vmem:[%s11116_s15 + $0x288] sm:$0xff]  ;;  %v11050_v8 = vmov 1983009808  }
 0x4ff   : > { %8450 = vmatpush1.bf16.msra.mxu0 %v8449_v35  ;;  %v1787_v22 = vld [vmem:[%s11116_s15 + $0x240] sm:$0xff]  ;;  %v1789_v27 = vld [vmem:[%s11116_s15 + $0x250] sm:$0xff]  ;;  %v1804_v52 = vld [vmem:[%s11116_s15 + $0x2c8] sm:$0xff]  ;;  %v3769_v9 = vunpack.c.l.s4 %v11050_v8  ;;  %v3771_v10 = vlaneseq }
 0x500   : > { %8962 = vmatpush1.bf16.msra.mxu1 %v8961_v49  ;;  %8452 = vmatprep.subr.bf16.mxu0 %v8451_v50  ;;  %v1798_v56 = vld [vmem:[%s11116_s15 + $0x298] sm:$0xff]  ;;  %v8457_v3 = vpack.c.bf16 %v1787_v22, %v1779_v21  ;;  %v8969_v4 = vpack.c.bf16 %v1789_v27, %v1781_v23  ;;  %v8459_v13 = vpack.c.bf16 %v1804_v52, %v1796_v28  ;;  %v1795_v31 = vld [vmem:[%s11116_s15 + $0x280] sm:$0xff]  ;;  %v1797_v19 = vld [vmem:[%s11116_s15 + $0x290] sm:$0xff] }
 0x501   : > { %8964 = vmatprep.subr.bf16.mxu1 %v8963_v53  ;;  %v1806_v62 = vld [vmem:[%s11116_s15 + $0x2d8] sm:$0xff]  ;;  %v1803_v32 = vld [vmem:[%s11116_s15 + $0x2c0] sm:$0xff]  ;;  %v1805_v25 = vld [vmem:[%s11116_s15 + $0x2d0] sm:$0xff] }
 0x502   : > { %v8971_v15 = vpack.c.bf16 %v1806_v62, %v1798_v56  ;;  %v1812_v29 = vld [vmem:[%s11116_s15 + $0x308] sm:$0xff]  ;;  %v1814_v33 = vld [vmem:[%s11116_s15 + $0x318] sm:$0xff]  ;;  %v8461_v36 = vpack.c.bf16 %v1803_v32, %v1795_v31  ;;  %v8973_v37 = vpack.c.bf16 %v1805_v25, %v1797_v19  ;;  %v1811_v40 = vld [vmem:[%s11116_s15 + $0x300] sm:$0xff]  ;;  %v3770_v62 = vunpack.c.0.s8 %v3769_v9 }
 0x503   : > { %8454 = vmatpush1.bf16.msra.mxu0 %v8453_v12  ;;  %v1820_v5 = vld [vmem:[%s11116_s15 + $0x348] sm:$0xff]  ;;  %v1822_v34 = vld [vmem:[%s11116_s15 + $0x358] sm:$0xff]  ;;  %v1819_v42 = vld [vmem:[%s11116_s15 + $0x340] sm:$0xff] }
 0x504   : > { %8966 = vmatpush1.bf16.msra.mxu1 %v8965_v14  ;;  %8456 = vmatprep.subr.bf16.mxu0 %v8455_v16  ;;  %v8463_v38 = vpack.c.bf16 %v1820_v5, %v1812_v29  ;;  %v1813_v41 = vld [vmem:[%s11116_s15 + $0x310] sm:$0xff]  ;;  %v8975_v44 = vpack.c.bf16 %v1822_v34, %v1814_v33  ;;  %v1828_v54 = vld [vmem:[%s11116_s15 + $0x388] sm:$0xff]  ;;  %v1830_v20 = vld [vmem:[%s11116_s15 + $0x398] sm:$0xff]  ;;  %v8465_v2 = vpack.c.bf16 %v1819_v42, %v1811_v40 }
 0x505   : > { %8968 = vmatprep.subr.bf16.mxu1 %v8967_v24  ;;  %v1821_v46 = vld [vmem:[%s11116_s15 + $0x350] sm:$0xff]  ;;  %v1836_v55 = vld [vmem:[%s11116_s15 + $0x3c8] sm:$0xff]  ;;  %v1838_v1 = vld [vmem:[%s11116_s15 + $0x3d8] sm:$0xff] }
 0x506   : > { %v8977_v57 = vpack.c.bf16 %v1821_v46, %v1813_v41  ;;  %v8467_v58 = vpack.c.bf16 %v1836_v55, %v1828_v54  ;;  %v1827_v43 = vld [vmem:[%s11116_s15 + $0x380] sm:$0xff]  ;;  %v1829_v18 = vld [vmem:[%s11116_s15 + $0x390] sm:$0xff]  ;;  %v8979_v60 = vpack.c.bf16 %v1838_v1, %v1830_v20  ;;  %v1844_v63 = vld [vmem:[%s11116_s15 + $0x408] sm:$0xff] }
 0x507   : > { %8458 = vmatpush1.bf16.msra.mxu0 %v8457_v3  ;;  %v1835_v59 = vld [vmem:[%s11116_s15 + $0x3c0] sm:$0xff]  ;;  %v1837_v61 = vld [vmem:[%s11116_s15 + $0x3d0] sm:$0xff]  ;;  %v1852_v0 = vld [vmem:[%s11116_s15 + $0x448] sm:$0xff]  ;;  %v11822_v3 = vshrl.u32 %v3771_v10, 7 }
 0x508   : > { %8970 = vmatpush1.bf16.msra.mxu1 %v8969_v4  ;;  %8460 = vmatprep.subr.bf16.mxu0 %v8459_v13  ;;  %v1846_v26 = vld [vmem:[%s11116_s15 + $0x418] sm:$0xff]  ;;  %v8469_v35 = vpack.c.bf16 %v1835_v59, %v1827_v43  ;;  %v8981_v39 = vpack.c.bf16 %v1837_v61, %v1829_v18  ;;  %v8471_v47 = vpack.c.bf16 %v1852_v0, %v1844_v63  ;;  %v1843_v48 = vld [vmem:[%s11116_s15 + $0x400] sm:$0xff]  ;;  %v1845_v50 = vld [vmem:[%s11116_s15 + $0x410] sm:$0xff] }
 0x509   : > { %8972 = vmatprep.subr.bf16.mxu1 %v8971_v15  ;;  %v1854_v30 = vld [vmem:[%s11116_s15 + $0x458] sm:$0xff]  ;;  %v1851_v49 = vld [vmem:[%s11116_s15 + $0x440] sm:$0xff]  ;;  %v1853_v45 = vld [vmem:[%s11116_s15 + $0x450] sm:$0xff] }
 0x50a   : > { %v8983_v17 = vpack.c.bf16 %v1854_v30, %v1846_v26  ;;  %v1860_v51 = vld [vmem:[%s11116_s15 + $0x488] sm:$0xff]  ;;  %v1862_v6 = vld [vmem:[%s11116_s15 + $0x498] sm:$0xff]  ;;  %v8473_v11 = vpack.c.bf16 %v1851_v49, %v1843_v48  ;;  %v8985_v12 = vpack.c.bf16 %v1853_v45, %v1845_v50  ;;  %v1859_v16 = vld [vmem:[%s11116_s15 + $0x480] sm:$0xff] }
 0x50b   : > { %8462 = vmatpush1.bf16.msra.mxu0 %v8461_v36  ;;  %v1868_v53 = vld [vmem:[%s11116_s15 + $0x4c8] sm:$0xff]  ;;  %v1870_v7 = vld [vmem:[%s11116_s15 + $0x4d8] sm:$0xff]  ;;  %v1867_v21 = vld [vmem:[%s11116_s15 + $0x4c0] sm:$0xff] }
 0x50c   : > { %8974 = vmatpush1.bf16.msra.mxu1 %v8973_v37  ;;  %8464 = vmatprep.subr.bf16.mxu0 %v8463_v38  ;;  %v8475_v14 = vpack.c.bf16 %v1868_v53, %v1860_v51  ;;  %v1861_v22 = vld [vmem:[%s11116_s15 + $0x490] sm:$0xff]  ;;  %v8987_v23 = vpack.c.bf16 %v1870_v7, %v1862_v6  ;;  %v1876_v27 = vld [vmem:[%s11116_s15 + $0x508] sm:$0xff]  ;;  %v1878_v52 = vld [vmem:[%s11116_s15 + $0x518] sm:$0xff]  ;;  %v8477_v4 = vpack.c.bf16 %v1867_v21, %v1859_v16 }
 0x50d   : > { %8976 = vmatprep.subr.bf16.mxu1 %v8975_v44  ;;  %v1869_v24 = vld [vmem:[%s11116_s15 + $0x4d0] sm:$0xff]  ;;  %v1884_v28 = vld [vmem:[%s11116_s15 + $0x548] sm:$0xff]  ;;  %v1886_v56 = vld [vmem:[%s11116_s15 + $0x558] sm:$0xff]  ;;  %v11834_v37 = vsub.s32 %v3770_v62, %v11822_v3 }
 0x50e   : > { %v8989_v13 = vpack.c.bf16 %v1869_v24, %v1861_v22  ;;  %v8479_v31 = vpack.c.bf16 %v1884_v28, %v1876_v27  ;;  %v1875_v32 = vld [vmem:[%s11116_s15 + $0x500] sm:$0xff]  ;;  %v1877_v15 = vld [vmem:[%s11116_s15 + $0x510] sm:$0xff]  ;;  %v8991_v25 = vpack.c.bf16 %v1886_v56, %v1878_v52  ;;  %v1892_v5 = vld [vmem:[%s11116_s15 + $0x588] sm:$0xff] }
 0x50f   : > { %8466 = vmatpush1.bf16.msra.mxu0 %v8465_v2  ;;  %v1883_v19 = vld [vmem:[%s11116_s15 + $0x540] sm:$0xff]  ;;  %v1885_v29 = vld [vmem:[%s11116_s15 + $0x550] sm:$0xff]  ;;  %v1900_v33 = vld [vmem:[%s11116_s15 + $0x5c8] sm:$0xff] }
 0x510   : > { %8978 = vmatpush1.bf16.msra.mxu1 %v8977_v57  ;;  %8468 = vmatprep.subr.bf16.mxu0 %v8467_v58  ;;  %v1894_v34 = vld [vmem:[%s11116_s15 + $0x598] sm:$0xff]  ;;  %v8481_v38 = vpack.c.bf16 %v1883_v19, %v1875_v32  ;;  %v1891_v40 = vld [vmem:[%s11116_s15 + $0x580] sm:$0xff]  ;;  %v8993_v42 = vpack.c.bf16 %v1885_v29, %v1877_v15  ;;  %v8483_v41 = vpack.c.bf16 %v1900_v33, %v1892_v5  ;;  %v1893_v46 = vld [vmem:[%s11116_s15 + $0x590] sm:$0xff] }
 0x511   : > { %8980 = vmatprep.subr.bf16.mxu1 %v8979_v60  ;;  %v1902_v36 = vld [vmem:[%s11116_s15 + $0x5d8] sm:$0xff]  ;;  %v1899_v44 = vld [vmem:[%s11116_s15 + $0x5c0] sm:$0xff]  ;;  %v1901_v54 = vld [vmem:[%s11116_s15 + $0x5d0] sm:$0xff] }
 0x512   : > { %v8995_v55 = vpack.c.bf16 %v1902_v36, %v1894_v34  ;;  %v1908_v20 = vld [vmem:[%s11116_s15 + $0x608] sm:$0xff]  ;;  %v11847_v2 = vld [vmem:[%s11844_s29] sm:$0xff]  ;;  %v1910_v57 = vld [vmem:[%s11116_s15 + $0x618] sm:$0xff]  ;;  %v8485_v59 = vpack.c.bf16 %v1899_v44, %v1891_v40  ;;  %v8997_v18 = vpack.c.bf16 %v1901_v54, %v1893_v46 }
 0x513   : > { %8470 = vmatpush1.bf16.msra.mxu0 %v8469_v35  ;;  %v1916_v1 = vld [vmem:[%s11116_s15 + $0x648] sm:$0xff]  ;;  %v1918_v58 = vld [vmem:[%s11116_s15 + $0x658] sm:$0xff]  ;;  %v11853_v43 = vrot.slane %v11847_v2, %v11834_v37  ;;  %v1907_v61 = vld [vmem:[%s11116_s15 + $0x600] sm:$0xff]  ;;  %v3767_v36 = vcombine.high %v11847_v2, %v11847_v2 }
 0x514   : > { %8982 = vmatpush1.bf16.msra.mxu1 %v8981_v39  ;;  %8472 = vmatprep.subr.bf16.mxu0 %v8471_v47  ;;  %v8487_v60 = vpack.c.bf16 %v1916_v1, %v1908_v20  ;;  %v1915_v63 = vld [vmem:[%s11116_s15 + $0x640] sm:$0xff]  ;;  %v1909_v0 = vld [vmem:[%s11116_s15 + $0x610] sm:$0xff]  ;;  %v8999_v30 = vpack.c.bf16 %v1918_v58, %v1910_v57  ;;  %v1924_v39 = vld [vmem:[%s11116_s15 + $0x688] sm:$0xff] }
 0x515   : > { %8984 = vmatprep.subr.bf16.mxu1 %v8983_v17  ;;  %v11860_v26 = vcombine.high %v11853_v43, %v11853_v43  ;;  %v1917_v35 = vld [vmem:[%s11116_s15 + $0x650] sm:$0xff]  ;;  %v1932_v47 = vld [vmem:[%s11116_s15 + $0x6c8] sm:$0xff]  ;;  %v1926_v48 = vld [vmem:[%s11116_s15 + $0x698] sm:$0xff]  ;;  %v8489_v50 = vpack.c.bf16 %v1915_v63, %v1907_v61  ;;  %v11902_v58 = vrot.slane %v3767_v36, %v11834_v37 }
 0x516   : > { %v1934_v49 = vld [vmem:[%s11116_s15 + $0x6d8] sm:$0xff]  ;;  %v9001_v17 = vpack.c.bf16 %v1917_v35, %v1909_v0  ;;  %v8491_v45 = vpack.c.bf16 %v1932_v47, %v1924_v39  ;;  %v1923_v51 = vld [vmem:[%s11116_s15 + $0x680] sm:$0xff]  ;;  %v1925_v6 = vld [vmem:[%s11116_s15 + $0x690] sm:$0xff] }
 0x517   : > { %8474 = vmatpush1.bf16.msra.mxu0 %v8473_v11  ;;  %3915 = vmatprep.mubr.f32.mxu0 %v11860_v26  ;;  %v1931_v53 = vld [vmem:[%s11116_s15 + $0x6c0] sm:$0xff]  ;;  %v9003_v7 = vpack.c.bf16 %v1934_v49, %v1926_v48  ;;  %v1933_v8 = vld [vmem:[%s11116_s15 + $0x6d0] sm:$0xff]  ;;  %v1940_v9 = vld [vmem:[%s11116_s15 + $0x708] sm:$0xff] }
 0x518   : > { %8986 = vmatpush1.bf16.msra.mxu1 %v8985_v12  ;;  %8476 = vmatprep.subr.bf16.mxu0 %v8475_v14  ;;  %v1948_v10 = vld [vmem:[%s11116_s15 + $0x748] sm:$0xff]  ;;  %v1942_v11 = vld [vmem:[%s11116_s15 + $0x718] sm:$0xff]  ;;  %v8493_v14 = vpack.c.bf16 %v1931_v53, %v1923_v51  ;;  %v9005_v16 = vpack.c.bf16 %v1933_v8, %v1925_v6  ;;  %v1939_v22 = vld [vmem:[%s11116_s15 + $0x700] sm:$0xff] }
 0x519   : > { %8988 = vmatprep.subr.bf16.mxu1 %v8987_v23  ;;  %4483 = vmatprep.mubr.f32.mxu1 %v11860_v26  ;;  %v1950_v12 = vld [vmem:[%s11116_s15 + $0x758] sm:$0xff]  ;;  %v8495_v21 = vpack.c.bf16 %v1948_v10, %v1940_v9  ;;  %v1947_v23 = vld [vmem:[%s11116_s15 + $0x740] sm:$0xff]  ;;  %v1941_v24 = vld [vmem:[%s11116_s15 + $0x710] sm:$0xff] }
 0x51a   : > { %v9007_v27 = vpack.c.bf16 %v1950_v12, %v1942_v11  ;;  %v1949_v28 = vld [vmem:[%s11116_s15 + $0x750] sm:$0xff]  ;;  %v1956_v52 = vld [vmem:[%s11116_s15 + $0x788] sm:$0xff]  ;;  %v1958_v62 = vld [vmem:[%s11116_s15 + $0x798] sm:$0xff] }
 0x51b   : > { %8478 = vmatpush1.bf16.msra.mxu0 %v8477_v4  ;;  %v1964_v56 = vld [vmem:[%s11116_s15 + $0x7c8] sm:$0xff]  ;;  %v1966_v4 = vld [vmem:[%s11116_s15 + $0x7d8] sm:$0xff]  ;;  %v1955_v19 = vld [vmem:[%s11116_s15 + $0x780] sm:$0xff] }
 0x51c   : > { %8990 = vmatpush1.bf16.msra.mxu1 %v8989_v13  ;;  %8480 = vmatprep.subr.bf16.mxu0 %v8479_v31  ;;  %v8497_v13 = vpack.c.bf16 %v1947_v23, %v1939_v22  ;;  %v9009_v31 = vpack.c.bf16 %v1949_v28, %v1941_v24  ;;  %v8499_v32 = vpack.c.bf16 %v1964_v56, %v1956_v52  ;;  %v1963_v15 = vld [vmem:[%s11116_s15 + $0x7c0] sm:$0xff]  ;;  %v1965_v5 = vld [vmem:[%s11116_s15 + $0x7d0] sm:$0xff]  ;;  %v1972_v33 = vld [vmem:[%s11116_s15 + $0x808] sm:$0xff] }
 0x51d   : > { %8992 = vmatprep.subr.bf16.mxu1 %v8991_v25  ;;  %v1957_v25 = vld [vmem:[%s11116_s15 + $0x790] sm:$0xff]  ;;  %v9011_v29 = vpack.c.bf16 %v1966_v4, %v1958_v62  ;;  %v1980_v34 = vld [vmem:[%s11116_s15 + $0x848] sm:$0xff]  ;;  %v1982_v40 = vld [vmem:[%s11116_s15 + $0x858] sm:$0xff] }
 0x51e   : > { %v8503_v44 = vpack.c.bf16 %v1980_v34, %v1972_v33  ;;  %v1971_v46 = vld [vmem:[%s11116_s15 + $0x800] sm:$0xff]  ;;  %v1981_v1 = vld [vmem:[%s11116_s15 + $0x850] sm:$0xff]  ;;  %v1988_v2 = vld [vmem:[%s11116_s15 + $0x888] sm:$0xff] }
 0x51f   : > { %8482 = vmatpush1.bf16.msra.mxu0 %v8481_v38  ;;  %v1974_v38 = vld [vmem:[%s11116_s15 + $0x818] sm:$0xff]  ;;  %v1979_v54 = vld [vmem:[%s11116_s15 + $0x840] sm:$0xff]  ;;  %v1996_v57 = vld [vmem:[%s11116_s15 + $0x8c8] sm:$0xff] }
 0x520   : > { %8994 = vmatpush1.bf16.msra.mxu1 %v8993_v42  ;;  %8484 = vmatprep.subr.bf16.mxu0 %v8483_v41  ;;  %v8501_v42 = vpack.c.bf16 %v1963_v15, %v1955_v19  ;;  %v9013_v41 = vpack.c.bf16 %v1965_v5, %v1957_v25  ;;  %v9015_v20 = vpack.c.bf16 %v1982_v40, %v1974_v38  ;;  %v1987_v0 = vld [vmem:[%s11116_s15 + $0x880] sm:$0xff]  ;;  %v1989_v35 = vld [vmem:[%s11116_s15 + $0x890] sm:$0xff]  ;;  %v2004_v48 = vld [vmem:[%s11116_s15 + $0x908] sm:$0xff] }
 0x521   : > { %8996 = vmatprep.subr.bf16.mxu1 %v8995_v55  ;;  %v1973_v55 = vld [vmem:[%s11116_s15 + $0x810] sm:$0xff]  ;;  %v8507_v63 = vpack.c.bf16 %v1996_v57, %v1988_v2  ;;  %v2012_v49 = vld [vmem:[%s11116_s15 + $0x948] sm:$0xff]  ;;  %v2011_v8 = vld [vmem:[%s11116_s15 + $0x940] sm:$0xff] }
 0x522   : > { %v9017_v61 = vpack.c.bf16 %v1981_v1, %v1973_v55  ;;  %v1997_v47 = vld [vmem:[%s11116_s15 + $0x8d0] sm:$0xff]  ;;  %v8511_v6 = vpack.c.bf16 %v2012_v49, %v2004_v48  ;;  %v2020_v12 = vld [vmem:[%s11116_s15 + $0x988] sm:$0xff]  ;;  %v2027_v28 = vld [vmem:[%s11116_s15 + $0x9c0] sm:$0xff] }
 0x523   : > { %8486 = vmatpush1.bf16.msra.mxu0 %v8485_v59  ;;  %v1990_v59 = vld [vmem:[%s11116_s15 + $0x898] sm:$0xff]  ;;  %v9021_v53 = vpack.c.bf16 %v1997_v47, %v1989_v35  ;;  %v2005_v9 = vld [vmem:[%s11116_s15 + $0x910] sm:$0xff]  ;;  %v2036_v4 = vld [vmem:[%s11116_s15 + $0xa08] sm:$0xff] }
 0x524   : > { %8998 = vmatpush1.bf16.msra.mxu1 %v8997_v18  ;;  %8488 = vmatprep.subr.bf16.mxu0 %v8487_v60  ;;  %v1998_v18 = vld [vmem:[%s11116_s15 + $0x8d8] sm:$0xff]  ;;  %v8505_v60 = vpack.c.bf16 %v1979_v54, %v1971_v46  ;;  %v2013_v11 = vld [vmem:[%s11116_s15 + $0x950] sm:$0xff]  ;;  %v2043_v5 = vld [vmem:[%s11116_s15 + $0xa40] sm:$0xff] }
 0x525   : > { %9000 = vmatprep.subr.bf16.mxu1 %v8999_v30  ;;  %v1995_v30 = vld [vmem:[%s11116_s15 + $0x8c0] sm:$0xff]  ;;  %v9019_v39 = vpack.c.bf16 %v1998_v18, %v1990_v59  ;;  %v9025_v23 = vpack.c.bf16 %v2013_v11, %v2005_v9  ;;  %v2021_v52 = vld [vmem:[%s11116_s15 + $0x990] sm:$0xff]  ;;  %v2052_v38 = vld [vmem:[%s11116_s15 + $0xa88] sm:$0xff] }
 0x526   : > { %v8509_v51 = vpack.c.bf16 %v1995_v30, %v1987_v0  ;;  %v2029_v62 = vld [vmem:[%s11116_s15 + $0x9d0] sm:$0xff]  ;;  %v2060_v40 = vld [vmem:[%s11116_s15 + $0xac8] sm:$0xff]  ;;  %v2051_v55 = vld [vmem:[%s11116_s15 + $0xa80] sm:$0xff] }
 0x527   : > { %8490 = vmatpush1.bf16.msra.mxu0 %v8489_v50  ;;  %v11914_v50 = vcombine.high %v11902_v58, %v11902_v58  ;;  %v9029_v15 = vpack.c.bf16 %v2029_v62, %v2021_v52  ;;  %v2037_v33 = vld [vmem:[%s11116_s15 + $0xa10] sm:$0xff]  ;;  %v8523_v54 = vpack.c.bf16 %v2060_v40, %v2052_v38  ;;  %v2068_v59 = vld [vmem:[%s11116_s15 + $0xb08] sm:$0xff]  ;;  %v2067_v35 = vld [vmem:[%s11116_s15 + $0xb00] sm:$0xff] }
 0x528   : > { %9002 = vmatpush1.bf16.msra.mxu1 %v9001_v17  ;;  %8492 = vmatprep.subr.bf16.mxu0 %v8491_v45  ;;  %v2006_v17 = vld [vmem:[%s11116_s15 + $0x918] sm:$0xff]  ;;  %v2045_v36 = vld [vmem:[%s11116_s15 + $0xa50] sm:$0xff]  ;;  %v2076_v18 = vld [vmem:[%s11116_s15 + $0xb48] sm:$0xff] }
 0x529   : > { %9004 = vmatprep.subr.bf16.mxu1 %v9003_v7  ;;  %v2014_v45 = vld [vmem:[%s11116_s15 + $0x958] sm:$0xff]  ;;  %v2003_v7 = vld [vmem:[%s11116_s15 + $0x900] sm:$0xff]  ;;  %v9033_v46 = vpack.c.bf16 %v2045_v36, %v2037_v33  ;;  %v2053_v1 = vld [vmem:[%s11116_s15 + $0xa90] sm:$0xff]  ;;  %v8527_v30 = vpack.c.bf16 %v2076_v18, %v2068_v59 }
 0x52a   : > { %v9023_v10 = vpack.c.bf16 %v2014_v45, %v2006_v17  ;;  %v8513_v22 = vpack.c.bf16 %v2011_v8, %v2003_v7  ;;  %v2061_v57 = vld [vmem:[%s11116_s15 + $0xad0] sm:$0xff]  ;;  %v2084_v17 = vld [vmem:[%s11116_s15 + $0xb88] sm:$0xff]  ;;  %v2083_v9 = vld [vmem:[%s11116_s15 + $0xb80] sm:$0xff] }
 0x52b   : > { %8494 = vmatpush1.bf16.msra.mxu0 %v8493_v14  ;;  %v2028_v14 = vld [vmem:[%s11116_s15 + $0x9c8] sm:$0xff]  ;;  %v9037_v0 = vpack.c.bf16 %v2061_v57, %v2053_v1  ;;  %v2069_v47 = vld [vmem:[%s11116_s15 + $0xb10] sm:$0xff]  ;;  %v2099_v52 = vld [vmem:[%s11116_s15 + $0xc00] sm:$0xff] }
 0x52c   : > { %9006 = vmatpush1.bf16.msra.mxu1 %v9005_v16  ;;  %8496 = vmatprep.subr.bf16.mxu0 %v8495_v21  ;;  %v2022_v16 = vld [vmem:[%s11116_s15 + $0x998] sm:$0xff]  ;;  %v8515_v24 = vpack.c.bf16 %v2028_v14, %v2020_v12  ;;  %v2077_v49 = vld [vmem:[%s11116_s15 + $0xb50] sm:$0xff]  ;;  %v2092_v45 = vld [vmem:[%s11116_s15 + $0xbc8] sm:$0xff] }
 0x52d   : > { %9008 = vmatprep.subr.bf16.mxu1 %v9007_v27  ;;  %v2030_v21 = vld [vmem:[%s11116_s15 + $0x9d8] sm:$0xff]  ;;  %v2019_v27 = vld [vmem:[%s11116_s15 + $0x980] sm:$0xff]  ;;  %v9041_v7 = vpack.c.bf16 %v2077_v49, %v2069_v47  ;;  %v8531_v8 = vpack.c.bf16 %v2092_v45, %v2084_v17  ;;  %v2085_v11 = vld [vmem:[%s11116_s15 + $0xb90] sm:$0xff] }
 0x52e   : > { %v9027_v56 = vpack.c.bf16 %v2030_v21, %v2022_v16  ;;  %v8517_v19 = vpack.c.bf16 %v2027_v28, %v2019_v27  ;;  %v2093_v14 = vld [vmem:[%s11116_s15 + $0xbd0] sm:$0xff]  ;;  %v2100_v16 = vld [vmem:[%s11116_s15 + $0xc08] sm:$0xff]  ;;  %v2115_v33 = vld [vmem:[%s11116_s15 + $0xc80] sm:$0xff] }
 0x52f   : > { %8498 = vmatpush1.bf16.msra.mxu0 %v8497_v13  ;;  %v2044_v13 = vld [vmem:[%s11116_s15 + $0xa48] sm:$0xff]  ;;  %v9045_v27 = vpack.c.bf16 %v2093_v14, %v2085_v11  ;;  %v2101_v62 = vld [vmem:[%s11116_s15 + $0xc10] sm:$0xff]  ;;  %v2131_v1 = vld [vmem:[%s11116_s15 + $0xd00] sm:$0xff] }
 0x530   : > { %9010 = vmatpush1.bf16.msra.mxu1 %v9009_v31  ;;  %8500 = vmatprep.subr.bf16.mxu0 %v8499_v32  ;;  %v2038_v31 = vld [vmem:[%s11116_s15 + $0xa18] sm:$0xff]  ;;  %v8519_v25 = vpack.c.bf16 %v2044_v13, %v2036_v4  ;;  %v2108_v21 = vld [vmem:[%s11116_s15 + $0xc48] sm:$0xff]  ;;  %v2109_v13 = vld [vmem:[%s11116_s15 + $0xc50] sm:$0xff] }
 0x531   : > { %9012 = vmatprep.subr.bf16.mxu1 %v9011_v29  ;;  %v2046_v32 = vld [vmem:[%s11116_s15 + $0xa58] sm:$0xff]  ;;  %v2035_v29 = vld [vmem:[%s11116_s15 + $0xa00] sm:$0xff]  ;;  %v8535_v28 = vpack.c.bf16 %v2108_v21, %v2100_v16  ;;  %v2117_v36 = vld [vmem:[%s11116_s15 + $0xc90] sm:$0xff] }
 0x532   : > { %v9031_v34 = vpack.c.bf16 %v2046_v32, %v2038_v31  ;;  %v2116_v31 = vld [vmem:[%s11116_s15 + $0xc88] sm:$0xff]  ;;  %v2125_v40 = vld [vmem:[%s11116_s15 + $0xcd0] sm:$0xff]  ;;  %v2147_v47 = vld [vmem:[%s11116_s15 + $0xd80] sm:$0xff] }
 0x533   : > { %8502 = vmatpush1.bf16.msra.mxu0 %v8501_v42  ;;  %v2054_v42 = vld [vmem:[%s11116_s15 + $0xa98] sm:$0xff]  ;;  %v2124_v32 = vld [vmem:[%s11116_s15 + $0xcc8] sm:$0xff]  ;;  %v2133_v57 = vld [vmem:[%s11116_s15 + $0xd10] sm:$0xff] }
 0x534   : > { %9014 = vmatpush1.bf16.msra.mxu1 %v9013_v41  ;;  %8504 = vmatprep.subr.bf16.mxu0 %v8503_v44  ;;  %v2062_v41 = vld [vmem:[%s11116_s15 + $0xad8] sm:$0xff]  ;;  %v8521_v44 = vpack.c.bf16 %v2043_v5, %v2035_v29  ;;  %v9049_v29 = vpack.c.bf16 %v2109_v13, %v2101_v62  ;;  %v8539_v5 = vpack.c.bf16 %v2124_v32, %v2116_v31  ;;  %v2141_v18 = vld [vmem:[%s11116_s15 + $0xd50] sm:$0xff]  ;;  %v2163_v11 = vld [vmem:[%s11116_s15 + $0xe00] sm:$0xff] }
 0x535   : > { %9016 = vmatprep.subr.bf16.mxu1 %v9015_v20  ;;  %v2059_v20 = vld [vmem:[%s11116_s15 + $0xac0] sm:$0xff]  ;;  %v9035_v2 = vpack.c.bf16 %v2062_v41, %v2054_v42  ;;  %v2132_v42 = vld [vmem:[%s11116_s15 + $0xd08] sm:$0xff]  ;;  %v2149_v49 = vld [vmem:[%s11116_s15 + $0xd90] sm:$0xff] }
 0x536   : > { %3916 = vmatmul.mubr.f32.vlgmr.msra.gmra.mrb[0].mxu0 %v11853_v43  ;;  %v2140_v41 = vld [vmem:[%s11116_s15 + $0xd48] sm:$0xff]  ;;  %v2157_v45 = vld [vmem:[%s11116_s15 + $0xdd0] sm:$0xff]  ;;  %v2179_v62 = vld [vmem:[%s11116_s15 + $0xe80] sm:$0xff] }
 0x537   : > { %8506 = vmatpush1.bf16.msra.mxu0 %v8505_v60  ;;  %4484 = vmatmul.mubr.f32.vlgmr.msra.gmra.mrb[0].mxu1 %v11853_v43  ;;  %v2070_v60 = vld [vmem:[%s11116_s15 + $0xb18] sm:$0xff]  ;;  %v2165_v14 = vld [vmem:[%s11116_s15 + $0xe10] sm:$0xff] }
 0x538   : > { %9018 = vmatpush1.bf16.msra.mxu1 %v9017_v61  ;;  %8508 = vmatprep.subr.bf16.mxu0 %v8507_v63  ;;  %v2078_v61 = vld [vmem:[%s11116_s15 + $0xb58] sm:$0xff]  ;;  %v8525_v63 = vpack.c.bf16 %v2059_v20, %v2051_v55  ;;  %v9053_v55 = vpack.c.bf16 %v2125_v40, %v2117_v36  ;;  %v8543_v20 = vpack.c.bf16 %v2140_v41, %v2132_v42  ;;  %v2173_v21 = vld [vmem:[%s11116_s15 + $0xe50] sm:$0xff]  ;;  %v2195_v36 = vld [vmem:[%s11116_s15 + $0xf00] sm:$0xff] }
 0x539   : > { %9020 = vmatprep.subr.bf16.mxu1 %v9019_v39  ;;  %3986 = vmatprep.mubr.f32.mxu0 %v11914_v50  ;;  %v2075_v39 = vld [vmem:[%s11116_s15 + $0xb40] sm:$0xff]  ;;  %v9039_v48 = vpack.c.bf16 %v2078_v61, %v2070_v60  ;;  %v2148_v60 = vld [vmem:[%s11116_s15 + $0xd88] sm:$0xff]  ;;  %v2181_v13 = vld [vmem:[%s11116_s15 + $0xe90] sm:$0xff] }
 0x53a   : > { %4554 = vmatprep.mubr.f32.mxu1 %v11914_v50  ;;  %v2156_v61 = vld [vmem:[%s11116_s15 + $0xdc8] sm:$0xff]  ;;  %v2189_v32 = vld [vmem:[%s11116_s15 + $0xed0] sm:$0xff] }
 0x53b   : > { %8510 = vmatpush1.bf16.msra.mxu0 %v8509_v51  ;;  %v2086_v51 = vld [vmem:[%s11116_s15 + $0xb98] sm:$0xff]  ;;  %v2197_v40 = vld [vmem:[%s11116_s15 + $0xf10] sm:$0xff] }
 0x53c   : > { %9022 = vmatpush1.bf16.msra.mxu1 %v9021_v53  ;;  %8512 = vmatprep.subr.bf16.mxu0 %v8511_v6  ;;  %v2094_v53 = vld [vmem:[%s11116_s15 + $0xbd8] sm:$0xff]  ;;  %v8529_v6 = vpack.c.bf16 %v2075_v39, %v2067_v35  ;;  %v9057_v35 = vpack.c.bf16 %v2141_v18, %v2133_v57  ;;  %v8547_v39 = vpack.c.bf16 %v2156_v61, %v2148_v60  ;;  %v2205_v41 = vld [vmem:[%s11116_s15 + $0xf50] sm:$0xff]  ;;  %v2211_v57 = vld [vmem:[%s11116_s15 + $0xf80] sm:$0xff] }
 0x53d   : > { %9024 = vmatprep.subr.bf16.mxu1 %v9023_v10  ;;  %v2091_v10 = vld [vmem:[%s11116_s15 + $0xbc0] sm:$0xff]  ;;  %v9043_v12 = vpack.c.bf16 %v2094_v53, %v2086_v51  ;;  %v2164_v51 = vld [vmem:[%s11116_s15 + $0xe08] sm:$0xff]  ;;  %v2213_v18 = vld [vmem:[%s11116_s15 + $0xf90] sm:$0xff] }
 0x53e   : > { %v2172_v53 = vld [vmem:[%s11116_s15 + $0xe48] sm:$0xff]  ;;  %v2221_v61 = vld [vmem:[%s11116_s15 + $0xfd0] sm:$0xff] }
 0x53f   : > { %8514 = vmatpush1.bf16.msra.mxu0 %v8513_v22  ;;  %v2102_v22 = vld [vmem:[%s11116_s15 + $0xc18] sm:$0xff] }
 0x540   : > { %9026 = vmatpush1.bf16.msra.mxu1 %v9025_v23  ;;  %8516 = vmatprep.subr.bf16.mxu0 %v8515_v24  ;;  %v2110_v23 = vld [vmem:[%s11116_s15 + $0xc58] sm:$0xff]  ;;  %v8533_v24 = vpack.c.bf16 %v2091_v10, %v2083_v9  ;;  %v9061_v9 = vpack.c.bf16 %v2157_v45, %v2149_v49  ;;  %v8551_v10 = vpack.c.bf16 %v2172_v53, %v2164_v51  ;;  %v2227_v49 = vld [vmem:[%s11116_s15 + $0x1000] sm:$0xff]  ;;  %v2229_v45 = vld [vmem:[%s11116_s15 + $0x1010] sm:$0xff] }
 0x541   : > { %9028 = vmatprep.subr.bf16.mxu1 %v9027_v56  ;;  %v2107_v56 = vld [vmem:[%s11116_s15 + $0xc40] sm:$0xff]  ;;  %v9047_v4 = vpack.c.bf16 %v2110_v23, %v2102_v22  ;;  %v2180_v22 = vld [vmem:[%s11116_s15 + $0xe88] sm:$0xff]  ;;  %v2237_v53 = vld [vmem:[%s11116_s15 + $0x1050] sm:$0xff] }
 0x542   : > { %v2188_v23 = vld [vmem:[%s11116_s15 + $0xec8] sm:$0xff] }
 0x543   : > { %8518 = vmatpush1.bf16.msra.mxu0 %v8517_v19  ;;  %v2118_v19 = vld [vmem:[%s11116_s15 + $0xc98] sm:$0xff] }
 0x544   : > { %9030 = vmatpush1.bf16.msra.mxu1 %v9029_v15  ;;  %8520 = vmatprep.subr.bf16.mxu0 %v8519_v25  ;;  %v2126_v15 = vld [vmem:[%s11116_s15 + $0xcd8] sm:$0xff]  ;;  %v8537_v25 = vpack.c.bf16 %v2107_v56, %v2099_v52  ;;  %v9065_v52 = vpack.c.bf16 %v2173_v21, %v2165_v14  ;;  %v8555_v56 = vpack.c.bf16 %v2188_v23, %v2180_v22  ;;  %v2251_v21 = vld [vmem:[%s11116_s15 + $0x10c0] sm:$0xff]  ;;  %v2245_v22 = vld [vmem:[%s11116_s15 + $0x1090] sm:$0xff] }
 0x545   : > { %9032 = vmatprep.subr.bf16.mxu1 %v9031_v34  ;;  %v2123_v34 = vld [vmem:[%s11116_s15 + $0xcc0] sm:$0xff]  ;;  %v9051_v38 = vpack.c.bf16 %v2126_v15, %v2118_v19  ;;  %v2196_v19 = vld [vmem:[%s11116_s15 + $0xf08] sm:$0xff] }
 0x546   : > { %v2204_v15 = vld [vmem:[%s11116_s15 + $0xf48] sm:$0xff] }
 0x547   : > { %8522 = vmatpush1.bf16.msra.mxu0 %v8521_v44  ;;  %v2134_v44 = vld [vmem:[%s11116_s15 + $0xd18] sm:$0xff] }
 0x548   : > { %9034 = vmatpush1.bf16.msra.mxu1 %v9033_v46  ;;  %8524 = vmatprep.subr.bf16.mxu0 %v8523_v54  ;;  %v2142_v46 = vld [vmem:[%s11116_s15 + $0xd58] sm:$0xff]  ;;  %v8541_v54 = vpack.c.bf16 %v2123_v34, %v2115_v33  ;;  %v9069_v33 = vpack.c.bf16 %v2189_v32, %v2181_v13  ;;  %v8559_v34 = vpack.c.bf16 %v2204_v15, %v2196_v19  ;;  %v2259_v19 = vld [vmem:[%s11116_s15 + $0x1100] sm:$0xff] }
 0x549   : > { %9036 = vmatprep.subr.bf16.mxu1 %v9035_v2  ;;  %v2139_v2 = vld [vmem:[%s11116_s15 + $0xd40] sm:$0xff]  ;;  %v9055_v59 = vpack.c.bf16 %v2142_v46, %v2134_v44  ;;  %v2212_v44 = vld [vmem:[%s11116_s15 + $0xf88] sm:$0xff] }
 0x54a   : > { %v2220_v46 = vld [vmem:[%s11116_s15 + $0xfc8] sm:$0xff]  ;;  %v2267_v15 = vld [vmem:[%s11116_s15 + $0x1140] sm:$0xff] }
 0x54b   : > { %8526 = vmatpush1.bf16.msra.mxu0 %v8525_v63  ;;  %v2150_v63 = vld [vmem:[%s11116_s15 + $0xd98] sm:$0xff] }
 0x54c   : > { %9038 = vmatpush1.bf16.msra.mxu1 %v9037_v0  ;;  %8528 = vmatprep.subr.bf16.mxu0 %v8527_v30  ;;  %v2158_v0 = vld [vmem:[%s11116_s15 + $0xdd8] sm:$0xff]  ;;  %v8545_v30 = vpack.c.bf16 %v2139_v2, %v2131_v1  ;;  %v9073_v1 = vpack.c.bf16 %v2205_v41, %v2197_v40  ;;  %v8563_v2 = vpack.c.bf16 %v2220_v46, %v2212_v44  ;;  %v2275_v44 = vld [vmem:[%s11116_s15 + $0x1180] sm:$0xff] }
 0x54d   : > { %9040 = vmatprep.subr.bf16.mxu1 %v9039_v48  ;;  %v2155_v48 = vld [vmem:[%s11116_s15 + $0xdc0] sm:$0xff]  ;;  %v9059_v17 = vpack.c.bf16 %v2158_v0, %v2150_v63  ;;  %v2228_v63 = vld [vmem:[%s11116_s15 + $0x1008] sm:$0xff]  ;;  %v8577_v40 = vpack.c.bf16 %v2267_v15, %v2259_v19  ;;  %v2342_v19 = vld [vmem:[%s11116_s15 + $0x1398] sm:$0xff] }
 0x54e   : > { %v2236_v0 = vld [vmem:[%s11116_s15 + $0x1048] sm:$0xff]  ;;  %v2283_v46 = vld [vmem:[%s11116_s15 + $0x11c0] sm:$0xff]  ;;  %v2350_v15 = vld [vmem:[%s11116_s15 + $0x13d8] sm:$0xff] }
 0x54f   : > { %8530 = vmatpush1.bf16.msra.mxu0 %v8529_v6  ;;  %v2166_v6 = vld [vmem:[%s11116_s15 + $0xe18] sm:$0xff] }
 0x550   : > { %9042 = vmatpush1.bf16.msra.mxu1 %v9041_v7  ;;  %8532 = vmatprep.subr.bf16.mxu0 %v8531_v8  ;;  %v2174_v7 = vld [vmem:[%s11116_s15 + $0xe58] sm:$0xff]  ;;  %v8549_v8 = vpack.c.bf16 %v2155_v48, %v2147_v47  ;;  %v9077_v47 = vpack.c.bf16 %v2221_v61, %v2213_v18  ;;  %v8567_v48 = vpack.c.bf16 %v2236_v0, %v2228_v63  ;;  %v2291_v63 = vld [vmem:[%s11116_s15 + $0x1200] sm:$0xff] }
 0x551   : > { %9044 = vmatprep.subr.bf16.mxu1 %v9043_v12  ;;  %v2171_v12 = vld [vmem:[%s11116_s15 + $0xe40] sm:$0xff]  ;;  %v9063_v16 = vpack.c.bf16 %v2174_v7, %v2166_v6  ;;  %v2244_v6 = vld [vmem:[%s11116_s15 + $0x1088] sm:$0xff]  ;;  %v8581_v18 = vpack.c.bf16 %v2283_v46, %v2275_v44  ;;  %v2358_v44 = vld [vmem:[%s11116_s15 + $0x1418] sm:$0xff] }
 0x552   : > { %v2252_v7 = vld [vmem:[%s11116_s15 + $0x10c8] sm:$0xff]  ;;  %v2299_v0 = vld [vmem:[%s11116_s15 + $0x1240] sm:$0xff]  ;;  %v2366_v46 = vld [vmem:[%s11116_s15 + $0x1458] sm:$0xff] }
 0x553   : > { %8534 = vmatpush1.bf16.msra.mxu0 %v8533_v24  ;;  %v2182_v24 = vld [vmem:[%s11116_s15 + $0xe98] sm:$0xff]  ;;  %v8571_v14 = vpack.c.bf16 %v2252_v7, %v2244_v6  ;;  %v2307_v6 = vld [vmem:[%s11116_s15 + $0x1280] sm:$0xff] }
 0x554   : > { %9046 = vmatpush1.bf16.msra.mxu1 %v9045_v27  ;;  %8536 = vmatprep.subr.bf16.mxu0 %v8535_v28  ;;  %v2190_v27 = vld [vmem:[%s11116_s15 + $0xed8] sm:$0xff]  ;;  %v8553_v28 = vpack.c.bf16 %v2171_v12, %v2163_v11  ;;  %v12043_v11 = vld [vmem:[%s11844_s29 + $0x8] sm:$0xff]  ;;  %v9081_v12 = vpack.c.bf16 %v2237_v53, %v2229_v45  ;;  %v8585_v45 = vpack.c.bf16 %v2299_v0, %v2291_v63  ;;  %v2315_v7 = vld [vmem:[%s11116_s15 + $0x12c0] sm:$0xff] }
 0x555   : > { %9048 = vmatprep.subr.bf16.mxu1 %v9047_v4  ;;  %v2187_v4 = vld [vmem:[%s11116_s15 + $0xec0] sm:$0xff]  ;;  %v9067_v31 = vpack.c.bf16 %v2190_v27, %v2182_v24  ;;  %v12050_v23 = vrot.slane %v12043_v11, %v11834_v37  ;;  %v2253_v27 = vld [vmem:[%s11116_s15 + $0x10d0] sm:$0xff]  ;;  %v2374_v63 = vld [vmem:[%s11116_s15 + $0x1498] sm:$0xff] }
 0x556   : > { %v2382_v0 = vld [vmem:[%s11116_s15 + $0x14d8] sm:$0xff] }
 0x557   : > { %8538 = vmatpush1.bf16.msra.mxu0 %v8537_v25  ;;  %v2198_v25 = vld [vmem:[%s11116_s15 + $0xf18] sm:$0xff] }
 0x558   : > { %9050 = vmatpush1.bf16.msra.mxu1 %v9049_v29  ;;  %8540 = vmatprep.subr.bf16.mxu0 %v8539_v5  ;;  %v2206_v29 = vld [vmem:[%s11116_s15 + $0xf58] sm:$0xff]  ;;  %v8557_v5 = vpack.c.bf16 %v2187_v4, %v2179_v62  ;;  %v12060_v4 = vcombine.high %v12050_v23, %v12050_v23 }
 0x559   : > { %9052 = vmatprep.subr.bf16.mxu1 %v9051_v38  ;;  %v2203_v38 = vld [vmem:[%s11116_s15 + $0xf40] sm:$0xff]  ;;  %v9071_v42 = vpack.c.bf16 %v2206_v29, %v2198_v25  ;;  %v2270_v62 = vld [vmem:[%s11116_s15 + $0x1158] sm:$0xff]  ;;  %v2261_v25 = vld [vmem:[%s11116_s15 + $0x1110] sm:$0xff] }
 0x55b   : > { %8542 = vmatpush1.bf16.msra.mxu0 %v8541_v54  ;;  %v2214_v54 = vld [vmem:[%s11116_s15 + $0xf98] sm:$0xff] }
 0x55c   : > { %9054 = vmatpush1.bf16.msra.mxu1 %v9053_v55  ;;  %8544 = vmatprep.subr.bf16.mxu0 %v8543_v20  ;;  %v2222_v55 = vld [vmem:[%s11116_s15 + $0xfd8] sm:$0xff]  ;;  %v8561_v20 = vpack.c.bf16 %v2203_v38, %v2195_v36 }
 0x55d   : > { %9056 = vmatprep.subr.bf16.mxu1 %v9055_v59  ;;  %v2219_v59 = vld [vmem:[%s11116_s15 + $0xfc0] sm:$0xff]  ;;  %v9075_v60 = vpack.c.bf16 %v2222_v55, %v2214_v54  ;;  %v2278_v36 = vld [vmem:[%s11116_s15 + $0x1198] sm:$0xff]  ;;  %v2277_v54 = vld [vmem:[%s11116_s15 + $0x1190] sm:$0xff] }
 0x55e   : > { %v2286_v38 = vld [vmem:[%s11116_s15 + $0x11d8] sm:$0xff] }
 0x55f   : > { %8546 = vmatpush1.bf16.msra.mxu0 %v8545_v30  ;;  %v2230_v30 = vld [vmem:[%s11116_s15 + $0x1018] sm:$0xff]  ;;  %v9091_v55 = vpack.c.bf16 %v2286_v38, %v2278_v36  ;;  %v2341_v36 = vld [vmem:[%s11116_s15 + $0x1390] sm:$0xff]  ;;  %v9107_v38 = vpack.c.bf16 %v2350_v15, %v2342_v19 }
 0x560   : > { %9058 = vmatpush1.bf16.msra.mxu1 %v9057_v35  ;;  %8548 = vmatprep.subr.bf16.mxu0 %v8547_v39  ;;  %v2238_v35 = vld [vmem:[%s11116_s15 + $0x1058] sm:$0xff]  ;;  %v8565_v39 = vpack.c.bf16 %v2219_v59, %v2211_v57  ;;  %v2405_v19 = vld [vmem:[%s11116_s15 + $0x1590] sm:$0xff] }
 0x561   : > { %9060 = vmatprep.subr.bf16.mxu1 %v9059_v17  ;;  %v2235_v17 = vld [vmem:[%s11116_s15 + $0x1040] sm:$0xff]  ;;  %v9079_v51 = vpack.c.bf16 %v2238_v35, %v2230_v30  ;;  %v2294_v57 = vld [vmem:[%s11116_s15 + $0x1218] sm:$0xff]  ;;  %v2293_v30 = vld [vmem:[%s11116_s15 + $0x1210] sm:$0xff] }
 0x562   : > { %v2302_v59 = vld [vmem:[%s11116_s15 + $0x1258] sm:$0xff] }
 0x563   : > { %8550 = vmatpush1.bf16.msra.mxu0 %v8549_v8  ;;  %v2246_v8 = vld [vmem:[%s11116_s15 + $0x1098] sm:$0xff]  ;;  %v9095_v35 = vpack.c.bf16 %v2302_v59, %v2294_v57  ;;  %v2357_v57 = vld [vmem:[%s11116_s15 + $0x1410] sm:$0xff]  ;;  %v9111_v59 = vpack.c.bf16 %v2366_v46, %v2358_v44 }
 0x564   : > { %9062 = vmatpush1.bf16.msra.mxu1 %v9061_v9  ;;  %8552 = vmatprep.subr.bf16.mxu0 %v8551_v10  ;;  %v2254_v9 = vld [vmem:[%s11116_s15 + $0x10d8] sm:$0xff]  ;;  %v8569_v10 = vpack.c.bf16 %v2235_v17, %v2227_v49  ;;  %v2421_v44 = vld [vmem:[%s11116_s15 + $0x1610] sm:$0xff] }
 0x565   : > { %9064 = vmatprep.subr.bf16.mxu1 %v9063_v16  ;;  %v2243_v16 = vld [vmem:[%s11116_s15 + $0x1080] sm:$0xff]  ;;  %v9083_v24 = vpack.c.bf16 %v2254_v9, %v2246_v8  ;;  %v2310_v49 = vld [vmem:[%s11116_s15 + $0x1298] sm:$0xff]  ;;  %v2309_v8 = vld [vmem:[%s11116_s15 + $0x1290] sm:$0xff] }
 0x566   : > { %v8573_v13 = vpack.c.bf16 %v2251_v21, %v2243_v16  ;;  %v2318_v17 = vld [vmem:[%s11116_s15 + $0x12d8] sm:$0xff] }
 0x567   : > { %8554 = vmatpush1.bf16.msra.mxu0 %v8553_v28  ;;  %v2260_v28 = vld [vmem:[%s11116_s15 + $0x1108] sm:$0xff]  ;;  %v9099_v9 = vpack.c.bf16 %v2318_v17, %v2310_v49  ;;  %v2326_v16 = vld [vmem:[%s11116_s15 + $0x1318] sm:$0xff]  ;;  %v2373_v49 = vld [vmem:[%s11116_s15 + $0x1490] sm:$0xff]  ;;  %v9115_v17 = vpack.c.bf16 %v2382_v0, %v2374_v63 }
 0x568   : > { %9066 = vmatpush1.bf16.msra.mxu1 %v9065_v52  ;;  %8556 = vmatprep.subr.bf16.mxu0 %v8555_v56  ;;  %v2268_v52 = vld [vmem:[%s11116_s15 + $0x1148] sm:$0xff]  ;;  %v2262_v56 = vld [vmem:[%s11116_s15 + $0x1118] sm:$0xff]  ;;  %v2437_v63 = vld [vmem:[%s11116_s15 + $0x1690] sm:$0xff] }
 0x569   : > { %9068 = vmatprep.subr.bf16.mxu1 %v9067_v31  ;;  %v9085_v31 = vpack.c.bf16 %v2253_v27, %v2245_v22  ;;  %v8575_v32 = vpack.c.bf16 %v2268_v52, %v2260_v28  ;;  %v9087_v29 = vpack.c.bf16 %v2270_v62, %v2262_v56  ;;  %v2334_v21 = vld [vmem:[%s11116_s15 + $0x1358] sm:$0xff]  ;;  %v8589_v22 = vpack.c.bf16 %v2315_v7, %v2307_v6  ;;  %v2323_v28 = vld [vmem:[%s11116_s15 + $0x1300] sm:$0xff]  ;;  %v2325_v56 = vld [vmem:[%s11116_s15 + $0x1310] sm:$0xff] }
 0x56a   : > { %v2331_v52 = vld [vmem:[%s11116_s15 + $0x1340] sm:$0xff]  ;;  %v9103_v62 = vpack.c.bf16 %v2334_v21, %v2326_v16  ;;  %v2390_v6 = vld [vmem:[%s11116_s15 + $0x1518] sm:$0xff]  ;;  %v2389_v16 = vld [vmem:[%s11116_s15 + $0x1510] sm:$0xff] }
 0x56b   : > { %8558 = vmatpush1.bf16.msra.mxu0 %v8557_v5  ;;  %v2269_v5 = vld [vmem:[%s11116_s15 + $0x1150] sm:$0xff]  ;;  %v2398_v7 = vld [vmem:[%s11116_s15 + $0x1558] sm:$0xff] }
 0x56c   : > { %9070 = vmatpush1.bf16.msra.mxu1 %v9069_v33  ;;  %8560 = vmatprep.subr.bf16.mxu0 %v8559_v34  ;;  %v2276_v33 = vld [vmem:[%s11116_s15 + $0x1188] sm:$0xff]  ;;  %v9119_v21 = vpack.c.bf16 %v2398_v7, %v2390_v6  ;;  %v2453_v6 = vld [vmem:[%s11116_s15 + $0x1710] sm:$0xff] }
 0x56d   : > { %9072 = vmatprep.subr.bf16.mxu1 %v9071_v42  ;;  %v2284_v34 = vld [vmem:[%s11116_s15 + $0x11c8] sm:$0xff]  ;;  %v9089_v42 = vpack.c.bf16 %v2269_v5, %v2261_v25  ;;  %v8593_v25 = vpack.c.bf16 %v2331_v52, %v2323_v28  ;;  %v2406_v28 = vld [vmem:[%s11116_s15 + $0x1598] sm:$0xff] }
 0x56e   : > { %v8579_v41 = vpack.c.bf16 %v2284_v34, %v2276_v33  ;;  %v2339_v33 = vld [vmem:[%s11116_s15 + $0x1380] sm:$0xff]  ;;  %v2414_v52 = vld [vmem:[%s11116_s15 + $0x15d8] sm:$0xff] }
 0x56f   : > { %8562 = vmatpush1.bf16.msra.mxu0 %v8561_v20  ;;  %v2285_v20 = vld [vmem:[%s11116_s15 + $0x11d0] sm:$0xff]  ;;  %v2347_v34 = vld [vmem:[%s11116_s15 + $0x13c0] sm:$0xff]  ;;  %v9123_v15 = vpack.c.bf16 %v2414_v52, %v2406_v28 }
 0x570   : > { %9074 = vmatpush1.bf16.msra.mxu1 %v9073_v1  ;;  %8564 = vmatprep.subr.bf16.mxu0 %v8563_v2  ;;  %v2292_v1 = vld [vmem:[%s11116_s15 + $0x1208] sm:$0xff]  ;;  %v2469_v28 = vld [vmem:[%s11116_s15 + $0x1790] sm:$0xff] }
 0x571   : > { %9076 = vmatprep.subr.bf16.mxu1 %v9075_v60  ;;  %v2300_v2 = vld [vmem:[%s11116_s15 + $0x1248] sm:$0xff]  ;;  %v9093_v60 = vpack.c.bf16 %v2285_v20, %v2277_v54  ;;  %v8597_v54 = vpack.c.bf16 %v2347_v34, %v2339_v33  ;;  %v2422_v33 = vld [vmem:[%s11116_s15 + $0x1618] sm:$0xff] }
 0x572   : > { %v8583_v61 = vpack.c.bf16 %v2300_v2, %v2292_v1  ;;  %v2355_v1 = vld [vmem:[%s11116_s15 + $0x1400] sm:$0xff]  ;;  %v2430_v34 = vld [vmem:[%s11116_s15 + $0x1658] sm:$0xff] }
 0x573   : > { %8566 = vmatpush1.bf16.msra.mxu0 %v8565_v39  ;;  %v2301_v39 = vld [vmem:[%s11116_s15 + $0x1250] sm:$0xff]  ;;  %v2363_v2 = vld [vmem:[%s11116_s15 + $0x1440] sm:$0xff]  ;;  %v9127_v46 = vpack.c.bf16 %v2430_v34, %v2422_v33 }
 0x574   : > { %9078 = vmatpush1.bf16.msra.mxu1 %v9077_v47  ;;  %8568 = vmatprep.subr.bf16.mxu0 %v8567_v48  ;;  %v2308_v47 = vld [vmem:[%s11116_s15 + $0x1288] sm:$0xff]  ;;  %v2491_v33 = vld [vmem:[%s11116_s15 + $0x1840] sm:$0xff]  ;;  %v2485_v34 = vld [vmem:[%s11116_s15 + $0x1810] sm:$0xff] }
 0x575   : > { %9080 = vmatprep.subr.bf16.mxu1 %v9079_v51  ;;  %v2316_v48 = vld [vmem:[%s11116_s15 + $0x12c8] sm:$0xff]  ;;  %v9097_v51 = vpack.c.bf16 %v2301_v39, %v2293_v30  ;;  %v8601_v30 = vpack.c.bf16 %v2363_v2, %v2355_v1  ;;  %v2438_v1 = vld [vmem:[%s11116_s15 + $0x1698] sm:$0xff] }
 0x576   : > { %3987 = vmatmul.mubr.f32.vlgmr.msra.gmra.mrb[0].mxu0 %v11902_v58  ;;  %v8587_v53 = vpack.c.bf16 %v2316_v48, %v2308_v47  ;;  %v2371_v47 = vld [vmem:[%s11116_s15 + $0x1480] sm:$0xff]  ;;  %v2446_v2 = vld [vmem:[%s11116_s15 + $0x16d8] sm:$0xff] }
 0x577   : > { %8570 = vmatpush1.bf16.msra.mxu0 %v8569_v10  ;;  %4555 = vmatmul.mubr.f32.vlgmr.msra.gmra.mrb[0].mxu1 %v11902_v58  ;;  %v2317_v10 = vld [vmem:[%s11116_s15 + $0x12d0] sm:$0xff]  ;;  %v2379_v48 = vld [vmem:[%s11116_s15 + $0x14c0] sm:$0xff]  ;;  %v9131_v0 = vpack.c.bf16 %v2446_v2, %v2438_v1 }
 0x578   : > { %9082 = vmatpush1.bf16.msra.mxu1 %v9081_v12  ;;  %8572 = vmatprep.subr.bf16.mxu0 %v8571_v14  ;;  %v2324_v12 = vld [vmem:[%s11116_s15 + $0x1308] sm:$0xff]  ;;  %v2507_v1 = vld [vmem:[%s11116_s15 + $0x18c0] sm:$0xff]  ;;  %v2501_v2 = vld [vmem:[%s11116_s15 + $0x1890] sm:$0xff] }
 0x579   : > { %9084 = vmatprep.subr.bf16.mxu1 %v9083_v24  ;;  %4057 = vmatprep.mubr.f32.mxu0 %v12060_v4  ;;  %v2332_v14 = vld [vmem:[%s11116_s15 + $0x1348] sm:$0xff]  ;;  %v9101_v24 = vpack.c.bf16 %v2317_v10, %v2309_v8  ;;  %v8605_v8 = vpack.c.bf16 %v2379_v48, %v2371_v47  ;;  %v2454_v47 = vld [vmem:[%s11116_s15 + $0x1718] sm:$0xff] }
 0x57a   : > { %4625 = vmatprep.mubr.f32.mxu1 %v12060_v4  ;;  %v8591_v27 = vpack.c.bf16 %v2332_v14, %v2324_v12  ;;  %v2387_v12 = vld [vmem:[%s11116_s15 + $0x1500] sm:$0xff]  ;;  %v2462_v48 = vld [vmem:[%s11116_s15 + $0x1758] sm:$0xff] }
 0x57b   : > { %8574 = vmatpush1.bf16.msra.mxu0 %v8573_v13  ;;  %v2333_v13 = vld [vmem:[%s11116_s15 + $0x1350] sm:$0xff]  ;;  %v2395_v14 = vld [vmem:[%s11116_s15 + $0x1540] sm:$0xff]  ;;  %v9135_v7 = vpack.c.bf16 %v2462_v48, %v2454_v47 }
 0x57c   : > { %9086 = vmatpush1.bf16.msra.mxu1 %v9085_v31  ;;  %8576 = vmatprep.subr.bf16.mxu0 %v8575_v32  ;;  %v2340_v31 = vld [vmem:[%s11116_s15 + $0x1388] sm:$0xff]  ;;  %v2515_v47 = vld [vmem:[%s11116_s15 + $0x1900] sm:$0xff] }
 0x57d   : > { %9088 = vmatprep.subr.bf16.mxu1 %v9087_v29  ;;  %v2348_v32 = vld [vmem:[%s11116_s15 + $0x13c8] sm:$0xff]  ;;  %v9105_v29 = vpack.c.bf16 %v2333_v13, %v2325_v56  ;;  %v8609_v56 = vpack.c.bf16 %v2395_v14, %v2387_v12  ;;  %v2470_v12 = vld [vmem:[%s11116_s15 + $0x1798] sm:$0xff]  ;;  %v2523_v48 = vld [vmem:[%s11116_s15 + $0x1940] sm:$0xff] }
 0x57e   : > { %v8595_v5 = vpack.c.bf16 %v2348_v32, %v2340_v31  ;;  %v2403_v31 = vld [vmem:[%s11116_s15 + $0x1580] sm:$0xff]  ;;  %v2478_v14 = vld [vmem:[%s11116_s15 + $0x17d8] sm:$0xff] }
 0x57f   : > { %8578 = vmatpush1.bf16.msra.mxu0 %v8577_v40  ;;  %v2349_v40 = vld [vmem:[%s11116_s15 + $0x13d0] sm:$0xff]  ;;  %v2411_v32 = vld [vmem:[%s11116_s15 + $0x15c0] sm:$0xff]  ;;  %v9139_v52 = vpack.c.bf16 %v2478_v14, %v2470_v12 }
 0x580   : > { %9090 = vmatpush1.bf16.msra.mxu1 %v9089_v42  ;;  %8580 = vmatprep.subr.bf16.mxu0 %v8579_v41  ;;  %v2356_v42 = vld [vmem:[%s11116_s15 + $0x1408] sm:$0xff]  ;;  %v2531_v12 = vld [vmem:[%s11116_s15 + $0x1980] sm:$0xff] }
 0x581   : > { %9092 = vmatprep.subr.bf16.mxu1 %v9091_v55  ;;  %v2364_v41 = vld [vmem:[%s11116_s15 + $0x1448] sm:$0xff]  ;;  %v9109_v55 = vpack.c.bf16 %v2349_v40, %v2341_v36  ;;  %v8613_v36 = vpack.c.bf16 %v2411_v32, %v2403_v31  ;;  %v3784_v31 = vcombine.high %v12043_v11, %v12043_v11  ;;  %v2486_v32 = vld [vmem:[%s11116_s15 + $0x1818] sm:$0xff]  ;;  %v2493_v11 = vld [vmem:[%s11116_s15 + $0x1850] sm:$0xff] }
 0x582   : > { %v8599_v20 = vpack.c.bf16 %v2364_v41, %v2356_v42  ;;  %v2419_v42 = vld [vmem:[%s11116_s15 + $0x1600] sm:$0xff] }
 0x583   : > { %8582 = vmatpush1.bf16.msra.mxu0 %v8581_v18  ;;  %v2365_v18 = vld [vmem:[%s11116_s15 + $0x1450] sm:$0xff]  ;;  %v2427_v41 = vld [vmem:[%s11116_s15 + $0x1640] sm:$0xff] }
 0x584   : > { %9094 = vmatpush1.bf16.msra.mxu1 %v9093_v60  ;;  %8584 = vmatprep.subr.bf16.mxu0 %v8583_v61  ;;  %v2372_v60 = vld [vmem:[%s11116_s15 + $0x1488] sm:$0xff]  ;;  %v2539_v14 = vld [vmem:[%s11116_s15 + $0x19c0] sm:$0xff] }
 0x585   : > { %9096 = vmatprep.subr.bf16.mxu1 %v9095_v35  ;;  %v2380_v61 = vld [vmem:[%s11116_s15 + $0x14c8] sm:$0xff]  ;;  %v9113_v35 = vpack.c.bf16 %v2365_v18, %v2357_v57  ;;  %v8617_v57 = vpack.c.bf16 %v2427_v41, %v2419_v42  ;;  %v12186_v42 = vrot.slane %v3784_v31, %v11834_v37  ;;  %v2502_v41 = vld [vmem:[%s11116_s15 + $0x1898] sm:$0xff]  ;;  %v2547_v31 = vld [vmem:[%s11116_s15 + $0x1a00] sm:$0xff] }
 0x586   : > { %v8603_v39 = vpack.c.bf16 %v2380_v61, %v2372_v60  ;;  %v2435_v60 = vld [vmem:[%s11116_s15 + $0x1680] sm:$0xff] }
 0x587   : > { %8586 = vmatpush1.bf16.msra.mxu0 %v8585_v45  ;;  %v2381_v45 = vld [vmem:[%s11116_s15 + $0x14d0] sm:$0xff]  ;;  %v2443_v61 = vld [vmem:[%s11116_s15 + $0x16c0] sm:$0xff] }
 0x588   : > { %9098 = vmatpush1.bf16.msra.mxu1 %v9097_v51  ;;  %8588 = vmatprep.subr.bf16.mxu0 %v8587_v53  ;;  %v2388_v51 = vld [vmem:[%s11116_s15 + $0x1508] sm:$0xff] }
 0x589   : > { %9100 = vmatprep.subr.bf16.mxu1 %v9099_v9  ;;  %v2396_v53 = vld [vmem:[%s11116_s15 + $0x1548] sm:$0xff]  ;;  %v9117_v9 = vpack.c.bf16 %v2381_v45, %v2373_v49  ;;  %v8621_v49 = vpack.c.bf16 %v2443_v61, %v2435_v60  ;;  %v12198_v61 = vcombine.high %v12186_v42, %v12186_v42 }
 0x58a   : > { %v8607_v10 = vpack.c.bf16 %v2396_v53, %v2388_v51  ;;  %v2451_v51 = vld [vmem:[%s11116_s15 + $0x1700] sm:$0xff]  ;;  %v2524_v60 = vld [vmem:[%s11116_s15 + $0x1948] sm:$0xff] }
 0x58b   : > { %8590 = vmatpush1.bf16.msra.mxu0 %v8589_v22  ;;  %v2397_v22 = vld [vmem:[%s11116_s15 + $0x1550] sm:$0xff]  ;;  %v2459_v53 = vld [vmem:[%s11116_s15 + $0x1740] sm:$0xff] }
 0x58c   : > { %9102 = vmatpush1.bf16.msra.mxu1 %v9101_v24  ;;  %8592 = vmatprep.subr.bf16.mxu0 %v8591_v27  ;;  %v2404_v24 = vld [vmem:[%s11116_s15 + $0x1588] sm:$0xff] }
 0x58d   : > { %9104 = vmatprep.subr.bf16.mxu1 %v9103_v62  ;;  %v2412_v27 = vld [vmem:[%s11116_s15 + $0x15c8] sm:$0xff]  ;;  %v9121_v62 = vpack.c.bf16 %v2397_v22, %v2389_v16  ;;  %v8625_v16 = vpack.c.bf16 %v2459_v53, %v2451_v51 }
 0x58e   : > { %v8611_v13 = vpack.c.bf16 %v2412_v27, %v2404_v24  ;;  %v2467_v24 = vld [vmem:[%s11116_s15 + $0x1780] sm:$0xff]  ;;  %v2532_v51 = vld [vmem:[%s11116_s15 + $0x1988] sm:$0xff] }
 0x58f   : > { %8594 = vmatpush1.bf16.msra.mxu0 %v8593_v25  ;;  %v2413_v25 = vld [vmem:[%s11116_s15 + $0x15d0] sm:$0xff]  ;;  %v2475_v27 = vld [vmem:[%s11116_s15 + $0x17c0] sm:$0xff]  ;;  %v2540_v53 = vld [vmem:[%s11116_s15 + $0x19c8] sm:$0xff] }
 0x590   : > { %9106 = vmatpush1.bf16.msra.mxu1 %v9105_v29  ;;  %8596 = vmatprep.subr.bf16.mxu0 %v8595_v5  ;;  %v2420_v29 = vld [vmem:[%s11116_s15 + $0x1608] sm:$0xff] }
 0x591   : > { %9108 = vmatprep.subr.bf16.mxu1 %v9107_v38  ;;  %v2428_v5 = vld [vmem:[%s11116_s15 + $0x1648] sm:$0xff]  ;;  %v9125_v38 = vpack.c.bf16 %v2413_v25, %v2405_v19  ;;  %v2494_v19 = vld [vmem:[%s11116_s15 + $0x1858] sm:$0xff] }
 0x592   : > { %v8615_v40 = vpack.c.bf16 %v2428_v5, %v2420_v29  ;;  %v2483_v5 = vld [vmem:[%s11116_s15 + $0x1800] sm:$0xff] }
 0x593   : > { %8598 = vmatpush1.bf16.msra.mxu0 %v8597_v54  ;;  %v2429_v54 = vld [vmem:[%s11116_s15 + $0x1650] sm:$0xff] }
 0x594   : > { %9110 = vmatpush1.bf16.msra.mxu1 %v9109_v55  ;;  %8600 = vmatprep.subr.bf16.mxu0 %v8599_v20  ;;  %v2436_v55 = vld [vmem:[%s11116_s15 + $0x1688] sm:$0xff] }
 0x595   : > { %9112 = vmatprep.subr.bf16.mxu1 %v9111_v59  ;;  %v2444_v20 = vld [vmem:[%s11116_s15 + $0x16c8] sm:$0xff]  ;;  %v9129_v59 = vpack.c.bf16 %v2429_v54, %v2421_v44  ;;  %v2510_v44 = vld [vmem:[%s11116_s15 + $0x18d8] sm:$0xff]  ;;  %v9145_v54 = vpack.c.bf16 %v2493_v11, %v2485_v34 }
 0x596   : > { %v8619_v18 = vpack.c.bf16 %v2444_v20, %v2436_v55  ;;  %v2499_v20 = vld [vmem:[%s11116_s15 + $0x1880] sm:$0xff]  ;;  %v2574_v34 = vld [vmem:[%s11116_s15 + $0x1ad8] sm:$0xff] }
 0x597   : > { %8602 = vmatpush1.bf16.msra.mxu0 %v8601_v30  ;;  %v2445_v30 = vld [vmem:[%s11116_s15 + $0x16d0] sm:$0xff] }
 0x598   : > { %9114 = vmatpush1.bf16.msra.mxu1 %v9113_v35  ;;  %8604 = vmatprep.subr.bf16.mxu0 %v8603_v39  ;;  %v2452_v35 = vld [vmem:[%s11116_s15 + $0x1708] sm:$0xff] }
 0x599   : > { %9116 = vmatprep.subr.bf16.mxu1 %v9115_v17  ;;  %v2460_v39 = vld [vmem:[%s11116_s15 + $0x1748] sm:$0xff]  ;;  %v9133_v17 = vpack.c.bf16 %v2445_v30, %v2437_v63  ;;  %v2518_v63 = vld [vmem:[%s11116_s15 + $0x1918] sm:$0xff]  ;;  %v8637_v30 = vpack.c.bf16 %v2507_v1, %v2499_v20 }
 0x59a   : > { %v8623_v45 = vpack.c.bf16 %v2460_v39, %v2452_v35  ;;  %v2588_v20 = vld [vmem:[%s11116_s15 + $0x1b48] sm:$0xff]  ;;  %v2582_v1 = vld [vmem:[%s11116_s15 + $0x1b18] sm:$0xff] }
 0x59b   : > { %8606 = vmatpush1.bf16.msra.mxu0 %v8605_v8  ;;  %v2461_v8 = vld [vmem:[%s11116_s15 + $0x1750] sm:$0xff] }
 0x59c   : > { %9118 = vmatpush1.bf16.msra.mxu1 %v9117_v9  ;;  %8608 = vmatprep.subr.bf16.mxu0 %v8607_v10  ;;  %v2468_v9 = vld [vmem:[%s11116_s15 + $0x1788] sm:$0xff] }
 0x59d   : > { %9120 = vmatprep.subr.bf16.mxu1 %v9119_v21  ;;  %v2476_v10 = vld [vmem:[%s11116_s15 + $0x17c8] sm:$0xff]  ;;  %v9137_v21 = vpack.c.bf16 %v2461_v8, %v2453_v6  ;;  %v2534_v6 = vld [vmem:[%s11116_s15 + $0x1998] sm:$0xff]  ;;  %v8641_v8 = vpack.c.bf16 %v2523_v48, %v2515_v47 }
 0x59e   : > { %v8627_v22 = vpack.c.bf16 %v2476_v10, %v2468_v9  ;;  %v8643_v10 = vpack.c.bf16 %v2540_v53, %v2532_v51  ;;  %v2604_v47 = vld [vmem:[%s11116_s15 + $0x1bc8] sm:$0xff]  ;;  %v2598_v48 = vld [vmem:[%s11116_s15 + $0x1b98] sm:$0xff]  ;;  %v2595_v53 = vld [vmem:[%s11116_s15 + $0x1b80] sm:$0xff] }
 0x59f   : > { %8610 = vmatpush1.bf16.msra.mxu0 %v8609_v56  ;;  %v2477_v56 = vld [vmem:[%s11116_s15 + $0x17d0] sm:$0xff] }
 0x5a0   : > { %9122 = vmatpush1.bf16.msra.mxu1 %v9121_v62  ;;  %8612 = vmatprep.subr.bf16.mxu0 %v8611_v13  ;;  %v2484_v62 = vld [vmem:[%s11116_s15 + $0x1808] sm:$0xff]  ;;  %v9141_v25 = vpack.c.bf16 %v2477_v56, %v2469_v28  ;;  %v2550_v28 = vld [vmem:[%s11116_s15 + $0x1a18] sm:$0xff]  ;;  %v8645_v56 = vpack.c.bf16 %v2539_v14, %v2531_v12 }
 0x5a1   : > { %9124 = vmatprep.subr.bf16.mxu1 %v9123_v15  ;;  %v2492_v13 = vld [vmem:[%s11116_s15 + $0x1848] sm:$0xff]  ;;  %v8629_v15 = vpack.c.bf16 %v2475_v27, %v2467_v24  ;;  %v2614_v14 = vld [vmem:[%s11116_s15 + $0x1c18] sm:$0xff] }
 0x5a2   : > { %v8631_v29 = vpack.c.bf16 %v2492_v13, %v2484_v62  ;;  %v2548_v24 = vld [vmem:[%s11116_s15 + $0x1a08] sm:$0xff] }
 0x5a3   : > { %8614 = vmatpush1.bf16.msra.mxu0 %v8613_v36  ;;  %v9143_v36 = vpack.c.bf16 %v2494_v19, %v2486_v32  ;;  %v2556_v27 = vld [vmem:[%s11116_s15 + $0x1a48] sm:$0xff]  ;;  %v2555_v32 = vld [vmem:[%s11116_s15 + $0x1a40] sm:$0xff]  ;;  %v2549_v19 = vld [vmem:[%s11116_s15 + $0x1a10] sm:$0xff] }
 0x5a4   : > { %9126 = vmatpush1.bf16.msra.mxu1 %v9125_v38  ;;  %8616 = vmatprep.subr.bf16.mxu0 %v8615_v40  ;;  %v2500_v38 = vld [vmem:[%s11116_s15 + $0x1888] sm:$0xff]  ;;  %v8647_v13 = vpack.c.bf16 %v2556_v27, %v2548_v24  ;;  %v2611_v27 = vld [vmem:[%s11116_s15 + $0x1c00] sm:$0xff] }
 0x5a5   : > { %9128 = vmatprep.subr.bf16.mxu1 %v9127_v46  ;;  %v2508_v40 = vld [vmem:[%s11116_s15 + $0x18c8] sm:$0xff]  ;;  %v8633_v46 = vpack.c.bf16 %v2491_v33, %v2483_v5  ;;  %v2566_v33 = vld [vmem:[%s11116_s15 + $0x1a98] sm:$0xff] }
 0x5a6   : > { %v8635_v55 = vpack.c.bf16 %v2508_v40, %v2500_v38  ;;  %v2572_v5 = vld [vmem:[%s11116_s15 + $0x1ac8] sm:$0xff]  ;;  %v2563_v40 = vld [vmem:[%s11116_s15 + $0x1a80] sm:$0xff] }
 0x5a7   : > { %8618 = vmatpush1.bf16.msra.mxu0 %v8617_v57  ;;  %v9147_v57 = vpack.c.bf16 %v2510_v44, %v2502_v41  ;;  %v2571_v41 = vld [vmem:[%s11116_s15 + $0x1ac0] sm:$0xff]  ;;  %v2565_v44 = vld [vmem:[%s11116_s15 + $0x1a90] sm:$0xff]  ;;  %v2620_v12 = vld [vmem:[%s11116_s15 + $0x1c48] sm:$0xff] }
 0x5a8   : > { %9130 = vmatpush1.bf16.msra.mxu1 %v9129_v59  ;;  %8620 = vmatprep.subr.bf16.mxu0 %v8619_v18  ;;  %v2509_v59 = vld [vmem:[%s11116_s15 + $0x18d0] sm:$0xff]  ;;  %v2516_v18 = vld [vmem:[%s11116_s15 + $0x1908] sm:$0xff] }
 0x5a9   : > { %9132 = vmatprep.subr.bf16.mxu1 %v9131_v0  ;;  %v2526_v0 = vld [vmem:[%s11116_s15 + $0x1958] sm:$0xff]  ;;  %v9149_v35 = vpack.c.bf16 %v2509_v59, %v2501_v2  ;;  %v8639_v39 = vpack.c.bf16 %v2524_v60, %v2516_v18  ;;  %v2579_v60 = vld [vmem:[%s11116_s15 + $0x1b00] sm:$0xff] }
 0x5aa   : > { %v2590_v2 = vld [vmem:[%s11116_s15 + $0x1b58] sm:$0xff] }
 0x5ab   : > { %8622 = vmatpush1.bf16.msra.mxu0 %v8621_v49  ;;  %v2517_v49 = vld [vmem:[%s11116_s15 + $0x1910] sm:$0xff] }
 0x5ac   : > { %9134 = vmatpush1.bf16.msra.mxu1 %v9133_v17  ;;  %8624 = vmatprep.subr.bf16.mxu0 %v8623_v45  ;;  %v9151_v17 = vpack.c.bf16 %v2526_v0, %v2518_v63  ;;  %v2525_v45 = vld [vmem:[%s11116_s15 + $0x1950] sm:$0xff]  ;;  %v2587_v63 = vld [vmem:[%s11116_s15 + $0x1b40] sm:$0xff] }
 0x5ad   : > { %9136 = vmatprep.subr.bf16.mxu1 %v9135_v7  ;;  %v2542_v7 = vld [vmem:[%s11116_s15 + $0x19d8] sm:$0xff]  ;;  %v9153_v9 = vpack.c.bf16 %v2525_v45, %v2517_v49  ;;  %v2581_v0 = vld [vmem:[%s11116_s15 + $0x1b10] sm:$0xff] }
 0x5ae   : > { %v2606_v49 = vld [vmem:[%s11116_s15 + $0x1bd8] sm:$0xff] }
 0x5af   : > { %8626 = vmatpush1.bf16.msra.mxu0 %v8625_v16  ;;  %v2533_v16 = vld [vmem:[%s11116_s15 + $0x1990] sm:$0xff] }
 0x5b0   : > { %9138 = vmatpush1.bf16.msra.mxu1 %v9137_v21  ;;  %8628 = vmatprep.subr.bf16.mxu0 %v8627_v22  ;;  %v9155_v21 = vpack.c.bf16 %v2542_v7, %v2534_v6  ;;  %v2541_v22 = vld [vmem:[%s11116_s15 + $0x19d0] sm:$0xff]  ;;  %v2603_v6 = vld [vmem:[%s11116_s15 + $0x1bc0] sm:$0xff] }
 0x5b1   : > { %9140 = vmatprep.subr.bf16.mxu1 %v9139_v52  ;;  %v2558_v52 = vld [vmem:[%s11116_s15 + $0x1a58] sm:$0xff]  ;;  %v9157_v62 = vpack.c.bf16 %v2541_v22, %v2533_v16  ;;  %v2597_v7 = vld [vmem:[%s11116_s15 + $0x1b90] sm:$0xff] }
 0x5b2   : > { %v2622_v16 = vld [vmem:[%s11116_s15 + $0x1c58] sm:$0xff] }
 0x5b3   : > { %8630 = vmatpush1.bf16.msra.mxu0 %v8629_v15  ;;  %v9159_v15 = vpack.c.bf16 %v2558_v52, %v2550_v28  ;;  %v2619_v28 = vld [vmem:[%s11116_s15 + $0x1c40] sm:$0xff]  ;;  %v2613_v52 = vld [vmem:[%s11116_s15 + $0x1c10] sm:$0xff] }
 0x5b4   : > { %9142 = vmatpush1.bf16.msra.mxu1 %v9141_v25  ;;  %8632 = vmatprep.subr.bf16.mxu0 %v8631_v29  ;;  %v2557_v25 = vld [vmem:[%s11116_s15 + $0x1a50] sm:$0xff]  ;;  %v2564_v29 = vld [vmem:[%s11116_s15 + $0x1a88] sm:$0xff] }
 0x5b5   : > { %9144 = vmatprep.subr.bf16.mxu1 %v9143_v36  ;;  %v8649_v36 = vpack.c.bf16 %v2555_v32, %v2547_v31  ;;  %v9161_v11 = vpack.c.bf16 %v2557_v25, %v2549_v19  ;;  %v8651_v38 = vpack.c.bf16 %v2572_v5, %v2564_v29  ;;  %v2636_v31 = vld [vmem:[%s11116_s15 + $0x1cc8] sm:$0xff]  ;;  %v2630_v32 = vld [vmem:[%s11116_s15 + $0x1c98] sm:$0xff]  ;;  %v2627_v5 = vld [vmem:[%s11116_s15 + $0x1c80] sm:$0xff] }
 0x5b6   : > { %4058 = vmatmul.mubr.f32.vlgmr.msra.gmra.mrb[0].mxu0 %v12050_v23  ;;  %v2638_v19 = vld [vmem:[%s11116_s15 + $0x1cd8] sm:$0xff] }
 0x5b7   : > { %8634 = vmatpush1.bf16.msra.mxu0 %v8633_v46  ;;  %4626 = vmatmul.mubr.f32.vlgmr.msra.gmra.mrb[0].mxu1 %v12050_v23  ;;  %v9163_v46 = vpack.c.bf16 %v2574_v34, %v2566_v33  ;;  %v2635_v33 = vld [vmem:[%s11116_s15 + $0x1cc0] sm:$0xff]  ;;  %v2629_v34 = vld [vmem:[%s11116_s15 + $0x1c90] sm:$0xff] }
 0x5b8   : > { %9146 = vmatpush1.bf16.msra.mxu1 %v9145_v54  ;;  %8636 = vmatprep.subr.bf16.mxu0 %v8635_v55  ;;  %v2573_v54 = vld [vmem:[%s11116_s15 + $0x1ad0] sm:$0xff]  ;;  %v2580_v55 = vld [vmem:[%s11116_s15 + $0x1b08] sm:$0xff] }
 0x5b9   : > { %9148 = vmatprep.subr.bf16.mxu1 %v9147_v57  ;;  %4128 = vmatprep.mubr.f32.mxu0 %v12198_v61  ;;  %v8653_v57 = vpack.c.bf16 %v2571_v41, %v2563_v40  ;;  %v9165_v59 = vpack.c.bf16 %v2573_v54, %v2565_v44  ;;  %v8655_v18 = vpack.c.bf16 %v2588_v20, %v2580_v55  ;;  %v2652_v40 = vld [vmem:[%s11116_s15 + $0x1d48] sm:$0xff]  ;;  %v2646_v41 = vld [vmem:[%s11116_s15 + $0x1d18] sm:$0xff]  ;;  %v2643_v20 = vld [vmem:[%s11116_s15 + $0x1d00] sm:$0xff] }
 0x5ba   : > { %4696 = vmatprep.mubr.f32.mxu1 %v12198_v61  ;;  %v2654_v44 = vld [vmem:[%s11116_s15 + $0x1d58] sm:$0xff] }
 0x5bb   : > { %8638 = vmatpush1.bf16.msra.mxu0 %v8637_v30  ;;  %v9167_v30 = vpack.c.bf16 %v2590_v2, %v2582_v1  ;;  %v2651_v1 = vld [vmem:[%s11116_s15 + $0x1d40] sm:$0xff]  ;;  %v2645_v2 = vld [vmem:[%s11116_s15 + $0x1d10] sm:$0xff] }
 0x5bc   : > { %9150 = vmatpush1.bf16.msra.mxu1 %v9149_v35  ;;  %8640 = vmatprep.subr.bf16.mxu0 %v8639_v39  ;;  %v2589_v35 = vld [vmem:[%s11116_s15 + $0x1b50] sm:$0xff]  ;;  %v2596_v39 = vld [vmem:[%s11116_s15 + $0x1b88] sm:$0xff] }
 0x5bd   : > { %9152 = vmatprep.subr.bf16.mxu1 %v9151_v17  ;;  %v8657_v17 = vpack.c.bf16 %v2587_v63, %v2579_v60  ;;  %v9169_v45 = vpack.c.bf16 %v2589_v35, %v2581_v0  ;;  %v8659_v51 = vpack.c.bf16 %v2604_v47, %v2596_v39  ;;  %v2668_v60 = vld [vmem:[%s11116_s15 + $0x1dc8] sm:$0xff]  ;;  %v2662_v63 = vld [vmem:[%s11116_s15 + $0x1d98] sm:$0xff]  ;;  %v2659_v47 = vld [vmem:[%s11116_s15 + $0x1d80] sm:$0xff] }
 0x5be   : > { %v2670_v0 = vld [vmem:[%s11116_s15 + $0x1dd8] sm:$0xff] }
 0x5bf   : > { %8642 = vmatpush1.bf16.msra.mxu0 %v8641_v8  ;;  %v9171_v8 = vpack.c.bf16 %v2606_v49, %v2598_v48  ;;  %v2667_v48 = vld [vmem:[%s11116_s15 + $0x1dc0] sm:$0xff]  ;;  %v2661_v49 = vld [vmem:[%s11116_s15 + $0x1d90] sm:$0xff] }
 0x5c0   : > { %9154 = vmatpush1.bf16.msra.mxu1 %v9153_v9  ;;  %8644 = vmatprep.subr.bf16.mxu0 %v8643_v10  ;;  %v2605_v9 = vld [vmem:[%s11116_s15 + $0x1bd0] sm:$0xff]  ;;  %v2612_v10 = vld [vmem:[%s11116_s15 + $0x1c08] sm:$0xff] }
 0x5c1   : > { %9156 = vmatprep.subr.bf16.mxu1 %v9155_v21  ;;  %v8661_v21 = vpack.c.bf16 %v2603_v6, %v2595_v53  ;;  %v9173_v22 = vpack.c.bf16 %v2605_v9, %v2597_v7  ;;  %v8663_v24 = vpack.c.bf16 %v2620_v12, %v2612_v10  ;;  %v2684_v53 = vld [vmem:[%s11116_s15 + $0x1e48] sm:$0xff]  ;;  %v2678_v6 = vld [vmem:[%s11116_s15 + $0x1e18] sm:$0xff]  ;;  %v2675_v12 = vld [vmem:[%s11116_s15 + $0x1e00] sm:$0xff] }
 0x5c2   : > { %v2686_v7 = vld [vmem:[%s11116_s15 + $0x1e58] sm:$0xff] }
 0x5c3   : > { %8646 = vmatpush1.bf16.msra.mxu0 %v8645_v56  ;;  %v9175_v56 = vpack.c.bf16 %v2622_v16, %v2614_v14  ;;  %v2683_v14 = vld [vmem:[%s11116_s15 + $0x1e40] sm:$0xff]  ;;  %v2677_v16 = vld [vmem:[%s11116_s15 + $0x1e10] sm:$0xff] }
 0x5c4   : > { %9158 = vmatpush1.bf16.msra.mxu1 %v9157_v62  ;;  %8648 = vmatprep.subr.bf16.mxu0 %v8647_v13  ;;  %v2621_v62 = vld [vmem:[%s11116_s15 + $0x1c50] sm:$0xff]  ;;  %v2628_v13 = vld [vmem:[%s11116_s15 + $0x1c88] sm:$0xff] }
 0x5c5   : > { %9160 = vmatprep.subr.bf16.mxu1 %v9159_v15  ;;  %v8665_v15 = vpack.c.bf16 %v2619_v28, %v2611_v27  ;;  %v9177_v25 = vpack.c.bf16 %v2621_v62, %v2613_v52  ;;  %v8667_v29 = vpack.c.bf16 %v2636_v31, %v2628_v13  ;;  %v2700_v27 = vld [vmem:[%s11116_s15 + $0x1ec8] sm:$0xff]  ;;  %v2694_v28 = vld [vmem:[%s11116_s15 + $0x1e98] sm:$0xff]  ;;  %v2691_v31 = vld [vmem:[%s11116_s15 + $0x1e80] sm:$0xff] }
 0x5c6   : > { %v2702_v52 = vld [vmem:[%s11116_s15 + $0x1ed8] sm:$0xff] }
 0x5c7   : > { %8650 = vmatpush1.bf16.msra.mxu0 %v8649_v36  ;;  %v9179_v36 = vpack.c.bf16 %v2638_v19, %v2630_v32  ;;  %v2699_v32 = vld [vmem:[%s11116_s15 + $0x1ec0] sm:$0xff]  ;;  %v2693_v19 = vld [vmem:[%s11116_s15 + $0x1e90] sm:$0xff] }
 0x5c8   : > { %9162 = vmatpush1.bf16.msra.mxu1 %v9161_v11  ;;  %8652 = vmatprep.subr.bf16.mxu0 %v8651_v38  ;;  %v2637_v11 = vld [vmem:[%s11116_s15 + $0x1cd0] sm:$0xff]  ;;  %v2644_v38 = vld [vmem:[%s11116_s15 + $0x1d08] sm:$0xff] }
 0x5c9   : > { %9164 = vmatprep.subr.bf16.mxu1 %v9163_v46  ;;  %v8669_v46 = vpack.c.bf16 %v2635_v33, %v2627_v5  ;;  %v9181_v54 = vpack.c.bf16 %v2637_v11, %v2629_v34  ;;  %v8671_v55 = vpack.c.bf16 %v2652_v40, %v2644_v38  ;;  %v2716_v5 = vld [vmem:[%s11116_s15 + $0x1f48] sm:$0xff]  ;;  %v2710_v33 = vld [vmem:[%s11116_s15 + $0x1f18] sm:$0xff]  ;;  %v2707_v40 = vld [vmem:[%s11116_s15 + $0x1f00] sm:$0xff] }
 0x5ca   : > { %v2718_v34 = vld [vmem:[%s11116_s15 + $0x1f58] sm:$0xff] }
 0x5cb   : > { %8654 = vmatpush1.bf16.msra.mxu0 %v8653_v57  ;;  %v9183_v57 = vpack.c.bf16 %v2654_v44, %v2646_v41  ;;  %v2715_v41 = vld [vmem:[%s11116_s15 + $0x1f40] sm:$0xff]  ;;  %v2709_v44 = vld [vmem:[%s11116_s15 + $0x1f10] sm:$0xff] }
 0x5cc   : > { %9166 = vmatpush1.bf16.msra.mxu1 %v9165_v59  ;;  %8656 = vmatprep.subr.bf16.mxu0 %v8655_v18  ;;  %v2653_v59 = vld [vmem:[%s11116_s15 + $0x1d50] sm:$0xff]  ;;  %v2660_v18 = vld [vmem:[%s11116_s15 + $0x1d88] sm:$0xff] }
 0x5cd   : > { %9168 = vmatprep.subr.bf16.mxu1 %v9167_v30  ;;  %v8673_v30 = vpack.c.bf16 %v2651_v1, %v2643_v20  ;;  %v9185_v35 = vpack.c.bf16 %v2653_v59, %v2645_v2  ;;  %v8675_v39 = vpack.c.bf16 %v2668_v60, %v2660_v18  ;;  %v2732_v20 = vld [vmem:[%s11116_s15 + $0x1fc8] sm:$0xff]  ;;  %v2726_v1 = vld [vmem:[%s11116_s15 + $0x1f98] sm:$0xff]  ;;  %v2723_v60 = vld [vmem:[%s11116_s15 + $0x1f80] sm:$0xff] }
 0x5ce   : > { %v2734_v2 = vld [vmem:[%s11116_s15 + $0x1fd8] sm:$0xff] }
 0x5cf   : > { %8658 = vmatpush1.bf16.msra.mxu0 %v8657_v17  ;;  %v9187_v17 = vpack.c.bf16 %v2670_v0, %v2662_v63  ;;  %v2731_v63 = vld [vmem:[%s11116_s15 + $0x1fc0] sm:$0xff]  ;;  %v2725_v0 = vld [vmem:[%s11116_s15 + $0x1f90] sm:$0xff] }
 0x5d0   : > { %9170 = vmatpush1.bf16.msra.mxu1 %v9169_v45  ;;  %8660 = vmatprep.subr.bf16.mxu0 %v8659_v51  ;;  %v2669_v45 = vld [vmem:[%s11116_s15 + $0x1dd0] sm:$0xff]  ;;  %v2676_v51 = vld [vmem:[%s11116_s15 + $0x1e08] sm:$0xff] }
 0x5d1   : > { %9172 = vmatprep.subr.bf16.mxu1 %v9171_v8  ;;  %v8677_v8 = vpack.c.bf16 %v2667_v48, %v2659_v47  ;;  %v9189_v9 = vpack.c.bf16 %v2669_v45, %v2661_v49  ;;  %v8679_v10 = vpack.c.bf16 %v2684_v53, %v2676_v51  ;;  %v2748_v47 = vld [vmem:[%s11116_s15 + $0x2048] sm:$0xff]  ;;  %v2742_v48 = vld [vmem:[%s11116_s15 + $0x2018] sm:$0xff]  ;;  %v8693_v45 = vpack.c.bf16 %v2731_v63, %v2723_v60  ;;  %v2797_v63 = vld [vmem:[%s11116_s15 + $0x21d0] sm:$0xff] }
 0x5d2   : > { %v2750_v49 = vld [vmem:[%s11116_s15 + $0x2058] sm:$0xff] }
 0x5d3   : > { %8662 = vmatpush1.bf16.msra.mxu0 %v8661_v21  ;;  %v9191_v21 = vpack.c.bf16 %v2686_v7, %v2678_v6  ;;  %v2739_v6 = vld [vmem:[%s11116_s15 + $0x2000] sm:$0xff] }
 0x5d4   : > { %9174 = vmatpush1.bf16.msra.mxu1 %v9173_v22  ;;  %8664 = vmatprep.subr.bf16.mxu0 %v8663_v24  ;;  %v2685_v22 = vld [vmem:[%s11116_s15 + $0x1e50] sm:$0xff]  ;;  %v2692_v24 = vld [vmem:[%s11116_s15 + $0x1e88] sm:$0xff]  ;;  %v2747_v7 = vld [vmem:[%s11116_s15 + $0x2040] sm:$0xff] }
 0x5d5   : > { %9176 = vmatprep.subr.bf16.mxu1 %v9175_v56  ;;  %v8681_v56 = vpack.c.bf16 %v2683_v14, %v2675_v12  ;;  %v9193_v62 = vpack.c.bf16 %v2685_v22, %v2677_v16  ;;  %v8683_v13 = vpack.c.bf16 %v2700_v27, %v2692_v24  ;;  %v2756_v12 = vld [vmem:[%s11116_s15 + $0x2088] sm:$0xff]  ;;  %v2766_v22 = vld [vmem:[%s11116_s15 + $0x20d8] sm:$0xff]  ;;  %v8697_v24 = vpack.c.bf16 %v2747_v7, %v2739_v6  ;;  %v2813_v7 = vld [vmem:[%s11116_s15 + $0x2250] sm:$0xff] }
 0x5d6   : > { %v2764_v14 = vld [vmem:[%s11116_s15 + $0x20c8] sm:$0xff] }
 0x5d7   : > { %8666 = vmatpush1.bf16.msra.mxu0 %v8665_v15  ;;  %v9195_v15 = vpack.c.bf16 %v2702_v52, %v2694_v28  ;;  %v8699_v28 = vpack.c.bf16 %v2764_v14, %v2756_v12  ;;  %v2755_v52 = vld [vmem:[%s11116_s15 + $0x2080] sm:$0xff]  ;;  %v2830_v12 = vld [vmem:[%s11116_s15 + $0x22d8] sm:$0xff] }
 0x5d8   : > { %9178 = vmatpush1.bf16.msra.mxu1 %v9177_v25  ;;  %8668 = vmatprep.subr.bf16.mxu0 %v8667_v29  ;;  %v2701_v25 = vld [vmem:[%s11116_s15 + $0x1ed0] sm:$0xff]  ;;  %v2708_v29 = vld [vmem:[%s11116_s15 + $0x1f08] sm:$0xff] }
 0x5d9   : > { %9180 = vmatprep.subr.bf16.mxu1 %v9179_v36  ;;  %v8685_v36 = vpack.c.bf16 %v2699_v32, %v2691_v31  ;;  %v9197_v11 = vpack.c.bf16 %v2701_v25, %v2693_v19  ;;  %v8687_v38 = vpack.c.bf16 %v2716_v5, %v2708_v29  ;;  %v2765_v31 = vld [vmem:[%s11116_s15 + $0x20d0] sm:$0xff]  ;;  %v2772_v32 = vld [vmem:[%s11116_s15 + $0x2108] sm:$0xff]  ;;  %v2774_v25 = vld [vmem:[%s11116_s15 + $0x2118] sm:$0xff] }
 0x5da   : > { %v2780_v19 = vld [vmem:[%s11116_s15 + $0x2148] sm:$0xff]  ;;  %v2782_v29 = vld [vmem:[%s11116_s15 + $0x2158] sm:$0xff] }
 0x5db   : > { %8670 = vmatpush1.bf16.msra.mxu0 %v8669_v46  ;;  %v9199_v46 = vpack.c.bf16 %v2718_v34, %v2710_v33  ;;  %v8703_v34 = vpack.c.bf16 %v2780_v19, %v2772_v32  ;;  %v2846_v32 = vld [vmem:[%s11116_s15 + $0x2358] sm:$0xff] }
 0x5dc   : > { %9182 = vmatpush1.bf16.msra.mxu1 %v9181_v54  ;;  %8672 = vmatprep.subr.bf16.mxu0 %v8671_v55  ;;  %v2717_v54 = vld [vmem:[%s11116_s15 + $0x1f50] sm:$0xff]  ;;  %v2724_v55 = vld [vmem:[%s11116_s15 + $0x1f88] sm:$0xff] }
 0x5dd   : > { %9184 = vmatprep.subr.bf16.mxu1 %v9183_v57  ;;  %v8689_v57 = vpack.c.bf16 %v2715_v41, %v2707_v40  ;;  %v9201_v59 = vpack.c.bf16 %v2717_v54, %v2709_v44  ;;  %v8691_v18 = vpack.c.bf16 %v2732_v20, %v2724_v55  ;;  %v9215_v40 = vpack.c.bf16 %v2782_v29, %v2774_v25  ;;  %v2781_v41 = vld [vmem:[%s11116_s15 + $0x2150] sm:$0xff]  ;;  %v2788_v44 = vld [vmem:[%s11116_s15 + $0x2188] sm:$0xff]  ;;  %v2790_v54 = vld [vmem:[%s11116_s15 + $0x2198] sm:$0xff] }
 0x5de   : > { %v2798_v55 = vld [vmem:[%s11116_s15 + $0x21d8] sm:$0xff] }
 0x5df   : > { %8674 = vmatpush1.bf16.msra.mxu0 %v8673_v30  ;;  %v9203_v30 = vpack.c.bf16 %v2734_v2, %v2726_v1  ;;  %v9219_v60 = vpack.c.bf16 %v2798_v55, %v2790_v54 }
 0x5e0   : > { %9186 = vmatpush1.bf16.msra.mxu1 %v9185_v35  ;;  %8676 = vmatprep.subr.bf16.mxu0 %v8675_v39  ;;  %v2733_v35 = vld [vmem:[%s11116_s15 + $0x1fd0] sm:$0xff]  ;;  %v2740_v39 = vld [vmem:[%s11116_s15 + $0x2008] sm:$0xff] }
 0x5e1   : > { %9188 = vmatprep.subr.bf16.mxu1 %v9187_v17  ;;  %v12319_v17 = vld [vmem:[%s11844_s29 + $0x10] sm:$0xff]  ;;  %v9205_v51 = vpack.c.bf16 %v2733_v35, %v2725_v0  ;;  %v8695_v53 = vpack.c.bf16 %v2748_v47, %v2740_v39  ;;  %v2804_v0 = vld [vmem:[%s11116_s15 + $0x2208] sm:$0xff]  ;;  %v2806_v35 = vld [vmem:[%s11116_s15 + $0x2218] sm:$0xff] }
 0x5e2   : > { %v12329_v16 = vrot.slane %v12319_v17, %v11834_v37  ;;  %v2814_v39 = vld [vmem:[%s11116_s15 + $0x2258] sm:$0xff] }
 0x5e3   : > { %8678 = vmatpush1.bf16.msra.mxu0 %v8677_v8  ;;  %v2741_v8 = vld [vmem:[%s11116_s15 + $0x2010] sm:$0xff]  ;;  %v9223_v6 = vpack.c.bf16 %v2814_v39, %v2806_v35 }
 0x5e4   : > { %9190 = vmatpush1.bf16.msra.mxu1 %v9189_v9  ;;  %8680 = vmatprep.subr.bf16.mxu0 %v8679_v10  ;;  %v9207_v9 = vpack.c.bf16 %v2750_v49, %v2742_v48  ;;  %v2749_v10 = vld [vmem:[%s11116_s15 + $0x2050] sm:$0xff] }
 0x5e5   : > { %9192 = vmatprep.subr.bf16.mxu1 %v9191_v21  ;;  %v2758_v21 = vld [vmem:[%s11116_s15 + $0x2098] sm:$0xff]  ;;  %v9209_v27 = vpack.c.bf16 %v2749_v10, %v2741_v8  ;;  %v2820_v8 = vld [vmem:[%s11116_s15 + $0x2288] sm:$0xff] }
 0x5e6   : > { %v2822_v10 = vld [vmem:[%s11116_s15 + $0x2298] sm:$0xff] }
 0x5e7   : > { %8682 = vmatpush1.bf16.msra.mxu0 %v8681_v56  ;;  %v2763_v56 = vld [vmem:[%s11116_s15 + $0x20c0] sm:$0xff] }
 0x5e8   : > { %9194 = vmatpush1.bf16.msra.mxu1 %v9193_v62  ;;  %8684 = vmatprep.subr.bf16.mxu0 %v8683_v13  ;;  %v2757_v62 = vld [vmem:[%s11116_s15 + $0x2090] sm:$0xff]  ;;  %v9211_v13 = vpack.c.bf16 %v2766_v22, %v2758_v21  ;;  %v8701_v5 = vpack.c.bf16 %v2763_v56, %v2755_v52  ;;  %v9227_v52 = vpack.c.bf16 %v2830_v12, %v2822_v10 }
 0x5e9   : > { %9196 = vmatprep.subr.bf16.mxu1 %v9195_v15  ;;  %v12341_v15 = vcombine.high %v12329_v16, %v12329_v16  ;;  %v9213_v33 = vpack.c.bf16 %v2765_v31, %v2757_v62  ;;  %v2829_v56 = vld [vmem:[%s11116_s15 + $0x22d0] sm:$0xff]  ;;  %v2836_v62 = vld [vmem:[%s11116_s15 + $0x2308] sm:$0xff]  ;;  %v2838_v31 = vld [vmem:[%s11116_s15 + $0x2318] sm:$0xff] }
 0x5eb   : > { %8686 = vmatpush1.bf16.msra.mxu0 %v8685_v36  ;;  %v2771_v36 = vld [vmem:[%s11116_s15 + $0x2100] sm:$0xff] }
 0x5ec   : > { %9198 = vmatpush1.bf16.msra.mxu1 %v9197_v11  ;;  %8688 = vmatprep.subr.bf16.mxu0 %v8687_v38  ;;  %v2779_v11 = vld [vmem:[%s11116_s15 + $0x2140] sm:$0xff]  ;;  %v2773_v38 = vld [vmem:[%s11116_s15 + $0x2110] sm:$0xff] }
 0x5ed   : > { %9200 = vmatprep.subr.bf16.mxu1 %v9199_v46  ;;  %v2796_v46 = vld [vmem:[%s11116_s15 + $0x21c8] sm:$0xff]  ;;  %v8705_v20 = vpack.c.bf16 %v2779_v11, %v2771_v36  ;;  %v9217_v1 = vpack.c.bf16 %v2781_v41, %v2773_v38  ;;  %v9231_v36 = vpack.c.bf16 %v2846_v32, %v2838_v31  ;;  %v2845_v11 = vld [vmem:[%s11116_s15 + $0x2350] sm:$0xff]  ;;  %v2854_v41 = vld [vmem:[%s11116_s15 + $0x2398] sm:$0xff] }
 0x5ee   : > { %v8707_v2 = vpack.c.bf16 %v2796_v46, %v2788_v44  ;;  %v2852_v38 = vld [vmem:[%s11116_s15 + $0x2388] sm:$0xff]  ;;  %v2862_v44 = vld [vmem:[%s11116_s15 + $0x23d8] sm:$0xff] }
 0x5ef   : > { %8690 = vmatpush1.bf16.msra.mxu0 %v8689_v57  ;;  %v2787_v57 = vld [vmem:[%s11116_s15 + $0x2180] sm:$0xff] }
 0x5f0   : > { %9202 = vmatpush1.bf16.msra.mxu1 %v9201_v59  ;;  %8692 = vmatprep.subr.bf16.mxu0 %v8691_v18  ;;  %v2795_v59 = vld [vmem:[%s11116_s15 + $0x21c0] sm:$0xff]  ;;  %v2789_v18 = vld [vmem:[%s11116_s15 + $0x2190] sm:$0xff] }
 0x5f1   : > { %9204 = vmatprep.subr.bf16.mxu1 %v9203_v30  ;;  %v2812_v30 = vld [vmem:[%s11116_s15 + $0x2248] sm:$0xff]  ;;  %v8709_v47 = vpack.c.bf16 %v2795_v59, %v2787_v57  ;;  %v9221_v48 = vpack.c.bf16 %v2797_v63, %v2789_v18  ;;  %v9235_v57 = vpack.c.bf16 %v2862_v44, %v2854_v41  ;;  %v2861_v59 = vld [vmem:[%s11116_s15 + $0x23d0] sm:$0xff]  ;;  %v2870_v63 = vld [vmem:[%s11116_s15 + $0x2418] sm:$0xff] }
 0x5f2   : > { %v8711_v49 = vpack.c.bf16 %v2812_v30, %v2804_v0  ;;  %v2868_v18 = vld [vmem:[%s11116_s15 + $0x2408] sm:$0xff]  ;;  %v2878_v0 = vld [vmem:[%s11116_s15 + $0x2458] sm:$0xff] }
 0x5f3   : > { %8694 = vmatpush1.bf16.msra.mxu0 %v8693_v45  ;;  %v2803_v45 = vld [vmem:[%s11116_s15 + $0x2200] sm:$0xff] }
 0x5f4   : > { %9206 = vmatpush1.bf16.msra.mxu1 %v9205_v51  ;;  %8696 = vmatprep.subr.bf16.mxu0 %v8695_v53  ;;  %v2811_v51 = vld [vmem:[%s11116_s15 + $0x2240] sm:$0xff]  ;;  %v2805_v53 = vld [vmem:[%s11116_s15 + $0x2210] sm:$0xff] }
 0x5f5   : > { %9208 = vmatprep.subr.bf16.mxu1 %v9207_v9  ;;  %v2828_v9 = vld [vmem:[%s11116_s15 + $0x22c8] sm:$0xff]  ;;  %v8713_v14 = vpack.c.bf16 %v2811_v51, %v2803_v45  ;;  %v9225_v21 = vpack.c.bf16 %v2813_v7, %v2805_v53  ;;  %v9239_v45 = vpack.c.bf16 %v2878_v0, %v2870_v63  ;;  %v2877_v51 = vld [vmem:[%s11116_s15 + $0x2450] sm:$0xff]  ;;  %v2886_v7 = vld [vmem:[%s11116_s15 + $0x2498] sm:$0xff] }
 0x5f6   : > { %4129 = vmatmul.mubr.f32.vlgmr.msra.gmra.mrb[0].mxu0 %v12186_v42  ;;  %v8715_v22 = vpack.c.bf16 %v2828_v9, %v2820_v8  ;;  %v2884_v53 = vld [vmem:[%s11116_s15 + $0x2488] sm:$0xff]  ;;  %v2894_v8 = vld [vmem:[%s11116_s15 + $0x24d8] sm:$0xff] }
 0x5f7   : > { %8698 = vmatpush1.bf16.msra.mxu0 %v8697_v24  ;;  %4697 = vmatmul.mubr.f32.vlgmr.msra.gmra.mrb[0].mxu1 %v12186_v42  ;;  %v2819_v24 = vld [vmem:[%s11116_s15 + $0x2280] sm:$0xff] }
 0x5f8   : > { %9210 = vmatpush1.bf16.msra.mxu1 %v9209_v27  ;;  %8700 = vmatprep.subr.bf16.mxu0 %v8699_v28  ;;  %v2827_v27 = vld [vmem:[%s11116_s15 + $0x22c0] sm:$0xff]  ;;  %v2821_v28 = vld [vmem:[%s11116_s15 + $0x2290] sm:$0xff] }
 0x5f9   : > { %9212 = vmatprep.subr.bf16.mxu1 %v9211_v13  ;;  %4199 = vmatprep.mubr.f32.mxu0 %v12341_v15  ;;  %v2844_v13 = vld [vmem:[%s11116_s15 + $0x2348] sm:$0xff]  ;;  %v8717_v19 = vpack.c.bf16 %v2827_v27, %v2819_v24  ;;  %v9229_v25 = vpack.c.bf16 %v2829_v56, %v2821_v28  ;;  %v9243_v24 = vpack.c.bf16 %v2894_v8, %v2886_v7  ;;  %v2893_v27 = vld [vmem:[%s11116_s15 + $0x24d0] sm:$0xff]  ;;  %v2902_v56 = vld [vmem:[%s11116_s15 + $0x2518] sm:$0xff] }
 0x5fa   : > { %4767 = vmatprep.mubr.f32.mxu1 %v12341_v15  ;;  %v8719_v29 = vpack.c.bf16 %v2844_v13, %v2836_v62  ;;  %v2900_v28 = vld [vmem:[%s11116_s15 + $0x2508] sm:$0xff]  ;;  %v2910_v62 = vld [vmem:[%s11116_s15 + $0x2558] sm:$0xff] }
 0x5fb   : > { %8702 = vmatpush1.bf16.msra.mxu0 %v8701_v5  ;;  %v2835_v5 = vld [vmem:[%s11116_s15 + $0x2300] sm:$0xff] }
 0x5fc   : > { %9214 = vmatpush1.bf16.msra.mxu1 %v9213_v33  ;;  %8704 = vmatprep.subr.bf16.mxu0 %v8703_v34  ;;  %v2843_v33 = vld [vmem:[%s11116_s15 + $0x2340] sm:$0xff]  ;;  %v2837_v34 = vld [vmem:[%s11116_s15 + $0x2310] sm:$0xff] }
 0x5fd   : > { %9216 = vmatprep.subr.bf16.mxu1 %v9215_v40  ;;  %v2860_v40 = vld [vmem:[%s11116_s15 + $0x23c8] sm:$0xff]  ;;  %v8721_v46 = vpack.c.bf16 %v2843_v33, %v2835_v5  ;;  %v9233_v54 = vpack.c.bf16 %v2845_v11, %v2837_v34  ;;  %v9247_v5 = vpack.c.bf16 %v2910_v62, %v2902_v56  ;;  %v2909_v33 = vld [vmem:[%s11116_s15 + $0x2550] sm:$0xff]  ;;  %v2918_v11 = vld [vmem:[%s11116_s15 + $0x2598] sm:$0xff] }
 0x5fe   : > { %v8723_v55 = vpack.c.bf16 %v2860_v40, %v2852_v38  ;;  %v2916_v34 = vld [vmem:[%s11116_s15 + $0x2588] sm:$0xff]  ;;  %v2926_v38 = vld [vmem:[%s11116_s15 + $0x25d8] sm:$0xff] }
 0x5ff   : > { %8706 = vmatpush1.bf16.msra.mxu0 %v8705_v20  ;;  %v2851_v20 = vld [vmem:[%s11116_s15 + $0x2380] sm:$0xff] }
 0x600   : > { %9218 = vmatpush1.bf16.msra.mxu1 %v9217_v1  ;;  %8708 = vmatprep.subr.bf16.mxu0 %v8707_v2  ;;  %v2859_v1 = vld [vmem:[%s11116_s15 + $0x23c0] sm:$0xff]  ;;  %v2853_v2 = vld [vmem:[%s11116_s15 + $0x2390] sm:$0xff] }
 0x601   : > { %9220 = vmatprep.subr.bf16.mxu1 %v9219_v60  ;;  %v2876_v60 = vld [vmem:[%s11116_s15 + $0x2448] sm:$0xff]  ;;  %v8725_v30 = vpack.c.bf16 %v2859_v1, %v2851_v20  ;;  %v9237_v35 = vpack.c.bf16 %v2861_v59, %v2853_v2  ;;  %v9251_v20 = vpack.c.bf16 %v2926_v38, %v2918_v11  ;;  %v2925_v1 = vld [vmem:[%s11116_s15 + $0x25d0] sm:$0xff]  ;;  %v2934_v59 = vld [vmem:[%s11116_s15 + $0x2618] sm:$0xff] }
 0x602   : > { %v8727_v39 = vpack.c.bf16 %v2876_v60, %v2868_v18  ;;  %v2932_v2 = vld [vmem:[%s11116_s15 + $0x2608] sm:$0xff]  ;;  %v2942_v18 = vld [vmem:[%s11116_s15 + $0x2658] sm:$0xff] }
 0x603   : > { %8710 = vmatpush1.bf16.msra.mxu0 %v8709_v47  ;;  %v2867_v47 = vld [vmem:[%s11116_s15 + $0x2400] sm:$0xff] }
 0x604   : > { %9222 = vmatpush1.bf16.msra.mxu1 %v9221_v48  ;;  %8712 = vmatprep.subr.bf16.mxu0 %v8711_v49  ;;  %v2875_v48 = vld [vmem:[%s11116_s15 + $0x2440] sm:$0xff]  ;;  %v2869_v49 = vld [vmem:[%s11116_s15 + $0x2410] sm:$0xff] }
 0x605   : > { %9224 = vmatprep.subr.bf16.mxu1 %v9223_v6  ;;  %v2892_v6 = vld [vmem:[%s11116_s15 + $0x24c8] sm:$0xff]  ;;  %v8729_v9 = vpack.c.bf16 %v2875_v48, %v2867_v47  ;;  %v9241_v10 = vpack.c.bf16 %v2877_v51, %v2869_v49  ;;  %v9255_v47 = vpack.c.bf16 %v2942_v18, %v2934_v59  ;;  %v2941_v48 = vld [vmem:[%s11116_s15 + $0x2650] sm:$0xff]  ;;  %v2950_v51 = vld [vmem:[%s11116_s15 + $0x2698] sm:$0xff] }
 0x606   : > { %v8731_v12 = vpack.c.bf16 %v2892_v6, %v2884_v53  ;;  %v2948_v49 = vld [vmem:[%s11116_s15 + $0x2688] sm:$0xff]  ;;  %v2958_v53 = vld [vmem:[%s11116_s15 + $0x26d8] sm:$0xff] }
 0x607   : > { %8714 = vmatpush1.bf16.msra.mxu0 %v8713_v14  ;;  %v2883_v14 = vld [vmem:[%s11116_s15 + $0x2480] sm:$0xff] }
 0x608   : > { %9226 = vmatpush1.bf16.msra.mxu1 %v9225_v21  ;;  %8716 = vmatprep.subr.bf16.mxu0 %v8715_v22  ;;  %v2891_v21 = vld [vmem:[%s11116_s15 + $0x24c0] sm:$0xff]  ;;  %v2885_v22 = vld [vmem:[%s11116_s15 + $0x2490] sm:$0xff] }
 0x609   : > { %9228 = vmatprep.subr.bf16.mxu1 %v9227_v52  ;;  %v2908_v52 = vld [vmem:[%s11116_s15 + $0x2548] sm:$0xff]  ;;  %v8733_v13 = vpack.c.bf16 %v2891_v21, %v2883_v14  ;;  %v9245_v31 = vpack.c.bf16 %v2893_v27, %v2885_v22  ;;  %v9259_v14 = vpack.c.bf16 %v2958_v53, %v2950_v51  ;;  %v2957_v21 = vld [vmem:[%s11116_s15 + $0x26d0] sm:$0xff]  ;;  %v2966_v27 = vld [vmem:[%s11116_s15 + $0x2718] sm:$0xff] }
 0x60a   : > { %v8735_v32 = vpack.c.bf16 %v2908_v52, %v2900_v28  ;;  %v2964_v22 = vld [vmem:[%s11116_s15 + $0x2708] sm:$0xff]  ;;  %v2974_v28 = vld [vmem:[%s11116_s15 + $0x2758] sm:$0xff] }
 0x60b   : > { %8718 = vmatpush1.bf16.msra.mxu0 %v8717_v19  ;;  %v2899_v19 = vld [vmem:[%s11116_s15 + $0x2500] sm:$0xff] }
 0x60c   : > { %9230 = vmatpush1.bf16.msra.mxu1 %v9229_v25  ;;  %8720 = vmatprep.subr.bf16.mxu0 %v8719_v29  ;;  %v2907_v25 = vld [vmem:[%s11116_s15 + $0x2540] sm:$0xff]  ;;  %v2901_v29 = vld [vmem:[%s11116_s15 + $0x2510] sm:$0xff] }
 0x60d   : > { %9232 = vmatprep.subr.bf16.mxu1 %v9231_v36  ;;  %v2924_v36 = vld [vmem:[%s11116_s15 + $0x25c8] sm:$0xff]  ;;  %v8737_v40 = vpack.c.bf16 %v2907_v25, %v2899_v19  ;;  %v9249_v41 = vpack.c.bf16 %v2909_v33, %v2901_v29  ;;  %v9263_v19 = vpack.c.bf16 %v2974_v28, %v2966_v27  ;;  %v2973_v25 = vld [vmem:[%s11116_s15 + $0x2750] sm:$0xff]  ;;  %v2982_v33 = vld [vmem:[%s11116_s15 + $0x2798] sm:$0xff] }
 0x60e   : > { %v8739_v44 = vpack.c.bf16 %v2924_v36, %v2916_v34  ;;  %v2980_v29 = vld [vmem:[%s11116_s15 + $0x2788] sm:$0xff]  ;;  %v2990_v34 = vld [vmem:[%s11116_s15 + $0x27d8] sm:$0xff] }
 0x60f   : > { %8722 = vmatpush1.bf16.msra.mxu0 %v8721_v46  ;;  %v2915_v46 = vld [vmem:[%s11116_s15 + $0x2580] sm:$0xff]  ;;  %v3038_v27 = vld [vmem:[%s11116_s15 + $0x2958] sm:$0xff] }
 0x610   : > { %9234 = vmatpush1.bf16.msra.mxu1 %v9233_v54  ;;  %8724 = vmatprep.subr.bf16.mxu0 %v8723_v55  ;;  %v2923_v54 = vld [vmem:[%s11116_s15 + $0x25c0] sm:$0xff]  ;;  %v2917_v55 = vld [vmem:[%s11116_s15 + $0x2590] sm:$0xff] }
 0x611   : > { %9236 = vmatprep.subr.bf16.mxu1 %v9235_v57  ;;  %v2940_v57 = vld [vmem:[%s11116_s15 + $0x2648] sm:$0xff]  ;;  %v8741_v60 = vpack.c.bf16 %v2923_v54, %v2915_v46  ;;  %v9253_v63 = vpack.c.bf16 %v2925_v1, %v2917_v55  ;;  %v9267_v46 = vpack.c.bf16 %v2990_v34, %v2982_v33  ;;  %v2989_v54 = vld [vmem:[%s11116_s15 + $0x27d0] sm:$0xff]  ;;  %v3801_v1 = vcombine.high %v12319_v17, %v12319_v17  ;;  %v3054_v33 = vld [vmem:[%s11116_s15 + $0x29d8] sm:$0xff] }
 0x612   : > { %v8743_v0 = vpack.c.bf16 %v2940_v57, %v2932_v2  ;;  %v2996_v55 = vld [vmem:[%s11116_s15 + $0x2808] sm:$0xff]  ;;  %v2998_v2 = vld [vmem:[%s11116_s15 + $0x2818] sm:$0xff]  ;;  %v3005_v17 = vld [vmem:[%s11116_s15 + $0x2850] sm:$0xff] }
 0x613   : > { %8726 = vmatpush1.bf16.msra.mxu0 %v8725_v30  ;;  %v2931_v30 = vld [vmem:[%s11116_s15 + $0x2600] sm:$0xff]  ;;  %v3006_v57 = vld [vmem:[%s11116_s15 + $0x2858] sm:$0xff] }
 0x614   : > { %9238 = vmatpush1.bf16.msra.mxu1 %v9237_v35  ;;  %8728 = vmatprep.subr.bf16.mxu0 %v8727_v39  ;;  %v2939_v35 = vld [vmem:[%s11116_s15 + $0x2640] sm:$0xff]  ;;  %v2933_v39 = vld [vmem:[%s11116_s15 + $0x2610] sm:$0xff] }
 0x615   : > { %9240 = vmatprep.subr.bf16.mxu1 %v9239_v45  ;;  %v2956_v45 = vld [vmem:[%s11116_s15 + $0x26c8] sm:$0xff]  ;;  %v8745_v6 = vpack.c.bf16 %v2939_v35, %v2931_v30  ;;  %v9257_v7 = vpack.c.bf16 %v2941_v48, %v2933_v39  ;;  %v2997_v30 = vld [vmem:[%s11116_s15 + $0x2810] sm:$0xff]  ;;  %v9271_v35 = vpack.c.bf16 %v3006_v57, %v2998_v2  ;;  %v12470_v48 = vrot.slane %v3801_v1, %v11834_v37  ;;  %v3070_v1 = vld [vmem:[%s11116_s15 + $0x2a58] sm:$0xff] }
 0x616   : > { %v8747_v8 = vpack.c.bf16 %v2956_v45, %v2948_v49  ;;  %v3012_v39 = vld [vmem:[%s11116_s15 + $0x2888] sm:$0xff]  ;;  %v3014_v49 = vld [vmem:[%s11116_s15 + $0x2898] sm:$0xff]  ;;  %v9273_v53 = vpack.c.bf16 %v3005_v17, %v2997_v30  ;;  %v3069_v30 = vld [vmem:[%s11116_s15 + $0x2a50] sm:$0xff] }
 0x617   : > { %8730 = vmatpush1.bf16.msra.mxu0 %v8729_v9  ;;  %v2947_v9 = vld [vmem:[%s11116_s15 + $0x2680] sm:$0xff]  ;;  %v3022_v45 = vld [vmem:[%s11116_s15 + $0x28d8] sm:$0xff]  ;;  %v3084_v17 = vld [vmem:[%s11116_s15 + $0x2ac8] sm:$0xff] }
 0x618   : > { %9242 = vmatpush1.bf16.msra.mxu1 %v9241_v10  ;;  %8732 = vmatprep.subr.bf16.mxu0 %v8731_v12  ;;  %v2955_v10 = vld [vmem:[%s11116_s15 + $0x26c0] sm:$0xff]  ;;  %v2949_v12 = vld [vmem:[%s11116_s15 + $0x2690] sm:$0xff] }
 0x619   : > { %9244 = vmatprep.subr.bf16.mxu1 %v9243_v24  ;;  %v2972_v24 = vld [vmem:[%s11116_s15 + $0x2748] sm:$0xff]  ;;  %v8749_v52 = vpack.c.bf16 %v2955_v10, %v2947_v9  ;;  %v9261_v56 = vpack.c.bf16 %v2957_v21, %v2949_v12  ;;  %v3013_v9 = vld [vmem:[%s11116_s15 + $0x2890] sm:$0xff]  ;;  %v9275_v10 = vpack.c.bf16 %v3022_v45, %v3014_v49 }
 0x61a   : > { %v8751_v62 = vpack.c.bf16 %v2972_v24, %v2964_v22  ;;  %v3021_v12 = vld [vmem:[%s11116_s15 + $0x28d0] sm:$0xff]  ;;  %v3036_v21 = vld [vmem:[%s11116_s15 + $0x2948] sm:$0xff]  ;;  %v12482_v22 = vcombine.high %v12470_v48, %v12470_v48  ;;  %v3030_v24 = vld [vmem:[%s11116_s15 + $0x2918] sm:$0xff] }
 0x61b   : > { %8734 = vmatpush1.bf16.msra.mxu0 %v8733_v13  ;;  %v2963_v13 = vld [vmem:[%s11116_s15 + $0x2700] sm:$0xff] }
 0x61c   : > { %9246 = vmatpush1.bf16.msra.mxu1 %v9245_v31  ;;  %8736 = vmatprep.subr.bf16.mxu0 %v8735_v32  ;;  %v2971_v31 = vld [vmem:[%s11116_s15 + $0x2740] sm:$0xff]  ;;  %v2965_v32 = vld [vmem:[%s11116_s15 + $0x2710] sm:$0xff] }
 0x61d   : > { %9248 = vmatprep.subr.bf16.mxu1 %v9247_v5  ;;  %v2988_v5 = vld [vmem:[%s11116_s15 + $0x27c8] sm:$0xff]  ;;  %v8753_v36 = vpack.c.bf16 %v2971_v31, %v2963_v13  ;;  %v9265_v11 = vpack.c.bf16 %v2973_v25, %v2965_v32  ;;  %v3035_v13 = vld [vmem:[%s11116_s15 + $0x2940] sm:$0xff]  ;;  %v3029_v31 = vld [vmem:[%s11116_s15 + $0x2910] sm:$0xff]  ;;  %v9279_v32 = vpack.c.bf16 %v3038_v27, %v3030_v24 }
 0x61e   : > { %v8755_v38 = vpack.c.bf16 %v2988_v5, %v2980_v29  ;;  %v3044_v25 = vld [vmem:[%s11116_s15 + $0x2988] sm:$0xff]  ;;  %v3046_v5 = vld [vmem:[%s11116_s15 + $0x2998] sm:$0xff] }
 0x61f   : > { %8738 = vmatpush1.bf16.msra.mxu0 %v8737_v40  ;;  %v2979_v40 = vld [vmem:[%s11116_s15 + $0x2780] sm:$0xff]  ;;  %v3052_v29 = vld [vmem:[%s11116_s15 + $0x29c8] sm:$0xff] }
 0x620   : > { %9250 = vmatpush1.bf16.msra.mxu1 %v9249_v41  ;;  %8740 = vmatprep.subr.bf16.mxu0 %v8739_v44  ;;  %v2987_v41 = vld [vmem:[%s11116_s15 + $0x27c0] sm:$0xff]  ;;  %v2981_v44 = vld [vmem:[%s11116_s15 + $0x2790] sm:$0xff] }
 0x621   : > { %9252 = vmatprep.subr.bf16.mxu1 %v9251_v20  ;;  %v3004_v20 = vld [vmem:[%s11116_s15 + $0x2848] sm:$0xff]  ;;  %v8757_v59 = vpack.c.bf16 %v2987_v41, %v2979_v40  ;;  %v9269_v18 = vpack.c.bf16 %v2989_v54, %v2981_v44  ;;  %v3051_v40 = vld [vmem:[%s11116_s15 + $0x29c0] sm:$0xff]  ;;  %v3045_v41 = vld [vmem:[%s11116_s15 + $0x2990] sm:$0xff]  ;;  %v9283_v44 = vpack.c.bf16 %v3054_v33, %v3046_v5 }
 0x622   : > { %v3060_v54 = vld [vmem:[%s11116_s15 + $0x2a08] sm:$0xff] }
 0x623   : > { %8742 = vmatpush1.bf16.msra.mxu0 %v8741_v60  ;;  %v8759_v60 = vpack.c.bf16 %v3004_v20, %v2996_v55  ;;  %v3068_v55 = vld [vmem:[%s11116_s15 + $0x2a48] sm:$0xff]  ;;  %v3062_v20 = vld [vmem:[%s11116_s15 + $0x2a18] sm:$0xff] }
 0x624   : > { %9254 = vmatpush1.bf16.msra.mxu1 %v9253_v63  ;;  %8744 = vmatprep.subr.bf16.mxu0 %v8743_v0  ;;  %v2995_v63 = vld [vmem:[%s11116_s15 + $0x2800] sm:$0xff] }
 0x625   : > { %9256 = vmatprep.subr.bf16.mxu1 %v9255_v47  ;;  %v3003_v0 = vld [vmem:[%s11116_s15 + $0x2840] sm:$0xff]  ;;  %v3020_v47 = vld [vmem:[%s11116_s15 + $0x28c8] sm:$0xff] }
 0x626   : > { %v8761_v51 = vpack.c.bf16 %v3003_v0, %v2995_v63  ;;  %v3061_v63 = vld [vmem:[%s11116_s15 + $0x2a10] sm:$0xff]  ;;  %v9287_v0 = vpack.c.bf16 %v3070_v1, %v3062_v20 }
 0x627   : > { %8746 = vmatpush1.bf16.msra.mxu0 %v8745_v6  ;;  %v8763_v6 = vpack.c.bf16 %v3020_v47, %v3012_v39  ;;  %v3078_v39 = vld [vmem:[%s11116_s15 + $0x2a98] sm:$0xff]  ;;  %v9289_v45 = vpack.c.bf16 %v3069_v30, %v3061_v63  ;;  %v3133_v63 = vld [vmem:[%s11116_s15 + $0x2c50] sm:$0xff]  ;;  %v3148_v30 = vld [vmem:[%s11116_s15 + $0x2cc8] sm:$0xff] }
 0x628   : > { %9258 = vmatpush1.bf16.msra.mxu1 %v9257_v7  ;;  %8748 = vmatprep.subr.bf16.mxu0 %v8747_v8  ;;  %v3011_v7 = vld [vmem:[%s11116_s15 + $0x2880] sm:$0xff]  ;;  %v3086_v47 = vld [vmem:[%s11116_s15 + $0x2ad8] sm:$0xff] }
 0x629   : > { %9260 = vmatprep.subr.bf16.mxu1 %v9259_v14  ;;  %v3019_v8 = vld [vmem:[%s11116_s15 + $0x28c0] sm:$0xff]  ;;  %v3028_v14 = vld [vmem:[%s11116_s15 + $0x2908] sm:$0xff] }
 0x62a   : > { %v8765_v28 = vpack.c.bf16 %v3019_v8, %v3011_v7  ;;  %v3077_v7 = vld [vmem:[%s11116_s15 + $0x2a90] sm:$0xff]  ;;  %v9291_v8 = vpack.c.bf16 %v3086_v47, %v3078_v39 }
 0x62b   : > { %8750 = vmatpush1.bf16.msra.mxu0 %v8749_v52  ;;  %v9277_v52 = vpack.c.bf16 %v3021_v12, %v3013_v9  ;;  %v3085_v9 = vld [vmem:[%s11116_s15 + $0x2ad0] sm:$0xff]  ;;  %v3100_v12 = vld [vmem:[%s11116_s15 + $0x2b48] sm:$0xff] }
 0x62c   : > { %9262 = vmatpush1.bf16.msra.mxu1 %v9261_v56  ;;  %8752 = vmatprep.subr.bf16.mxu0 %v8751_v62  ;;  %v8767_v56 = vpack.c.bf16 %v3036_v21, %v3028_v14  ;;  %v3027_v62 = vld [vmem:[%s11116_s15 + $0x2900] sm:$0xff]  ;;  %v3094_v14 = vld [vmem:[%s11116_s15 + $0x2b18] sm:$0xff]  ;;  %v9293_v27 = vpack.c.bf16 %v3085_v9, %v3077_v7  ;;  %v3149_v7 = vld [vmem:[%s11116_s15 + $0x2cd0] sm:$0xff] }
 0x62d   : > { %9264 = vmatprep.subr.bf16.mxu1 %v9263_v19  ;;  %v3037_v19 = vld [vmem:[%s11116_s15 + $0x2950] sm:$0xff]  ;;  %v8769_v34 = vpack.c.bf16 %v3035_v13, %v3027_v62  ;;  %v3102_v21 = vld [vmem:[%s11116_s15 + $0x2b58] sm:$0xff]  ;;  %v3164_v9 = vld [vmem:[%s11116_s15 + $0x2d48] sm:$0xff] }
 0x62e   : > { %v3093_v62 = vld [vmem:[%s11116_s15 + $0x2b10] sm:$0xff]  ;;  %v9295_v13 = vpack.c.bf16 %v3102_v21, %v3094_v14 }
 0x62f   : > { %8754 = vmatpush1.bf16.msra.mxu0 %v8753_v36  ;;  %v9281_v36 = vpack.c.bf16 %v3037_v19, %v3029_v31  ;;  %v3101_v31 = vld [vmem:[%s11116_s15 + $0x2b50] sm:$0xff]  ;;  %v3116_v19 = vld [vmem:[%s11116_s15 + $0x2bc8] sm:$0xff] }
 0x630   : > { %9266 = vmatpush1.bf16.msra.mxu1 %v9265_v11  ;;  %8756 = vmatprep.subr.bf16.mxu0 %v8755_v38  ;;  %v8771_v11 = vpack.c.bf16 %v3052_v29, %v3044_v25  ;;  %v3043_v38 = vld [vmem:[%s11116_s15 + $0x2980] sm:$0xff]  ;;  %v3110_v25 = vld [vmem:[%s11116_s15 + $0x2b98] sm:$0xff]  ;;  %v9297_v33 = vpack.c.bf16 %v3101_v31, %v3093_v62  ;;  %v3165_v62 = vld [vmem:[%s11116_s15 + $0x2d50] sm:$0xff] }
 0x631   : > { %9268 = vmatprep.subr.bf16.mxu1 %v9267_v46  ;;  %v3053_v46 = vld [vmem:[%s11116_s15 + $0x29d0] sm:$0xff]  ;;  %v8773_v2 = vpack.c.bf16 %v3051_v40, %v3043_v38  ;;  %v3118_v29 = vld [vmem:[%s11116_s15 + $0x2bd8] sm:$0xff]  ;;  %v3180_v31 = vld [vmem:[%s11116_s15 + $0x2dc8] sm:$0xff] }
 0x632   : > { %v9285_v57 = vpack.c.bf16 %v3053_v46, %v3045_v41  ;;  %v3109_v38 = vld [vmem:[%s11116_s15 + $0x2b90] sm:$0xff]  ;;  %v9299_v40 = vpack.c.bf16 %v3118_v29, %v3110_v25  ;;  %v3132_v46 = vld [vmem:[%s11116_s15 + $0x2c48] sm:$0xff] }
 0x633   : > { %8758 = vmatpush1.bf16.msra.mxu0 %v8757_v59  ;;  %v8775_v59 = vpack.c.bf16 %v3068_v55, %v3060_v54  ;;  %v3117_v41 = vld [vmem:[%s11116_s15 + $0x2bd0] sm:$0xff]  ;;  %v3126_v54 = vld [vmem:[%s11116_s15 + $0x2c18] sm:$0xff] }
 0x634   : > { %9270 = vmatpush1.bf16.msra.mxu1 %v9269_v18  ;;  %8760 = vmatprep.subr.bf16.mxu0 %v8759_v60  ;;  %v3059_v18 = vld [vmem:[%s11116_s15 + $0x2a00] sm:$0xff]  ;;  %v3134_v55 = vld [vmem:[%s11116_s15 + $0x2c58] sm:$0xff]  ;;  %v9301_v1 = vpack.c.bf16 %v3117_v41, %v3109_v38  ;;  %v3181_v38 = vld [vmem:[%s11116_s15 + $0x2dd0] sm:$0xff] }
 0x635   : > { %9272 = vmatprep.subr.bf16.mxu1 %v9271_v35  ;;  %v3067_v60 = vld [vmem:[%s11116_s15 + $0x2a40] sm:$0xff]  ;;  %v3076_v35 = vld [vmem:[%s11116_s15 + $0x2a88] sm:$0xff] }
 0x636   : > { %4200 = vmatmul.mubr.f32.vlgmr.msra.gmra.mrb[0].mxu0 %v12329_v16  ;;  %v8777_v49 = vpack.c.bf16 %v3067_v60, %v3059_v18  ;;  %v3125_v18 = vld [vmem:[%s11116_s15 + $0x2c10] sm:$0xff]  ;;  %v9303_v60 = vpack.c.bf16 %v3134_v55, %v3126_v54  ;;  %v3196_v41 = vld [vmem:[%s11116_s15 + $0x2e48] sm:$0xff] }
 0x637   : > { %8762 = vmatpush1.bf16.msra.mxu0 %v8761_v51  ;;  %4768 = vmatmul.mubr.f32.vlgmr.msra.gmra.mrb[0].mxu1 %v12329_v16  ;;  %v8779_v51 = vpack.c.bf16 %v3084_v17, %v3076_v35  ;;  %v3142_v35 = vld [vmem:[%s11116_s15 + $0x2c98] sm:$0xff]  ;;  %v9305_v47 = vpack.c.bf16 %v3133_v63, %v3125_v18  ;;  %v3197_v18 = vld [vmem:[%s11116_s15 + $0x2e50] sm:$0xff]  ;;  %v3212_v63 = vld [vmem:[%s11116_s15 + $0x2ec8] sm:$0xff] }
 0x638   : > { %9274 = vmatpush1.bf16.msra.mxu1 %v9273_v53  ;;  %8764 = vmatprep.subr.bf16.mxu0 %v8763_v6  ;;  %v3075_v53 = vld [vmem:[%s11116_s15 + $0x2a80] sm:$0xff]  ;;  %v3150_v17 = vld [vmem:[%s11116_s15 + $0x2cd8] sm:$0xff] }
 0x639   : > { %9276 = vmatprep.subr.bf16.mxu1 %v9275_v10  ;;  %4270 = vmatprep.mubr.f32.mxu0 %v12482_v22  ;;  %v3083_v6 = vld [vmem:[%s11116_s15 + $0x2ac0] sm:$0xff]  ;;  %v3092_v10 = vld [vmem:[%s11116_s15 + $0x2b08] sm:$0xff] }
 0x63a   : > { %4838 = vmatprep.mubr.f32.mxu1 %v12482_v22  ;;  %v8781_v24 = vpack.c.bf16 %v3083_v6, %v3075_v53  ;;  %v3141_v53 = vld [vmem:[%s11116_s15 + $0x2c90] sm:$0xff]  ;;  %v9307_v6 = vpack.c.bf16 %v3150_v17, %v3142_v35 }
 0x63b   : > { %8766 = vmatpush1.bf16.msra.mxu0 %v8765_v28  ;;  %v8783_v28 = vpack.c.bf16 %v3100_v12, %v3092_v10  ;;  %v3158_v10 = vld [vmem:[%s11116_s15 + $0x2d18] sm:$0xff]  ;;  %v9309_v21 = vpack.c.bf16 %v3149_v7, %v3141_v53  ;;  %v3213_v53 = vld [vmem:[%s11116_s15 + $0x2ed0] sm:$0xff]  ;;  %v3228_v7 = vld [vmem:[%s11116_s15 + $0x2f48] sm:$0xff] }
 0x63c   : > { %9278 = vmatpush1.bf16.msra.mxu1 %v9277_v52  ;;  %8768 = vmatprep.subr.bf16.mxu0 %v8767_v56  ;;  %v3091_v52 = vld [vmem:[%s11116_s15 + $0x2b00] sm:$0xff]  ;;  %v3166_v12 = vld [vmem:[%s11116_s15 + $0x2d58] sm:$0xff] }
 0x63d   : > { %9280 = vmatprep.subr.bf16.mxu1 %v9279_v32  ;;  %v3099_v56 = vld [vmem:[%s11116_s15 + $0x2b40] sm:$0xff]  ;;  %v3108_v32 = vld [vmem:[%s11116_s15 + $0x2b88] sm:$0xff] }
 0x63e   : > { %v8785_v5 = vpack.c.bf16 %v3099_v56, %v3091_v52  ;;  %v3157_v52 = vld [vmem:[%s11116_s15 + $0x2d10] sm:$0xff]  ;;  %v9311_v56 = vpack.c.bf16 %v3166_v12, %v3158_v10 }
 0x63f   : > { %8770 = vmatpush1.bf16.msra.mxu0 %v8769_v34  ;;  %v8787_v34 = vpack.c.bf16 %v3116_v19, %v3108_v32  ;;  %v3174_v32 = vld [vmem:[%s11116_s15 + $0x2d98] sm:$0xff]  ;;  %v9313_v29 = vpack.c.bf16 %v3165_v62, %v3157_v52  ;;  %v3229_v52 = vld [vmem:[%s11116_s15 + $0x2f50] sm:$0xff]  ;;  %v3244_v62 = vld [vmem:[%s11116_s15 + $0x2fc8] sm:$0xff] }
 0x640   : > { %9282 = vmatpush1.bf16.msra.mxu1 %v9281_v36  ;;  %8772 = vmatprep.subr.bf16.mxu0 %v8771_v11  ;;  %v3107_v36 = vld [vmem:[%s11116_s15 + $0x2b80] sm:$0xff]  ;;  %v3182_v19 = vld [vmem:[%s11116_s15 + $0x2dd8] sm:$0xff] }
 0x641   : > { %9284 = vmatprep.subr.bf16.mxu1 %v9283_v44  ;;  %v3115_v11 = vld [vmem:[%s11116_s15 + $0x2bc0] sm:$0xff]  ;;  %v3124_v44 = vld [vmem:[%s11116_s15 + $0x2c08] sm:$0xff] }
 0x642   : > { %v8789_v20 = vpack.c.bf16 %v3115_v11, %v3107_v36  ;;  %v3173_v36 = vld [vmem:[%s11116_s15 + $0x2d90] sm:$0xff]  ;;  %v9315_v11 = vpack.c.bf16 %v3182_v19, %v3174_v32 }
 0x643   : > { %8774 = vmatpush1.bf16.msra.mxu0 %v8773_v2  ;;  %v8791_v2 = vpack.c.bf16 %v3132_v46, %v3124_v44  ;;  %v3190_v44 = vld [vmem:[%s11116_s15 + $0x2e18] sm:$0xff]  ;;  %v9317_v55 = vpack.c.bf16 %v3181_v38, %v3173_v36  ;;  %v3245_v36 = vld [vmem:[%s11116_s15 + $0x2fd0] sm:$0xff]  ;;  %v3260_v38 = vld [vmem:[%s11116_s15 + $0x3048] sm:$0xff] }
 0x644   : > { %9286 = vmatpush1.bf16.msra.mxu1 %v9285_v57  ;;  %8776 = vmatprep.subr.bf16.mxu0 %v8775_v59  ;;  %v3123_v57 = vld [vmem:[%s11116_s15 + $0x2c00] sm:$0xff]  ;;  %v3198_v46 = vld [vmem:[%s11116_s15 + $0x2e58] sm:$0xff] }
 0x645   : > { %9288 = vmatprep.subr.bf16.mxu1 %v9287_v0  ;;  %v3131_v59 = vld [vmem:[%s11116_s15 + $0x2c40] sm:$0xff]  ;;  %v3140_v0 = vld [vmem:[%s11116_s15 + $0x2c88] sm:$0xff] }
 0x646   : > { %v8793_v39 = vpack.c.bf16 %v3131_v59, %v3123_v57  ;;  %v3189_v57 = vld [vmem:[%s11116_s15 + $0x2e10] sm:$0xff]  ;;  %v9319_v59 = vpack.c.bf16 %v3198_v46, %v3190_v44  ;;  %v12603_v44 = vld [vmem:[%s11844_s29 + $0x18] sm:$0xff] }
 0x647   : > { %8778 = vmatpush1.bf16.msra.mxu0 %v8777_v49  ;;  %v8795_v49 = vpack.c.bf16 %v3148_v30, %v3140_v0  ;;  %v3206_v0 = vld [vmem:[%s11116_s15 + $0x2e98] sm:$0xff]  ;;  %v9321_v17 = vpack.c.bf16 %v3197_v18, %v3189_v57  ;;  %v3268_v18 = vld [vmem:[%s11116_s15 + $0x3088] sm:$0xff] }
 0x648   : > { %9290 = vmatpush1.bf16.msra.mxu1 %v9289_v45  ;;  %8780 = vmatprep.subr.bf16.mxu0 %v8779_v51  ;;  %v3139_v45 = vld [vmem:[%s11116_s15 + $0x2c80] sm:$0xff]  ;;  %v3214_v30 = vld [vmem:[%s11116_s15 + $0x2ed8] sm:$0xff] }
 0x649   : > { %9292 = vmatprep.subr.bf16.mxu1 %v9291_v8  ;;  %v3147_v51 = vld [vmem:[%s11116_s15 + $0x2cc0] sm:$0xff]  ;;  %v3156_v8 = vld [vmem:[%s11116_s15 + $0x2d08] sm:$0xff] }
 0x64a   : > { %v8797_v14 = vpack.c.bf16 %v3147_v51, %v3139_v45  ;;  %v3205_v45 = vld [vmem:[%s11116_s15 + $0x2e90] sm:$0xff]  ;;  %v9323_v51 = vpack.c.bf16 %v3214_v30, %v3206_v0  ;;  %v3270_v0 = vld [vmem:[%s11116_s15 + $0x3098] sm:$0xff] }
 0x64b   : > { %8782 = vmatpush1.bf16.msra.mxu0 %v8781_v24  ;;  %v8799_v24 = vpack.c.bf16 %v3164_v9, %v3156_v8  ;;  %v3222_v8 = vld [vmem:[%s11116_s15 + $0x2f18] sm:$0xff]  ;;  %v9325_v12 = vpack.c.bf16 %v3213_v53, %v3205_v45  ;;  %v3269_v45 = vld [vmem:[%s11116_s15 + $0x3090] sm:$0xff] }
 0x64c   : > { %9294 = vmatpush1.bf16.msra.mxu1 %v9293_v27  ;;  %8784 = vmatprep.subr.bf16.mxu0 %v8783_v28  ;;  %v3155_v27 = vld [vmem:[%s11116_s15 + $0x2d00] sm:$0xff]  ;;  %v3230_v9 = vld [vmem:[%s11116_s15 + $0x2f58] sm:$0xff]  ;;  %v3277_v53 = vld [vmem:[%s11116_s15 + $0x30d0] sm:$0xff] }
 0x64d   : > { %9296 = vmatprep.subr.bf16.mxu1 %v9295_v13  ;;  %v3163_v28 = vld [vmem:[%s11116_s15 + $0x2d40] sm:$0xff]  ;;  %v3172_v13 = vld [vmem:[%s11116_s15 + $0x2d88] sm:$0xff]  ;;  %v3278_v30 = vld [vmem:[%s11116_s15 + $0x30d8] sm:$0xff] }
 0x64e   : > { %v8801_v25 = vpack.c.bf16 %v3163_v28, %v3155_v27  ;;  %v3221_v27 = vld [vmem:[%s11116_s15 + $0x2f10] sm:$0xff]  ;;  %v9327_v28 = vpack.c.bf16 %v3230_v9, %v3222_v8  ;;  %v3286_v9 = vld [vmem:[%s11116_s15 + $0x3118] sm:$0xff] }
 0x64f   : > { %8786 = vmatpush1.bf16.msra.mxu0 %v8785_v5  ;;  %v8803_v5 = vpack.c.bf16 %v3180_v31, %v3172_v13  ;;  %v3238_v13 = vld [vmem:[%s11116_s15 + $0x2f98] sm:$0xff]  ;;  %v9329_v19 = vpack.c.bf16 %v3229_v52, %v3221_v27  ;;  %v3291_v27 = vld [vmem:[%s11116_s15 + $0x3140] sm:$0xff] }
 0x650   : > { %9298 = vmatpush1.bf16.msra.mxu1 %v9297_v33  ;;  %8788 = vmatprep.subr.bf16.mxu0 %v8787_v34  ;;  %v3171_v33 = vld [vmem:[%s11116_s15 + $0x2d80] sm:$0xff]  ;;  %v3246_v31 = vld [vmem:[%s11116_s15 + $0x2fd8] sm:$0xff] }
 0x651   : > { %9300 = vmatprep.subr.bf16.mxu1 %v9299_v40  ;;  %v3179_v34 = vld [vmem:[%s11116_s15 + $0x2dc0] sm:$0xff]  ;;  %v3188_v40 = vld [vmem:[%s11116_s15 + $0x2e08] sm:$0xff] }
 0x652   : > { %v8805_v54 = vpack.c.bf16 %v3179_v34, %v3171_v33  ;;  %v3237_v33 = vld [vmem:[%s11116_s15 + $0x2f90] sm:$0xff]  ;;  %v9331_v34 = vpack.c.bf16 %v3246_v31, %v3238_v13  ;;  %v3308_v13 = vld [vmem:[%s11116_s15 + $0x31c8] sm:$0xff]  ;;  %v3302_v31 = vld [vmem:[%s11116_s15 + $0x3198] sm:$0xff] }
 0x653   : > { %8790 = vmatpush1.bf16.msra.mxu0 %v8789_v20  ;;  %v8807_v20 = vpack.c.bf16 %v3196_v41, %v3188_v40  ;;  %v3254_v40 = vld [vmem:[%s11116_s15 + $0x3018] sm:$0xff] }
 0x654   : > { %9302 = vmatpush1.bf16.msra.mxu1 %v9301_v1  ;;  %8792 = vmatprep.subr.bf16.mxu0 %v8791_v2  ;;  %v3187_v1 = vld [vmem:[%s11116_s15 + $0x2e00] sm:$0xff]  ;;  %v3262_v41 = vld [vmem:[%s11116_s15 + $0x3058] sm:$0xff] }
 0x655   : > { %9304 = vmatprep.subr.bf16.mxu1 %v9303_v60  ;;  %v3195_v2 = vld [vmem:[%s11116_s15 + $0x2e40] sm:$0xff]  ;;  %v3204_v60 = vld [vmem:[%s11116_s15 + $0x2e88] sm:$0xff]  ;;  %v9335_v57 = vpack.c.bf16 %v3262_v41, %v3254_v40  ;;  %v3318_v41 = vld [vmem:[%s11116_s15 + $0x3218] sm:$0xff] }
 0x656   : > { %v8809_v35 = vpack.c.bf16 %v3195_v2, %v3187_v1  ;;  %v3259_v1 = vld [vmem:[%s11116_s15 + $0x3040] sm:$0xff]  ;;  %v3253_v2 = vld [vmem:[%s11116_s15 + $0x3010] sm:$0xff]  ;;  %v3324_v40 = vld [vmem:[%s11116_s15 + $0x3248] sm:$0xff] }
 0x657   : > { %8794 = vmatpush1.bf16.msra.mxu0 %v8793_v39  ;;  %v8811_v39 = vpack.c.bf16 %v3212_v63, %v3204_v60  ;;  %v3276_v60 = vld [vmem:[%s11116_s15 + $0x30c8] sm:$0xff]  ;;  %v12613_v63 = vrot.slane %v12603_v44, %v11834_v37 }
 0x658   : > { %9306 = vmatpush1.bf16.msra.mxu1 %v9305_v47  ;;  %8796 = vmatprep.subr.bf16.mxu0 %v8795_v49  ;;  %v3203_v47 = vld [vmem:[%s11116_s15 + $0x2e80] sm:$0xff] }
 0x659   : > { %9308 = vmatprep.subr.bf16.mxu1 %v9307_v6  ;;  %v3211_v49 = vld [vmem:[%s11116_s15 + $0x2ec0] sm:$0xff]  ;;  %v3220_v6 = vld [vmem:[%s11116_s15 + $0x2f08] sm:$0xff]  ;;  %v12625_v8 = vcombine.high %v12613_v63, %v12613_v63 }
 0x65a   : > { %v8813_v10 = vpack.c.bf16 %v3211_v49, %v3203_v47  ;;  %v3267_v47 = vld [vmem:[%s11116_s15 + $0x3080] sm:$0xff] }
 0x65b   : > { %8798 = vmatpush1.bf16.msra.mxu0 %v8797_v14  ;;  %v8815_v14 = vpack.c.bf16 %v3228_v7, %v3220_v6  ;;  %v3275_v49 = vld [vmem:[%s11116_s15 + $0x30c0] sm:$0xff]  ;;  %v3284_v6 = vld [vmem:[%s11116_s15 + $0x3108] sm:$0xff] }
 0x65c   : > { %9310 = vmatpush1.bf16.msra.mxu1 %v9309_v21  ;;  %8800 = vmatprep.subr.bf16.mxu0 %v8799_v24  ;;  %v3219_v21 = vld [vmem:[%s11116_s15 + $0x2f00] sm:$0xff]  ;;  %v3292_v7 = vld [vmem:[%s11116_s15 + $0x3148] sm:$0xff] }
 0x65d   : > { %9312 = vmatprep.subr.bf16.mxu1 %v9311_v56  ;;  %v3227_v24 = vld [vmem:[%s11116_s15 + $0x2f40] sm:$0xff]  ;;  %v3236_v56 = vld [vmem:[%s11116_s15 + $0x2f88] sm:$0xff] }
 0x65e   : > { %v8817_v32 = vpack.c.bf16 %v3227_v24, %v3219_v21  ;;  %v8831_v21 = vpack.c.bf16 %v3292_v7, %v3284_v6  ;;  %v3283_v24 = vld [vmem:[%s11116_s15 + $0x3100] sm:$0xff]  ;;  %v3341_v6 = vld [vmem:[%s11116_s15 + $0x32d0] sm:$0xff]  ;;  %v3348_v7 = vld [vmem:[%s11116_s15 + $0x3308] sm:$0xff] }
 0x65f   : > { %8802 = vmatpush1.bf16.msra.mxu0 %v8801_v25  ;;  %v8819_v25 = vpack.c.bf16 %v3244_v62, %v3236_v56  ;;  %v3293_v56 = vld [vmem:[%s11116_s15 + $0x3150] sm:$0xff]  ;;  %v3300_v62 = vld [vmem:[%s11116_s15 + $0x3188] sm:$0xff] }
 0x660   : > { %9314 = vmatpush1.bf16.msra.mxu1 %v9313_v29  ;;  %8804 = vmatprep.subr.bf16.mxu0 %v8803_v5  ;;  %v3235_v29 = vld [vmem:[%s11116_s15 + $0x2f80] sm:$0xff] }
 0x661   : > { %9316 = vmatprep.subr.bf16.mxu1 %v9315_v11  ;;  %v3243_v5 = vld [vmem:[%s11116_s15 + $0x2fc0] sm:$0xff]  ;;  %v3252_v11 = vld [vmem:[%s11116_s15 + $0x3008] sm:$0xff] }
 0x662   : > { %v8821_v46 = vpack.c.bf16 %v3243_v5, %v3235_v29  ;;  %v8835_v29 = vpack.c.bf16 %v3308_v13, %v3300_v62  ;;  %v3299_v5 = vld [vmem:[%s11116_s15 + $0x3180] sm:$0xff]  ;;  %v3357_v62 = vld [vmem:[%s11116_s15 + $0x3350] sm:$0xff]  ;;  %v3364_v13 = vld [vmem:[%s11116_s15 + $0x3388] sm:$0xff] }
 0x663   : > { %8806 = vmatpush1.bf16.msra.mxu0 %v8805_v54  ;;  %v9333_v54 = vpack.c.bf16 %v3245_v36, %v3237_v33  ;;  %v3307_v33 = vld [vmem:[%s11116_s15 + $0x31c0] sm:$0xff] }
 0x664   : > { %9318 = vmatpush1.bf16.msra.mxu1 %v9317_v55  ;;  %8808 = vmatprep.subr.bf16.mxu0 %v8807_v20  ;;  %v8823_v55 = vpack.c.bf16 %v3260_v38, %v3252_v11  ;;  %v3251_v20 = vld [vmem:[%s11116_s15 + $0x3000] sm:$0xff]  ;;  %v3309_v11 = vld [vmem:[%s11116_s15 + $0x31d0] sm:$0xff]  ;;  %v3316_v38 = vld [vmem:[%s11116_s15 + $0x3208] sm:$0xff] }
 0x665   : > { %9320 = vmatprep.subr.bf16.mxu1 %v9319_v59  ;;  %v3261_v59 = vld [vmem:[%s11116_s15 + $0x3050] sm:$0xff] }
 0x667   : > { %8810 = vmatpush1.bf16.msra.mxu0 %v8809_v35  ;;  %v8825_v35 = vpack.c.bf16 %v3259_v1, %v3251_v20  ;;  %v8839_v20 = vpack.c.bf16 %v3324_v40, %v3316_v38  ;;  %v3315_v1 = vld [vmem:[%s11116_s15 + $0x3200] sm:$0xff]  ;;  %v3373_v38 = vld [vmem:[%s11116_s15 + $0x33d0] sm:$0xff]  ;;  %v3380_v40 = vld [vmem:[%s11116_s15 + $0x3408] sm:$0xff] }
 0x668   : > { %9322 = vmatpush1.bf16.msra.mxu1 %v9321_v17  ;;  %8812 = vmatprep.subr.bf16.mxu0 %v8811_v39  ;;  %v9337_v17 = vpack.c.bf16 %v3261_v59, %v3253_v2  ;;  %v8827_v39 = vpack.c.bf16 %v3276_v60, %v3268_v18  ;;  %v3323_v2 = vld [vmem:[%s11116_s15 + $0x3240] sm:$0xff]  ;;  %v3325_v18 = vld [vmem:[%s11116_s15 + $0x3250] sm:$0xff]  ;;  %v3332_v60 = vld [vmem:[%s11116_s15 + $0x3288] sm:$0xff] }
 0x669   : > { %9324 = vmatprep.subr.bf16.mxu1 %v9323_v51  ;;  %v9339_v51 = vpack.c.bf16 %v3278_v30, %v3270_v0  ;;  %v3340_v0 = vld [vmem:[%s11116_s15 + $0x32c8] sm:$0xff]  ;;  %v3334_v30 = vld [vmem:[%s11116_s15 + $0x3298] sm:$0xff] }
 0x66b   : > { %8814 = vmatpush1.bf16.msra.mxu0 %v8813_v10  ;;  %v3294_v10 = vld [vmem:[%s11116_s15 + $0x3158] sm:$0xff] }
 0x66c   : > { %9326 = vmatpush1.bf16.msra.mxu1 %v9325_v12  ;;  %8816 = vmatprep.subr.bf16.mxu0 %v8815_v14  ;;  %v8829_v12 = vpack.c.bf16 %v3275_v49, %v3267_v47  ;;  %v9341_v14 = vpack.c.bf16 %v3277_v53, %v3269_v45  ;;  %v9343_v52 = vpack.c.bf16 %v3294_v10, %v3286_v9  ;;  %v3331_v49 = vld [vmem:[%s11116_s15 + $0x3280] sm:$0xff]  ;;  %v3356_v9 = vld [vmem:[%s11116_s15 + $0x3348] sm:$0xff]  ;;  %v3350_v10 = vld [vmem:[%s11116_s15 + $0x3318] sm:$0xff] }
 0x66d   : > { %9328 = vmatprep.subr.bf16.mxu1 %v9327_v28  ;;  %v3285_v28 = vld [vmem:[%s11116_s15 + $0x3110] sm:$0xff]  ;;  %v8843_v47 = vpack.c.bf16 %v3340_v0, %v3332_v60  ;;  %v3339_v45 = vld [vmem:[%s11116_s15 + $0x32c0] sm:$0xff]  ;;  %v3396_v0 = vld [vmem:[%s11116_s15 + $0x3488] sm:$0xff] }
 0x66e   : > { %v3389_v60 = vld [vmem:[%s11116_s15 + $0x3450] sm:$0xff] }
 0x66f   : > { %8818 = vmatpush1.bf16.msra.mxu0 %v8817_v32  ;;  %v3310_v32 = vld [vmem:[%s11116_s15 + $0x31d8] sm:$0xff] }
 0x670   : > { %9330 = vmatpush1.bf16.msra.mxu1 %v9329_v19  ;;  %8820 = vmatprep.subr.bf16.mxu0 %v8819_v25  ;;  %v8833_v19 = vpack.c.bf16 %v3291_v27, %v3283_v24  ;;  %v9345_v25 = vpack.c.bf16 %v3293_v56, %v3285_v28  ;;  %v9347_v36 = vpack.c.bf16 %v3310_v32, %v3302_v31  ;;  %v3347_v27 = vld [vmem:[%s11116_s15 + $0x3300] sm:$0xff]  ;;  %v3372_v31 = vld [vmem:[%s11116_s15 + $0x33c8] sm:$0xff]  ;;  %v3366_v32 = vld [vmem:[%s11116_s15 + $0x3398] sm:$0xff] }
 0x671   : > { %9332 = vmatprep.subr.bf16.mxu1 %v9331_v34  ;;  %v3301_v34 = vld [vmem:[%s11116_s15 + $0x3190] sm:$0xff]  ;;  %v8847_v24 = vpack.c.bf16 %v3356_v9, %v3348_v7  ;;  %v3355_v28 = vld [vmem:[%s11116_s15 + $0x3340] sm:$0xff]  ;;  %v3412_v9 = vld [vmem:[%s11116_s15 + $0x3508] sm:$0xff] }
 0x672   : > { %v3405_v7 = vld [vmem:[%s11116_s15 + $0x34d0] sm:$0xff] }
 0x673   : > { %8822 = vmatpush1.bf16.msra.mxu0 %v8821_v46  ;;  %v3326_v46 = vld [vmem:[%s11116_s15 + $0x3258] sm:$0xff] }
 0x674   : > { %9334 = vmatpush1.bf16.msra.mxu1 %v9333_v54  ;;  %8824 = vmatprep.subr.bf16.mxu0 %v8823_v55  ;;  %v8837_v54 = vpack.c.bf16 %v3307_v33, %v3299_v5  ;;  %v9349_v55 = vpack.c.bf16 %v3309_v11, %v3301_v34  ;;  %v9351_v59 = vpack.c.bf16 %v3326_v46, %v3318_v41  ;;  %v3363_v33 = vld [vmem:[%s11116_s15 + $0x3380] sm:$0xff]  ;;  %v3388_v41 = vld [vmem:[%s11116_s15 + $0x3448] sm:$0xff]  ;;  %v3382_v46 = vld [vmem:[%s11116_s15 + $0x3418] sm:$0xff] }
 0x675   : > { %9336 = vmatprep.subr.bf16.mxu1 %v9335_v57  ;;  %v3317_v57 = vld [vmem:[%s11116_s15 + $0x3210] sm:$0xff]  ;;  %v8851_v5 = vpack.c.bf16 %v3372_v31, %v3364_v13  ;;  %v3371_v34 = vld [vmem:[%s11116_s15 + $0x33c0] sm:$0xff]  ;;  %v3428_v31 = vld [vmem:[%s11116_s15 + $0x3588] sm:$0xff] }
 0x676   : > { %4271 = vmatmul.mubr.f32.vlgmr.msra.gmra.mrb[0].mxu0 %v12470_v48  ;;  %v3421_v13 = vld [vmem:[%s11116_s15 + $0x3550] sm:$0xff] }
 0x677   : > { %8826 = vmatpush1.bf16.msra.mxu0 %v8825_v35  ;;  %4839 = vmatmul.mubr.f32.vlgmr.msra.gmra.mrb[0].mxu1 %v12470_v48  ;;  %v3342_v35 = vld [vmem:[%s11116_s15 + $0x32d8] sm:$0xff] }
 0x678   : > { %9338 = vmatpush1.bf16.msra.mxu1 %v9337_v17  ;;  %8828 = vmatprep.subr.bf16.mxu0 %v8827_v39  ;;  %v8841_v17 = vpack.c.bf16 %v3323_v2, %v3315_v1  ;;  %v9353_v39 = vpack.c.bf16 %v3325_v18, %v3317_v57  ;;  %v9355_v53 = vpack.c.bf16 %v3342_v35, %v3334_v30  ;;  %v3379_v2 = vld [vmem:[%s11116_s15 + $0x3400] sm:$0xff]  ;;  %v3404_v30 = vld [vmem:[%s11116_s15 + $0x34c8] sm:$0xff]  ;;  %v3398_v35 = vld [vmem:[%s11116_s15 + $0x3498] sm:$0xff] }
 0x679   : > { %9340 = vmatprep.subr.bf16.mxu1 %v9339_v51  ;;  %4341 = vmatprep.mubr.f32.mxu0 %v12625_v8  ;;  %v3333_v51 = vld [vmem:[%s11116_s15 + $0x3290] sm:$0xff]  ;;  %v8855_v1 = vpack.c.bf16 %v3388_v41, %v3380_v40  ;;  %v3387_v57 = vld [vmem:[%s11116_s15 + $0x3440] sm:$0xff]  ;;  %v3444_v41 = vld [vmem:[%s11116_s15 + $0x3608] sm:$0xff] }
 0x67a   : > { %4909 = vmatprep.mubr.f32.mxu1 %v12625_v8  ;;  %v3437_v40 = vld [vmem:[%s11116_s15 + $0x35d0] sm:$0xff] }
 0x67b   : > { %8830 = vmatpush1.bf16.msra.mxu0 %v8829_v12  ;;  %v3358_v12 = vld [vmem:[%s11116_s15 + $0x3358] sm:$0xff] }
 0x67c   : > { %9342 = vmatpush1.bf16.msra.mxu1 %v9341_v14  ;;  %8832 = vmatprep.subr.bf16.mxu0 %v8831_v21  ;;  %v8845_v14 = vpack.c.bf16 %v3339_v45, %v3331_v49  ;;  %v9357_v21 = vpack.c.bf16 %v3341_v6, %v3333_v51  ;;  %v9359_v56 = vpack.c.bf16 %v3358_v12, %v3350_v10  ;;  %v3395_v45 = vld [vmem:[%s11116_s15 + $0x3480] sm:$0xff]  ;;  %v3420_v10 = vld [vmem:[%s11116_s15 + $0x3548] sm:$0xff]  ;;  %v3414_v12 = vld [vmem:[%s11116_s15 + $0x3518] sm:$0xff] }
 0x67d   : > { %9344 = vmatprep.subr.bf16.mxu1 %v9343_v52  ;;  %v3349_v52 = vld [vmem:[%s11116_s15 + $0x3310] sm:$0xff]  ;;  %v8859_v49 = vpack.c.bf16 %v3404_v30, %v3396_v0  ;;  %v3403_v51 = vld [vmem:[%s11116_s15 + $0x34c0] sm:$0xff]  ;;  %v3460_v30 = vld [vmem:[%s11116_s15 + $0x3688] sm:$0xff] }
 0x67e   : > { %v3453_v0 = vld [vmem:[%s11116_s15 + $0x3650] sm:$0xff] }
 0x67f   : > { %8834 = vmatpush1.bf16.msra.mxu0 %v8833_v19  ;;  %v3374_v19 = vld [vmem:[%s11116_s15 + $0x33d8] sm:$0xff] }
 0x680   : > { %9346 = vmatpush1.bf16.msra.mxu1 %v9345_v25  ;;  %8836 = vmatprep.subr.bf16.mxu0 %v8835_v29  ;;  %v8849_v25 = vpack.c.bf16 %v3355_v28, %v3347_v27  ;;  %v9361_v29 = vpack.c.bf16 %v3357_v62, %v3349_v52  ;;  %v9363_v11 = vpack.c.bf16 %v3374_v19, %v3366_v32  ;;  %v3411_v28 = vld [vmem:[%s11116_s15 + $0x3500] sm:$0xff]  ;;  %v3436_v32 = vld [vmem:[%s11116_s15 + $0x35c8] sm:$0xff]  ;;  %v3430_v19 = vld [vmem:[%s11116_s15 + $0x3598] sm:$0xff] }
 0x681   : > { %9348 = vmatprep.subr.bf16.mxu1 %v9347_v36  ;;  %v3365_v36 = vld [vmem:[%s11116_s15 + $0x3390] sm:$0xff]  ;;  %v8863_v27 = vpack.c.bf16 %v3420_v10, %v3412_v9  ;;  %v3419_v52 = vld [vmem:[%s11116_s15 + $0x3540] sm:$0xff]  ;;  %v3476_v10 = vld [vmem:[%s11116_s15 + $0x3708] sm:$0xff] }
 0x682   : > { %v3469_v9 = vld [vmem:[%s11116_s15 + $0x36d0] sm:$0xff] }
 0x683   : > { %8838 = vmatpush1.bf16.msra.mxu0 %v8837_v54  ;;  %v3390_v54 = vld [vmem:[%s11116_s15 + $0x3458] sm:$0xff] }
 0x684   : > { %9350 = vmatpush1.bf16.msra.mxu1 %v9349_v55  ;;  %8840 = vmatprep.subr.bf16.mxu0 %v8839_v20  ;;  %v8853_v55 = vpack.c.bf16 %v3371_v34, %v3363_v33  ;;  %v9365_v20 = vpack.c.bf16 %v3373_v38, %v3365_v36  ;;  %v9367_v18 = vpack.c.bf16 %v3390_v54, %v3382_v46  ;;  %v3427_v34 = vld [vmem:[%s11116_s15 + $0x3580] sm:$0xff]  ;;  %v3452_v46 = vld [vmem:[%s11116_s15 + $0x3648] sm:$0xff]  ;;  %v3446_v54 = vld [vmem:[%s11116_s15 + $0x3618] sm:$0xff] }
 0x685   : > { %9352 = vmatprep.subr.bf16.mxu1 %v9351_v59  ;;  %v3381_v59 = vld [vmem:[%s11116_s15 + $0x3410] sm:$0xff]  ;;  %v8867_v33 = vpack.c.bf16 %v3436_v32, %v3428_v31  ;;  %v3435_v36 = vld [vmem:[%s11116_s15 + $0x35c0] sm:$0xff]  ;;  %v3492_v32 = vld [vmem:[%s11116_s15 + $0x3788] sm:$0xff] }
 0x686   : > { %v3485_v31 = vld [vmem:[%s11116_s15 + $0x3750] sm:$0xff] }
 0x687   : > { %8842 = vmatpush1.bf16.msra.mxu0 %v8841_v17  ;;  %v3406_v17 = vld [vmem:[%s11116_s15 + $0x34d8] sm:$0xff] }
 0x688   : > { %9354 = vmatpush1.bf16.msra.mxu1 %v9353_v39  ;;  %8844 = vmatprep.subr.bf16.mxu0 %v8843_v47  ;;  %v8857_v39 = vpack.c.bf16 %v3387_v57, %v3379_v2  ;;  %v9369_v47 = vpack.c.bf16 %v3389_v60, %v3381_v59  ;;  %v9371_v6 = vpack.c.bf16 %v3406_v17, %v3398_v35  ;;  %v3443_v57 = vld [vmem:[%s11116_s15 + $0x3600] sm:$0xff]  ;;  %v3468_v35 = vld [vmem:[%s11116_s15 + $0x36c8] sm:$0xff]  ;;  %v3462_v17 = vld [vmem:[%s11116_s15 + $0x3698] sm:$0xff] }
 0x689   : > { %9356 = vmatprep.subr.bf16.mxu1 %v9355_v53  ;;  %v3397_v53 = vld [vmem:[%s11116_s15 + $0x3490] sm:$0xff]  ;;  %v8871_v2 = vpack.c.bf16 %v3452_v46, %v3444_v41  ;;  %v3451_v59 = vld [vmem:[%s11116_s15 + $0x3640] sm:$0xff]  ;;  %v3508_v46 = vld [vmem:[%s11116_s15 + $0x3808] sm:$0xff] }
 0x68a   : > { %v3501_v41 = vld [vmem:[%s11116_s15 + $0x37d0] sm:$0xff] }
 0x68b   : > { %8846 = vmatpush1.bf16.msra.mxu0 %v8845_v14  ;;  %v3422_v14 = vld [vmem:[%s11116_s15 + $0x3558] sm:$0xff] }
 0x68c   : > { %9358 = vmatpush1.bf16.msra.mxu1 %v9357_v21  ;;  %8848 = vmatprep.subr.bf16.mxu0 %v8847_v24  ;;  %v8861_v21 = vpack.c.bf16 %v3403_v51, %v3395_v45  ;;  %v9373_v24 = vpack.c.bf16 %v3405_v7, %v3397_v53  ;;  %v9375_v62 = vpack.c.bf16 %v3422_v14, %v3414_v12  ;;  %v3459_v51 = vld [vmem:[%s11116_s15 + $0x3680] sm:$0xff]  ;;  %v3484_v12 = vld [vmem:[%s11116_s15 + $0x3748] sm:$0xff]  ;;  %v3478_v14 = vld [vmem:[%s11116_s15 + $0x3718] sm:$0xff] }
 0x68d   : > { %9360 = vmatprep.subr.bf16.mxu1 %v9359_v56  ;;  %v3413_v56 = vld [vmem:[%s11116_s15 + $0x3510] sm:$0xff]  ;;  %v8875_v45 = vpack.c.bf16 %v3468_v35, %v3460_v30  ;;  %v3467_v53 = vld [vmem:[%s11116_s15 + $0x36c0] sm:$0xff]  ;;  %v3524_v35 = vld [vmem:[%s11116_s15 + $0x3888] sm:$0xff] }
 0x68f   : > { %8850 = vmatpush1.bf16.msra.mxu0 %v8849_v25  ;;  %v3438_v25 = vld [vmem:[%s11116_s15 + $0x35d8] sm:$0xff] }
 0x690   : > { %9362 = vmatpush1.bf16.msra.mxu1 %v9361_v29  ;;  %8852 = vmatprep.subr.bf16.mxu0 %v8851_v5  ;;  %v8865_v29 = vpack.c.bf16 %v3419_v52, %v3411_v28  ;;  %v9377_v5 = vpack.c.bf16 %v3421_v13, %v3413_v56  ;;  %v9379_v38 = vpack.c.bf16 %v3438_v25, %v3430_v19  ;;  %v3475_v52 = vld [vmem:[%s11116_s15 + $0x3700] sm:$0xff]  ;;  %v3500_v19 = vld [vmem:[%s11116_s15 + $0x37c8] sm:$0xff]  ;;  %v3494_v25 = vld [vmem:[%s11116_s15 + $0x3798] sm:$0xff] }
 0x691   : > { %9364 = vmatprep.subr.bf16.mxu1 %v9363_v11  ;;  %v3429_v11 = vld [vmem:[%s11116_s15 + $0x3590] sm:$0xff]  ;;  %v8879_v28 = vpack.c.bf16 %v3484_v12, %v3476_v10  ;;  %v3483_v56 = vld [vmem:[%s11116_s15 + $0x3740] sm:$0xff] }
 0x692   : > { %v3533_v12 = vld [vmem:[%s11116_s15 + $0x38d0] sm:$0xff] }
 0x693   : > { %8854 = vmatpush1.bf16.msra.mxu0 %v8853_v55  ;;  %v3454_v55 = vld [vmem:[%s11116_s15 + $0x3658] sm:$0xff] }
 0x694   : > { %9366 = vmatpush1.bf16.msra.mxu1 %v9365_v20  ;;  %8856 = vmatprep.subr.bf16.mxu0 %v8855_v1  ;;  %v8869_v20 = vpack.c.bf16 %v3435_v36, %v3427_v34  ;;  %v9381_v1 = vpack.c.bf16 %v3437_v40, %v3429_v11  ;;  %v9383_v60 = vpack.c.bf16 %v3454_v55, %v3446_v54  ;;  %v3491_v36 = vld [vmem:[%s11116_s15 + $0x3780] sm:$0xff]  ;;  %v3516_v54 = vld [vmem:[%s11116_s15 + $0x3848] sm:$0xff] }
 0x695   : > { %9368 = vmatprep.subr.bf16.mxu1 %v9367_v18  ;;  %v3445_v18 = vld [vmem:[%s11116_s15 + $0x3610] sm:$0xff]  ;;  %v8883_v34 = vpack.c.bf16 %v3500_v19, %v3492_v32  ;;  %v3499_v11 = vld [vmem:[%s11116_s15 + $0x37c0] sm:$0xff]  ;;  %v3818_v55 = vcombine.high %v12603_v44, %v12603_v44 }
 0x696   : > { %v3517_v44 = vld [vmem:[%s11116_s15 + $0x3850] sm:$0xff] }
 0x697   : > { %8858 = vmatpush1.bf16.msra.mxu0 %v8857_v39  ;;  %v3470_v39 = vld [vmem:[%s11116_s15 + $0x36d8] sm:$0xff]  ;;  %v3541_v32 = vld [vmem:[%s11116_s15 + $0x3910] sm:$0xff] }
 0x698   : > { %9370 = vmatpush1.bf16.msra.mxu1 %v9369_v47  ;;  %8860 = vmatprep.subr.bf16.mxu0 %v8859_v49  ;;  %v8873_v47 = vpack.c.bf16 %v3451_v59, %v3443_v57  ;;  %v9385_v49 = vpack.c.bf16 %v3453_v0, %v3445_v18  ;;  %v9387_v7 = vpack.c.bf16 %v3470_v39, %v3462_v17  ;;  %v3507_v18 = vld [vmem:[%s11116_s15 + $0x3800] sm:$0xff]  ;;  %v3509_v0 = vld [vmem:[%s11116_s15 + $0x3810] sm:$0xff]  ;;  %v3532_v17 = vld [vmem:[%s11116_s15 + $0x38c8] sm:$0xff] }
 0x699   : > { %9372 = vmatprep.subr.bf16.mxu1 %v9371_v6  ;;  %v3461_v6 = vld [vmem:[%s11116_s15 + $0x3690] sm:$0xff]  ;;  %v8887_v59 = vpack.c.bf16 %v3516_v54, %v3508_v46  ;;  %v12754_v39 = vrot.slane %v3818_v55, %v11834_v37 }
 0x69a   : > { %v3557_v46 = vld [vmem:[%s11116_s15 + $0x3990] sm:$0xff] }
 0x69b   : > { %8862 = vmatpush1.bf16.msra.mxu0 %v8861_v21  ;;  %v3486_v21 = vld [vmem:[%s11116_s15 + $0x3758] sm:$0xff]  ;;  %v3565_v55 = vld [vmem:[%s11116_s15 + $0x39d0] sm:$0xff] }
 0x69c   : > { %9374 = vmatpush1.bf16.msra.mxu1 %v9373_v24  ;;  %8864 = vmatprep.subr.bf16.mxu0 %v8863_v27  ;;  %v8877_v24 = vpack.c.bf16 %v3467_v53, %v3459_v51  ;;  %v9389_v27 = vpack.c.bf16 %v3469_v9, %v3461_v6  ;;  %v9391_v13 = vpack.c.bf16 %v3486_v21, %v3478_v14  ;;  %v3523_v6 = vld [vmem:[%s11116_s15 + $0x3880] sm:$0xff]  ;;  %v3525_v9 = vld [vmem:[%s11116_s15 + $0x3890] sm:$0xff]  ;;  %v3540_v14 = vld [vmem:[%s11116_s15 + $0x3908] sm:$0xff] }
 0x69d   : > { %9376 = vmatprep.subr.bf16.mxu1 %v9375_v62  ;;  %v3477_v62 = vld [vmem:[%s11116_s15 + $0x3710] sm:$0xff]  ;;  %v9401_v51 = vpack.c.bf16 %v3517_v44, %v3509_v0  ;;  %v8891_v53 = vpack.c.bf16 %v3532_v17, %v3524_v35  ;;  %v3548_v21 = vld [vmem:[%s11116_s15 + $0x3948] sm:$0xff]  ;;  %v3571_v0 = vld [vmem:[%s11116_s15 + $0x3a00] sm:$0xff] }
 0x69e   : > { %v3573_v44 = vld [vmem:[%s11116_s15 + $0x3a10] sm:$0xff] }
 0x69f   : > { %8866 = vmatpush1.bf16.msra.mxu0 %v8865_v29  ;;  %v3502_v29 = vld [vmem:[%s11116_s15 + $0x37d8] sm:$0xff]  ;;  %v3581_v17 = vld [vmem:[%s11116_s15 + $0x3a50] sm:$0xff] }
 0x6a0   : > { %9378 = vmatpush1.bf16.msra.mxu1 %v9377_v5  ;;  %8868 = vmatprep.subr.bf16.mxu0 %v8867_v33  ;;  %v8881_v5 = vpack.c.bf16 %v3483_v56, %v3475_v52  ;;  %v9393_v33 = vpack.c.bf16 %v3485_v31, %v3477_v62  ;;  %v9395_v40 = vpack.c.bf16 %v3502_v29, %v3494_v25  ;;  %v3547_v31 = vld [vmem:[%s11116_s15 + $0x3940] sm:$0xff]  ;;  %v3549_v25 = vld [vmem:[%s11116_s15 + $0x3950] sm:$0xff]  ;;  %v3556_v29 = vld [vmem:[%s11116_s15 + $0x3988] sm:$0xff] }
 0x6a1   : > { %9380 = vmatprep.subr.bf16.mxu1 %v9379_v38  ;;  %v3493_v38 = vld [vmem:[%s11116_s15 + $0x3790] sm:$0xff]  ;;  %v9405_v56 = vpack.c.bf16 %v3533_v12, %v3525_v9  ;;  %v8895_v62 = vpack.c.bf16 %v3548_v21, %v3540_v14  ;;  %v3587_v9 = vld [vmem:[%s11116_s15 + $0x3a80] sm:$0xff] }
 0x6a2   : > { %v9397_v57 = vpack.c.bf16 %v3501_v41, %v3493_v38  ;;  %v3563_v41 = vld [vmem:[%s11116_s15 + $0x39c0] sm:$0xff]  ;;  %v3589_v12 = vld [vmem:[%s11116_s15 + $0x3a90] sm:$0xff] }
 0x6a3   : > { %8870 = vmatpush1.bf16.msra.mxu0 %v8869_v20  ;;  %v3510_v20 = vld [vmem:[%s11116_s15 + $0x3818] sm:$0xff]  ;;  %v3597_v21 = vld [vmem:[%s11116_s15 + $0x3ad0] sm:$0xff] }
 0x6a4   : > { %9382 = vmatpush1.bf16.msra.mxu1 %v9381_v1  ;;  %8872 = vmatprep.subr.bf16.mxu0 %v8871_v2  ;;  %v3518_v1 = vld [vmem:[%s11116_s15 + $0x3858] sm:$0xff]  ;;  %v8885_v2 = vpack.c.bf16 %v3499_v11, %v3491_v36  ;;  %v9409_v11 = vpack.c.bf16 %v3549_v25, %v3541_v32  ;;  %v3603_v32 = vld [vmem:[%s11116_s15 + $0x3b00] sm:$0xff]  ;;  %v3605_v25 = vld [vmem:[%s11116_s15 + $0x3b10] sm:$0xff] }
 0x6a5   : > { %9384 = vmatprep.subr.bf16.mxu1 %v9383_v60  ;;  %v3515_v60 = vld [vmem:[%s11116_s15 + $0x3840] sm:$0xff]  ;;  %v9399_v30 = vpack.c.bf16 %v3518_v1, %v3510_v20  ;;  %v3572_v20 = vld [vmem:[%s11116_s15 + $0x3a08] sm:$0xff] }
 0x6a6   : > { %v3580_v1 = vld [vmem:[%s11116_s15 + $0x3a48] sm:$0xff] }
 0x6a7   : > { %8874 = vmatpush1.bf16.msra.mxu0 %v8873_v47  ;;  %v3526_v47 = vld [vmem:[%s11116_s15 + $0x3898] sm:$0xff] }
 0x6a8   : > { %9386 = vmatpush1.bf16.msra.mxu1 %v9385_v49  ;;  %8876 = vmatprep.subr.bf16.mxu0 %v8875_v45  ;;  %v3534_v49 = vld [vmem:[%s11116_s15 + $0x38d8] sm:$0xff]  ;;  %v8889_v45 = vpack.c.bf16 %v3515_v60, %v3507_v18  ;;  %v9413_v18 = vpack.c.bf16 %v3565_v55, %v3557_v46  ;;  %v8903_v60 = vpack.c.bf16 %v3580_v1, %v3572_v20  ;;  %v3619_v46 = vld [vmem:[%s11116_s15 + $0x3b80] sm:$0xff]  ;;  %v3621_v55 = vld [vmem:[%s11116_s15 + $0x3b90] sm:$0xff] }
 0x6a9   : > { %9388 = vmatprep.subr.bf16.mxu1 %v9387_v7  ;;  %v3531_v7 = vld [vmem:[%s11116_s15 + $0x38c0] sm:$0xff]  ;;  %v9403_v10 = vpack.c.bf16 %v3534_v49, %v3526_v47  ;;  %v3588_v47 = vld [vmem:[%s11116_s15 + $0x3a88] sm:$0xff]  ;;  %v3629_v1 = vld [vmem:[%s11116_s15 + $0x3bd0] sm:$0xff] }
 0x6aa   : > { %v8893_v52 = vpack.c.bf16 %v3531_v7, %v3523_v6  ;;  %v3596_v49 = vld [vmem:[%s11116_s15 + $0x3ac8] sm:$0xff]  ;;  %v9417_v6 = vpack.c.bf16 %v3581_v17, %v3573_v44  ;;  %v3635_v44 = vld [vmem:[%s11116_s15 + $0x3c00] sm:$0xff]  ;;  %v3637_v17 = vld [vmem:[%s11116_s15 + $0x3c10] sm:$0xff] }
 0x6ab   : > { %8878 = vmatpush1.bf16.msra.mxu0 %v8877_v24  ;;  %v12766_v24 = vcombine.high %v12754_v39, %v12754_v39  ;;  %v8907_v7 = vpack.c.bf16 %v3596_v49, %v3588_v47  ;;  %v3645_v49 = vld [vmem:[%s11116_s15 + $0x3c50] sm:$0xff] }
 0x6ac   : > { %9390 = vmatpush1.bf16.msra.mxu1 %v9389_v27  ;;  %8880 = vmatprep.subr.bf16.mxu0 %v8879_v28  ;;  %v3542_v27 = vld [vmem:[%s11116_s15 + $0x3918] sm:$0xff] }
 0x6ad   : > { %9392 = vmatprep.subr.bf16.mxu1 %v9391_v13  ;;  %v3550_v28 = vld [vmem:[%s11116_s15 + $0x3958] sm:$0xff]  ;;  %v3539_v13 = vld [vmem:[%s11116_s15 + $0x3900] sm:$0xff] }
 0x6ae   : > { %v9407_v19 = vpack.c.bf16 %v3550_v28, %v3542_v27  ;;  %v8897_v36 = vpack.c.bf16 %v3547_v31, %v3539_v13  ;;  %v3604_v27 = vld [vmem:[%s11116_s15 + $0x3b08] sm:$0xff]  ;;  %v9421_v13 = vpack.c.bf16 %v3597_v21, %v3589_v12  ;;  %v3651_v12 = vld [vmem:[%s11116_s15 + $0x3c80] sm:$0xff]  ;;  %v3653_v21 = vld [vmem:[%s11116_s15 + $0x3c90] sm:$0xff] }
 0x6af   : > { %8882 = vmatpush1.bf16.msra.mxu0 %v8881_v5  ;;  %v3564_v5 = vld [vmem:[%s11116_s15 + $0x39c8] sm:$0xff] }
 0x6b0   : > { %9394 = vmatpush1.bf16.msra.mxu1 %v9393_v33  ;;  %8884 = vmatprep.subr.bf16.mxu0 %v8883_v34  ;;  %v3558_v33 = vld [vmem:[%s11116_s15 + $0x3998] sm:$0xff]  ;;  %v8899_v38 = vpack.c.bf16 %v3564_v5, %v3556_v29  ;;  %v3612_v28 = vld [vmem:[%s11116_s15 + $0x3b48] sm:$0xff]  ;;  %v3613_v5 = vld [vmem:[%s11116_s15 + $0x3b50] sm:$0xff] }
 0x6b1   : > { %9396 = vmatprep.subr.bf16.mxu1 %v9395_v40  ;;  %v3566_v34 = vld [vmem:[%s11116_s15 + $0x39d8] sm:$0xff]  ;;  %v3555_v40 = vld [vmem:[%s11116_s15 + $0x3980] sm:$0xff]  ;;  %v8911_v31 = vpack.c.bf16 %v3612_v28, %v3604_v27  ;;  %v3661_v28 = vld [vmem:[%s11116_s15 + $0x3cd0] sm:$0xff] }
 0x6b2   : > { %v9411_v54 = vpack.c.bf16 %v3566_v34, %v3558_v33  ;;  %v3620_v33 = vld [vmem:[%s11116_s15 + $0x3b88] sm:$0xff] }
 0x6b3   : > { %8886 = vmatpush1.bf16.msra.mxu0 %v8885_v2  ;;  %v3574_v2 = vld [vmem:[%s11116_s15 + $0x3a18] sm:$0xff]  ;;  %v3628_v34 = vld [vmem:[%s11116_s15 + $0x3bc8] sm:$0xff] }
 0x6b4   : > { %9398 = vmatpush1.bf16.msra.mxu1 %v9397_v57  ;;  %8888 = vmatprep.subr.bf16.mxu0 %v8887_v59  ;;  %v3582_v57 = vld [vmem:[%s11116_s15 + $0x3a58] sm:$0xff]  ;;  %v8901_v59 = vpack.c.bf16 %v3563_v41, %v3555_v40  ;;  %v9425_v40 = vpack.c.bf16 %v3613_v5, %v3605_v25  ;;  %v8915_v41 = vpack.c.bf16 %v3628_v34, %v3620_v33  ;;  %v3667_v25 = vld [vmem:[%s11116_s15 + $0x3d00] sm:$0xff]  ;;  %v3669_v5 = vld [vmem:[%s11116_s15 + $0x3d10] sm:$0xff] }
 0x6b5   : > { %9400 = vmatprep.subr.bf16.mxu1 %v9399_v30  ;;  %v3579_v30 = vld [vmem:[%s11116_s15 + $0x3a40] sm:$0xff]  ;;  %v9415_v35 = vpack.c.bf16 %v3582_v57, %v3574_v2  ;;  %v3636_v2 = vld [vmem:[%s11116_s15 + $0x3c08] sm:$0xff]  ;;  %v3677_v34 = vld [vmem:[%s11116_s15 + $0x3d50] sm:$0xff] }
 0x6b6   : > { %4342 = vmatmul.mubr.f32.vlgmr.msra.gmra.mrb[0].mxu0 %v12613_v63  ;;  %v3644_v57 = vld [vmem:[%s11116_s15 + $0x3c48] sm:$0xff] }
 0x6b7   : > { %8890 = vmatpush1.bf16.msra.mxu0 %v8889_v45  ;;  %4910 = vmatmul.mubr.f32.vlgmr.msra.gmra.mrb[0].mxu1 %v12613_v63  ;;  %v3590_v45 = vld [vmem:[%s11116_s15 + $0x3a98] sm:$0xff] }
 0x6b8   : > { %9402 = vmatpush1.bf16.msra.mxu1 %v9401_v51  ;;  %8892 = vmatprep.subr.bf16.mxu0 %v8891_v53  ;;  %v3598_v51 = vld [vmem:[%s11116_s15 + $0x3ad8] sm:$0xff]  ;;  %v8905_v53 = vpack.c.bf16 %v3579_v30, %v3571_v0  ;;  %v9429_v0 = vpack.c.bf16 %v3629_v1, %v3621_v55  ;;  %v8919_v30 = vpack.c.bf16 %v3644_v57, %v3636_v2  ;;  %v3683_v55 = vld [vmem:[%s11116_s15 + $0x3d80] sm:$0xff]  ;;  %v3685_v1 = vld [vmem:[%s11116_s15 + $0x3d90] sm:$0xff] }
 0x6b9   : > { %9404 = vmatprep.subr.bf16.mxu1 %v9403_v10  ;;  %4412 = vmatprep.mubr.f32.mxu0 %v12766_v24  ;;  %v3595_v10 = vld [vmem:[%s11116_s15 + $0x3ac0] sm:$0xff]  ;;  %v9419_v14 = vpack.c.bf16 %v3598_v51, %v3590_v45  ;;  %v3652_v45 = vld [vmem:[%s11116_s15 + $0x3c88] sm:$0xff]  ;;  %v3693_v57 = vld [vmem:[%s11116_s15 + $0x3dd0] sm:$0xff] }
 0x6ba   : > { %4980 = vmatprep.mubr.f32.mxu1 %v12766_v24  ;;  %v3660_v51 = vld [vmem:[%s11116_s15 + $0x3cc8] sm:$0xff] }
 0x6bb   : > { %8894 = vmatpush1.bf16.msra.mxu0 %v8893_v52  ;;  %v3606_v52 = vld [vmem:[%s11116_s15 + $0x3b18] sm:$0xff] }
 0x6bc   : > { %9406 = vmatpush1.bf16.msra.mxu1 %v9405_v56  ;;  %8896 = vmatprep.subr.bf16.mxu0 %v8895_v62  ;;  %v3614_v56 = vld [vmem:[%s11116_s15 + $0x3b58] sm:$0xff]  ;;  %v8909_v62 = vpack.c.bf16 %v3595_v10, %v3587_v9  ;;  %v9433_v9 = vpack.c.bf16 %v3645_v49, %v3637_v17  ;;  %v8923_v10 = vpack.c.bf16 %v3660_v51, %v3652_v45  ;;  %v3699_v17 = vld [vmem:[%s11116_s15 + $0x3e00] sm:$0xff]  ;;  %v3701_v49 = vld [vmem:[%s11116_s15 + $0x3e10] sm:$0xff] }
 0x6bd   : > { %9408 = vmatprep.subr.bf16.mxu1 %v9407_v19  ;;  %v3611_v19 = vld [vmem:[%s11116_s15 + $0x3b40] sm:$0xff]  ;;  %v9423_v29 = vpack.c.bf16 %v3614_v56, %v3606_v52  ;;  %v3668_v52 = vld [vmem:[%s11116_s15 + $0x3d08] sm:$0xff]  ;;  %v3709_v51 = vld [vmem:[%s11116_s15 + $0x3e50] sm:$0xff] }
 0x6be   : > { %v3676_v56 = vld [vmem:[%s11116_s15 + $0x3d48] sm:$0xff] }
 0x6bf   : > { %8898 = vmatpush1.bf16.msra.mxu0 %v8897_v36  ;;  %v3622_v36 = vld [vmem:[%s11116_s15 + $0x3b98] sm:$0xff] }
 0x6c0   : > { %9410 = vmatpush1.bf16.msra.mxu1 %v9409_v11  ;;  %8900 = vmatprep.subr.bf16.mxu0 %v8899_v38  ;;  %v3630_v11 = vld [vmem:[%s11116_s15 + $0x3bd8] sm:$0xff]  ;;  %v8913_v38 = vpack.c.bf16 %v3611_v19, %v3603_v32  ;;  %v9437_v32 = vpack.c.bf16 %v3661_v28, %v3653_v21  ;;  %v8927_v19 = vpack.c.bf16 %v3676_v56, %v3668_v52  ;;  %v3715_v21 = vld [vmem:[%s11116_s15 + $0x3e80] sm:$0xff]  ;;  %v3717_v28 = vld [vmem:[%s11116_s15 + $0x3e90] sm:$0xff] }
 0x6c1   : > { %9412 = vmatprep.subr.bf16.mxu1 %v9411_v54  ;;  %v3627_v54 = vld [vmem:[%s11116_s15 + $0x3bc0] sm:$0xff]  ;;  %v9427_v20 = vpack.c.bf16 %v3630_v11, %v3622_v36  ;;  %v3684_v36 = vld [vmem:[%s11116_s15 + $0x3d88] sm:$0xff]  ;;  %v3725_v56 = vld [vmem:[%s11116_s15 + $0x3ed0] sm:$0xff] }
 0x6c2   : > { %v3692_v11 = vld [vmem:[%s11116_s15 + $0x3dc8] sm:$0xff] }
 0x6c3   : > { %8902 = vmatpush1.bf16.msra.mxu0 %v8901_v59  ;;  %v3638_v59 = vld [vmem:[%s11116_s15 + $0x3c18] sm:$0xff] }
 0x6c4   : > { %9414 = vmatpush1.bf16.msra.mxu1 %v9413_v18  ;;  %8904 = vmatprep.subr.bf16.mxu0 %v8903_v60  ;;  %v3646_v18 = vld [vmem:[%s11116_s15 + $0x3c58] sm:$0xff]  ;;  %v8917_v60 = vpack.c.bf16 %v3627_v54, %v3619_v46  ;;  %v9441_v46 = vpack.c.bf16 %v3677_v34, %v3669_v5  ;;  %v8931_v54 = vpack.c.bf16 %v3692_v11, %v3684_v36  ;;  %v3731_v5 = vld [vmem:[%s11116_s15 + $0x3f00] sm:$0xff]  ;;  %v3733_v34 = vld [vmem:[%s11116_s15 + $0x3f10] sm:$0xff] }
 0x6c5   : > { %9416 = vmatprep.subr.bf16.mxu1 %v9415_v35  ;;  %v3643_v35 = vld [vmem:[%s11116_s15 + $0x3c40] sm:$0xff]  ;;  %v9431_v47 = vpack.c.bf16 %v3646_v18, %v3638_v59  ;;  %v3700_v59 = vld [vmem:[%s11116_s15 + $0x3e08] sm:$0xff]  ;;  %v3741_v11 = vld [vmem:[%s11116_s15 + $0x3f50] sm:$0xff] }
 0x6c6   : > { %v3708_v18 = vld [vmem:[%s11116_s15 + $0x3e48] sm:$0xff] }
 0x6c7   : > { %8906 = vmatpush1.bf16.msra.mxu0 %v8905_v53  ;;  %v3654_v53 = vld [vmem:[%s11116_s15 + $0x3c98] sm:$0xff] }
 0x6c8   : > { %9418 = vmatpush1.bf16.msra.mxu1 %v9417_v6  ;;  %8908 = vmatprep.subr.bf16.mxu0 %v8907_v7  ;;  %v3662_v6 = vld [vmem:[%s11116_s15 + $0x3cd8] sm:$0xff]  ;;  %v8921_v7 = vpack.c.bf16 %v3643_v35, %v3635_v44  ;;  %v9445_v44 = vpack.c.bf16 %v3693_v57, %v3685_v1  ;;  %v8935_v35 = vpack.c.bf16 %v3708_v18, %v3700_v59  ;;  %v3747_v1 = vld [vmem:[%s11116_s15 + $0x3f80] sm:$0xff]  ;;  %v3749_v57 = vld [vmem:[%s11116_s15 + $0x3f90] sm:$0xff] }
 0x6c9   : > { %9420 = vmatprep.subr.bf16.mxu1 %v9419_v14  ;;  %v3659_v14 = vld [vmem:[%s11116_s15 + $0x3cc0] sm:$0xff]  ;;  %v9435_v27 = vpack.c.bf16 %v3662_v6, %v3654_v53  ;;  %v3716_v53 = vld [vmem:[%s11116_s15 + $0x3e88] sm:$0xff]  ;;  %v3757_v18 = vld [vmem:[%s11116_s15 + $0x3fd0] sm:$0xff] }
 0x6ca   : > { %v3724_v6 = vld [vmem:[%s11116_s15 + $0x3ec8] sm:$0xff] }
 0x6cb   : > { %8910 = vmatpush1.bf16.msra.mxu0 %v8909_v62  ;;  %v3670_v62 = vld [vmem:[%s11116_s15 + $0x3d18] sm:$0xff] }
 0x6cc   : > { %9422 = vmatpush1.bf16.msra.mxu1 %v9421_v13  ;;  %8912 = vmatprep.subr.bf16.mxu0 %v8911_v31  ;;  %v3678_v13 = vld [vmem:[%s11116_s15 + $0x3d58] sm:$0xff]  ;;  %v8925_v31 = vpack.c.bf16 %v3659_v14, %v3651_v12  ;;  %v9449_v12 = vpack.c.bf16 %v3709_v51, %v3701_v49  ;;  %v8939_v14 = vpack.c.bf16 %v3724_v6, %v3716_v53  ;;  %v1719_v49 = vld [vmem:[%s11116_s15 + $0x20] sm:$0xff]  ;;  %v1721_v51 = vld [vmem:[%s11116_s15 + $0x30] sm:$0xff] }
 0x6cd   : > { %9424 = vmatprep.subr.bf16.mxu1 %v9423_v29  ;;  %v3675_v29 = vld [vmem:[%s11116_s15 + $0x3d40] sm:$0xff]  ;;  %v9439_v33 = vpack.c.bf16 %v3678_v13, %v3670_v62  ;;  %v3732_v62 = vld [vmem:[%s11116_s15 + $0x3f08] sm:$0xff]  ;;  %v1729_v6 = vld [vmem:[%s11116_s15 + $0x70] sm:$0xff] }
 0x6ce   : > { %v3740_v13 = vld [vmem:[%s11116_s15 + $0x3f48] sm:$0xff] }
 0x6cf   : > { %8914 = vmatpush1.bf16.msra.mxu0 %v8913_v38  ;;  %v3686_v38 = vld [vmem:[%s11116_s15 + $0x3d98] sm:$0xff] }
 0x6d0   : > { %9426 = vmatpush1.bf16.msra.mxu1 %v9425_v40  ;;  %8916 = vmatprep.subr.bf16.mxu0 %v8915_v41  ;;  %v3694_v40 = vld [vmem:[%s11116_s15 + $0x3dd8] sm:$0xff]  ;;  %v8929_v41 = vpack.c.bf16 %v3675_v29, %v3667_v25  ;;  %v9453_v25 = vpack.c.bf16 %v3725_v56, %v3717_v28  ;;  %v8943_v29 = vpack.c.bf16 %v3740_v13, %v3732_v62  ;;  %v1735_v28 = vld [vmem:[%s11116_s15 + $0xa0] sm:$0xff]  ;;  %v1737_v56 = vld [vmem:[%s11116_s15 + $0xb0] sm:$0xff] }
 0x6d1   : > { %9428 = vmatprep.subr.bf16.mxu1 %v9427_v20  ;;  %v3691_v20 = vld [vmem:[%s11116_s15 + $0x3dc0] sm:$0xff]  ;;  %v9443_v2 = vpack.c.bf16 %v3694_v40, %v3686_v38  ;;  %v3748_v38 = vld [vmem:[%s11116_s15 + $0x3f88] sm:$0xff]  ;;  %v1745_v13 = vld [vmem:[%s11116_s15 + $0xf0] sm:$0xff] }
 0x6d2   : > { %v3756_v40 = vld [vmem:[%s11116_s15 + $0x3fc8] sm:$0xff] }
 0x6d3   : > { %8918 = vmatpush1.bf16.msra.mxu0 %v8917_v60  ;;  %v3702_v60 = vld [vmem:[%s11116_s15 + $0x3e18] sm:$0xff] }
 0x6d4   : > { %9430 = vmatpush1.bf16.msra.mxu1 %v9429_v0  ;;  %8920 = vmatprep.subr.bf16.mxu0 %v8919_v30  ;;  %v3710_v0 = vld [vmem:[%s11116_s15 + $0x3e58] sm:$0xff]  ;;  %v8933_v30 = vpack.c.bf16 %v3691_v20, %v3683_v55  ;;  %v9457_v55 = vpack.c.bf16 %v3741_v11, %v3733_v34  ;;  %v8947_v20 = vpack.c.bf16 %v3756_v40, %v3748_v38  ;;  %v1751_v34 = vld [vmem:[%s11116_s15 + $0x120] sm:$0xff]  ;;  %v1753_v11 = vld [vmem:[%s11116_s15 + $0x130] sm:$0xff] }
 0x6d5   : > { %9432 = vmatprep.subr.bf16.mxu1 %v9431_v47  ;;  %v3707_v47 = vld [vmem:[%s11116_s15 + $0x3e40] sm:$0xff]  ;;  %v9447_v45 = vpack.c.bf16 %v3710_v0, %v3702_v60  ;;  %v1720_v60 = vld [vmem:[%s11116_s15 + $0x28] sm:$0xff]  ;;  %v1761_v40 = vld [vmem:[%s11116_s15 + $0x170] sm:$0xff] }
 0x6d6   : > { %v1728_v0 = vld [vmem:[%s11116_s15 + $0x68] sm:$0xff] }
 0x6d7   : > { %8922 = vmatpush1.bf16.msra.mxu0 %v8921_v7  ;;  %v3718_v7 = vld [vmem:[%s11116_s15 + $0x3e98] sm:$0xff] }
 0x6d8   : > { %9434 = vmatpush1.bf16.msra.mxu1 %v9433_v9  ;;  %8924 = vmatprep.subr.bf16.mxu0 %v8923_v10  ;;  %v3726_v9 = vld [vmem:[%s11116_s15 + $0x3ed8] sm:$0xff]  ;;  %v8937_v10 = vpack.c.bf16 %v3707_v47, %v3699_v17  ;;  %v9461_v17 = vpack.c.bf16 %v3757_v18, %v3749_v57  ;;  %v9463_v47 = vpack.c.bf16 %v1728_v0, %v1720_v60  ;;  %v1767_v57 = vld [vmem:[%s11116_s15 + $0x1a0] sm:$0xff]  ;;  %v1769_v18 = vld [vmem:[%s11116_s15 + $0x1b0] sm:$0xff] }
 0x6d9   : > { %9436 = vmatprep.subr.bf16.mxu1 %v9435_v27  ;;  %v3723_v27 = vld [vmem:[%s11116_s15 + $0x3ec0] sm:$0xff]  ;;  %v9451_v52 = vpack.c.bf16 %v3726_v9, %v3718_v7  ;;  %v1736_v7 = vld [vmem:[%s11116_s15 + $0xa8] sm:$0xff]  ;;  %v1777_v0 = vld [vmem:[%s11116_s15 + $0x1f0] sm:$0xff] }
 0x6da   : > { %v1744_v9 = vld [vmem:[%s11116_s15 + $0xe8] sm:$0xff] }
 0x6db   : > { %8926 = vmatpush1.bf16.msra.mxu0 %v8925_v31  ;;  %v3734_v31 = vld [vmem:[%s11116_s15 + $0x3f18] sm:$0xff] }
 0x6dc   : > { %9438 = vmatpush1.bf16.msra.mxu1 %v9437_v32  ;;  %8928 = vmatprep.subr.bf16.mxu0 %v8927_v19  ;;  %v3742_v32 = vld [vmem:[%s11116_s15 + $0x3f58] sm:$0xff]  ;;  %v8941_v19 = vpack.c.bf16 %v3723_v27, %v3715_v21  ;;  %v9977_v21 = vpack.c.bf16 %v1729_v6, %v1721_v51  ;;  %v9467_v27 = vpack.c.bf16 %v1744_v9, %v1736_v7  ;;  %v1791_v51 = vld [vmem:[%s11116_s15 + $0x260] sm:$0xff]  ;;  %v1793_v7 = vld [vmem:[%s11116_s15 + $0x270] sm:$0xff] }
 0x6dd   : > { %9440 = vmatprep.subr.bf16.mxu1 %v9439_v33  ;;  %v3739_v33 = vld [vmem:[%s11116_s15 + $0x3f40] sm:$0xff]  ;;  %v9455_v36 = vpack.c.bf16 %v3742_v32, %v3734_v31  ;;  %v1752_v31 = vld [vmem:[%s11116_s15 + $0x128] sm:$0xff] }
 0x6de   : > { %v1760_v32 = vld [vmem:[%s11116_s15 + $0x168] sm:$0xff] }
 0x6df   : > { %8930 = vmatpush1.bf16.msra.mxu0 %v8929_v41  ;;  %v3750_v41 = vld [vmem:[%s11116_s15 + $0x3f98] sm:$0xff]  ;;  %v1800_v9 = vld [vmem:[%s11116_s15 + $0x2a8] sm:$0xff] }
 0x6e0   : > { %9442 = vmatpush1.bf16.msra.mxu1 %v9441_v46  ;;  %8932 = vmatprep.subr.bf16.mxu0 %v8931_v54  ;;  %v3758_v46 = vld [vmem:[%s11116_s15 + $0x3fd8] sm:$0xff]  ;;  %v8945_v54 = vpack.c.bf16 %v3739_v33, %v3731_v5  ;;  %v9981_v5 = vpack.c.bf16 %v1745_v13, %v1737_v56  ;;  %v9471_v33 = vpack.c.bf16 %v1760_v32, %v1752_v31  ;;  %v1807_v56 = vld [vmem:[%s11116_s15 + $0x2e0] sm:$0xff]  ;;  %v1809_v31 = vld [vmem:[%s11116_s15 + $0x2f0] sm:$0xff] }
 0x6e1   : > { %9444 = vmatprep.subr.bf16.mxu1 %v9443_v2  ;;  %v3755_v2 = vld [vmem:[%s11116_s15 + $0x3fc0] sm:$0xff]  ;;  %v9459_v59 = vpack.c.bf16 %v3758_v46, %v3750_v41  ;;  %v1768_v41 = vld [vmem:[%s11116_s15 + $0x1a8] sm:$0xff] }
 0x6e2   : > { %v1776_v46 = vld [vmem:[%s11116_s15 + $0x1e8] sm:$0xff] }
 0x6e3   : > { %8934 = vmatpush1.bf16.msra.mxu0 %v8933_v30  ;;  %v1722_v30 = vld [vmem:[%s11116_s15 + $0x38] sm:$0xff]  ;;  %v1816_v32 = vld [vmem:[%s11116_s15 + $0x328] sm:$0xff] }
 0x6e4   : > { %9446 = vmatpush1.bf16.msra.mxu1 %v9445_v44  ;;  %8936 = vmatprep.subr.bf16.mxu0 %v8935_v35  ;;  %v1730_v44 = vld [vmem:[%s11116_s15 + $0x78] sm:$0xff]  ;;  %v8949_v35 = vpack.c.bf16 %v3755_v2, %v3747_v1  ;;  %v9985_v1 = vpack.c.bf16 %v1761_v40, %v1753_v11  ;;  %v9475_v2 = vpack.c.bf16 %v1776_v46, %v1768_v41  ;;  %v1823_v11 = vld [vmem:[%s11116_s15 + $0x360] sm:$0xff]  ;;  %v1825_v41 = vld [vmem:[%s11116_s15 + $0x370] sm:$0xff] }
 0x6e5   : > { %9448 = vmatprep.subr.bf16.mxu1 %v9447_v45  ;;  %v1727_v45 = vld [vmem:[%s11116_s15 + $0x60] sm:$0xff]  ;;  %v9975_v53 = vpack.c.bf16 %v1730_v44, %v1722_v30  ;;  %v1784_v30 = vld [vmem:[%s11116_s15 + $0x228] sm:$0xff]  ;;  %v1786_v44 = vld [vmem:[%s11116_s15 + $0x238] sm:$0xff] }
 0x6e6   : > { %v1832_v46 = vld [vmem:[%s11116_s15 + $0x3a8] sm:$0xff] }
 0x6e7   : > { %8938 = vmatpush1.bf16.msra.mxu0 %v8937_v10  ;;  %v1738_v10 = vld [vmem:[%s11116_s15 + $0xb8] sm:$0xff] }
 0x6e8   : > { %9450 = vmatpush1.bf16.msra.mxu1 %v9449_v12  ;;  %8940 = vmatprep.subr.bf16.mxu0 %v8939_v14  ;;  %v1746_v12 = vld [vmem:[%s11116_s15 + $0xf8] sm:$0xff]  ;;  %v9465_v14 = vpack.c.bf16 %v1727_v45, %v1719_v49  ;;  %v1783_v45 = vld [vmem:[%s11116_s15 + $0x220] sm:$0xff] }
 0x6e9   : > { %9452 = vmatprep.subr.bf16.mxu1 %v9451_v52  ;;  %v1743_v52 = vld [vmem:[%s11116_s15 + $0xe0] sm:$0xff]  ;;  %v9979_v62 = vpack.c.bf16 %v1746_v12, %v1738_v10  ;;  %v1808_v10 = vld [vmem:[%s11116_s15 + $0x2e8] sm:$0xff]  ;;  %v1802_v12 = vld [vmem:[%s11116_s15 + $0x2b8] sm:$0xff] }
 0x6eb   : > { %8942 = vmatpush1.bf16.msra.mxu0 %v8941_v19  ;;  %v1754_v19 = vld [vmem:[%s11116_s15 + $0x138] sm:$0xff] }
 0x6ec   : > { %9454 = vmatpush1.bf16.msra.mxu1 %v9453_v25  ;;  %8944 = vmatprep.subr.bf16.mxu0 %v8943_v29  ;;  %v1762_v25 = vld [vmem:[%s11116_s15 + $0x178] sm:$0xff]  ;;  %v9469_v29 = vpack.c.bf16 %v1743_v52, %v1735_v28  ;;  %v9483_v28 = vpack.c.bf16 %v1808_v10, %v1800_v9  ;;  %v1799_v52 = vld [vmem:[%s11116_s15 + $0x2a0] sm:$0xff]  ;;  %v1857_v9 = vld [vmem:[%s11116_s15 + $0x470] sm:$0xff] }
 0x6ed   : > { %9456 = vmatprep.subr.bf16.mxu1 %v9455_v36  ;;  %v1759_v36 = vld [vmem:[%s11116_s15 + $0x160] sm:$0xff]  ;;  %v9983_v38 = vpack.c.bf16 %v1762_v25, %v1754_v19  ;;  %v1824_v19 = vld [vmem:[%s11116_s15 + $0x368] sm:$0xff]  ;;  %v1818_v25 = vld [vmem:[%s11116_s15 + $0x338] sm:$0xff] }
 0x6ee   : > { %v1864_v10 = vld [vmem:[%s11116_s15 + $0x4a8] sm:$0xff] }
 0x6ef   : > { %8946 = vmatpush1.bf16.msra.mxu0 %v8945_v54  ;;  %v1770_v54 = vld [vmem:[%s11116_s15 + $0x1b8] sm:$0xff] }
 0x6f0   : > { %9458 = vmatpush1.bf16.msra.mxu1 %v9457_v55  ;;  %8948 = vmatprep.subr.bf16.mxu0 %v8947_v20  ;;  %v1778_v55 = vld [vmem:[%s11116_s15 + $0x1f8] sm:$0xff]  ;;  %v9473_v20 = vpack.c.bf16 %v1759_v36, %v1751_v34  ;;  %v9487_v34 = vpack.c.bf16 %v1824_v19, %v1816_v32  ;;  %v1815_v36 = vld [vmem:[%s11116_s15 + $0x320] sm:$0xff]  ;;  %v1873_v32 = vld [vmem:[%s11116_s15 + $0x4f0] sm:$0xff] }
 0x6f1   : > { %9460 = vmatprep.subr.bf16.mxu1 %v9459_v59  ;;  %v1775_v59 = vld [vmem:[%s11116_s15 + $0x1e0] sm:$0xff]  ;;  %v9987_v60 = vpack.c.bf16 %v1778_v55, %v1770_v54  ;;  %v1840_v54 = vld [vmem:[%s11116_s15 + $0x3e8] sm:$0xff]  ;;  %v1834_v55 = vld [vmem:[%s11116_s15 + $0x3b8] sm:$0xff] }
 0x6f2   : > { %v1880_v19 = vld [vmem:[%s11116_s15 + $0x528] sm:$0xff] }
 0x6f3   : > { %8950 = vmatpush1.bf16.msra.mxu0 %v8949_v35  ;;  %v1794_v35 = vld [vmem:[%s11116_s15 + $0x278] sm:$0xff] }
 0x6f4   : > { %9462 = vmatpush1.bf16.msra.mxu1 %v9461_v17  ;;  %9464 = vmatprep.subr.bf16.mxu0 %v9463_v47  ;;  %v9477_v17 = vpack.c.bf16 %v1775_v59, %v1767_v57  ;;  %v9989_v47 = vpack.c.bf16 %v1777_v0, %v1769_v18  ;;  %v9991_v6 = vpack.c.bf16 %v1794_v35, %v1786_v44  ;;  %v1831_v59 = vld [vmem:[%s11116_s15 + $0x3a0] sm:$0xff]  ;;  %v1856_v44 = vld [vmem:[%s11116_s15 + $0x468] sm:$0xff]  ;;  %v1850_v35 = vld [vmem:[%s11116_s15 + $0x438] sm:$0xff] }
 0x6f5   : > { %9976 = vmatprep.subr.bf16.mxu1 %v9975_v53  ;;  %v1785_v53 = vld [vmem:[%s11116_s15 + $0x230] sm:$0xff]  ;;  %v9491_v57 = vpack.c.bf16 %v1840_v54, %v1832_v46  ;;  %v1839_v18 = vld [vmem:[%s11116_s15 + $0x3e0] sm:$0xff]  ;;  %v1896_v54 = vld [vmem:[%s11116_s15 + $0x5a8] sm:$0xff] }
 0x6f6   : > { %4413 = vmatmul.mubr.f32.vlgmr.msra.gmra.mrb[0].mxu0 %v12754_v39  ;;  %v1889_v46 = vld [vmem:[%s11116_s15 + $0x570] sm:$0xff] }
 0x6f7   : > { %4981 = vmatmul.mubr.f32.vlgmr.msra.gmra.mrb[0].mxu1 %v12754_v39  ;;  %9466 = vmatpush1.bf16.msra.mxu0 %v9465_v14  ;;  %v1810_v14 = vld [vmem:[%s11116_s15 + $0x2f8] sm:$0xff] }
 0x6f8   : > { %9978 = vmatpush1.bf16.msra.mxu1 %v9977_v21  ;;  %9468 = vmatprep.subr.bf16.mxu0 %v9467_v27  ;;  %v9481_v21 = vpack.c.bf16 %v1791_v51, %v1783_v45  ;;  %v9993_v27 = vpack.c.bf16 %v1793_v7, %v1785_v53  ;;  %v9995_v13 = vpack.c.bf16 %v1810_v14, %v1802_v12  ;;  %v1847_v51 = vld [vmem:[%s11116_s15 + $0x420] sm:$0xff]  ;;  %v1872_v12 = vld [vmem:[%s11116_s15 + $0x4e8] sm:$0xff]  ;;  %v1866_v14 = vld [vmem:[%s11116_s15 + $0x4b8] sm:$0xff] }
 0x6f9   : > { %9980 = vmatprep.subr.bf16.mxu1 %v9979_v62  ;;  %5051 = vmatprep.mubr.f32.mxu0 %v11860_v26  ;;  %v1801_v62 = vld [vmem:[%s11116_s15 + $0x2b0] sm:$0xff]  ;;  %v1855_v53 = vld [vmem:[%s11116_s15 + $0x460] sm:$0xff] }
 0x6fa   : > { %5619 = vmatprep.mubr.f32.mxu1 %v11860_v26  ;;  %v1792_v26 = vld [vmem:[%s11116_s15 + $0x268] sm:$0xff] }
 0x6fb   : > { %9470 = vmatpush1.bf16.msra.mxu0 %v9469_v29  ;;  %v9479_v49 = vpack.c.bf16 %v1792_v26, %v1784_v30  ;;  %v1826_v29 = vld [vmem:[%s11116_s15 + $0x378] sm:$0xff]  ;;  %v1841_v30 = vld [vmem:[%s11116_s15 + $0x3f0] sm:$0xff]  ;;  %v1848_v26 = vld [vmem:[%s11116_s15 + $0x428] sm:$0xff] }
 0x6fc   : > { %9982 = vmatpush1.bf16.msra.mxu1 %v9981_v5  ;;  %9472 = vmatprep.subr.bf16.mxu0 %v9471_v33  ;;  %v9485_v5 = vpack.c.bf16 %v1807_v56, %v1799_v52  ;;  %v9997_v33 = vpack.c.bf16 %v1809_v31, %v1801_v62  ;;  %v9999_v40 = vpack.c.bf16 %v1826_v29, %v1818_v25  ;;  %v1863_v56 = vld [vmem:[%s11116_s15 + $0x4a0] sm:$0xff]  ;;  %v1888_v25 = vld [vmem:[%s11116_s15 + $0x568] sm:$0xff]  ;;  %v1882_v29 = vld [vmem:[%s11116_s15 + $0x538] sm:$0xff] }
 0x6fd   : > { %9984 = vmatprep.subr.bf16.mxu1 %v9983_v38  ;;  %v1817_v38 = vld [vmem:[%s11116_s15 + $0x330] sm:$0xff]  ;;  %v9495_v45 = vpack.c.bf16 %v1856_v44, %v1848_v26  ;;  %v9499_v52 = vpack.c.bf16 %v1872_v12, %v1864_v10  ;;  %v1871_v62 = vld [vmem:[%s11116_s15 + $0x4e0] sm:$0xff]  ;;  %v1912_v44 = vld [vmem:[%s11116_s15 + $0x628] sm:$0xff] }
 0x6fe   : > { %v1905_v26 = vld [vmem:[%s11116_s15 + $0x5f0] sm:$0xff]  ;;  %v1928_v12 = vld [vmem:[%s11116_s15 + $0x6a8] sm:$0xff] }
 0x6ff   : > { %9474 = vmatpush1.bf16.msra.mxu0 %v9473_v20  ;;  %v1842_v20 = vld [vmem:[%s11116_s15 + $0x3f8] sm:$0xff]  ;;  %v1921_v10 = vld [vmem:[%s11116_s15 + $0x670] sm:$0xff] }
 0x700   : > { %9986 = vmatpush1.bf16.msra.mxu1 %v9985_v1  ;;  %9476 = vmatprep.subr.bf16.mxu0 %v9475_v2  ;;  %v9489_v1 = vpack.c.bf16 %v1823_v11, %v1815_v36  ;;  %v10001_v2 = vpack.c.bf16 %v1825_v41, %v1817_v38  ;;  %v10003_v0 = vpack.c.bf16 %v1842_v20, %v1834_v55  ;;  %v1879_v11 = vld [vmem:[%s11116_s15 + $0x520] sm:$0xff]  ;;  %v1904_v55 = vld [vmem:[%s11116_s15 + $0x5e8] sm:$0xff]  ;;  %v1898_v20 = vld [vmem:[%s11116_s15 + $0x5b8] sm:$0xff] }
 0x701   : > { %9988 = vmatprep.subr.bf16.mxu1 %v9987_v60  ;;  %v1833_v60 = vld [vmem:[%s11116_s15 + $0x3b0] sm:$0xff]  ;;  %v9503_v36 = vpack.c.bf16 %v1888_v25, %v1880_v19  ;;  %v1887_v38 = vld [vmem:[%s11116_s15 + $0x560] sm:$0xff]  ;;  %v1944_v25 = vld [vmem:[%s11116_s15 + $0x728] sm:$0xff] }
 0x702   : > { %v1937_v19 = vld [vmem:[%s11116_s15 + $0x6f0] sm:$0xff] }
 0x703   : > { %9478 = vmatpush1.bf16.msra.mxu0 %v9477_v17  ;;  %v1858_v17 = vld [vmem:[%s11116_s15 + $0x478] sm:$0xff] }
 0x704   : > { %9990 = vmatpush1.bf16.msra.mxu1 %v9989_v47  ;;  %9480 = vmatprep.subr.bf16.mxu0 %v9479_v49  ;;  %v9493_v47 = vpack.c.bf16 %v1839_v18, %v1831_v59  ;;  %v10005_v49 = vpack.c.bf16 %v1841_v30, %v1833_v60  ;;  %v10007_v7 = vpack.c.bf16 %v1858_v17, %v1850_v35  ;;  %v1895_v18 = vld [vmem:[%s11116_s15 + $0x5a0] sm:$0xff]  ;;  %v1920_v35 = vld [vmem:[%s11116_s15 + $0x668] sm:$0xff]  ;;  %v1914_v17 = vld [vmem:[%s11116_s15 + $0x638] sm:$0xff] }
 0x705   : > { %9992 = vmatprep.subr.bf16.mxu1 %v9991_v6  ;;  %v1849_v6 = vld [vmem:[%s11116_s15 + $0x430] sm:$0xff]  ;;  %v9507_v59 = vpack.c.bf16 %v1904_v55, %v1896_v54  ;;  %v1903_v60 = vld [vmem:[%s11116_s15 + $0x5e0] sm:$0xff]  ;;  %v1960_v55 = vld [vmem:[%s11116_s15 + $0x7a8] sm:$0xff] }
 0x706   : > { %v1953_v54 = vld [vmem:[%s11116_s15 + $0x770] sm:$0xff] }
 0x707   : > { %9482 = vmatpush1.bf16.msra.mxu0 %v9481_v21  ;;  %v1874_v21 = vld [vmem:[%s11116_s15 + $0x4f8] sm:$0xff] }
 0x708   : > { %9994 = vmatpush1.bf16.msra.mxu1 %v9993_v27  ;;  %9484 = vmatprep.subr.bf16.mxu0 %v9483_v28  ;;  %v9497_v27 = vpack.c.bf16 %v1855_v53, %v1847_v51  ;;  %v10009_v28 = vpack.c.bf16 %v1857_v9, %v1849_v6  ;;  %v10011_v31 = vpack.c.bf16 %v1874_v21, %v1866_v14  ;;  %v1911_v53 = vld [vmem:[%s11116_s15 + $0x620] sm:$0xff]  ;;  %v1936_v14 = vld [vmem:[%s11116_s15 + $0x6e8] sm:$0xff]  ;;  %v1930_v21 = vld [vmem:[%s11116_s15 + $0x6b8] sm:$0xff] }
 0x709   : > { %9996 = vmatprep.subr.bf16.mxu1 %v9995_v13  ;;  %v1865_v13 = vld [vmem:[%s11116_s15 + $0x4b0] sm:$0xff]  ;;  %v9511_v51 = vpack.c.bf16 %v1920_v35, %v1912_v44  ;;  %v1919_v6 = vld [vmem:[%s11116_s15 + $0x660] sm:$0xff]  ;;  %v1976_v35 = vld [vmem:[%s11116_s15 + $0x828] sm:$0xff] }
 0x70a   : > { %v1969_v44 = vld [vmem:[%s11116_s15 + $0x7f0] sm:$0xff] }
 0x70b   : > { %9486 = vmatpush1.bf16.msra.mxu0 %v9485_v5  ;;  %v1890_v5 = vld [vmem:[%s11116_s15 + $0x578] sm:$0xff] }
 0x70c   : > { %9998 = vmatpush1.bf16.msra.mxu1 %v9997_v33  ;;  %9488 = vmatprep.subr.bf16.mxu0 %v9487_v34  ;;  %v9501_v33 = vpack.c.bf16 %v1871_v62, %v1863_v56  ;;  %v10013_v34 = vpack.c.bf16 %v1873_v32, %v1865_v13  ;;  %v10015_v41 = vpack.c.bf16 %v1890_v5, %v1882_v29  ;;  %v1927_v62 = vld [vmem:[%s11116_s15 + $0x6a0] sm:$0xff]  ;;  %v1952_v29 = vld [vmem:[%s11116_s15 + $0x768] sm:$0xff]  ;;  %v1946_v5 = vld [vmem:[%s11116_s15 + $0x738] sm:$0xff] }
 0x70d   : > { %10000 = vmatprep.subr.bf16.mxu1 %v9999_v40  ;;  %v1881_v40 = vld [vmem:[%s11116_s15 + $0x530] sm:$0xff]  ;;  %v9515_v56 = vpack.c.bf16 %v1936_v14, %v1928_v12  ;;  %v1935_v13 = vld [vmem:[%s11116_s15 + $0x6e0] sm:$0xff]  ;;  %v1992_v14 = vld [vmem:[%s11116_s15 + $0x8a8] sm:$0xff] }
 0x70e   : > { %v1985_v12 = vld [vmem:[%s11116_s15 + $0x870] sm:$0xff] }
 0x70f   : > { %9490 = vmatpush1.bf16.msra.mxu0 %v9489_v1  ;;  %v1906_v1 = vld [vmem:[%s11116_s15 + $0x5f8] sm:$0xff] }
 0x710   : > { %10002 = vmatpush1.bf16.msra.mxu1 %v10001_v2  ;;  %9492 = vmatprep.subr.bf16.mxu0 %v9491_v57  ;;  %v9505_v2 = vpack.c.bf16 %v1887_v38, %v1879_v11  ;;  %v10017_v57 = vpack.c.bf16 %v1889_v46, %v1881_v40  ;;  %v10019_v30 = vpack.c.bf16 %v1906_v1, %v1898_v20  ;;  %v1943_v38 = vld [vmem:[%s11116_s15 + $0x720] sm:$0xff]  ;;  %v1968_v20 = vld [vmem:[%s11116_s15 + $0x7e8] sm:$0xff]  ;;  %v1962_v1 = vld [vmem:[%s11116_s15 + $0x7b8] sm:$0xff] }
 0x711   : > { %10004 = vmatprep.subr.bf16.mxu1 %v10003_v0  ;;  %v1897_v0 = vld [vmem:[%s11116_s15 + $0x5b0] sm:$0xff]  ;;  %v9519_v11 = vpack.c.bf16 %v1952_v29, %v1944_v25  ;;  %v1951_v40 = vld [vmem:[%s11116_s15 + $0x760] sm:$0xff]  ;;  %v2008_v29 = vld [vmem:[%s11116_s15 + $0x928] sm:$0xff] }
 0x712   : > { %v2001_v25 = vld [vmem:[%s11116_s15 + $0x8f0] sm:$0xff] }
 0x713   : > { %9494 = vmatpush1.bf16.msra.mxu0 %v9493_v47  ;;  %v1922_v47 = vld [vmem:[%s11116_s15 + $0x678] sm:$0xff] }
 0x714   : > { %10006 = vmatpush1.bf16.msra.mxu1 %v10005_v49  ;;  %9496 = vmatprep.subr.bf16.mxu0 %v9495_v45  ;;  %v9509_v49 = vpack.c.bf16 %v1903_v60, %v1895_v18  ;;  %v10021_v45 = vpack.c.bf16 %v1905_v26, %v1897_v0  ;;  %v10023_v9 = vpack.c.bf16 %v1922_v47, %v1914_v17  ;;  %v1959_v60 = vld [vmem:[%s11116_s15 + $0x7a0] sm:$0xff]  ;;  %v1984_v17 = vld [vmem:[%s11116_s15 + $0x868] sm:$0xff]  ;;  %v1978_v47 = vld [vmem:[%s11116_s15 + $0x838] sm:$0xff] }
 0x715   : > { %10008 = vmatprep.subr.bf16.mxu1 %v10007_v7  ;;  %v1913_v7 = vld [vmem:[%s11116_s15 + $0x630] sm:$0xff]  ;;  %v9523_v18 = vpack.c.bf16 %v1968_v20, %v1960_v55  ;;  %v1967_v0 = vld [vmem:[%s11116_s15 + $0x7e0] sm:$0xff]  ;;  %v2024_v20 = vld [vmem:[%s11116_s15 + $0x9a8] sm:$0xff] }
 0x716   : > { %v2017_v55 = vld [vmem:[%s11116_s15 + $0x970] sm:$0xff] }
 0x717   : > { %9498 = vmatpush1.bf16.msra.mxu0 %v9497_v27  ;;  %v1938_v27 = vld [vmem:[%s11116_s15 + $0x6f8] sm:$0xff] }
 0x718   : > { %10010 = vmatpush1.bf16.msra.mxu1 %v10009_v28  ;;  %9500 = vmatprep.subr.bf16.mxu0 %v9499_v52  ;;  %v9513_v28 = vpack.c.bf16 %v1919_v6, %v1911_v53  ;;  %v10025_v52 = vpack.c.bf16 %v1921_v10, %v1913_v7  ;;  %v10027_v32 = vpack.c.bf16 %v1938_v27, %v1930_v21  ;;  %v1975_v6 = vld [vmem:[%s11116_s15 + $0x820] sm:$0xff]  ;;  %v2000_v21 = vld [vmem:[%s11116_s15 + $0x8e8] sm:$0xff]  ;;  %v1994_v27 = vld [vmem:[%s11116_s15 + $0x8b8] sm:$0xff] }
 0x719   : > { %10012 = vmatprep.subr.bf16.mxu1 %v10011_v31  ;;  %v1929_v31 = vld [vmem:[%s11116_s15 + $0x6b0] sm:$0xff]  ;;  %v9527_v53 = vpack.c.bf16 %v1984_v17, %v1976_v35  ;;  %v1983_v7 = vld [vmem:[%s11116_s15 + $0x860] sm:$0xff]  ;;  %v2040_v35 = vld [vmem:[%s11116_s15 + $0xa28] sm:$0xff] }
 0x71a   : > { %v2042_v17 = vld [vmem:[%s11116_s15 + $0xa38] sm:$0xff] }
 0x71b   : > { %9502 = vmatpush1.bf16.msra.mxu0 %v9501_v33  ;;  %v1954_v33 = vld [vmem:[%s11116_s15 + $0x778] sm:$0xff] }
 0x71c   : > { %10014 = vmatpush1.bf16.msra.mxu1 %v10013_v34  ;;  %9504 = vmatprep.subr.bf16.mxu0 %v9503_v36  ;;  %v9517_v34 = vpack.c.bf16 %v1935_v13, %v1927_v62  ;;  %v10029_v36 = vpack.c.bf16 %v1937_v19, %v1929_v31  ;;  %v10031_v46 = vpack.c.bf16 %v1954_v33, %v1946_v5  ;;  %v1991_v13 = vld [vmem:[%s11116_s15 + $0x8a0] sm:$0xff]  ;;  %v2016_v5 = vld [vmem:[%s11116_s15 + $0x968] sm:$0xff]  ;;  %v2010_v33 = vld [vmem:[%s11116_s15 + $0x938] sm:$0xff] }
 0x71d   : > { %10016 = vmatprep.subr.bf16.mxu1 %v10015_v41  ;;  %v1945_v41 = vld [vmem:[%s11116_s15 + $0x730] sm:$0xff]  ;;  %v9531_v62 = vpack.c.bf16 %v2000_v21, %v1992_v14  ;;  %v1999_v31 = vld [vmem:[%s11116_s15 + $0x8e0] sm:$0xff]  ;;  %v2064_v14 = vld [vmem:[%s11116_s15 + $0xae8] sm:$0xff] }
 0x71e   : > { %v2058_v21 = vld [vmem:[%s11116_s15 + $0xab8] sm:$0xff] }
 0x71f   : > { %9506 = vmatpush1.bf16.msra.mxu0 %v9505_v2  ;;  %v1970_v2 = vld [vmem:[%s11116_s15 + $0x7f8] sm:$0xff] }
 0x720   : > { %10018 = vmatpush1.bf16.msra.mxu1 %v10017_v57  ;;  %9508 = vmatprep.subr.bf16.mxu0 %v9507_v59  ;;  %v9521_v57 = vpack.c.bf16 %v1951_v40, %v1943_v38  ;;  %v10033_v59 = vpack.c.bf16 %v1953_v54, %v1945_v41  ;;  %v10035_v26 = vpack.c.bf16 %v1970_v2, %v1962_v1  ;;  %v2007_v40 = vld [vmem:[%s11116_s15 + $0x920] sm:$0xff]  ;;  %v2032_v1 = vld [vmem:[%s11116_s15 + $0x9e8] sm:$0xff]  ;;  %v2034_v2 = vld [vmem:[%s11116_s15 + $0x9f8] sm:$0xff] }
 0x721   : > { %10020 = vmatprep.subr.bf16.mxu1 %v10019_v30  ;;  %v1961_v30 = vld [vmem:[%s11116_s15 + $0x7b0] sm:$0xff]  ;;  %v9535_v38 = vpack.c.bf16 %v2016_v5, %v2008_v29  ;;  %v2015_v41 = vld [vmem:[%s11116_s15 + $0x960] sm:$0xff]  ;;  %v2080_v29 = vld [vmem:[%s11116_s15 + $0xb68] sm:$0xff] }
 0x722   : > { %v2074_v5 = vld [vmem:[%s11116_s15 + $0xb38] sm:$0xff] }
 0x723   : > { %9510 = vmatpush1.bf16.msra.mxu0 %v9509_v49  ;;  %v1986_v49 = vld [vmem:[%s11116_s15 + $0x878] sm:$0xff] }
 0x724   : > { %10022 = vmatpush1.bf16.msra.mxu1 %v10021_v45  ;;  %9512 = vmatprep.subr.bf16.mxu0 %v9511_v51  ;;  %v9525_v45 = vpack.c.bf16 %v1967_v0, %v1959_v60  ;;  %v10037_v51 = vpack.c.bf16 %v1969_v44, %v1961_v30  ;;  %v10039_v10 = vpack.c.bf16 %v1986_v49, %v1978_v47  ;;  %v2023_v60 = vld [vmem:[%s11116_s15 + $0x9a0] sm:$0xff]  ;;  %v2025_v30 = vld [vmem:[%s11116_s15 + $0x9b0] sm:$0xff]  ;;  %v2050_v47 = vld [vmem:[%s11116_s15 + $0xa78] sm:$0xff] }
 0x725   : > { %10024 = vmatprep.subr.bf16.mxu1 %v10023_v9  ;;  %v1977_v9 = vld [vmem:[%s11116_s15 + $0x830] sm:$0xff]  ;;  %v2031_v0 = vld [vmem:[%s11116_s15 + $0x9e0] sm:$0xff] }
 0x726   : > { %v2033_v44 = vld [vmem:[%s11116_s15 + $0x9f0] sm:$0xff]  ;;  %v9541_v49 = vpack.c.bf16 %v2031_v0, %v2023_v60  ;;  %v2095_v60 = vld [vmem:[%s11116_s15 + $0xbe0] sm:$0xff] }
 0x727   : > { %9514 = vmatpush1.bf16.msra.mxu0 %v9513_v28  ;;  %v2002_v28 = vld [vmem:[%s11116_s15 + $0x8f8] sm:$0xff]  ;;  %v2089_v0 = vld [vmem:[%s11116_s15 + $0xbb0] sm:$0xff] }
 0x728   : > { %10026 = vmatpush1.bf16.msra.mxu1 %v10025_v52  ;;  %9516 = vmatprep.subr.bf16.mxu0 %v9515_v56  ;;  %v9529_v52 = vpack.c.bf16 %v1983_v7, %v1975_v6  ;;  %v10041_v56 = vpack.c.bf16 %v1985_v12, %v1977_v9  ;;  %v10043_v19 = vpack.c.bf16 %v2002_v28, %v1994_v27  ;;  %v2047_v6 = vld [vmem:[%s11116_s15 + $0xa60] sm:$0xff]  ;;  %v2041_v7 = vld [vmem:[%s11116_s15 + $0xa30] sm:$0xff]  ;;  %v2056_v12 = vld [vmem:[%s11116_s15 + $0xaa8] sm:$0xff] }
 0x729   : > { %10028 = vmatprep.subr.bf16.mxu1 %v10027_v32  ;;  %v1993_v32 = vld [vmem:[%s11116_s15 + $0x8b0] sm:$0xff]  ;;  %v10055_v9 = vpack.c.bf16 %v2050_v47, %v2042_v17  ;;  %v2066_v27 = vld [vmem:[%s11116_s15 + $0xaf8] sm:$0xff] }
 0x72a   : > { %v2114_v17 = vld [vmem:[%s11116_s15 + $0xc78] sm:$0xff] }
 0x72b   : > { %9518 = vmatpush1.bf16.msra.mxu0 %v9517_v34  ;;  %v2018_v34 = vld [vmem:[%s11116_s15 + $0x978] sm:$0xff] }
 0x72c   : > { %10030 = vmatpush1.bf16.msra.mxu1 %v10029_v36  ;;  %9520 = vmatprep.subr.bf16.mxu0 %v9519_v11  ;;  %v9533_v36 = vpack.c.bf16 %v1999_v31, %v1991_v13  ;;  %v10045_v11 = vpack.c.bf16 %v2001_v25, %v1993_v32  ;;  %v10047_v54 = vpack.c.bf16 %v2018_v34, %v2010_v33  ;;  %v2063_v13 = vld [vmem:[%s11116_s15 + $0xae0] sm:$0xff]  ;;  %v2057_v31 = vld [vmem:[%s11116_s15 + $0xab0] sm:$0xff]  ;;  %v2072_v25 = vld [vmem:[%s11116_s15 + $0xb28] sm:$0xff] }
 0x72d   : > { %10032 = vmatprep.subr.bf16.mxu1 %v10031_v46  ;;  %v2009_v46 = vld [vmem:[%s11116_s15 + $0x930] sm:$0xff]  ;;  %v10059_v32 = vpack.c.bf16 %v2066_v27, %v2058_v21  ;;  %v2082_v33 = vld [vmem:[%s11116_s15 + $0xb78] sm:$0xff] }
 0x72e   : > { %v2130_v21 = vld [vmem:[%s11116_s15 + $0xcf8] sm:$0xff] }
 0x72f   : > { %9522 = vmatpush1.bf16.msra.mxu0 %v9521_v57  ;;  %v9537_v57 = vpack.c.bf16 %v2015_v41, %v2007_v40  ;;  %v2079_v40 = vld [vmem:[%s11116_s15 + $0xb60] sm:$0xff]  ;;  %v2073_v41 = vld [vmem:[%s11116_s15 + $0xb30] sm:$0xff] }
 0x730   : > { %10034 = vmatpush1.bf16.msra.mxu1 %v10033_v59  ;;  %9524 = vmatprep.subr.bf16.mxu0 %v9523_v18  ;;  %v10049_v59 = vpack.c.bf16 %v2017_v55, %v2009_v46  ;;  %v9539_v18 = vpack.c.bf16 %v2032_v1, %v2024_v20  ;;  %v10063_v46 = vpack.c.bf16 %v2082_v33, %v2074_v5  ;;  %v2088_v55 = vld [vmem:[%s11116_s15 + $0xba8] sm:$0xff]  ;;  %v2090_v1 = vld [vmem:[%s11116_s15 + $0xbb8] sm:$0xff] }
 0x731   : > { %10036 = vmatprep.subr.bf16.mxu1 %v10035_v26  ;;  %v2096_v20 = vld [vmem:[%s11116_s15 + $0xbe8] sm:$0xff]  ;;  %v2146_v5 = vld [vmem:[%s11116_s15 + $0xd78] sm:$0xff] }
 0x733   : > { %9526 = vmatpush1.bf16.msra.mxu0 %v9525_v45  ;;  %v10053_v45 = vpack.c.bf16 %v2033_v44, %v2025_v30  ;;  %v2104_v44 = vld [vmem:[%s11116_s15 + $0xc28] sm:$0xff] }
 0x734   : > { %10038 = vmatpush1.bf16.msra.mxu1 %v10037_v51  ;;  %9528 = vmatprep.subr.bf16.mxu0 %v9527_v53  ;;  %v2039_v53 = vld [vmem:[%s11116_s15 + $0xa20] sm:$0xff] }
 0x735   : > { %10040 = vmatprep.subr.bf16.mxu1 %v10039_v10  ;;  %v2049_v10 = vld [vmem:[%s11116_s15 + $0xa70] sm:$0xff]  ;;  %v9545_v28 = vpack.c.bf16 %v2047_v6, %v2039_v53  ;;  %v2111_v53 = vld [vmem:[%s11116_s15 + $0xc60] sm:$0xff] }
 0x736   : > { %5052 = vmatmul.mubr.f32.vlgmr.msra.gmra.mrb[2].mxu0 %v11853_v43  ;;  %v2105_v6 = vld [vmem:[%s11116_s15 + $0xc30] sm:$0xff] }
 0x737   : > { %9530 = vmatpush1.bf16.msra.mxu0 %v9529_v52  ;;  %5620 = vmatmul.mubr.f32.vlgmr.msra.gmra.mrb[2].mxu1 %v11853_v43  ;;  %v2026_v43 = vld [vmem:[%s11116_s15 + $0x9b8] sm:$0xff]  ;;  %v10057_v52 = vpack.c.bf16 %v2049_v10, %v2041_v7  ;;  %v2120_v10 = vld [vmem:[%s11116_s15 + $0xca8] sm:$0xff] }
 0x738   : > { %10042 = vmatpush1.bf16.msra.mxu1 %v10041_v56  ;;  %9532 = vmatprep.subr.bf16.mxu0 %v9531_v62  ;;  %v10051_v26 = vpack.c.bf16 %v2034_v2, %v2026_v43  ;;  %v9547_v56 = vpack.c.bf16 %v2064_v14, %v2056_v12  ;;  %v2055_v62 = vld [vmem:[%s11116_s15 + $0xaa0] sm:$0xff]  ;;  %v2098_v43 = vld [vmem:[%s11116_s15 + $0xbf8] sm:$0xff]  ;;  %v2128_v12 = vld [vmem:[%s11116_s15 + $0xce8] sm:$0xff] }
 0x739   : > { %10044 = vmatprep.subr.bf16.mxu1 %v10043_v19  ;;  %5122 = vmatprep.mubr.f32.mxu0 %v11914_v50  ;;  %v2065_v19 = vld [vmem:[%s11116_s15 + $0xaf0] sm:$0xff]  ;;  %v9549_v34 = vpack.c.bf16 %v2063_v13, %v2055_v62  ;;  %v10067_v30 = vpack.c.bf16 %v2098_v43, %v2090_v1  ;;  %v2122_v14 = vld [vmem:[%s11116_s15 + $0xcb8] sm:$0xff]  ;;  %v2127_v62 = vld [vmem:[%s11116_s15 + $0xce0] sm:$0xff] }
 0x73a   : > { %5690 = vmatprep.mubr.f32.mxu1 %v11914_v50  ;;  %v2048_v50 = vld [vmem:[%s11116_s15 + $0xa68] sm:$0xff]  ;;  %v2121_v13 = vld [vmem:[%s11116_s15 + $0xcb0] sm:$0xff]  ;;  %v2162_v1 = vld [vmem:[%s11116_s15 + $0xdf8] sm:$0xff] }
 0x73b   : > { %9534 = vmatpush1.bf16.msra.mxu0 %v9533_v36  ;;  %v9543_v51 = vpack.c.bf16 %v2048_v50, %v2040_v35  ;;  %v10061_v36 = vpack.c.bf16 %v2065_v19, %v2057_v31  ;;  %v2112_v35 = vld [vmem:[%s11116_s15 + $0xc68] sm:$0xff]  ;;  %v2106_v50 = vld [vmem:[%s11116_s15 + $0xc38] sm:$0xff]  ;;  %v10075_v31 = vpack.c.bf16 %v2130_v21, %v2122_v14 }
 0x73c   : > { %10046 = vmatpush1.bf16.msra.mxu1 %v10045_v11  ;;  %9536 = vmatprep.subr.bf16.mxu0 %v9535_v38  ;;  %v9551_v11 = vpack.c.bf16 %v2080_v29, %v2072_v25  ;;  %v2071_v38 = vld [vmem:[%s11116_s15 + $0xb20] sm:$0xff]  ;;  %v10071_v7 = vpack.c.bf16 %v2114_v17, %v2106_v50  ;;  %v2136_v19 = vld [vmem:[%s11116_s15 + $0xd28] sm:$0xff]  ;;  %v2138_v29 = vld [vmem:[%s11116_s15 + $0xd38] sm:$0xff] }
 0x73d   : > { %10048 = vmatprep.subr.bf16.mxu1 %v10047_v54  ;;  %v2081_v54 = vld [vmem:[%s11116_s15 + $0xb70] sm:$0xff]  ;;  %v9553_v2 = vpack.c.bf16 %v2079_v40, %v2071_v38  ;;  %v2144_v25 = vld [vmem:[%s11116_s15 + $0xd68] sm:$0xff]  ;;  %v2143_v38 = vld [vmem:[%s11116_s15 + $0xd60] sm:$0xff] }
 0x73e   : > { %v2137_v40 = vld [vmem:[%s11116_s15 + $0xd30] sm:$0xff]  ;;  %v2178_v50 = vld [vmem:[%s11116_s15 + $0xe78] sm:$0xff] }
 0x73f   : > { %9538 = vmatpush1.bf16.msra.mxu0 %v9537_v57  ;;  %v10065_v57 = vpack.c.bf16 %v2081_v54, %v2073_v41  ;;  %v10079_v41 = vpack.c.bf16 %v2146_v5, %v2138_v29  ;;  %v2152_v54 = vld [vmem:[%s11116_s15 + $0xda8] sm:$0xff]  ;;  %v2194_v14 = vld [vmem:[%s11116_s15 + $0xef8] sm:$0xff] }
 0x740   : > { %10050 = vmatpush1.bf16.msra.mxu1 %v10049_v59  ;;  %9540 = vmatprep.subr.bf16.mxu0 %v9539_v18  ;;  %v9555_v59 = vpack.c.bf16 %v2096_v20, %v2088_v55  ;;  %v2087_v18 = vld [vmem:[%s11116_s15 + $0xba0] sm:$0xff]  ;;  %v2160_v55 = vld [vmem:[%s11116_s15 + $0xde8] sm:$0xff]  ;;  %v2154_v20 = vld [vmem:[%s11116_s15 + $0xdb8] sm:$0xff] }
 0x741   : > { %10052 = vmatprep.subr.bf16.mxu1 %v10051_v26  ;;  %v2097_v26 = vld [vmem:[%s11116_s15 + $0xbf0] sm:$0xff]  ;;  %v9557_v47 = vpack.c.bf16 %v2095_v60, %v2087_v18  ;;  %v2159_v18 = vld [vmem:[%s11116_s15 + $0xde0] sm:$0xff]  ;;  %v2210_v29 = vld [vmem:[%s11116_s15 + $0xf78] sm:$0xff] }
 0x742   : > { %v2153_v60 = vld [vmem:[%s11116_s15 + $0xdb0] sm:$0xff] }
 0x743   : > { %9542 = vmatpush1.bf16.msra.mxu0 %v9541_v49  ;;  %v10069_v49 = vpack.c.bf16 %v2097_v26, %v2089_v0  ;;  %v10083_v0 = vpack.c.bf16 %v2162_v1, %v2154_v20  ;;  %v2168_v26 = vld [vmem:[%s11116_s15 + $0xe28] sm:$0xff]  ;;  %v2226_v20 = vld [vmem:[%s11116_s15 + $0xff8] sm:$0xff] }
 0x744   : > { %10054 = vmatpush1.bf16.msra.mxu1 %v10053_v45  ;;  %9544 = vmatprep.subr.bf16.mxu0 %v9543_v51  ;;  %v9559_v45 = vpack.c.bf16 %v2112_v35, %v2104_v44  ;;  %v2103_v51 = vld [vmem:[%s11116_s15 + $0xc20] sm:$0xff]  ;;  %v2176_v44 = vld [vmem:[%s11116_s15 + $0xe68] sm:$0xff]  ;;  %v2170_v35 = vld [vmem:[%s11116_s15 + $0xe38] sm:$0xff] }
 0x745   : > { %10056 = vmatprep.subr.bf16.mxu1 %v10055_v9  ;;  %v2113_v9 = vld [vmem:[%s11116_s15 + $0xc70] sm:$0xff]  ;;  %v9561_v27 = vpack.c.bf16 %v2111_v53, %v2103_v51  ;;  %v2175_v51 = vld [vmem:[%s11116_s15 + $0xe60] sm:$0xff] }
 0x746   : > { %v2169_v53 = vld [vmem:[%s11116_s15 + $0xe30] sm:$0xff] }
 0x747   : > { %9546 = vmatpush1.bf16.msra.mxu0 %v9545_v28  ;;  %v10073_v28 = vpack.c.bf16 %v2113_v9, %v2105_v6  ;;  %v10087_v6 = vpack.c.bf16 %v2178_v50, %v2170_v35  ;;  %v2184_v9 = vld [vmem:[%s11116_s15 + $0xea8] sm:$0xff]  ;;  %v2242_v35 = vld [vmem:[%s11116_s15 + $0x1078] sm:$0xff] }
 0x748   : > { %10058 = vmatpush1.bf16.msra.mxu1 %v10057_v52  ;;  %9548 = vmatprep.subr.bf16.mxu0 %v9547_v56  ;;  %v9563_v52 = vpack.c.bf16 %v2128_v12, %v2120_v10  ;;  %v2119_v56 = vld [vmem:[%s11116_s15 + $0xca0] sm:$0xff]  ;;  %v2192_v10 = vld [vmem:[%s11116_s15 + $0xee8] sm:$0xff]  ;;  %v2186_v12 = vld [vmem:[%s11116_s15 + $0xeb8] sm:$0xff] }
 0x749   : > { %10060 = vmatprep.subr.bf16.mxu1 %v10059_v32  ;;  %v2129_v32 = vld [vmem:[%s11116_s15 + $0xcf0] sm:$0xff]  ;;  %v9565_v33 = vpack.c.bf16 %v2127_v62, %v2119_v56  ;;  %v2191_v56 = vld [vmem:[%s11116_s15 + $0xee0] sm:$0xff] }
 0x74a   : > { %v2185_v62 = vld [vmem:[%s11116_s15 + $0xeb0] sm:$0xff] }
 0x74b   : > { %9550 = vmatpush1.bf16.msra.mxu0 %v9549_v34  ;;  %v10077_v34 = vpack.c.bf16 %v2129_v32, %v2121_v13  ;;  %v10091_v13 = vpack.c.bf16 %v2194_v14, %v2186_v12  ;;  %v2200_v32 = vld [vmem:[%s11116_s15 + $0xf28] sm:$0xff]  ;;  %v2258_v12 = vld [vmem:[%s11116_s15 + $0x10f8] sm:$0xff] }
 0x74c   : > { %10062 = vmatpush1.bf16.msra.mxu1 %v10061_v36  ;;  %9552 = vmatprep.subr.bf16.mxu0 %v9551_v11  ;;  %v9567_v36 = vpack.c.bf16 %v2144_v25, %v2136_v19  ;;  %v2135_v11 = vld [vmem:[%s11116_s15 + $0xd20] sm:$0xff]  ;;  %v2208_v19 = vld [vmem:[%s11116_s15 + $0xf68] sm:$0xff]  ;;  %v2202_v25 = vld [vmem:[%s11116_s15 + $0xf38] sm:$0xff] }
 0x74d   : > { %10064 = vmatprep.subr.bf16.mxu1 %v10063_v46  ;;  %v2145_v46 = vld [vmem:[%s11116_s15 + $0xd70] sm:$0xff]  ;;  %v9569_v43 = vpack.c.bf16 %v2143_v38, %v2135_v11  ;;  %v2207_v11 = vld [vmem:[%s11116_s15 + $0xf60] sm:$0xff] }
 0x74e   : > { %v2201_v38 = vld [vmem:[%s11116_s15 + $0xf30] sm:$0xff] }
 0x74f   : > { %9554 = vmatpush1.bf16.msra.mxu0 %v9553_v2  ;;  %v10081_v2 = vpack.c.bf16 %v2145_v46, %v2137_v40  ;;  %v10095_v40 = vpack.c.bf16 %v2210_v29, %v2202_v25  ;;  %v2216_v46 = vld [vmem:[%s11116_s15 + $0xfa8] sm:$0xff]  ;;  %v2274_v25 = vld [vmem:[%s11116_s15 + $0x1178] sm:$0xff] }
 0x750   : > { %10066 = vmatpush1.bf16.msra.mxu1 %v10065_v57  ;;  %9556 = vmatprep.subr.bf16.mxu0 %v9555_v59  ;;  %v9571_v57 = vpack.c.bf16 %v2160_v55, %v2152_v54  ;;  %v2151_v59 = vld [vmem:[%s11116_s15 + $0xda0] sm:$0xff]  ;;  %v2224_v54 = vld [vmem:[%s11116_s15 + $0xfe8] sm:$0xff]  ;;  %v2218_v55 = vld [vmem:[%s11116_s15 + $0xfb8] sm:$0xff] }
 0x751   : > { %10068 = vmatprep.subr.bf16.mxu1 %v10067_v30  ;;  %v2161_v30 = vld [vmem:[%s11116_s15 + $0xdf0] sm:$0xff]  ;;  %v9573_v17 = vpack.c.bf16 %v2159_v18, %v2151_v59  ;;  %v2223_v59 = vld [vmem:[%s11116_s15 + $0xfe0] sm:$0xff] }
 0x752   : > { %v2217_v18 = vld [vmem:[%s11116_s15 + $0xfb0] sm:$0xff] }
 0x753   : > { %9558 = vmatpush1.bf16.msra.mxu0 %v9557_v47  ;;  %v10085_v47 = vpack.c.bf16 %v2161_v30, %v2153_v60  ;;  %v10099_v60 = vpack.c.bf16 %v2226_v20, %v2218_v55  ;;  %v2232_v30 = vld [vmem:[%s11116_s15 + $0x1028] sm:$0xff] }
 0x754   : > { %10070 = vmatpush1.bf16.msra.mxu1 %v10069_v49  ;;  %9560 = vmatprep.subr.bf16.mxu0 %v9559_v45  ;;  %v9575_v49 = vpack.c.bf16 %v2176_v44, %v2168_v26  ;;  %v2167_v45 = vld [vmem:[%s11116_s15 + $0xe20] sm:$0xff]  ;;  %v2240_v26 = vld [vmem:[%s11116_s15 + $0x1068] sm:$0xff]  ;;  %v2234_v44 = vld [vmem:[%s11116_s15 + $0x1038] sm:$0xff] }
 0x755   : > { %10072 = vmatprep.subr.bf16.mxu1 %v10071_v7  ;;  %v2177_v7 = vld [vmem:[%s11116_s15 + $0xe70] sm:$0xff]  ;;  %v9577_v21 = vpack.c.bf16 %v2175_v51, %v2167_v45  ;;  %v2239_v45 = vld [vmem:[%s11116_s15 + $0x1060] sm:$0xff] }
 0x756   : > { %v2233_v51 = vld [vmem:[%s11116_s15 + $0x1030] sm:$0xff] }
 0x757   : > { %9562 = vmatpush1.bf16.msra.mxu0 %v9561_v27  ;;  %v10089_v27 = vpack.c.bf16 %v2177_v7, %v2169_v53  ;;  %v10103_v53 = vpack.c.bf16 %v2242_v35, %v2234_v44  ;;  %v2248_v7 = vld [vmem:[%s11116_s15 + $0x10a8] sm:$0xff] }
 0x758   : > { %10074 = vmatpush1.bf16.msra.mxu1 %v10073_v28  ;;  %9564 = vmatprep.subr.bf16.mxu0 %v9563_v52  ;;  %v9579_v28 = vpack.c.bf16 %v2192_v10, %v2184_v9  ;;  %v2183_v52 = vld [vmem:[%s11116_s15 + $0xea0] sm:$0xff]  ;;  %v2256_v9 = vld [vmem:[%s11116_s15 + $0x10e8] sm:$0xff]  ;;  %v2250_v10 = vld [vmem:[%s11116_s15 + $0x10b8] sm:$0xff] }
 0x759   : > { %10076 = vmatprep.subr.bf16.mxu1 %v10075_v31  ;;  %v2193_v31 = vld [vmem:[%s11116_s15 + $0xef0] sm:$0xff]  ;;  %v9581_v5 = vpack.c.bf16 %v2191_v56, %v2183_v52  ;;  %v2255_v52 = vld [vmem:[%s11116_s15 + $0x10e0] sm:$0xff] }
 0x75a   : > { %v2249_v56 = vld [vmem:[%s11116_s15 + $0x10b0] sm:$0xff] }
 0x75b   : > { %9566 = vmatpush1.bf16.msra.mxu0 %v9565_v33  ;;  %v10093_v33 = vpack.c.bf16 %v2193_v31, %v2185_v62  ;;  %v10107_v62 = vpack.c.bf16 %v2258_v12, %v2250_v10  ;;  %v2264_v31 = vld [vmem:[%s11116_s15 + $0x1128] sm:$0xff] }
 0x75c   : > { %10078 = vmatpush1.bf16.msra.mxu1 %v10077_v34  ;;  %9568 = vmatprep.subr.bf16.mxu0 %v9567_v36  ;;  %v9583_v34 = vpack.c.bf16 %v2208_v19, %v2200_v32  ;;  %v2199_v36 = vld [vmem:[%s11116_s15 + $0xf20] sm:$0xff]  ;;  %v2272_v32 = vld [vmem:[%s11116_s15 + $0x1168] sm:$0xff]  ;;  %v2266_v19 = vld [vmem:[%s11116_s15 + $0x1138] sm:$0xff] }
 0x75d   : > { %10080 = vmatprep.subr.bf16.mxu1 %v10079_v41  ;;  %v2209_v41 = vld [vmem:[%s11116_s15 + $0xf70] sm:$0xff]  ;;  %v9585_v1 = vpack.c.bf16 %v2207_v11, %v2199_v36  ;;  %v2271_v36 = vld [vmem:[%s11116_s15 + $0x1160] sm:$0xff] }
 0x75e   : > { %v2265_v11 = vld [vmem:[%s11116_s15 + $0x1130] sm:$0xff] }
 0x75f   : > { %9570 = vmatpush1.bf16.msra.mxu0 %v9569_v43  ;;  %v10097_v43 = vpack.c.bf16 %v2209_v41, %v2201_v38  ;;  %v10111_v38 = vpack.c.bf16 %v2274_v25, %v2266_v19  ;;  %v2280_v41 = vld [vmem:[%s11116_s15 + $0x11a8] sm:$0xff] }
 0x760   : > { %10082 = vmatpush1.bf16.msra.mxu1 %v10081_v2  ;;  %9572 = vmatprep.subr.bf16.mxu0 %v9571_v57  ;;  %v9587_v2 = vpack.c.bf16 %v2224_v54, %v2216_v46  ;;  %v2215_v57 = vld [vmem:[%s11116_s15 + $0xfa0] sm:$0xff]  ;;  %v2288_v46 = vld [vmem:[%s11116_s15 + $0x11e8] sm:$0xff]  ;;  %v2290_v54 = vld [vmem:[%s11116_s15 + $0x11f8] sm:$0xff] }
 0x761   : > { %10084 = vmatprep.subr.bf16.mxu1 %v10083_v0  ;;  %v2225_v0 = vld [vmem:[%s11116_s15 + $0xff0] sm:$0xff]  ;;  %v9589_v50 = vpack.c.bf16 %v2223_v59, %v2215_v57 }
 0x762   : > { %v2281_v57 = vld [vmem:[%s11116_s15 + $0x11b0] sm:$0xff] }
 0x763   : > { %9574 = vmatpush1.bf16.msra.mxu0 %v9573_v17  ;;  %v10101_v17 = vpack.c.bf16 %v2225_v0, %v2217_v18  ;;  %v2289_v18 = vld [vmem:[%s11116_s15 + $0x11f0] sm:$0xff]  ;;  %v2298_v0 = vld [vmem:[%s11116_s15 + $0x1238] sm:$0xff] }
 0x764   : > { %10086 = vmatpush1.bf16.msra.mxu1 %v10085_v47  ;;  %9576 = vmatprep.subr.bf16.mxu0 %v9575_v49  ;;  %v9591_v47 = vpack.c.bf16 %v2240_v26, %v2232_v30  ;;  %v2231_v49 = vld [vmem:[%s11116_s15 + $0x1020] sm:$0xff]  ;;  %v2306_v30 = vld [vmem:[%s11116_s15 + $0x1278] sm:$0xff]  ;;  %v10117_v44 = vpack.c.bf16 %v2289_v18, %v2281_v57  ;;  %v2360_v57 = vld [vmem:[%s11116_s15 + $0x1428] sm:$0xff] }
 0x765   : > { %10088 = vmatprep.subr.bf16.mxu1 %v10087_v6  ;;  %v2241_v6 = vld [vmem:[%s11116_s15 + $0x1070] sm:$0xff]  ;;  %v9593_v14 = vpack.c.bf16 %v2239_v45, %v2231_v49  ;;  %v10119_v49 = vpack.c.bf16 %v2306_v30, %v2298_v0  ;;  %v2362_v18 = vld [vmem:[%s11116_s15 + $0x1438] sm:$0xff] }
 0x766   : > { %v2305_v45 = vld [vmem:[%s11116_s15 + $0x1270] sm:$0xff] }
 0x767   : > { %9578 = vmatpush1.bf16.msra.mxu0 %v9577_v21  ;;  %v10105_v21 = vpack.c.bf16 %v2241_v6, %v2233_v51  ;;  %v2312_v51 = vld [vmem:[%s11116_s15 + $0x12a8] sm:$0xff]  ;;  %v2314_v6 = vld [vmem:[%s11116_s15 + $0x12b8] sm:$0xff] }
 0x768   : > { %10090 = vmatpush1.bf16.msra.mxu1 %v10089_v27  ;;  %9580 = vmatprep.subr.bf16.mxu0 %v9579_v28  ;;  %v9595_v27 = vpack.c.bf16 %v2256_v9, %v2248_v7  ;;  %v2247_v28 = vld [vmem:[%s11116_s15 + $0x10a0] sm:$0xff]  ;;  %v2322_v7 = vld [vmem:[%s11116_s15 + $0x12f8] sm:$0xff] }
 0x769   : > { %10092 = vmatprep.subr.bf16.mxu1 %v10091_v13  ;;  %v2257_v13 = vld [vmem:[%s11116_s15 + $0x10f0] sm:$0xff]  ;;  %v9597_v29 = vpack.c.bf16 %v2255_v52, %v2247_v28  ;;  %v10123_v28 = vpack.c.bf16 %v2322_v7, %v2314_v6 }
 0x76a   : > { %v2321_v52 = vld [vmem:[%s11116_s15 + $0x12f0] sm:$0xff] }
 0x76b   : > { %9582 = vmatpush1.bf16.msra.mxu0 %v9581_v5  ;;  %v10109_v5 = vpack.c.bf16 %v2257_v13, %v2249_v56  ;;  %v2328_v56 = vld [vmem:[%s11116_s15 + $0x1328] sm:$0xff]  ;;  %v2330_v13 = vld [vmem:[%s11116_s15 + $0x1338] sm:$0xff] }
 0x76c   : > { %10094 = vmatpush1.bf16.msra.mxu1 %v10093_v33  ;;  %9584 = vmatprep.subr.bf16.mxu0 %v9583_v34  ;;  %v9599_v33 = vpack.c.bf16 %v2272_v32, %v2264_v31  ;;  %v2263_v34 = vld [vmem:[%s11116_s15 + $0x1120] sm:$0xff]  ;;  %v2338_v31 = vld [vmem:[%s11116_s15 + $0x1378] sm:$0xff] }
 0x76d   : > { %10096 = vmatprep.subr.bf16.mxu1 %v10095_v40  ;;  %v2273_v40 = vld [vmem:[%s11116_s15 + $0x1170] sm:$0xff]  ;;  %v9601_v55 = vpack.c.bf16 %v2271_v36, %v2263_v34  ;;  %v10127_v34 = vpack.c.bf16 %v2338_v31, %v2330_v13 }
 0x76e   : > { %v10113_v20 = vpack.c.bf16 %v2273_v40, %v2265_v11  ;;  %v2337_v36 = vld [vmem:[%s11116_s15 + $0x1370] sm:$0xff]  ;;  %v2344_v11 = vld [vmem:[%s11116_s15 + $0x13a8] sm:$0xff]  ;;  %v2346_v40 = vld [vmem:[%s11116_s15 + $0x13b8] sm:$0xff] }
 0x76f   : > { %9586 = vmatpush1.bf16.msra.mxu0 %v9585_v1  ;;  %v9603_v1 = vpack.c.bf16 %v2288_v46, %v2280_v41  ;;  %v2354_v41 = vld [vmem:[%s11116_s15 + $0x13f8] sm:$0xff] }
 0x770   : > { %10098 = vmatpush1.bf16.msra.mxu1 %v10097_v43  ;;  %9588 = vmatprep.subr.bf16.mxu0 %v9587_v2  ;;  %v2279_v43 = vld [vmem:[%s11116_s15 + $0x11a0] sm:$0xff] }
 0x771   : > { %10100 = vmatprep.subr.bf16.mxu1 %v10099_v60  ;;  %v2287_v2 = vld [vmem:[%s11116_s15 + $0x11e0] sm:$0xff]  ;;  %v2296_v60 = vld [vmem:[%s11116_s15 + $0x1228] sm:$0xff] }
 0x772   : > { %v9605_v26 = vpack.c.bf16 %v2287_v2, %v2279_v43  ;;  %v10131_v43 = vpack.c.bf16 %v2354_v41, %v2346_v40  ;;  %v2353_v2 = vld [vmem:[%s11116_s15 + $0x13f0] sm:$0xff] }
 0x773   : > { %9590 = vmatpush1.bf16.msra.mxu0 %v9589_v50  ;;  %v2295_v50 = vld [vmem:[%s11116_s15 + $0x1220] sm:$0xff] }
 0x774   : > { %10102 = vmatpush1.bf16.msra.mxu1 %v10101_v17  ;;  %9592 = vmatprep.subr.bf16.mxu0 %v9591_v47  ;;  %v2303_v17 = vld [vmem:[%s11116_s15 + $0x1260] sm:$0xff]  ;;  %v2297_v47 = vld [vmem:[%s11116_s15 + $0x1230] sm:$0xff] }
 0x775   : > { %10104 = vmatprep.subr.bf16.mxu1 %v10103_v53  ;;  %v2320_v53 = vld [vmem:[%s11116_s15 + $0x12e8] sm:$0xff]  ;;  %v9609_v9 = vpack.c.bf16 %v2303_v17, %v2295_v50  ;;  %v10121_v10 = vpack.c.bf16 %v2305_v45, %v2297_v47  ;;  %v2369_v17 = vld [vmem:[%s11116_s15 + $0x1470] sm:$0xff]  ;;  %v2378_v45 = vld [vmem:[%s11116_s15 + $0x14b8] sm:$0xff] }
 0x776   : > { %5123 = vmatmul.mubr.f32.vlgmr.msra.gmra.mrb[2].mxu0 %v11902_v58  ;;  %v9611_v12 = vpack.c.bf16 %v2320_v53, %v2312_v51  ;;  %v2376_v47 = vld [vmem:[%s11116_s15 + $0x14a8] sm:$0xff]  ;;  %v2386_v51 = vld [vmem:[%s11116_s15 + $0x14f8] sm:$0xff] }
 0x777   : > { %9594 = vmatpush1.bf16.msra.mxu0 %v9593_v14  ;;  %5691 = vmatmul.mubr.f32.vlgmr.msra.gmra.mrb[2].mxu1 %v11902_v58  ;;  %v2282_v58 = vld [vmem:[%s11116_s15 + $0x11b8] sm:$0xff]  ;;  %v2311_v14 = vld [vmem:[%s11116_s15 + $0x12a0] sm:$0xff] }
 0x778   : > { %10106 = vmatpush1.bf16.msra.mxu1 %v10105_v21  ;;  %9596 = vmatprep.subr.bf16.mxu0 %v9595_v27  ;;  %v10115_v59 = vpack.c.bf16 %v2290_v54, %v2282_v58  ;;  %v2319_v21 = vld [vmem:[%s11116_s15 + $0x12e0] sm:$0xff]  ;;  %v2313_v27 = vld [vmem:[%s11116_s15 + $0x12b0] sm:$0xff] }
 0x779   : > { %10108 = vmatprep.subr.bf16.mxu1 %v10107_v62  ;;  %5193 = vmatprep.mubr.f32.mxu0 %v12060_v4  ;;  %v2336_v62 = vld [vmem:[%s11116_s15 + $0x1368] sm:$0xff]  ;;  %v9613_v32 = vpack.c.bf16 %v2319_v21, %v2311_v14  ;;  %v10125_v19 = vpack.c.bf16 %v2321_v52, %v2313_v27  ;;  %v10139_v14 = vpack.c.bf16 %v2386_v51, %v2378_v45  ;;  %v2385_v21 = vld [vmem:[%s11116_s15 + $0x14f0] sm:$0xff]  ;;  %v2394_v52 = vld [vmem:[%s11116_s15 + $0x1538] sm:$0xff] }
 0x77a   : > { %5761 = vmatprep.mubr.f32.mxu1 %v12060_v4  ;;  %v2304_v4 = vld [vmem:[%s11116_s15 + $0x1268] sm:$0xff]  ;;  %v9615_v25 = vpack.c.bf16 %v2336_v62, %v2328_v56  ;;  %v2402_v56 = vld [vmem:[%s11116_s15 + $0x1578] sm:$0xff] }
 0x77b   : > { %9598 = vmatpush1.bf16.msra.mxu0 %v9597_v29  ;;  %v9607_v35 = vpack.c.bf16 %v2304_v4, %v2296_v60  ;;  %v2327_v29 = vld [vmem:[%s11116_s15 + $0x1320] sm:$0xff]  ;;  %v2370_v60 = vld [vmem:[%s11116_s15 + $0x1478] sm:$0xff]  ;;  %v2392_v27 = vld [vmem:[%s11116_s15 + $0x1528] sm:$0xff] }
 0x77c   : > { %10110 = vmatpush1.bf16.msra.mxu1 %v10109_v5  ;;  %9600 = vmatprep.subr.bf16.mxu0 %v9599_v33  ;;  %v2335_v5 = vld [vmem:[%s11116_s15 + $0x1360] sm:$0xff]  ;;  %v2329_v33 = vld [vmem:[%s11116_s15 + $0x1330] sm:$0xff]  ;;  %v10135_v50 = vpack.c.bf16 %v2370_v60, %v2362_v18 }
 0x77d   : > { %10112 = vmatprep.subr.bf16.mxu1 %v10111_v38  ;;  %v2352_v38 = vld [vmem:[%s11116_s15 + $0x13e8] sm:$0xff]  ;;  %v9617_v46 = vpack.c.bf16 %v2335_v5, %v2327_v29  ;;  %v10129_v58 = vpack.c.bf16 %v2337_v36, %v2329_v33  ;;  %v10143_v29 = vpack.c.bf16 %v2402_v56, %v2394_v52  ;;  %v2401_v5 = vld [vmem:[%s11116_s15 + $0x1570] sm:$0xff]  ;;  %v2410_v36 = vld [vmem:[%s11116_s15 + $0x15b8] sm:$0xff] }
 0x77e   : > { %v9619_v54 = vpack.c.bf16 %v2352_v38, %v2344_v11  ;;  %v2408_v33 = vld [vmem:[%s11116_s15 + $0x15a8] sm:$0xff]  ;;  %v2418_v11 = vld [vmem:[%s11116_s15 + $0x15f8] sm:$0xff] }
 0x77f   : > { %9602 = vmatpush1.bf16.msra.mxu0 %v9601_v55  ;;  %v2343_v55 = vld [vmem:[%s11116_s15 + $0x13a0] sm:$0xff] }
 0x780   : > { %10114 = vmatpush1.bf16.msra.mxu1 %v10113_v20  ;;  %9604 = vmatprep.subr.bf16.mxu0 %v9603_v1  ;;  %v2351_v20 = vld [vmem:[%s11116_s15 + $0x13e0] sm:$0xff]  ;;  %v2345_v1 = vld [vmem:[%s11116_s15 + $0x13b0] sm:$0xff] }
 0x781   : > { %10116 = vmatprep.subr.bf16.mxu1 %v10115_v59  ;;  %v2368_v59 = vld [vmem:[%s11116_s15 + $0x1468] sm:$0xff]  ;;  %v9621_v4 = vpack.c.bf16 %v2351_v20, %v2343_v55  ;;  %v10133_v0 = vpack.c.bf16 %v2353_v2, %v2345_v1  ;;  %v10147_v55 = vpack.c.bf16 %v2418_v11, %v2410_v36  ;;  %v2417_v20 = vld [vmem:[%s11116_s15 + $0x15f0] sm:$0xff]  ;;  %v2426_v2 = vld [vmem:[%s11116_s15 + $0x1638] sm:$0xff] }
 0x782   : > { %v9623_v30 = vpack.c.bf16 %v2368_v59, %v2360_v57  ;;  %v2424_v1 = vld [vmem:[%s11116_s15 + $0x1628] sm:$0xff]  ;;  %v2434_v57 = vld [vmem:[%s11116_s15 + $0x1678] sm:$0xff] }
 0x783   : > { %9606 = vmatpush1.bf16.msra.mxu0 %v9605_v26  ;;  %v2359_v26 = vld [vmem:[%s11116_s15 + $0x1420] sm:$0xff] }
 0x784   : > { %10118 = vmatpush1.bf16.msra.mxu1 %v10117_v44  ;;  %9608 = vmatprep.subr.bf16.mxu0 %v9607_v35  ;;  %v2367_v44 = vld [vmem:[%s11116_s15 + $0x1460] sm:$0xff]  ;;  %v2361_v35 = vld [vmem:[%s11116_s15 + $0x1430] sm:$0xff] }
 0x785   : > { %10120 = vmatprep.subr.bf16.mxu1 %v10119_v49  ;;  %v2384_v49 = vld [vmem:[%s11116_s15 + $0x14e8] sm:$0xff]  ;;  %v9625_v53 = vpack.c.bf16 %v2367_v44, %v2359_v26  ;;  %v10137_v6 = vpack.c.bf16 %v2369_v17, %v2361_v35  ;;  %v10151_v26 = vpack.c.bf16 %v2434_v57, %v2426_v2  ;;  %v2433_v44 = vld [vmem:[%s11116_s15 + $0x1670] sm:$0xff]  ;;  %v2442_v17 = vld [vmem:[%s11116_s15 + $0x16b8] sm:$0xff] }
 0x786   : > { %v9627_v7 = vpack.c.bf16 %v2384_v49, %v2376_v47  ;;  %v2440_v35 = vld [vmem:[%s11116_s15 + $0x16a8] sm:$0xff]  ;;  %v2450_v47 = vld [vmem:[%s11116_s15 + $0x16f8] sm:$0xff] }
 0x787   : > { %9610 = vmatpush1.bf16.msra.mxu0 %v9609_v9  ;;  %v2375_v9 = vld [vmem:[%s11116_s15 + $0x14a0] sm:$0xff] }
 0x788   : > { %10122 = vmatpush1.bf16.msra.mxu1 %v10121_v10  ;;  %9612 = vmatprep.subr.bf16.mxu0 %v9611_v12  ;;  %v2383_v10 = vld [vmem:[%s11116_s15 + $0x14e0] sm:$0xff]  ;;  %v2377_v12 = vld [vmem:[%s11116_s15 + $0x14b0] sm:$0xff] }
 0x789   : > { %10124 = vmatprep.subr.bf16.mxu1 %v10123_v28  ;;  %v2400_v28 = vld [vmem:[%s11116_s15 + $0x1568] sm:$0xff]  ;;  %v9629_v62 = vpack.c.bf16 %v2383_v10, %v2375_v9  ;;  %v10141_v13 = vpack.c.bf16 %v2385_v21, %v2377_v12  ;;  %v10155_v9 = vpack.c.bf16 %v2450_v47, %v2442_v17  ;;  %v2449_v10 = vld [vmem:[%s11116_s15 + $0x16f0] sm:$0xff]  ;;  %v2458_v21 = vld [vmem:[%s11116_s15 + $0x1738] sm:$0xff] }
 0x78a   : > { %v9631_v31 = vpack.c.bf16 %v2400_v28, %v2392_v27  ;;  %v2456_v12 = vld [vmem:[%s11116_s15 + $0x1728] sm:$0xff]  ;;  %v2466_v27 = vld [vmem:[%s11116_s15 + $0x1778] sm:$0xff] }
 0x78b   : > { %9614 = vmatpush1.bf16.msra.mxu0 %v9613_v32  ;;  %v2391_v32 = vld [vmem:[%s11116_s15 + $0x1520] sm:$0xff] }
 0x78c   : > { %10126 = vmatpush1.bf16.msra.mxu1 %v10125_v19  ;;  %9616 = vmatprep.subr.bf16.mxu0 %v9615_v25  ;;  %v2399_v19 = vld [vmem:[%s11116_s15 + $0x1560] sm:$0xff]  ;;  %v2393_v25 = vld [vmem:[%s11116_s15 + $0x1530] sm:$0xff] }
 0x78d   : > { %10128 = vmatprep.subr.bf16.mxu1 %v10127_v34  ;;  %v2416_v34 = vld [vmem:[%s11116_s15 + $0x15e8] sm:$0xff]  ;;  %v9633_v38 = vpack.c.bf16 %v2399_v19, %v2391_v32  ;;  %v10145_v40 = vpack.c.bf16 %v2401_v5, %v2393_v25  ;;  %v10159_v32 = vpack.c.bf16 %v2466_v27, %v2458_v21  ;;  %v2465_v19 = vld [vmem:[%s11116_s15 + $0x1770] sm:$0xff]  ;;  %v2474_v5 = vld [vmem:[%s11116_s15 + $0x17b8] sm:$0xff] }
 0x78e   : > { %v9635_v41 = vpack.c.bf16 %v2416_v34, %v2408_v33  ;;  %v2472_v25 = vld [vmem:[%s11116_s15 + $0x17a8] sm:$0xff]  ;;  %v2482_v33 = vld [vmem:[%s11116_s15 + $0x17f8] sm:$0xff] }
 0x78f   : > { %9618 = vmatpush1.bf16.msra.mxu0 %v9617_v46  ;;  %v2407_v46 = vld [vmem:[%s11116_s15 + $0x15a0] sm:$0xff] }
 0x790   : > { %10130 = vmatpush1.bf16.msra.mxu1 %v10129_v58  ;;  %9620 = vmatprep.subr.bf16.mxu0 %v9619_v54  ;;  %v2415_v58 = vld [vmem:[%s11116_s15 + $0x15e0] sm:$0xff]  ;;  %v2409_v54 = vld [vmem:[%s11116_s15 + $0x15b0] sm:$0xff] }
 0x791   : > { %10132 = vmatprep.subr.bf16.mxu1 %v10131_v43  ;;  %v2432_v43 = vld [vmem:[%s11116_s15 + $0x1668] sm:$0xff]  ;;  %v9637_v59 = vpack.c.bf16 %v2415_v58, %v2407_v46  ;;  %v10149_v18 = vpack.c.bf16 %v2417_v20, %v2409_v54  ;;  %v10163_v46 = vpack.c.bf16 %v2482_v33, %v2474_v5  ;;  %v2481_v58 = vld [vmem:[%s11116_s15 + $0x17f0] sm:$0xff]  ;;  %v2490_v20 = vld [vmem:[%s11116_s15 + $0x1838] sm:$0xff] }
 0x792   : > { %v9639_v60 = vpack.c.bf16 %v2432_v43, %v2424_v1  ;;  %v2488_v54 = vld [vmem:[%s11116_s15 + $0x1828] sm:$0xff]  ;;  %v2498_v1 = vld [vmem:[%s11116_s15 + $0x1878] sm:$0xff]  ;;  %v2535_v33 = vld [vmem:[%s11116_s15 + $0x19a0] sm:$0xff] }
 0x793   : > { %9622 = vmatpush1.bf16.msra.mxu0 %v9621_v4  ;;  %v2423_v4 = vld [vmem:[%s11116_s15 + $0x1620] sm:$0xff] }
 0x794   : > { %10134 = vmatpush1.bf16.msra.mxu1 %v10133_v0  ;;  %9624 = vmatprep.subr.bf16.mxu0 %v9623_v30  ;;  %v2431_v0 = vld [vmem:[%s11116_s15 + $0x1660] sm:$0xff]  ;;  %v2425_v30 = vld [vmem:[%s11116_s15 + $0x1630] sm:$0xff] }
 0x795   : > { %10136 = vmatprep.subr.bf16.mxu1 %v10135_v50  ;;  %v2448_v50 = vld [vmem:[%s11116_s15 + $0x16e8] sm:$0xff]  ;;  %v9641_v49 = vpack.c.bf16 %v2431_v0, %v2423_v4  ;;  %v10153_v45 = vpack.c.bf16 %v2433_v44, %v2425_v30  ;;  %v10167_v4 = vpack.c.bf16 %v2498_v1, %v2490_v20  ;;  %v2497_v0 = vld [vmem:[%s11116_s15 + $0x1870] sm:$0xff]  ;;  %v2506_v44 = vld [vmem:[%s11116_s15 + $0x18b8] sm:$0xff] }
 0x796   : > { %v9643_v51 = vpack.c.bf16 %v2448_v50, %v2440_v35  ;;  %v2504_v30 = vld [vmem:[%s11116_s15 + $0x18a8] sm:$0xff]  ;;  %v2514_v35 = vld [vmem:[%s11116_s15 + $0x18f8] sm:$0xff]  ;;  %v2551_v20 = vld [vmem:[%s11116_s15 + $0x1a20] sm:$0xff] }
 0x797   : > { %9626 = vmatpush1.bf16.msra.mxu0 %v9625_v53  ;;  %v2439_v53 = vld [vmem:[%s11116_s15 + $0x16a0] sm:$0xff] }
 0x798   : > { %10138 = vmatpush1.bf16.msra.mxu1 %v10137_v6  ;;  %9628 = vmatprep.subr.bf16.mxu0 %v9627_v7  ;;  %v2447_v6 = vld [vmem:[%s11116_s15 + $0x16e0] sm:$0xff]  ;;  %v2441_v7 = vld [vmem:[%s11116_s15 + $0x16b0] sm:$0xff] }
 0x799   : > { %10140 = vmatprep.subr.bf16.mxu1 %v10139_v14  ;;  %v2464_v14 = vld [vmem:[%s11116_s15 + $0x1768] sm:$0xff]  ;;  %v9645_v28 = vpack.c.bf16 %v2447_v6, %v2439_v53  ;;  %v10157_v52 = vpack.c.bf16 %v2449_v10, %v2441_v7  ;;  %v10171_v53 = vpack.c.bf16 %v2514_v35, %v2506_v44  ;;  %v2513_v6 = vld [vmem:[%s11116_s15 + $0x18f0] sm:$0xff]  ;;  %v2522_v10 = vld [vmem:[%s11116_s15 + $0x1938] sm:$0xff] }
 0x79a   : > { %v9647_v56 = vpack.c.bf16 %v2464_v14, %v2456_v12  ;;  %v2520_v7 = vld [vmem:[%s11116_s15 + $0x1928] sm:$0xff]  ;;  %v2530_v12 = vld [vmem:[%s11116_s15 + $0x1978] sm:$0xff]  ;;  %v2559_v1 = vld [vmem:[%s11116_s15 + $0x1a60] sm:$0xff] }
 0x79b   : > { %9630 = vmatpush1.bf16.msra.mxu0 %v9629_v62  ;;  %v2455_v62 = vld [vmem:[%s11116_s15 + $0x1720] sm:$0xff] }
 0x79c   : > { %10142 = vmatpush1.bf16.msra.mxu1 %v10141_v13  ;;  %9632 = vmatprep.subr.bf16.mxu0 %v9631_v31  ;;  %v2463_v13 = vld [vmem:[%s11116_s15 + $0x1760] sm:$0xff]  ;;  %v2457_v31 = vld [vmem:[%s11116_s15 + $0x1730] sm:$0xff] }
 0x79d   : > { %10144 = vmatprep.subr.bf16.mxu1 %v10143_v29  ;;  %v2480_v29 = vld [vmem:[%s11116_s15 + $0x17e8] sm:$0xff]  ;;  %v9649_v34 = vpack.c.bf16 %v2463_v13, %v2455_v62  ;;  %v10161_v36 = vpack.c.bf16 %v2465_v19, %v2457_v31  ;;  %v10175_v62 = vpack.c.bf16 %v2530_v12, %v2522_v10  ;;  %v2529_v13 = vld [vmem:[%s11116_s15 + $0x1970] sm:$0xff]  ;;  %v2546_v19 = vld [vmem:[%s11116_s15 + $0x19f8] sm:$0xff] }
 0x79e   : > { %v9651_v11 = vpack.c.bf16 %v2480_v29, %v2472_v25  ;;  %v2536_v31 = vld [vmem:[%s11116_s15 + $0x19a8] sm:$0xff]  ;;  %v2567_v44 = vld [vmem:[%s11116_s15 + $0x1aa0] sm:$0xff] }
 0x79f   : > { %9634 = vmatpush1.bf16.msra.mxu0 %v9633_v38  ;;  %v2471_v38 = vld [vmem:[%s11116_s15 + $0x17a0] sm:$0xff] }
 0x7a0   : > { %10146 = vmatpush1.bf16.msra.mxu1 %v10145_v40  ;;  %9636 = vmatprep.subr.bf16.mxu0 %v9635_v41  ;;  %v2479_v40 = vld [vmem:[%s11116_s15 + $0x17e0] sm:$0xff]  ;;  %v2473_v41 = vld [vmem:[%s11116_s15 + $0x17b0] sm:$0xff] }
 0x7a1   : > { %10148 = vmatprep.subr.bf16.mxu1 %v10147_v55  ;;  %v2496_v55 = vld [vmem:[%s11116_s15 + $0x1868] sm:$0xff]  ;;  %v9653_v43 = vpack.c.bf16 %v2479_v40, %v2471_v38  ;;  %v10165_v2 = vpack.c.bf16 %v2481_v58, %v2473_v41  ;;  %v2545_v38 = vld [vmem:[%s11116_s15 + $0x19f0] sm:$0xff]  ;;  %v2554_v41 = vld [vmem:[%s11116_s15 + $0x1a38] sm:$0xff] }
 0x7a2   : > { %v9655_v57 = vpack.c.bf16 %v2496_v55, %v2488_v54  ;;  %v2552_v40 = vld [vmem:[%s11116_s15 + $0x1a28] sm:$0xff]  ;;  %v2575_v35 = vld [vmem:[%s11116_s15 + $0x1ae0] sm:$0xff] }
 0x7a3   : > { %9638 = vmatpush1.bf16.msra.mxu0 %v9637_v59  ;;  %v2487_v59 = vld [vmem:[%s11116_s15 + $0x1820] sm:$0xff] }
 0x7a4   : > { %10150 = vmatpush1.bf16.msra.mxu1 %v10149_v18  ;;  %9640 = vmatprep.subr.bf16.mxu0 %v9639_v60  ;;  %v2495_v18 = vld [vmem:[%s11116_s15 + $0x1860] sm:$0xff]  ;;  %v2489_v60 = vld [vmem:[%s11116_s15 + $0x1830] sm:$0xff] }
 0x7a5   : > { %10152 = vmatprep.subr.bf16.mxu1 %v10151_v26  ;;  %v2512_v26 = vld [vmem:[%s11116_s15 + $0x18e8] sm:$0xff]  ;;  %v9657_v50 = vpack.c.bf16 %v2495_v18, %v2487_v59  ;;  %v10169_v17 = vpack.c.bf16 %v2497_v0, %v2489_v60  ;;  %v2570_v60 = vld [vmem:[%s11116_s15 + $0x1ab8] sm:$0xff]  ;;  %v9673_v0 = vpack.c.bf16 %v2559_v1, %v2551_v20  ;;  %v2583_v10 = vld [vmem:[%s11116_s15 + $0x1b20] sm:$0xff] }
 0x7a6   : > { %v9659_v47 = vpack.c.bf16 %v2512_v26, %v2504_v30  ;;  %v2568_v59 = vld [vmem:[%s11116_s15 + $0x1aa8] sm:$0xff]  ;;  %v2591_v12 = vld [vmem:[%s11116_s15 + $0x1b60] sm:$0xff] }
 0x7a7   : > { %9642 = vmatpush1.bf16.msra.mxu0 %v9641_v49  ;;  %v2503_v49 = vld [vmem:[%s11116_s15 + $0x18a0] sm:$0xff]  ;;  %v2576_v18 = vld [vmem:[%s11116_s15 + $0x1ae8] sm:$0xff] }
 0x7a8   : > { %10154 = vmatpush1.bf16.msra.mxu1 %v10153_v45  ;;  %9644 = vmatprep.subr.bf16.mxu0 %v9643_v51  ;;  %v2511_v45 = vld [vmem:[%s11116_s15 + $0x18e0] sm:$0xff]  ;;  %v2505_v51 = vld [vmem:[%s11116_s15 + $0x18b0] sm:$0xff]  ;;  %v9675_v26 = vpack.c.bf16 %v2576_v18, %v2568_v59 }
 0x7a9   : > { %10156 = vmatprep.subr.bf16.mxu1 %v10155_v9  ;;  %v2528_v9 = vld [vmem:[%s11116_s15 + $0x1968] sm:$0xff]  ;;  %v9661_v14 = vpack.c.bf16 %v2511_v45, %v2503_v49  ;;  %v10173_v21 = vpack.c.bf16 %v2513_v6, %v2505_v51  ;;  %v2586_v51 = vld [vmem:[%s11116_s15 + $0x1b38] sm:$0xff]  ;;  %v9677_v6 = vpack.c.bf16 %v2575_v35, %v2567_v44  ;;  %v1705_v20 = vld [vmem:[#allocation3] sm:$0xff] }
 0x7aa   : > { %v9663_v27 = vpack.c.bf16 %v2528_v9, %v2520_v7  ;;  %v2584_v49 = vld [vmem:[%s11116_s15 + $0x1b28] sm:$0xff]  ;;  %v2615_v59 = vld [vmem:[%s11116_s15 + $0x1c20] sm:$0xff]  ;;  %v2634_v35 = vld [vmem:[%s11116_s15 + $0x1cb8] sm:$0xff] }
 0x7ab   : > { %9646 = vmatpush1.bf16.msra.mxu0 %v9645_v28  ;;  %v2519_v28 = vld [vmem:[%s11116_s15 + $0x1920] sm:$0xff]  ;;  %v2592_v45 = vld [vmem:[%s11116_s15 + $0x1b68] sm:$0xff] }
 0x7ac   : > { %10158 = vmatpush1.bf16.msra.mxu1 %v10157_v52  ;;  %9648 = vmatprep.subr.bf16.mxu0 %v9647_v56  ;;  %v2527_v52 = vld [vmem:[%s11116_s15 + $0x1960] sm:$0xff]  ;;  %v2521_v56 = vld [vmem:[%s11116_s15 + $0x1930] sm:$0xff]  ;;  %v9679_v9 = vpack.c.bf16 %v2592_v45, %v2584_v49 }
 0x7ad   : > { %10160 = vmatprep.subr.bf16.mxu1 %v10159_v32  ;;  %v2544_v32 = vld [vmem:[%s11116_s15 + $0x19e8] sm:$0xff]  ;;  %v9665_v25 = vpack.c.bf16 %v2527_v52, %v2519_v28  ;;  %v10177_v29 = vpack.c.bf16 %v2529_v13, %v2521_v56  ;;  %v2593_v28 = vld [vmem:[%s11116_s15 + $0x1b70] sm:$0xff]  ;;  %v2623_v18 = vld [vmem:[%s11116_s15 + $0x1c60] sm:$0xff] }
 0x7ae   : > { %v9667_v5 = vpack.c.bf16 %v2544_v32, %v2536_v31  ;;  %v2600_v52 = vld [vmem:[%s11116_s15 + $0x1ba8] sm:$0xff]  ;;  %v2602_v31 = vld [vmem:[%s11116_s15 + $0x1bb8] sm:$0xff]  ;;  %v2631_v45 = vld [vmem:[%s11116_s15 + $0x1ca0] sm:$0xff] }
 0x7af   : > { %9650 = vmatpush1.bf16.msra.mxu0 %v9649_v34  ;;  %v2543_v34 = vld [vmem:[%s11116_s15 + $0x19e0] sm:$0xff]  ;;  %v2608_v56 = vld [vmem:[%s11116_s15 + $0x1be8] sm:$0xff]  ;;  %v2610_v32 = vld [vmem:[%s11116_s15 + $0x1bf8] sm:$0xff] }
 0x7b0   : > { %10162 = vmatpush1.bf16.msra.mxu1 %v10161_v36  ;;  %9652 = vmatprep.subr.bf16.mxu0 %v9651_v11  ;;  %v2537_v36 = vld [vmem:[%s11116_s15 + $0x19b0] sm:$0xff]  ;;  %v9669_v58 = vpack.c.bf16 %v2543_v34, %v2535_v33  ;;  %v9683_v33 = vpack.c.bf16 %v2608_v56, %v2600_v52  ;;  %v2599_v34 = vld [vmem:[%s11116_s15 + $0x1ba0] sm:$0xff] }
 0x7b1   : > { %10164 = vmatprep.subr.bf16.mxu1 %v10163_v46  ;;  %v2562_v46 = vld [vmem:[%s11116_s15 + $0x1a78] sm:$0xff]  ;;  %v10181_v54 = vpack.c.bf16 %v2545_v38, %v2537_v36  ;;  %v2607_v36 = vld [vmem:[%s11116_s15 + $0x1be0] sm:$0xff] }
 0x7b2   : > { %v9685_v1 = vpack.c.bf16 %v2607_v36, %v2599_v34  ;;  %v2647_v52 = vld [vmem:[%s11116_s15 + $0x1d20] sm:$0xff] }
 0x7b3   : > { %9654 = vmatpush1.bf16.msra.mxu0 %v9653_v43  ;;  %v2553_v43 = vld [vmem:[%s11116_s15 + $0x1a30] sm:$0xff]  ;;  %v2655_v56 = vld [vmem:[%s11116_s15 + $0x1d60] sm:$0xff] }
 0x7b4   : > { %10166 = vmatpush1.bf16.msra.mxu1 %v10165_v2  ;;  %9656 = vmatprep.subr.bf16.mxu0 %v9655_v57  ;;  %v10183_v2 = vpack.c.bf16 %v2562_v46, %v2554_v41  ;;  %v2561_v57 = vld [vmem:[%s11116_s15 + $0x1a70] sm:$0xff]  ;;  %v2616_v41 = vld [vmem:[%s11116_s15 + $0x1c28] sm:$0xff]  ;;  %v2663_v34 = vld [vmem:[%s11116_s15 + $0x1da0] sm:$0xff] }
 0x7b5   : > { %10168 = vmatprep.subr.bf16.mxu1 %v10167_v4  ;;  %v2578_v4 = vld [vmem:[%s11116_s15 + $0x1af8] sm:$0xff]  ;;  %v10185_v30 = vpack.c.bf16 %v2561_v57, %v2553_v43  ;;  %v2624_v46 = vld [vmem:[%s11116_s15 + $0x1c68] sm:$0xff]  ;;  %v2671_v36 = vld [vmem:[%s11116_s15 + $0x1de0] sm:$0xff] }
 0x7b6   : > { %5194 = vmatmul.mubr.f32.vlgmr.msra.gmra.mrb[2].mxu0 %v12050_v23  ;;  %v9687_v57 = vpack.c.bf16 %v2624_v46, %v2616_v41  ;;  %v2688_v41 = vld [vmem:[%s11116_s15 + $0x1e68] sm:$0xff]  ;;  %v2682_v46 = vld [vmem:[%s11116_s15 + $0x1e38] sm:$0xff] }
 0x7b7   : > { %9658 = vmatpush1.bf16.msra.mxu0 %v9657_v50  ;;  %5762 = vmatmul.mubr.f32.vlgmr.msra.gmra.mrb[2].mxu1 %v12050_v23  ;;  %v2538_v23 = vld [vmem:[%s11116_s15 + $0x19b8] sm:$0xff]  ;;  %v2569_v50 = vld [vmem:[%s11116_s15 + $0x1ab0] sm:$0xff] }
 0x7b8   : > { %10170 = vmatpush1.bf16.msra.mxu1 %v10169_v17  ;;  %9660 = vmatprep.subr.bf16.mxu0 %v9659_v47  ;;  %v10179_v11 = vpack.c.bf16 %v2546_v19, %v2538_v23  ;;  %v10187_v17 = vpack.c.bf16 %v2578_v4, %v2570_v60  ;;  %v2577_v47 = vld [vmem:[%s11116_s15 + $0x1af0] sm:$0xff] }
 0x7b9   : > { %10172 = vmatprep.subr.bf16.mxu1 %v10171_v53  ;;  %5264 = vmatprep.mubr.f32.mxu0 %v12198_v61  ;;  %v2594_v53 = vld [vmem:[%s11116_s15 + $0x1b78] sm:$0xff]  ;;  %v10189_v7 = vpack.c.bf16 %v2577_v47, %v2569_v50  ;;  %v2617_v60 = vld [vmem:[%s11116_s15 + $0x1c30] sm:$0xff] }
 0x7ba   : > { %5832 = vmatprep.mubr.f32.mxu1 %v12198_v61  ;;  %v2560_v61 = vld [vmem:[%s11116_s15 + $0x1a68] sm:$0xff]  ;;  %v2642_v50 = vld [vmem:[%s11116_s15 + $0x1cf8] sm:$0xff] }
 0x7bb   : > { %9662 = vmatpush1.bf16.msra.mxu0 %v9661_v14  ;;  %v9671_v55 = vpack.c.bf16 %v2560_v61, %v2552_v40  ;;  %v2585_v14 = vld [vmem:[%s11116_s15 + $0x1b30] sm:$0xff]  ;;  %v10195_v40 = vpack.c.bf16 %v2610_v32, %v2602_v31  ;;  %v2664_v32 = vld [vmem:[%s11116_s15 + $0x1da8] sm:$0xff] }
 0x7bc   : > { %10174 = vmatpush1.bf16.msra.mxu1 %v10173_v21  ;;  %9664 = vmatprep.subr.bf16.mxu0 %v9663_v27  ;;  %v10191_v27 = vpack.c.bf16 %v2594_v53, %v2586_v51  ;;  %v2609_v61 = vld [vmem:[%s11116_s15 + $0x1bf0] sm:$0xff]  ;;  %v2639_v51 = vld [vmem:[%s11116_s15 + $0x1ce0] sm:$0xff] }
 0x7bd   : > { %10176 = vmatprep.subr.bf16.mxu1 %v10175_v62  ;;  %v2633_v53 = vld [vmem:[%s11116_s15 + $0x1cb0] sm:$0xff] }
 0x7be   : > { %v2657_v31 = vld [vmem:[%s11116_s15 + $0x1d70] sm:$0xff] }
 0x7bf   : > { %9666 = vmatpush1.bf16.msra.mxu0 %v9665_v25  ;;  %v9681_v25 = vpack.c.bf16 %v2591_v12, %v2583_v10  ;;  %v2656_v10 = vld [vmem:[%s11116_s15 + $0x1d68] sm:$0xff]  ;;  %v2650_v12 = vld [vmem:[%s11116_s15 + $0x1d38] sm:$0xff] }
 0x7c0   : > { %10178 = vmatpush1.bf16.msra.mxu1 %v10177_v29  ;;  %9668 = vmatprep.subr.bf16.mxu0 %v9667_v5  ;;  %v10193_v5 = vpack.c.bf16 %v2593_v28, %v2585_v14  ;;  %v2658_v14 = vld [vmem:[%s11116_s15 + $0x1d78] sm:$0xff] }
 0x7c1   : > { %10180 = vmatprep.subr.bf16.mxu1 %v10179_v11  ;;  %v2601_v11 = vld [vmem:[%s11116_s15 + $0x1bb0] sm:$0xff] }
 0x7c3   : > { %9670 = vmatpush1.bf16.msra.mxu0 %v9669_v58 }
 0x7c4   : > { %10182 = vmatpush1.bf16.msra.mxu1 %v10181_v54  ;;  %9672 = vmatprep.subr.bf16.mxu0 %v9671_v55  ;;  %v2618_v54 = vld [vmem:[%s11116_s15 + $0x1c38] sm:$0xff] }
 0x7c5   : > { %10184 = vmatprep.subr.bf16.mxu1 %v10183_v2  ;;  %v2626_v55 = vld [vmem:[%s11116_s15 + $0x1c78] sm:$0xff]  ;;  %v10197_v2 = vpack.c.bf16 %v2609_v61, %v2601_v11  ;;  %v2665_v11 = vld [vmem:[%s11116_s15 + $0x1db0] sm:$0xff]  ;;  %v2680_v61 = vld [vmem:[%s11116_s15 + $0x1e28] sm:$0xff] }
 0x7c6   : > { %v10199_v4 = vpack.c.bf16 %v2626_v55, %v2618_v54  ;;  %v9701_v54 = vpack.c.bf16 %v2671_v36, %v2663_v34  ;;  %v2744_v34 = vld [vmem:[%s11116_s15 + $0x2028] sm:$0xff] }
 0x7c7   : > { %9674 = vmatpush1.bf16.msra.mxu0 %v9673_v0  ;;  %v2625_v0 = vld [vmem:[%s11116_s15 + $0x1c70] sm:$0xff]  ;;  %v2752_v36 = vld [vmem:[%s11116_s15 + $0x2068] sm:$0xff] }
 0x7c8   : > { %10186 = vmatpush1.bf16.msra.mxu1 %v10185_v30  ;;  %9676 = vmatprep.subr.bf16.mxu0 %v9675_v26  ;;  %v2632_v30 = vld [vmem:[%s11116_s15 + $0x1ca8] sm:$0xff]  ;;  %v10201_v47 = vpack.c.bf16 %v2625_v0, %v2617_v60  ;;  %v2706_v0 = vld [vmem:[%s11116_s15 + $0x1ef8] sm:$0xff] }
 0x7c9   : > { %v4414_v21 = vpop.f32.mrb[0].mxu0  ;;  %10188 = vmatprep.subr.bf16.mxu1 %v10187_v17  ;;  %v2640_v26 = vld [vmem:[%s11116_s15 + $0x1ce8] sm:$0xff]  ;;  %v9689_v17 = vpack.c.bf16 %v2623_v18, %v2615_v59  ;;  %v2689_v59 = vld [vmem:[%s11116_s15 + $0x1e70] sm:$0xff] }
 0x7ca   : > { %v4982_v62 = vpop.f32.mrb[0].mxu1  ;;  %v4416_v13 = vpop.f32.mrb[1].mxu0  ;;  %v9691_v49 = vpack.c.bf16 %v2640_v26, %v2632_v30  ;;  %v2696_v18 = vld [vmem:[%s11116_s15 + $0x1ea8] sm:$0xff] }
 0x7cb   : > { %v6131_v23 = vcombine.low %v4414_v21, %v4416_v13  ;;  %v4984_v19 = vpop.f32.mrb[1].mxu1  ;;  %9678 = vmatpush1.bf16.msra.mxu0 %v9677_v6  ;;  %v10203_v6 = vpack.c.bf16 %v2642_v50, %v2634_v35  ;;  %v9693_v21 = vpack.c.bf16 %v2639_v51, %v2631_v45  ;;  %v10207_v13 = vpack.c.bf16 %v2658_v14, %v2650_v12  ;;  %v2704_v60 = vld [vmem:[%s11116_s15 + $0x1ee8] sm:$0xff]  ;;  %v2695_v35 = vld [vmem:[%s11116_s15 + $0x1ea0] sm:$0xff] }
 0x7cc   : > { %v6132_v29 = vcombine.low %v4982_v62, %v4984_v19  ;;  %10190 = vmatpush1.bf16.msra.mxu1 %v10189_v7  ;;  %9680 = vmatprep.subr.bf16.mxu0 %v9679_v9  ;;  %v2641_v7 = vld [vmem:[%s11116_s15 + $0x1cf0] sm:$0xff]  ;;  %v2648_v9 = vld [vmem:[%s11116_s15 + $0x1d28] sm:$0xff]  ;;  %v2666_v19 = vld [vmem:[%s11116_s15 + $0x1db8] sm:$0xff] }
 0x7cd   : > { %v6139_v38 = vrot.slane %v6131_v23, %v11834_v37  ;;  %10192 = vmatprep.subr.bf16.mxu1 %v10191_v27  ;;  %v10205_v27 = vpack.c.bf16 %v2641_v7, %v2633_v53  ;;  %v9695_v28 = vpack.c.bf16 %v2656_v10, %v2648_v9  ;;  %v2649_v62 = vld [vmem:[%s11116_s15 + $0x1d30] sm:$0xff]  ;;  %v2672_v23 = vld [vmem:[%s11116_s15 + $0x1de8] sm:$0xff]  ;;  %v2703_v50 = vld [vmem:[%s11116_s15 + $0x1ee0] sm:$0xff] }
 0x7ce   : > { %v6146_v58 = vrot.slane %v6132_v29, %v11834_v37  ;;  %v9697_v29 = vpack.c.bf16 %v2655_v56, %v2647_v52  ;;  %v2712_v45 = vld [vmem:[%s11116_s15 + $0x1f28] sm:$0xff]  ;;  %v2714_v53 = vld [vmem:[%s11116_s15 + $0x1f38] sm:$0xff]  ;;  %v9709_v7 = vpack.c.bf16 %v2703_v50, %v2695_v35  ;;  %v2711_v12 = vld [vmem:[%s11116_s15 + $0x1f20] sm:$0xff] }
 0x7cf   : > { %9682 = vmatpush1.bf16.msra.mxu0 %v9681_v25  ;;  %v2674_v25 = vld [vmem:[%s11116_s15 + $0x1df8] sm:$0xff]  ;;  %v2720_v51 = vld [vmem:[%s11116_s15 + $0x1f68] sm:$0xff]  ;;  %v2719_v14 = vld [vmem:[%s11116_s15 + $0x1f60] sm:$0xff] }
 0x7d0   : > { %v6147_v43 = vcombine.low %v6139_v38, %v6146_v58  ;;  %10194 = vmatpush1.bf16.msra.mxu1 %v10193_v5  ;;  %9684 = vmatprep.subr.bf16.mxu0 %v9683_v33  ;;  %v10209_v5 = vpack.c.bf16 %v2657_v31, %v2649_v62  ;;  %v9699_v33 = vpack.c.bf16 %v2672_v23, %v2664_v32  ;;  %v2690_v58 = vld [vmem:[%s11116_s15 + $0x1e78] sm:$0xff]  ;;  %v2728_v52 = vld [vmem:[%s11116_s15 + $0x1fa8] sm:$0xff] }
 0x7d1   : > { %10196 = vmatprep.subr.bf16.mxu1 %v10195_v40  ;;  %v10211_v38 = vpack.c.bf16 %v2674_v25, %v2666_v19  ;;  %v2673_v40 = vld [vmem:[%s11116_s15 + $0x1df0] sm:$0xff]  ;;  %v9711_v10 = vpack.c.bf16 %v2720_v51, %v2712_v45  ;;  %v2736_v56 = vld [vmem:[%s11116_s15 + $0x1fe8] sm:$0xff]  ;;  %v2730_v62 = vld [vmem:[%s11116_s15 + $0x1fb8] sm:$0xff]  ;;  %v9713_v31 = vpack.c.bf16 %v2719_v14, %v2711_v12 }
 0x7d2   : > { %v6167_v44 = vadd.f32 %v6147_v43, %v1705_v20  ;;  %v10213_v55 = vpack.c.bf16 %v2673_v40, %v2665_v11  ;;  %v9703_v20 = vpack.c.bf16 %v2688_v41, %v2680_v61  ;;  %v2687_v43 = vld [vmem:[%s11116_s15 + $0x1e60] sm:$0xff]  ;;  %v9715_v23 = vpack.c.bf16 %v2736_v56, %v2728_v52  ;;  %v2746_v11 = vld [vmem:[%s11116_s15 + $0x2038] sm:$0xff]  ;;  %v2776_v35 = vld [vmem:[%s11116_s15 + $0x2128] sm:$0xff] }
 0x7d3   : > { %9686 = vmatpush1.bf16.msra.mxu0 %v9685_v1  ;;  %v2679_v1 = vld [vmem:[%s11116_s15 + $0x1e20] sm:$0xff]  ;;  %v9719_v41 = vpack.c.bf16 %v2752_v36, %v2744_v34  ;;  %v2784_v50 = vld [vmem:[%s11116_s15 + $0x2168] sm:$0xff] }
 0x7d4   : > { %6169 = vst [vmem:[#allocation3] sm:$0xff] %v6167_v44  ;;  %10198 = vmatpush1.bf16.msra.mxu1 %v10197_v2  ;;  %9688 = vmatprep.subr.bf16.mxu0 %v9687_v57  ;;  %v2681_v2 = vld [vmem:[%s11116_s15 + $0x1e30] sm:$0xff]  ;;  %v10215_v57 = vpack.c.bf16 %v2690_v58, %v2682_v46  ;;  %v9705_v30 = vpack.c.bf16 %v2687_v43, %v2679_v1  ;;  %v2727_v19 = vld [vmem:[%s11116_s15 + $0x1fa0] sm:$0xff]  ;;  %v2760_v1 = vld [vmem:[%s11116_s15 + $0x20a8] sm:$0xff] }
 0x7d5   : > { %10200 = vmatprep.subr.bf16.mxu1 %v10199_v4  ;;  %v2698_v4 = vld [vmem:[%s11116_s15 + $0x1eb8] sm:$0xff]  ;;  %v10217_v26 = vpack.c.bf16 %v2689_v59, %v2681_v2  ;;  %v9707_v44 = vpack.c.bf16 %v2704_v60, %v2696_v18  ;;  %v2735_v25 = vld [vmem:[%s11116_s15 + $0x1fe0] sm:$0xff]  ;;  %v2768_v43 = vld [vmem:[%s11116_s15 + $0x20e8] sm:$0xff]  ;;  %v9727_v51 = vpack.c.bf16 %v2784_v50, %v2776_v35 }
 0x7d6   : > { %v9717_v40 = vpack.c.bf16 %v2735_v25, %v2727_v19  ;;  %v2743_v46 = vld [vmem:[%s11116_s15 + $0x2020] sm:$0xff]  ;;  %v2762_v2 = vld [vmem:[%s11116_s15 + $0x20b8] sm:$0xff]  ;;  %v9723_v60 = vpack.c.bf16 %v2768_v43, %v2760_v1  ;;  %v2792_v12 = vld [vmem:[%s11116_s15 + $0x21a8] sm:$0xff] }
 0x7d7   : > { %9690 = vmatpush1.bf16.msra.mxu0 %v9689_v17  ;;  %v2697_v17 = vld [vmem:[%s11116_s15 + $0x1eb0] sm:$0xff]  ;;  %v2751_v58 = vld [vmem:[%s11116_s15 + $0x2060] sm:$0xff]  ;;  %v2800_v14 = vld [vmem:[%s11116_s15 + $0x21e8] sm:$0xff] }
 0x7d8   : > { %10202 = vmatpush1.bf16.msra.mxu1 %v10201_v47  ;;  %9692 = vmatprep.subr.bf16.mxu0 %v9691_v49  ;;  %v10219_v47 = vpack.c.bf16 %v2706_v0, %v2698_v4  ;;  %v2705_v49 = vld [vmem:[%s11116_s15 + $0x1ef0] sm:$0xff]  ;;  %v9721_v59 = vpack.c.bf16 %v2751_v58, %v2743_v46  ;;  %v2759_v4 = vld [vmem:[%s11116_s15 + $0x20a0] sm:$0xff]  ;;  %v9731_v52 = vpack.c.bf16 %v2800_v14, %v2792_v12  ;;  %v2810_v19 = vld [vmem:[%s11116_s15 + $0x2238] sm:$0xff] }
 0x7d9   : > { %10204 = vmatprep.subr.bf16.mxu1 %v10203_v6  ;;  %v2722_v6 = vld [vmem:[%s11116_s15 + $0x1f78] sm:$0xff]  ;;  %v10221_v9 = vpack.c.bf16 %v2705_v49, %v2697_v17  ;;  %v2767_v0 = vld [vmem:[%s11116_s15 + $0x20e0] sm:$0xff] }
 0x7da   : > { %v2778_v17 = vld [vmem:[%s11116_s15 + $0x2138] sm:$0xff]  ;;  %v9725_v49 = vpack.c.bf16 %v2767_v0, %v2759_v4  ;;  %v2791_v56 = vld [vmem:[%s11116_s15 + $0x21a0] sm:$0xff] }
 0x7db   : > { %9694 = vmatpush1.bf16.msra.mxu0 %v9693_v21  ;;  %v2713_v21 = vld [vmem:[%s11116_s15 + $0x1f30] sm:$0xff]  ;;  %v2818_v25 = vld [vmem:[%s11116_s15 + $0x2278] sm:$0xff]  ;;  %v2807_v34 = vld [vmem:[%s11116_s15 + $0x2220] sm:$0xff] }
 0x7dc   : > { %10206 = vmatpush1.bf16.msra.mxu1 %v10205_v27  ;;  %9696 = vmatprep.subr.bf16.mxu0 %v9695_v28  ;;  %v10223_v27 = vpack.c.bf16 %v2722_v6, %v2714_v53  ;;  %v2721_v28 = vld [vmem:[%s11116_s15 + $0x1f70] sm:$0xff]  ;;  %v2775_v53 = vld [vmem:[%s11116_s15 + $0x2120] sm:$0xff]  ;;  %v2826_v46 = vld [vmem:[%s11116_s15 + $0x22b8] sm:$0xff] }
 0x7dd   : > { %10208 = vmatprep.subr.bf16.mxu1 %v10207_v13  ;;  %v2738_v13 = vld [vmem:[%s11116_s15 + $0x1ff8] sm:$0xff]  ;;  %v10225_v32 = vpack.c.bf16 %v2721_v28, %v2713_v21  ;;  %v2783_v6 = vld [vmem:[%s11116_s15 + $0x2160] sm:$0xff] }
 0x7de   : > { %v2802_v21 = vld [vmem:[%s11116_s15 + $0x21f8] sm:$0xff]  ;;  %v2815_v36 = vld [vmem:[%s11116_s15 + $0x2260] sm:$0xff] }
 0x7df   : > { %9698 = vmatpush1.bf16.msra.mxu0 %v9697_v29  ;;  %v2729_v29 = vld [vmem:[%s11116_s15 + $0x1fb0] sm:$0xff]  ;;  %v2834_v58 = vld [vmem:[%s11116_s15 + $0x22f8] sm:$0xff]  ;;  %v2823_v1 = vld [vmem:[%s11116_s15 + $0x22a0] sm:$0xff] }
 0x7e0   : > { %10210 = vmatpush1.bf16.msra.mxu1 %v10209_v5  ;;  %9700 = vmatprep.subr.bf16.mxu0 %v9699_v33  ;;  %v10227_v5 = vpack.c.bf16 %v2738_v13, %v2730_v62  ;;  %v2737_v33 = vld [vmem:[%s11116_s15 + $0x1ff0] sm:$0xff]  ;;  %v2799_v62 = vld [vmem:[%s11116_s15 + $0x21e0] sm:$0xff]  ;;  %v2842_v4 = vld [vmem:[%s11116_s15 + $0x2338] sm:$0xff] }
 0x7e1   : > { %10212 = vmatprep.subr.bf16.mxu1 %v10211_v38  ;;  %v2754_v38 = vld [vmem:[%s11116_s15 + $0x2078] sm:$0xff]  ;;  %v10229_v61 = vpack.c.bf16 %v2737_v33, %v2729_v29  ;;  %v2793_v13 = vld [vmem:[%s11116_s15 + $0x21b0] sm:$0xff]  ;;  %v9733_v29 = vpack.c.bf16 %v2799_v62, %v2791_v56  ;;  %v2831_v43 = vld [vmem:[%s11116_s15 + $0x22e0] sm:$0xff] }
 0x7e2   : > { %v2850_v0 = vld [vmem:[%s11116_s15 + $0x2378] sm:$0xff]  ;;  %v2839_v35 = vld [vmem:[%s11116_s15 + $0x2320] sm:$0xff] }
 0x7e3   : > { %9702 = vmatpush1.bf16.msra.mxu0 %v9701_v54  ;;  %v2745_v54 = vld [vmem:[%s11116_s15 + $0x2030] sm:$0xff]  ;;  %v2847_v50 = vld [vmem:[%s11116_s15 + $0x2360] sm:$0xff]  ;;  %v2874_v56 = vld [vmem:[%s11116_s15 + $0x2438] sm:$0xff] }
 0x7e4   : > { %10214 = vmatpush1.bf16.msra.mxu1 %v10213_v55  ;;  %9704 = vmatprep.subr.bf16.mxu0 %v9703_v20  ;;  %v10231_v55 = vpack.c.bf16 %v2754_v38, %v2746_v11  ;;  %v2753_v20 = vld [vmem:[%s11116_s15 + $0x2070] sm:$0xff]  ;;  %v10247_v38 = vpack.c.bf16 %v2818_v25, %v2810_v19  ;;  %v2855_v12 = vld [vmem:[%s11116_s15 + $0x23a0] sm:$0xff]  ;;  %v2882_v62 = vld [vmem:[%s11116_s15 + $0x2478] sm:$0xff] }
 0x7e5   : > { %10216 = vmatprep.subr.bf16.mxu1 %v10215_v57  ;;  %v2770_v57 = vld [vmem:[%s11116_s15 + $0x20f8] sm:$0xff]  ;;  %v10233_v18 = vpack.c.bf16 %v2753_v20, %v2745_v54  ;;  %v2809_v11 = vld [vmem:[%s11116_s15 + $0x2230] sm:$0xff]  ;;  %v9737_v54 = vpack.c.bf16 %v2815_v36, %v2807_v34  ;;  %v2863_v14 = vld [vmem:[%s11116_s15 + $0x23e0] sm:$0xff]  ;;  %v10263_v25 = vpack.c.bf16 %v2882_v62, %v2874_v56 }
 0x7e6   : > { %v2873_v19 = vld [vmem:[%s11116_s15 + $0x2430] sm:$0xff]  ;;  %v2890_v34 = vld [vmem:[%s11116_s15 + $0x24b8] sm:$0xff] }
 0x7e7   : > { %9706 = vmatpush1.bf16.msra.mxu0 %v9705_v30  ;;  %v2761_v30 = vld [vmem:[%s11116_s15 + $0x20b0] sm:$0xff]  ;;  %v2898_v36 = vld [vmem:[%s11116_s15 + $0x24f8] sm:$0xff] }
 0x7e8   : > { %10218 = vmatpush1.bf16.msra.mxu1 %v10217_v26  ;;  %9708 = vmatprep.subr.bf16.mxu0 %v9707_v44  ;;  %v10235_v26 = vpack.c.bf16 %v2770_v57, %v2762_v2  ;;  %v2769_v44 = vld [vmem:[%s11116_s15 + $0x20f0] sm:$0xff]  ;;  %v10251_v57 = vpack.c.bf16 %v2834_v58, %v2826_v46  ;;  %v10267_v58 = vpack.c.bf16 %v2898_v36, %v2890_v34 }
 0x7e9   : > { %10220 = vmatprep.subr.bf16.mxu1 %v10219_v47  ;;  %v2786_v47 = vld [vmem:[%s11116_s15 + $0x2178] sm:$0xff]  ;;  %v10237_v45 = vpack.c.bf16 %v2769_v44, %v2761_v30  ;;  %v2825_v2 = vld [vmem:[%s11116_s15 + $0x22b0] sm:$0xff]  ;;  %v9741_v30 = vpack.c.bf16 %v2831_v43, %v2823_v1 }
 0x7ea   : > { %v2889_v46 = vld [vmem:[%s11116_s15 + $0x24b0] sm:$0xff]  ;;  %v2906_v1 = vld [vmem:[%s11116_s15 + $0x2538] sm:$0xff] }
 0x7eb   : > { %9710 = vmatpush1.bf16.msra.mxu0 %v9709_v7  ;;  %v2777_v7 = vld [vmem:[%s11116_s15 + $0x2130] sm:$0xff]  ;;  %v2914_v43 = vld [vmem:[%s11116_s15 + $0x2578] sm:$0xff] }
 0x7ec   : > { %10222 = vmatpush1.bf16.msra.mxu1 %v10221_v9  ;;  %9712 = vmatprep.subr.bf16.mxu0 %v9711_v10  ;;  %v10239_v9 = vpack.c.bf16 %v2786_v47, %v2778_v17  ;;  %v2785_v10 = vld [vmem:[%s11116_s15 + $0x2170] sm:$0xff]  ;;  %v10255_v47 = vpack.c.bf16 %v2850_v0, %v2842_v4  ;;  %v10271_v0 = vpack.c.bf16 %v2914_v43, %v2906_v1 }
 0x7ed   : > { %10224 = vmatprep.subr.bf16.mxu1 %v10223_v27  ;;  %v9729_v27 = vpack.c.bf16 %v2783_v6, %v2775_v53  ;;  %v10241_v28 = vpack.c.bf16 %v2785_v10, %v2777_v7  ;;  %v2841_v17 = vld [vmem:[%s11116_s15 + $0x2330] sm:$0xff]  ;;  %v2858_v53 = vld [vmem:[%s11116_s15 + $0x23b8] sm:$0xff]  ;;  %v9745_v7 = vpack.c.bf16 %v2847_v50, %v2839_v35 }
 0x7ee   : > { %v2866_v6 = vld [vmem:[%s11116_s15 + $0x23f8] sm:$0xff]  ;;  %v2905_v4 = vld [vmem:[%s11116_s15 + $0x2530] sm:$0xff] }
 0x7ef   : > { %9714 = vmatpush1.bf16.msra.mxu0 %v9713_v31  ;;  %v2922_v35 = vld [vmem:[%s11116_s15 + $0x25b8] sm:$0xff]  ;;  %v2937_v56 = vld [vmem:[%s11116_s15 + $0x2630] sm:$0xff] }
 0x7f0   : > { %10226 = vmatpush1.bf16.msra.mxu1 %v10225_v32  ;;  %9716 = vmatprep.subr.bf16.mxu0 %v9715_v23  ;;  %v2801_v32 = vld [vmem:[%s11116_s15 + $0x21f0] sm:$0xff]  ;;  %v2808_v23 = vld [vmem:[%s11116_s15 + $0x2228] sm:$0xff]  ;;  %v2930_v50 = vld [vmem:[%s11116_s15 + $0x25f8] sm:$0xff] }
 0x7f1   : > { %10228 = vmatprep.subr.bf16.mxu1 %v10227_v5  ;;  %v10245_v5 = vpack.c.bf16 %v2801_v32, %v2793_v13  ;;  %v9749_v13 = vpack.c.bf16 %v2863_v14, %v2855_v12  ;;  %v2938_v12 = vld [vmem:[%s11116_s15 + $0x2638] sm:$0xff]  ;;  %v2953_v34 = vld [vmem:[%s11116_s15 + $0x26b0] sm:$0xff] }
 0x7f2   : > { %v2946_v14 = vld [vmem:[%s11116_s15 + $0x2678] sm:$0xff]  ;;  %v2969_v1 = vld [vmem:[%s11116_s15 + $0x2730] sm:$0xff] }
 0x7f3   : > { %9718 = vmatpush1.bf16.msra.mxu0 %v9717_v40  ;;  %v2817_v40 = vld [vmem:[%s11116_s15 + $0x2270] sm:$0xff]  ;;  %v10279_v62 = vpack.c.bf16 %v2946_v14, %v2938_v12 }
 0x7f4   : > { %10230 = vmatpush1.bf16.msra.mxu1 %v10229_v61  ;;  %9720 = vmatprep.subr.bf16.mxu0 %v9719_v41  ;;  %v2824_v61 = vld [vmem:[%s11116_s15 + $0x22a8] sm:$0xff]  ;;  %v3001_v12 = vld [vmem:[%s11116_s15 + $0x2830] sm:$0xff] }
 0x7f5   : > { %10232 = vmatprep.subr.bf16.mxu1 %v10231_v55  ;;  %v2832_v41 = vld [vmem:[%s11116_s15 + $0x22e8] sm:$0xff]  ;;  %v10249_v55 = vpack.c.bf16 %v2817_v40, %v2809_v11 }
 0x7f6   : > { %5265 = vmatmul.mubr.f32.vlgmr.msra.gmra.mrb[2].mxu0 %v12186_v42  ;;  %v9739_v20 = vpack.c.bf16 %v2832_v41, %v2824_v61  ;;  %v2887_v61 = vld [vmem:[%s11116_s15 + $0x24a0] sm:$0xff] }
 0x7f7   : > { %9722 = vmatpush1.bf16.msra.mxu0 %v9721_v59  ;;  %5833 = vmatmul.mubr.f32.vlgmr.msra.gmra.mrb[2].mxu1 %v12186_v42  ;;  %v2794_v42 = vld [vmem:[%s11116_s15 + $0x21b8] sm:$0xff]  ;;  %v2833_v59 = vld [vmem:[%s11116_s15 + $0x22f0] sm:$0xff]  ;;  %v2895_v41 = vld [vmem:[%s11116_s15 + $0x24e0] sm:$0xff] }
 0x7f8   : > { %10234 = vmatpush1.bf16.msra.mxu1 %v10233_v18  ;;  %9724 = vmatprep.subr.bf16.mxu0 %v9723_v60  ;;  %v10243_v31 = vpack.c.bf16 %v2802_v21, %v2794_v42  ;;  %v2840_v18 = vld [vmem:[%s11116_s15 + $0x2328] sm:$0xff]  ;;  %v2857_v42 = vld [vmem:[%s11116_s15 + $0x23b0] sm:$0xff]  ;;  %v10259_v21 = vpack.c.bf16 %v2866_v6, %v2858_v53  ;;  %v10275_v6 = vpack.c.bf16 %v2930_v50, %v2922_v35 }
 0x7f9   : > { %10236 = vmatprep.subr.bf16.mxu1 %v10235_v26  ;;  %5335 = vmatprep.mubr.f32.mxu0 %v12341_v15  ;;  %v2848_v60 = vld [vmem:[%s11116_s15 + $0x2368] sm:$0xff]  ;;  %v10253_v26 = vpack.c.bf16 %v2833_v59, %v2825_v2  ;;  %v9757_v2 = vpack.c.bf16 %v2895_v41, %v2887_v61  ;;  %v2921_v53 = vld [vmem:[%s11116_s15 + $0x25b0] sm:$0xff]  ;;  %v2970_v61 = vld [vmem:[%s11116_s15 + $0x2738] sm:$0xff] }
 0x7fa   : > { %5903 = vmatprep.mubr.f32.mxu1 %v12341_v15  ;;  %v2816_v15 = vld [vmem:[%s11116_s15 + $0x2268] sm:$0xff]  ;;  %v9743_v44 = vpack.c.bf16 %v2848_v60, %v2840_v18  ;;  %v2903_v18 = vld [vmem:[%s11116_s15 + $0x2520] sm:$0xff]  ;;  %v2978_v41 = vld [vmem:[%s11116_s15 + $0x2778] sm:$0xff] }
 0x7fb   : > { %9726 = vmatpush1.bf16.msra.mxu0 %v9725_v49  ;;  %v9735_v33 = vpack.c.bf16 %v2816_v15, %v2808_v23  ;;  %v2849_v49 = vld [vmem:[%s11116_s15 + $0x2370] sm:$0xff]  ;;  %v2871_v23 = vld [vmem:[%s11116_s15 + $0x2420] sm:$0xff]  ;;  %v10287_v43 = vpack.c.bf16 %v2978_v41, %v2970_v61 }
 0x7fc   : > { %10238 = vmatpush1.bf16.msra.mxu1 %v10237_v45  ;;  %9728 = vmatprep.subr.bf16.mxu0 %v9727_v51  ;;  %v2856_v45 = vld [vmem:[%s11116_s15 + $0x23a8] sm:$0xff]  ;;  %v2879_v15 = vld [vmem:[%s11116_s15 + $0x2460] sm:$0xff]  ;;  %v2985_v35 = vld [vmem:[%s11116_s15 + $0x27b0] sm:$0xff] }
 0x7fd   : > { %10240 = vmatprep.subr.bf16.mxu1 %v10239_v9  ;;  %v2864_v51 = vld [vmem:[%s11116_s15 + $0x23e8] sm:$0xff]  ;;  %v10257_v9 = vpack.c.bf16 %v2849_v49, %v2841_v17  ;;  %v9753_v11 = vpack.c.bf16 %v2879_v15, %v2871_v23  ;;  %v2911_v60 = vld [vmem:[%s11116_s15 + $0x2560] sm:$0xff]  ;;  %v2954_v23 = vld [vmem:[%s11116_s15 + $0x26b8] sm:$0xff] }
 0x7fe   : > { %v9747_v10 = vpack.c.bf16 %v2864_v51, %v2856_v45  ;;  %v9761_v17 = vpack.c.bf16 %v2911_v60, %v2903_v18  ;;  %v2919_v45 = vld [vmem:[%s11116_s15 + $0x25a0] sm:$0xff]  ;;  %v2962_v15 = vld [vmem:[%s11116_s15 + $0x26f8] sm:$0xff]  ;;  %v3033_v61 = vld [vmem:[%s11116_s15 + $0x2930] sm:$0xff] }
 0x7ff   : > { %9730 = vmatpush1.bf16.msra.mxu0 %v9729_v27  ;;  %v2865_v27 = vld [vmem:[%s11116_s15 + $0x23f0] sm:$0xff]  ;;  %v2927_v51 = vld [vmem:[%s11116_s15 + $0x25e0] sm:$0xff]  ;;  %v10283_v36 = vpack.c.bf16 %v2962_v15, %v2954_v23  ;;  %v2986_v18 = vld [vmem:[%s11116_s15 + $0x27b8] sm:$0xff] }
 0x800   : > { %10242 = vmatpush1.bf16.msra.mxu1 %v10241_v28  ;;  %9732 = vmatprep.subr.bf16.mxu0 %v9731_v52  ;;  %v2872_v28 = vld [vmem:[%s11116_s15 + $0x2428] sm:$0xff]  ;;  %v2994_v60 = vld [vmem:[%s11116_s15 + $0x27f8] sm:$0xff]  ;;  %v3017_v23 = vld [vmem:[%s11116_s15 + $0x28b0] sm:$0xff] }
 0x801   : > { %10244 = vmatprep.subr.bf16.mxu1 %v10243_v31  ;;  %v2880_v52 = vld [vmem:[%s11116_s15 + $0x2468] sm:$0xff]  ;;  %v10261_v31 = vpack.c.bf16 %v2865_v27, %v2857_v42  ;;  %v9765_v42 = vpack.c.bf16 %v2927_v51, %v2919_v45  ;;  %v10291_v50 = vpack.c.bf16 %v2994_v60, %v2986_v18  ;;  %v3002_v45 = vld [vmem:[%s11116_s15 + $0x2838] sm:$0xff]  ;;  %v3057_v60 = vld [vmem:[%s11116_s15 + $0x29f0] sm:$0xff] }
 0x802   : > { %v9751_v32 = vpack.c.bf16 %v2880_v52, %v2872_v28  ;;  %v2935_v28 = vld [vmem:[%s11116_s15 + $0x2620] sm:$0xff]  ;;  %v3010_v51 = vld [vmem:[%s11116_s15 + $0x2878] sm:$0xff] }
 0x803   : > { %9734 = vmatpush1.bf16.msra.mxu0 %v9733_v29  ;;  %v2881_v29 = vld [vmem:[%s11116_s15 + $0x2470] sm:$0xff]  ;;  %v2943_v52 = vld [vmem:[%s11116_s15 + $0x2660] sm:$0xff]  ;;  %v10295_v14 = vpack.c.bf16 %v3010_v51, %v3002_v45  ;;  %v3080_v51 = vld [vmem:[%s11116_s15 + $0x2aa8] sm:$0xff] }
 0x804   : > { %10246 = vmatpush1.bf16.msra.mxu1 %v10245_v5  ;;  %9736 = vmatprep.subr.bf16.mxu0 %v9735_v33  ;;  %v2888_v5 = vld [vmem:[%s11116_s15 + $0x24a8] sm:$0xff]  ;;  %v3073_v45 = vld [vmem:[%s11116_s15 + $0x2a70] sm:$0xff] }
 0x805   : > { %10248 = vmatprep.subr.bf16.mxu1 %v10247_v38  ;;  %v2896_v33 = vld [vmem:[%s11116_s15 + $0x24e8] sm:$0xff]  ;;  %v10265_v38 = vpack.c.bf16 %v2881_v29, %v2873_v19  ;;  %v9769_v19 = vpack.c.bf16 %v2943_v52, %v2935_v28  ;;  %v3018_v28 = vld [vmem:[%s11116_s15 + $0x28b8] sm:$0xff] }
 0x806   : > { %v9755_v40 = vpack.c.bf16 %v2896_v33, %v2888_v5  ;;  %v2951_v5 = vld [vmem:[%s11116_s15 + $0x26a0] sm:$0xff]  ;;  %v3026_v52 = vld [vmem:[%s11116_s15 + $0x28f8] sm:$0xff] }
 0x807   : > { %9738 = vmatpush1.bf16.msra.mxu0 %v9737_v54  ;;  %v2897_v54 = vld [vmem:[%s11116_s15 + $0x24f0] sm:$0xff]  ;;  %v2959_v33 = vld [vmem:[%s11116_s15 + $0x26e0] sm:$0xff]  ;;  %v10299_v15 = vpack.c.bf16 %v3026_v52, %v3018_v28  ;;  %v3096_v52 = vld [vmem:[%s11116_s15 + $0x2b28] sm:$0xff] }
 0x808   : > { %10250 = vmatpush1.bf16.msra.mxu1 %v10249_v55  ;;  %9740 = vmatprep.subr.bf16.mxu0 %v9739_v20  ;;  %v2904_v55 = vld [vmem:[%s11116_s15 + $0x2528] sm:$0xff]  ;;  %v3089_v28 = vld [vmem:[%s11116_s15 + $0x2af0] sm:$0xff] }
 0x809   : > { %10252 = vmatprep.subr.bf16.mxu1 %v10251_v57  ;;  %v2912_v20 = vld [vmem:[%s11116_s15 + $0x2568] sm:$0xff]  ;;  %v10269_v57 = vpack.c.bf16 %v2897_v54, %v2889_v46  ;;  %v9773_v46 = vpack.c.bf16 %v2959_v33, %v2951_v5  ;;  %v3034_v5 = vld [vmem:[%s11116_s15 + $0x2938] sm:$0xff] }
 0x80a   : > { %v9759_v59 = vpack.c.bf16 %v2912_v20, %v2904_v55  ;;  %v2967_v55 = vld [vmem:[%s11116_s15 + $0x2720] sm:$0xff]  ;;  %v3042_v33 = vld [vmem:[%s11116_s15 + $0x2978] sm:$0xff] }
 0x80b   : > { %9742 = vmatpush1.bf16.msra.mxu0 %v9741_v30  ;;  %v2913_v30 = vld [vmem:[%s11116_s15 + $0x2570] sm:$0xff]  ;;  %v2975_v20 = vld [vmem:[%s11116_s15 + $0x2760] sm:$0xff]  ;;  %v10303_v41 = vpack.c.bf16 %v3042_v33, %v3034_v5  ;;  %v3112_v33 = vld [vmem:[%s11116_s15 + $0x2ba8] sm:$0xff] }
 0x80c   : > { %10254 = vmatpush1.bf16.msra.mxu1 %v10253_v26  ;;  %9744 = vmatprep.subr.bf16.mxu0 %v9743_v44  ;;  %v2920_v26 = vld [vmem:[%s11116_s15 + $0x25a8] sm:$0xff]  ;;  %v3105_v5 = vld [vmem:[%s11116_s15 + $0x2b70] sm:$0xff] }
 0x80d   : > { %10256 = vmatprep.subr.bf16.mxu1 %v10255_v47  ;;  %v2928_v44 = vld [vmem:[%s11116_s15 + $0x25e8] sm:$0xff]  ;;  %v10273_v47 = vpack.c.bf16 %v2913_v30, %v2905_v4  ;;  %v9777_v4 = vpack.c.bf16 %v2975_v20, %v2967_v55  ;;  %v3058_v55 = vld [vmem:[%s11116_s15 + $0x29f8] sm:$0xff] }
 0x80e   : > { %v9763_v49 = vpack.c.bf16 %v2928_v44, %v2920_v26  ;;  %v2983_v26 = vld [vmem:[%s11116_s15 + $0x27a0] sm:$0xff] }
 0x80f   : > { %9746 = vmatpush1.bf16.msra.mxu0 %v9745_v7  ;;  %v2929_v7 = vld [vmem:[%s11116_s15 + $0x25f0] sm:$0xff]  ;;  %v2991_v44 = vld [vmem:[%s11116_s15 + $0x27e0] sm:$0xff] }
 0x810   : > { %10258 = vmatpush1.bf16.msra.mxu1 %v10257_v9  ;;  %9748 = vmatprep.subr.bf16.mxu0 %v9747_v10  ;;  %v2936_v9 = vld [vmem:[%s11116_s15 + $0x2628] sm:$0xff] }
 0x811   : > { %10260 = vmatprep.subr.bf16.mxu1 %v10259_v21  ;;  %v2944_v10 = vld [vmem:[%s11116_s15 + $0x2668] sm:$0xff]  ;;  %v10277_v21 = vpack.c.bf16 %v2929_v7, %v2921_v53  ;;  %v9781_v53 = vpack.c.bf16 %v2991_v44, %v2983_v26 }
 0x812   : > { %v9767_v27 = vpack.c.bf16 %v2944_v10, %v2936_v9  ;;  %v2999_v9 = vld [vmem:[%s11116_s15 + $0x2820] sm:$0xff] }
 0x813   : > { %9750 = vmatpush1.bf16.msra.mxu0 %v9749_v13  ;;  %v2945_v13 = vld [vmem:[%s11116_s15 + $0x2670] sm:$0xff]  ;;  %v3007_v10 = vld [vmem:[%s11116_s15 + $0x2860] sm:$0xff] }
 0x814   : > { %10262 = vmatpush1.bf16.msra.mxu1 %v10261_v31  ;;  %9752 = vmatprep.subr.bf16.mxu0 %v9751_v32  ;;  %v2952_v31 = vld [vmem:[%s11116_s15 + $0x26a8] sm:$0xff] }
 0x815   : > { %10264 = vmatprep.subr.bf16.mxu1 %v10263_v25  ;;  %v2960_v32 = vld [vmem:[%s11116_s15 + $0x26e8] sm:$0xff]  ;;  %v10281_v25 = vpack.c.bf16 %v2945_v13, %v2937_v56  ;;  %v9785_v56 = vpack.c.bf16 %v3007_v10, %v2999_v9 }
 0x816   : > { %v9771_v29 = vpack.c.bf16 %v2960_v32, %v2952_v31  ;;  %v3015_v31 = vld [vmem:[%s11116_s15 + $0x28a0] sm:$0xff] }
 0x817   : > { %9754 = vmatpush1.bf16.msra.mxu0 %v9753_v11  ;;  %v2961_v11 = vld [vmem:[%s11116_s15 + $0x26f0] sm:$0xff]  ;;  %v3023_v32 = vld [vmem:[%s11116_s15 + $0x28e0] sm:$0xff] }
 0x818   : > { %10266 = vmatpush1.bf16.msra.mxu1 %v10265_v38  ;;  %9756 = vmatprep.subr.bf16.mxu0 %v9755_v40  ;;  %v2968_v38 = vld [vmem:[%s11116_s15 + $0x2728] sm:$0xff] }
 0x819   : > { %10268 = vmatprep.subr.bf16.mxu1 %v10267_v58  ;;  %v2976_v40 = vld [vmem:[%s11116_s15 + $0x2768] sm:$0xff]  ;;  %v10285_v58 = vpack.c.bf16 %v2961_v11, %v2953_v34  ;;  %v9789_v34 = vpack.c.bf16 %v3023_v32, %v3015_v31 }
 0x81a   : > { %v9775_v54 = vpack.c.bf16 %v2976_v40, %v2968_v38  ;;  %v3031_v38 = vld [vmem:[%s11116_s15 + $0x2920] sm:$0xff] }
 0x81b   : > { %9758 = vmatpush1.bf16.msra.mxu0 %v9757_v2  ;;  %v2977_v2 = vld [vmem:[%s11116_s15 + $0x2770] sm:$0xff]  ;;  %v3039_v40 = vld [vmem:[%s11116_s15 + $0x2960] sm:$0xff] }
 0x81c   : > { %10270 = vmatpush1.bf16.msra.mxu1 %v10269_v57  ;;  %9760 = vmatprep.subr.bf16.mxu0 %v9759_v59  ;;  %v2984_v57 = vld [vmem:[%s11116_s15 + $0x27a8] sm:$0xff]  ;;  %v9793_v20 = vpack.c.bf16 %v3039_v40, %v3031_v38 }
 0x81d   : > { %10272 = vmatprep.subr.bf16.mxu1 %v10271_v0  ;;  %v2992_v59 = vld [vmem:[%s11116_s15 + $0x27e8] sm:$0xff]  ;;  %v10289_v0 = vpack.c.bf16 %v2977_v2, %v2969_v1  ;;  %v3047_v2 = vld [vmem:[%s11116_s15 + $0x29a0] sm:$0xff] }
 0x81e   : > { %v9779_v30 = vpack.c.bf16 %v2992_v59, %v2984_v57  ;;  %v3055_v57 = vld [vmem:[%s11116_s15 + $0x29e0] sm:$0xff]  ;;  %v3049_v59 = vld [vmem:[%s11116_s15 + $0x29b0] sm:$0xff] }
 0x81f   : > { %9762 = vmatpush1.bf16.msra.mxu0 %v9761_v17  ;;  %v2993_v17 = vld [vmem:[%s11116_s15 + $0x27f0] sm:$0xff]  ;;  %v9797_v26 = vpack.c.bf16 %v3055_v57, %v3047_v2  ;;  %v10309_v44 = vpack.c.bf16 %v3057_v60, %v3049_v59  ;;  %v3135_v60 = vld [vmem:[%s11116_s15 + $0x2c60] sm:$0xff] }
 0x820   : > { %10274 = vmatpush1.bf16.msra.mxu1 %v10273_v47  ;;  %9764 = vmatprep.subr.bf16.mxu0 %v9763_v49  ;;  %v3000_v47 = vld [vmem:[%s11116_s15 + $0x2828] sm:$0xff] }
 0x821   : > { %10276 = vmatprep.subr.bf16.mxu1 %v10275_v6  ;;  %v3008_v49 = vld [vmem:[%s11116_s15 + $0x2868] sm:$0xff]  ;;  %v10293_v6 = vpack.c.bf16 %v2993_v17, %v2985_v35  ;;  %v3071_v17 = vld [vmem:[%s11116_s15 + $0x2a60] sm:$0xff] }
 0x822   : > { %v9783_v7 = vpack.c.bf16 %v3008_v49, %v3000_v47  ;;  %v3065_v47 = vld [vmem:[%s11116_s15 + $0x2a30] sm:$0xff] }
 0x823   : > { %9766 = vmatpush1.bf16.msra.mxu0 %v9765_v42  ;;  %v3009_v42 = vld [vmem:[%s11116_s15 + $0x2870] sm:$0xff]  ;;  %v10313_v10 = vpack.c.bf16 %v3073_v45, %v3065_v47  ;;  %v3151_v45 = vld [vmem:[%s11116_s15 + $0x2ce0] sm:$0xff] }
 0x824   : > { %10278 = vmatpush1.bf16.msra.mxu1 %v10277_v21  ;;  %9768 = vmatprep.subr.bf16.mxu0 %v9767_v27  ;;  %v3016_v21 = vld [vmem:[%s11116_s15 + $0x28a8] sm:$0xff] }
 0x825   : > { %10280 = vmatprep.subr.bf16.mxu1 %v10279_v62  ;;  %v3024_v27 = vld [vmem:[%s11116_s15 + $0x28e8] sm:$0xff]  ;;  %v10297_v62 = vpack.c.bf16 %v3009_v42, %v3001_v12  ;;  %v3087_v42 = vld [vmem:[%s11116_s15 + $0x2ae0] sm:$0xff] }
 0x826   : > { %v9787_v13 = vpack.c.bf16 %v3024_v27, %v3016_v21  ;;  %v3081_v21 = vld [vmem:[%s11116_s15 + $0x2ab0] sm:$0xff] }
 0x827   : > { %9770 = vmatpush1.bf16.msra.mxu0 %v9769_v19  ;;  %v3025_v19 = vld [vmem:[%s11116_s15 + $0x28f0] sm:$0xff]  ;;  %v10317_v32 = vpack.c.bf16 %v3089_v28, %v3081_v21  ;;  %v3167_v28 = vld [vmem:[%s11116_s15 + $0x2d60] sm:$0xff] }
 0x828   : > { %10282 = vmatpush1.bf16.msra.mxu1 %v10281_v25  ;;  %9772 = vmatprep.subr.bf16.mxu0 %v9771_v29  ;;  %v3032_v25 = vld [vmem:[%s11116_s15 + $0x2928] sm:$0xff] }
 0x829   : > { %10284 = vmatprep.subr.bf16.mxu1 %v10283_v36  ;;  %v3040_v29 = vld [vmem:[%s11116_s15 + $0x2968] sm:$0xff]  ;;  %v10301_v36 = vpack.c.bf16 %v3025_v19, %v3017_v23  ;;  %v3103_v19 = vld [vmem:[%s11116_s15 + $0x2b60] sm:$0xff] }
 0x82a   : > { %v9791_v11 = vpack.c.bf16 %v3040_v29, %v3032_v25  ;;  %v3097_v25 = vld [vmem:[%s11116_s15 + $0x2b30] sm:$0xff] }
 0x82b   : > { %9774 = vmatpush1.bf16.msra.mxu0 %v9773_v46  ;;  %v3041_v46 = vld [vmem:[%s11116_s15 + $0x2970] sm:$0xff]  ;;  %v10321_v40 = vpack.c.bf16 %v3105_v5, %v3097_v25  ;;  %v3183_v5 = vld [vmem:[%s11116_s15 + $0x2de0] sm:$0xff] }
 0x82c   : > { %10286 = vmatpush1.bf16.msra.mxu1 %v10285_v58  ;;  %9776 = vmatprep.subr.bf16.mxu0 %v9775_v54  ;;  %v3048_v58 = vld [vmem:[%s11116_s15 + $0x29a8] sm:$0xff]  ;;  %v10305_v1 = vpack.c.bf16 %v3041_v46, %v3033_v61  ;;  %v3119_v46 = vld [vmem:[%s11116_s15 + $0x2be0] sm:$0xff] }
 0x82d   : > { %10288 = vmatprep.subr.bf16.mxu1 %v10287_v43  ;;  %v3056_v54 = vld [vmem:[%s11116_s15 + $0x29e8] sm:$0xff] }
 0x82e   : > { %v9795_v43 = vpack.c.bf16 %v3056_v54, %v3048_v58  ;;  %v3113_v58 = vld [vmem:[%s11116_s15 + $0x2bb0] sm:$0xff] }
 0x82f   : > { %9778 = vmatpush1.bf16.msra.mxu0 %v9777_v4  ;;  %v3064_v4 = vld [vmem:[%s11116_s15 + $0x2a28] sm:$0xff] }
 0x830   : > { %10290 = vmatpush1.bf16.msra.mxu1 %v10289_v0  ;;  %9780 = vmatprep.subr.bf16.mxu0 %v9779_v30  ;;  %v3066_v0 = vld [vmem:[%s11116_s15 + $0x2a38] sm:$0xff] }
 0x831   : > { %10292 = vmatprep.subr.bf16.mxu1 %v10291_v50  ;;  %v3074_v30 = vld [vmem:[%s11116_s15 + $0x2a78] sm:$0xff]  ;;  %v3063_v50 = vld [vmem:[%s11116_s15 + $0x2a20] sm:$0xff] }
 0x832   : > { %v10311_v49 = vpack.c.bf16 %v3074_v30, %v3066_v0  ;;  %v9801_v9 = vpack.c.bf16 %v3071_v17, %v3063_v50  ;;  %v3137_v0 = vld [vmem:[%s11116_s15 + $0x2c70] sm:$0xff]  ;;  %v3144_v30 = vld [vmem:[%s11116_s15 + $0x2ca8] sm:$0xff] }
 0x833   : > { %9782 = vmatpush1.bf16.msra.mxu0 %v9781_v53  ;;  %v3088_v53 = vld [vmem:[%s11116_s15 + $0x2ae8] sm:$0xff] }
 0x834   : > { %10294 = vmatpush1.bf16.msra.mxu1 %v10293_v6  ;;  %9784 = vmatprep.subr.bf16.mxu0 %v9783_v7  ;;  %v3082_v6 = vld [vmem:[%s11116_s15 + $0x2ab8] sm:$0xff]  ;;  %v9803_v12 = vpack.c.bf16 %v3088_v53, %v3080_v51  ;;  %v3145_v51 = vld [vmem:[%s11116_s15 + $0x2cb0] sm:$0xff] }
 0x835   : > { %10296 = vmatprep.subr.bf16.mxu1 %v10295_v14  ;;  %v3090_v7 = vld [vmem:[%s11116_s15 + $0x2af8] sm:$0xff]  ;;  %v3079_v14 = vld [vmem:[%s11116_s15 + $0x2aa0] sm:$0xff] }
 0x836   : > { %5336 = vmatmul.mubr.f32.vlgmr.msra.gmra.mrb[2].mxu0 %v12329_v16  ;;  %v10315_v27 = vpack.c.bf16 %v3090_v7, %v3082_v6  ;;  %v9805_v31 = vpack.c.bf16 %v3087_v42, %v3079_v14  ;;  %v3153_v6 = vld [vmem:[%s11116_s15 + $0x2cf0] sm:$0xff]  ;;  %v3160_v7 = vld [vmem:[%s11116_s15 + $0x2d28] sm:$0xff] }
 0x837   : > { %9786 = vmatpush1.bf16.msra.mxu0 %v9785_v56  ;;  %5904 = vmatmul.mubr.f32.vlgmr.msra.gmra.mrb[2].mxu1 %v12329_v16  ;;  %v3050_v16 = vld [vmem:[%s11116_s15 + $0x29b8] sm:$0xff]  ;;  %v3104_v56 = vld [vmem:[%s11116_s15 + $0x2b68] sm:$0xff]  ;;  %v10333_v42 = vpack.c.bf16 %v3153_v6, %v3145_v51  ;;  %v3231_v6 = vld [vmem:[%s11116_s15 + $0x2f60] sm:$0xff] }
 0x838   : > { %10298 = vmatpush1.bf16.msra.mxu1 %v10297_v62  ;;  %9788 = vmatprep.subr.bf16.mxu0 %v9787_v13  ;;  %v10307_v18 = vpack.c.bf16 %v3058_v55, %v3050_v16  ;;  %v3098_v62 = vld [vmem:[%s11116_s15 + $0x2b38] sm:$0xff]  ;;  %v9807_v23 = vpack.c.bf16 %v3104_v56, %v3096_v52  ;;  %v3121_v16 = vld [vmem:[%s11116_s15 + $0x2bf0] sm:$0xff]  ;;  %v3128_v55 = vld [vmem:[%s11116_s15 + $0x2c28] sm:$0xff] }
 0x839   : > { %10300 = vmatprep.subr.bf16.mxu1 %v10299_v15  ;;  %5406 = vmatprep.mubr.f32.mxu0 %v12482_v22  ;;  %v3106_v13 = vld [vmem:[%s11116_s15 + $0x2b78] sm:$0xff]  ;;  %v3095_v15 = vld [vmem:[%s11116_s15 + $0x2b20] sm:$0xff]  ;;  %v10325_v57 = vpack.c.bf16 %v3121_v16, %v3113_v58  ;;  %v3161_v52 = vld [vmem:[%s11116_s15 + $0x2d30] sm:$0xff] }
 0x83a   : > { %5974 = vmatprep.mubr.f32.mxu1 %v12482_v22  ;;  %v3072_v22 = vld [vmem:[%s11116_s15 + $0x2a68] sm:$0xff]  ;;  %v10319_v29 = vpack.c.bf16 %v3106_v13, %v3098_v62  ;;  %v9809_v38 = vpack.c.bf16 %v3103_v19, %v3095_v15  ;;  %v3169_v62 = vld [vmem:[%s11116_s15 + $0x2d70] sm:$0xff]  ;;  %v3199_v16 = vld [vmem:[%s11116_s15 + $0x2e60] sm:$0xff] }
 0x83b   : > { %9790 = vmatpush1.bf16.msra.mxu0 %v9789_v34  ;;  %v9799_v35 = vpack.c.bf16 %v3072_v22, %v3064_v4  ;;  %v3120_v34 = vld [vmem:[%s11116_s15 + $0x2be8] sm:$0xff]  ;;  %v3129_v4 = vld [vmem:[%s11116_s15 + $0x2c30] sm:$0xff]  ;;  %v10337_v19 = vpack.c.bf16 %v3169_v62, %v3161_v52  ;;  %v3247_v62 = vld [vmem:[%s11116_s15 + $0x2fe0] sm:$0xff] }
 0x83c   : > { %10302 = vmatpush1.bf16.msra.mxu1 %v10301_v36  ;;  %9792 = vmatprep.subr.bf16.mxu0 %v9791_v11  ;;  %v3114_v36 = vld [vmem:[%s11116_s15 + $0x2bb8] sm:$0xff]  ;;  %v9811_v61 = vpack.c.bf16 %v3120_v34, %v3112_v33  ;;  %v10329_v17 = vpack.c.bf16 %v3137_v0, %v3129_v4  ;;  %v3176_v13 = vld [vmem:[%s11116_s15 + $0x2da8] sm:$0xff]  ;;  %v3177_v33 = vld [vmem:[%s11116_s15 + $0x2db0] sm:$0xff] }
 0x83d   : > { %10304 = vmatprep.subr.bf16.mxu1 %v10303_v41  ;;  %v3122_v11 = vld [vmem:[%s11116_s15 + $0x2bf8] sm:$0xff]  ;;  %v3111_v41 = vld [vmem:[%s11116_s15 + $0x2ba0] sm:$0xff] }
 0x83e   : > { %v10323_v54 = vpack.c.bf16 %v3122_v11, %v3114_v36  ;;  %v9813_v2 = vpack.c.bf16 %v3119_v46, %v3111_v41  ;;  %v3185_v36 = vld [vmem:[%s11116_s15 + $0x2df0] sm:$0xff]  ;;  %v3192_v11 = vld [vmem:[%s11116_s15 + $0x2e28] sm:$0xff]  ;;  %v3215_v0 = vld [vmem:[%s11116_s15 + $0x2ee0] sm:$0xff] }
 0x83f   : > { %9794 = vmatpush1.bf16.msra.mxu0 %v9793_v20  ;;  %v3136_v20 = vld [vmem:[%s11116_s15 + $0x2c68] sm:$0xff]  ;;  %v10341_v46 = vpack.c.bf16 %v3185_v36, %v3177_v33  ;;  %v3263_v36 = vld [vmem:[%s11116_s15 + $0x3060] sm:$0xff] }
 0x840   : > { %10306 = vmatpush1.bf16.msra.mxu1 %v10305_v1  ;;  %9796 = vmatprep.subr.bf16.mxu0 %v9795_v43  ;;  %v3130_v1 = vld [vmem:[%s11116_s15 + $0x2c38] sm:$0xff]  ;;  %v9815_v59 = vpack.c.bf16 %v3136_v20, %v3128_v55  ;;  %v3193_v55 = vld [vmem:[%s11116_s15 + $0x2e30] sm:$0xff] }
 0x841   : > { %10308 = vmatprep.subr.bf16.mxu1 %v10307_v18  ;;  %v3138_v43 = vld [vmem:[%s11116_s15 + $0x2c78] sm:$0xff]  ;;  %v3127_v18 = vld [vmem:[%s11116_s15 + $0x2c20] sm:$0xff] }
 0x842   : > { %v10327_v22 = vpack.c.bf16 %v3138_v43, %v3130_v1  ;;  %v9817_v50 = vpack.c.bf16 %v3135_v60, %v3127_v18  ;;  %v3201_v1 = vld [vmem:[%s11116_s15 + $0x2e70] sm:$0xff]  ;;  %v3208_v43 = vld [vmem:[%s11116_s15 + $0x2ea8] sm:$0xff] }
 0x843   : > { %9798 = vmatpush1.bf16.msra.mxu0 %v9797_v26  ;;  %v3152_v26 = vld [vmem:[%s11116_s15 + $0x2ce8] sm:$0xff]  ;;  %v10345_v60 = vpack.c.bf16 %v3201_v1, %v3193_v55  ;;  %v3279_v1 = vld [vmem:[%s11116_s15 + $0x30e0] sm:$0xff] }
 0x844   : > { %10310 = vmatpush1.bf16.msra.mxu1 %v10309_v44  ;;  %9800 = vmatprep.subr.bf16.mxu0 %v9799_v35  ;;  %v3146_v44 = vld [vmem:[%s11116_s15 + $0x2cb8] sm:$0xff]  ;;  %v9819_v47 = vpack.c.bf16 %v3152_v26, %v3144_v30  ;;  %v3209_v30 = vld [vmem:[%s11116_s15 + $0x2eb0] sm:$0xff] }
 0x845   : > { %10312 = vmatprep.subr.bf16.mxu1 %v10311_v49  ;;  %v3154_v35 = vld [vmem:[%s11116_s15 + $0x2cf8] sm:$0xff]  ;;  %v3143_v49 = vld [vmem:[%s11116_s15 + $0x2ca0] sm:$0xff] }
 0x846   : > { %v10331_v53 = vpack.c.bf16 %v3154_v35, %v3146_v44  ;;  %v9821_v14 = vpack.c.bf16 %v3151_v45, %v3143_v49  ;;  %v3217_v44 = vld [vmem:[%s11116_s15 + $0x2ef0] sm:$0xff]  ;;  %v3224_v35 = vld [vmem:[%s11116_s15 + $0x2f28] sm:$0xff] }
 0x847   : > { %9802 = vmatpush1.bf16.msra.mxu0 %v9801_v9  ;;  %v3168_v9 = vld [vmem:[%s11116_s15 + $0x2d68] sm:$0xff]  ;;  %v10349_v45 = vpack.c.bf16 %v3217_v44, %v3209_v30  ;;  %v3295_v44 = vld [vmem:[%s11116_s15 + $0x3160] sm:$0xff] }
 0x848   : > { %10314 = vmatpush1.bf16.msra.mxu1 %v10313_v10  ;;  %9804 = vmatprep.subr.bf16.mxu0 %v9803_v12  ;;  %v3162_v10 = vld [vmem:[%s11116_s15 + $0x2d38] sm:$0xff]  ;;  %v9823_v21 = vpack.c.bf16 %v3168_v9, %v3160_v7  ;;  %v3225_v7 = vld [vmem:[%s11116_s15 + $0x2f30] sm:$0xff] }
 0x849   : > { %10316 = vmatprep.subr.bf16.mxu1 %v10315_v27  ;;  %v3170_v12 = vld [vmem:[%s11116_s15 + $0x2d78] sm:$0xff]  ;;  %v3159_v27 = vld [vmem:[%s11116_s15 + $0x2d20] sm:$0xff] }
 0x84a   : > { %v10335_v56 = vpack.c.bf16 %v3170_v12, %v3162_v10  ;;  %v9825_v15 = vpack.c.bf16 %v3167_v28, %v3159_v27  ;;  %v3233_v10 = vld [vmem:[%s11116_s15 + $0x2f70] sm:$0xff]  ;;  %v3240_v12 = vld [vmem:[%s11116_s15 + $0x2fa8] sm:$0xff] }
 0x84b   : > { %9806 = vmatpush1.bf16.msra.mxu0 %v9805_v31  ;;  %v3184_v31 = vld [vmem:[%s11116_s15 + $0x2de8] sm:$0xff]  ;;  %v10353_v28 = vpack.c.bf16 %v3233_v10, %v3225_v7  ;;  %v3303_v7 = vld [vmem:[%s11116_s15 + $0x31a0] sm:$0xff]  ;;  %v3305_v10 = vld [vmem:[%s11116_s15 + $0x31b0] sm:$0xff] }
 0x84c   : > { %10318 = vmatpush1.bf16.msra.mxu1 %v10317_v32  ;;  %9808 = vmatprep.subr.bf16.mxu0 %v9807_v23  ;;  %v3178_v32 = vld [vmem:[%s11116_s15 + $0x2db8] sm:$0xff]  ;;  %v9827_v25 = vpack.c.bf16 %v3184_v31, %v3176_v13  ;;  %v3241_v13 = vld [vmem:[%s11116_s15 + $0x2fb0] sm:$0xff] }
 0x84d   : > { %10320 = vmatprep.subr.bf16.mxu1 %v10319_v29  ;;  %v3186_v23 = vld [vmem:[%s11116_s15 + $0x2df8] sm:$0xff]  ;;  %v3175_v29 = vld [vmem:[%s11116_s15 + $0x2da0] sm:$0xff] }
 0x84e   : > { %v10339_v34 = vpack.c.bf16 %v3186_v23, %v3178_v32  ;;  %v9829_v41 = vpack.c.bf16 %v3183_v5, %v3175_v29  ;;  %v3249_v32 = vld [vmem:[%s11116_s15 + $0x2ff0] sm:$0xff]  ;;  %v3256_v23 = vld [vmem:[%s11116_s15 + $0x3028] sm:$0xff] }
 0x84f   : > { %9810 = vmatpush1.bf16.msra.mxu0 %v9809_v38  ;;  %v3200_v38 = vld [vmem:[%s11116_s15 + $0x2e68] sm:$0xff]  ;;  %v10357_v5 = vpack.c.bf16 %v3249_v32, %v3241_v13  ;;  %v3327_v13 = vld [vmem:[%s11116_s15 + $0x3260] sm:$0xff] }
 0x850   : > { %10322 = vmatpush1.bf16.msra.mxu1 %v10321_v40  ;;  %9812 = vmatprep.subr.bf16.mxu0 %v9811_v61  ;;  %v3194_v40 = vld [vmem:[%s11116_s15 + $0x2e38] sm:$0xff]  ;;  %v9831_v58 = vpack.c.bf16 %v3200_v38, %v3192_v11  ;;  %v3257_v11 = vld [vmem:[%s11116_s15 + $0x3030] sm:$0xff] }
 0x851   : > { %10324 = vmatprep.subr.bf16.mxu1 %v10323_v54  ;;  %v3202_v61 = vld [vmem:[%s11116_s15 + $0x2e78] sm:$0xff]  ;;  %v3191_v54 = vld [vmem:[%s11116_s15 + $0x2e20] sm:$0xff] }
 0x852   : > { %v10343_v20 = vpack.c.bf16 %v3202_v61, %v3194_v40  ;;  %v9833_v18 = vpack.c.bf16 %v3199_v16, %v3191_v54  ;;  %v3265_v40 = vld [vmem:[%s11116_s15 + $0x3070] sm:$0xff]  ;;  %v3272_v61 = vld [vmem:[%s11116_s15 + $0x30a8] sm:$0xff] }
 0x853   : > { %9814 = vmatpush1.bf16.msra.mxu0 %v9813_v2  ;;  %v3216_v2 = vld [vmem:[%s11116_s15 + $0x2ee8] sm:$0xff]  ;;  %v10361_v16 = vpack.c.bf16 %v3265_v40, %v3257_v11  ;;  %v3343_v11 = vld [vmem:[%s11116_s15 + $0x32e0] sm:$0xff] }
 0x854   : > { %10326 = vmatpush1.bf16.msra.mxu1 %v10325_v57  ;;  %9816 = vmatprep.subr.bf16.mxu0 %v9815_v59  ;;  %v3210_v57 = vld [vmem:[%s11116_s15 + $0x2eb8] sm:$0xff]  ;;  %v9835_v4 = vpack.c.bf16 %v3216_v2, %v3208_v43  ;;  %v3273_v43 = vld [vmem:[%s11116_s15 + $0x30b0] sm:$0xff] }
 0x855   : > { %10328 = vmatprep.subr.bf16.mxu1 %v10327_v22  ;;  %v3218_v59 = vld [vmem:[%s11116_s15 + $0x2ef8] sm:$0xff]  ;;  %v3207_v22 = vld [vmem:[%s11116_s15 + $0x2ea0] sm:$0xff] }
 0x856   : > { %v10347_v26 = vpack.c.bf16 %v3218_v59, %v3210_v57  ;;  %v9837_v49 = vpack.c.bf16 %v3215_v0, %v3207_v22  ;;  %v3281_v57 = vld [vmem:[%s11116_s15 + $0x30f0] sm:$0xff]  ;;  %v3288_v59 = vld [vmem:[%s11116_s15 + $0x3128] sm:$0xff] }
 0x857   : > { %9818 = vmatpush1.bf16.msra.mxu0 %v9817_v50  ;;  %v3232_v50 = vld [vmem:[%s11116_s15 + $0x2f68] sm:$0xff]  ;;  %v10365_v0 = vpack.c.bf16 %v3281_v57, %v3273_v43  ;;  %v3359_v43 = vld [vmem:[%s11116_s15 + $0x3360] sm:$0xff] }
 0x858   : > { %10330 = vmatpush1.bf16.msra.mxu1 %v10329_v17  ;;  %9820 = vmatprep.subr.bf16.mxu0 %v9819_v47  ;;  %v3226_v17 = vld [vmem:[%s11116_s15 + $0x2f38] sm:$0xff]  ;;  %v9839_v51 = vpack.c.bf16 %v3232_v50, %v3224_v35  ;;  %v3289_v35 = vld [vmem:[%s11116_s15 + $0x3130] sm:$0xff] }
 0x859   : > { %10332 = vmatprep.subr.bf16.mxu1 %v10331_v53  ;;  %v3234_v47 = vld [vmem:[%s11116_s15 + $0x2f78] sm:$0xff]  ;;  %v3223_v53 = vld [vmem:[%s11116_s15 + $0x2f20] sm:$0xff] }
 0x85a   : > { %v10351_v9 = vpack.c.bf16 %v3234_v47, %v3226_v17  ;;  %v9841_v27 = vpack.c.bf16 %v3231_v6, %v3223_v53  ;;  %v3297_v17 = vld [vmem:[%s11116_s15 + $0x3170] sm:$0xff]  ;;  %v3304_v47 = vld [vmem:[%s11116_s15 + $0x31a8] sm:$0xff] }
 0x85b   : > { %9822 = vmatpush1.bf16.msra.mxu0 %v9821_v14  ;;  %v3248_v14 = vld [vmem:[%s11116_s15 + $0x2fe8] sm:$0xff]  ;;  %v10369_v53 = vpack.c.bf16 %v3297_v17, %v3289_v35  ;;  %v3375_v35 = vld [vmem:[%s11116_s15 + $0x33e0] sm:$0xff] }
 0x85c   : > { %10334 = vmatpush1.bf16.msra.mxu1 %v10333_v42  ;;  %9824 = vmatprep.subr.bf16.mxu0 %v9823_v21  ;;  %v3242_v42 = vld [vmem:[%s11116_s15 + $0x2fb8] sm:$0xff]  ;;  %v9843_v52 = vpack.c.bf16 %v3248_v14, %v3240_v12  ;;  %v3313_v14 = vld [vmem:[%s11116_s15 + $0x31f0] sm:$0xff] }
 0x85d   : > { %10336 = vmatprep.subr.bf16.mxu1 %v10335_v56  ;;  %v3250_v21 = vld [vmem:[%s11116_s15 + $0x2ff8] sm:$0xff]  ;;  %v3239_v56 = vld [vmem:[%s11116_s15 + $0x2fa0] sm:$0xff] }
 0x85e   : > { %v10355_v31 = vpack.c.bf16 %v3250_v21, %v3242_v42  ;;  %v9845_v29 = vpack.c.bf16 %v3247_v62, %v3239_v56  ;;  %v3320_v42 = vld [vmem:[%s11116_s15 + $0x3228] sm:$0xff]  ;;  %v3322_v21 = vld [vmem:[%s11116_s15 + $0x3238] sm:$0xff]  ;;  %v3319_v62 = vld [vmem:[%s11116_s15 + $0x3220] sm:$0xff] }
 0x85f   : > { %9826 = vmatpush1.bf16.msra.mxu0 %v9825_v15  ;;  %v3264_v15 = vld [vmem:[%s11116_s15 + $0x3068] sm:$0xff] }
 0x860   : > { %10338 = vmatpush1.bf16.msra.mxu1 %v10337_v19  ;;  %9828 = vmatprep.subr.bf16.mxu0 %v9827_v25  ;;  %v3258_v19 = vld [vmem:[%s11116_s15 + $0x3038] sm:$0xff]  ;;  %v9847_v33 = vpack.c.bf16 %v3264_v15, %v3256_v23  ;;  %v3329_v23 = vld [vmem:[%s11116_s15 + $0x3270] sm:$0xff]  ;;  %v3336_v15 = vld [vmem:[%s11116_s15 + $0x32a8] sm:$0xff] }
 0x861   : > { %10340 = vmatprep.subr.bf16.mxu1 %v10339_v34  ;;  %v3266_v25 = vld [vmem:[%s11116_s15 + $0x3078] sm:$0xff]  ;;  %v3255_v34 = vld [vmem:[%s11116_s15 + $0x3020] sm:$0xff] }
 0x862   : > { %v10359_v38 = vpack.c.bf16 %v3266_v25, %v3258_v19  ;;  %v9849_v54 = vpack.c.bf16 %v3263_v36, %v3255_v34  ;;  %v3344_v19 = vld [vmem:[%s11116_s15 + $0x32e8] sm:$0xff]  ;;  %v3338_v25 = vld [vmem:[%s11116_s15 + $0x32b8] sm:$0xff]  ;;  %v3335_v36 = vld [vmem:[%s11116_s15 + $0x32a0] sm:$0xff] }
 0x863   : > { %9830 = vmatpush1.bf16.msra.mxu0 %v9829_v41  ;;  %v3280_v41 = vld [vmem:[%s11116_s15 + $0x30e8] sm:$0xff]  ;;  %v9867_v34 = vpack.c.bf16 %v3344_v19, %v3336_v15  ;;  %v3409_v15 = vld [vmem:[%s11116_s15 + $0x34f0] sm:$0xff] }
 0x864   : > { %10342 = vmatpush1.bf16.msra.mxu1 %v10341_v46  ;;  %9832 = vmatprep.subr.bf16.mxu0 %v9831_v58  ;;  %v3274_v46 = vld [vmem:[%s11116_s15 + $0x30b8] sm:$0xff]  ;;  %v9851_v55 = vpack.c.bf16 %v3280_v41, %v3272_v61  ;;  %v3345_v61 = vld [vmem:[%s11116_s15 + $0x32f0] sm:$0xff]  ;;  %v3352_v41 = vld [vmem:[%s11116_s15 + $0x3328] sm:$0xff] }
 0x865   : > { %10344 = vmatprep.subr.bf16.mxu1 %v10343_v20  ;;  %v3282_v58 = vld [vmem:[%s11116_s15 + $0x30f8] sm:$0xff]  ;;  %v3271_v20 = vld [vmem:[%s11116_s15 + $0x30a0] sm:$0xff]  ;;  %v3416_v19 = vld [vmem:[%s11116_s15 + $0x3528] sm:$0xff] }
 0x866   : > { %v10363_v2 = vpack.c.bf16 %v3282_v58, %v3274_v46  ;;  %v9853_v22 = vpack.c.bf16 %v3279_v1, %v3271_v20  ;;  %v3360_v46 = vld [vmem:[%s11116_s15 + $0x3368] sm:$0xff]  ;;  %v3354_v58 = vld [vmem:[%s11116_s15 + $0x3338] sm:$0xff]  ;;  %v3351_v1 = vld [vmem:[%s11116_s15 + $0x3320] sm:$0xff] }
 0x867   : > { %9834 = vmatpush1.bf16.msra.mxu0 %v9833_v18  ;;  %v3296_v18 = vld [vmem:[%s11116_s15 + $0x3168] sm:$0xff]  ;;  %v9871_v20 = vpack.c.bf16 %v3360_v46, %v3352_v41  ;;  %v3425_v41 = vld [vmem:[%s11116_s15 + $0x3570] sm:$0xff] }
 0x868   : > { %10346 = vmatpush1.bf16.msra.mxu1 %v10345_v60  ;;  %9836 = vmatprep.subr.bf16.mxu0 %v9835_v4  ;;  %v3290_v60 = vld [vmem:[%s11116_s15 + $0x3138] sm:$0xff]  ;;  %v9855_v30 = vpack.c.bf16 %v3296_v18, %v3288_v59  ;;  %v3361_v59 = vld [vmem:[%s11116_s15 + $0x3370] sm:$0xff]  ;;  %v3368_v18 = vld [vmem:[%s11116_s15 + $0x33a8] sm:$0xff] }
 0x869   : > { %10348 = vmatprep.subr.bf16.mxu1 %v10347_v26  ;;  %v3298_v4 = vld [vmem:[%s11116_s15 + $0x3178] sm:$0xff]  ;;  %v3287_v26 = vld [vmem:[%s11116_s15 + $0x3120] sm:$0xff]  ;;  %v3432_v46 = vld [vmem:[%s11116_s15 + $0x35a8] sm:$0xff] }
 0x86a   : > { %v10367_v50 = vpack.c.bf16 %v3298_v4, %v3290_v60  ;;  %v3376_v60 = vld [vmem:[%s11116_s15 + $0x33e8] sm:$0xff]  ;;  %v3370_v4 = vld [vmem:[%s11116_s15 + $0x33b8] sm:$0xff] }
 0x86b   : > { %9838 = vmatpush1.bf16.msra.mxu0 %v9837_v49  ;;  %v3312_v49 = vld [vmem:[%s11116_s15 + $0x31e8] sm:$0xff] }
 0x86c   : > { %10350 = vmatpush1.bf16.msra.mxu1 %v10349_v45  ;;  %9840 = vmatprep.subr.bf16.mxu0 %v9839_v51  ;;  %v3314_v45 = vld [vmem:[%s11116_s15 + $0x31f8] sm:$0xff]  ;;  %v9857_v51 = vpack.c.bf16 %v3295_v44, %v3287_v26  ;;  %v9859_v6 = vpack.c.bf16 %v3312_v49, %v3304_v47  ;;  %v9875_v26 = vpack.c.bf16 %v3376_v60, %v3368_v18  ;;  %v3367_v44 = vld [vmem:[%s11116_s15 + $0x33a0] sm:$0xff]  ;;  %v3377_v47 = vld [vmem:[%s11116_s15 + $0x33f0] sm:$0xff] }
 0x86d   : > { %10352 = vmatprep.subr.bf16.mxu1 %v10351_v9  ;;  %v3311_v9 = vld [vmem:[%s11116_s15 + $0x31e0] sm:$0xff]  ;;  %v3384_v49 = vld [vmem:[%s11116_s15 + $0x3428] sm:$0xff]  ;;  %v3441_v18 = vld [vmem:[%s11116_s15 + $0x35f0] sm:$0xff] }
 0x86e   : > { %v3448_v60 = vld [vmem:[%s11116_s15 + $0x3628] sm:$0xff] }
 0x86f   : > { %9842 = vmatpush1.bf16.msra.mxu0 %v9841_v27  ;;  %v3330_v27 = vld [vmem:[%s11116_s15 + $0x3278] sm:$0xff] }
 0x870   : > { %10354 = vmatpush1.bf16.msra.mxu1 %v10353_v28  ;;  %9844 = vmatprep.subr.bf16.mxu0 %v9843_v52  ;;  %v9861_v28 = vpack.c.bf16 %v3311_v9, %v3303_v7  ;;  %v10373_v52 = vpack.c.bf16 %v3313_v14, %v3305_v10  ;;  %v10375_v32 = vpack.c.bf16 %v3330_v27, %v3322_v21  ;;  %v3383_v9 = vld [vmem:[%s11116_s15 + $0x3420] sm:$0xff]  ;;  %v3408_v21 = vld [vmem:[%s11116_s15 + $0x34e8] sm:$0xff]  ;;  %v3402_v27 = vld [vmem:[%s11116_s15 + $0x34b8] sm:$0xff] }
 0x871   : > { %10356 = vmatprep.subr.bf16.mxu1 %v10355_v31  ;;  %v3321_v31 = vld [vmem:[%s11116_s15 + $0x3230] sm:$0xff]  ;;  %v3391_v10 = vld [vmem:[%s11116_s15 + $0x3460] sm:$0xff] }
 0x873   : > { %9846 = vmatpush1.bf16.msra.mxu0 %v9845_v29  ;;  %v3346_v29 = vld [vmem:[%s11116_s15 + $0x32f8] sm:$0xff] }
 0x874   : > { %10358 = vmatpush1.bf16.msra.mxu1 %v10357_v5  ;;  %9848 = vmatprep.subr.bf16.mxu0 %v9847_v33  ;;  %v9865_v5 = vpack.c.bf16 %v3327_v13, %v3319_v62  ;;  %v10377_v33 = vpack.c.bf16 %v3329_v23, %v3321_v31  ;;  %v10379_v40 = vpack.c.bf16 %v3346_v29, %v3338_v25  ;;  %v3399_v13 = vld [vmem:[%s11116_s15 + $0x34a0] sm:$0xff]  ;;  %v3424_v25 = vld [vmem:[%s11116_s15 + $0x3568] sm:$0xff]  ;;  %v3418_v29 = vld [vmem:[%s11116_s15 + $0x3538] sm:$0xff] }
 0x875   : > { %10360 = vmatprep.subr.bf16.mxu1 %v10359_v38  ;;  %v3337_v38 = vld [vmem:[%s11116_s15 + $0x32b0] sm:$0xff]  ;;  %v3407_v31 = vld [vmem:[%s11116_s15 + $0x34e0] sm:$0xff] }
 0x876   : > { %5407 = vmatmul.mubr.f32.vlgmr.msra.gmra.mrb[2].mxu0 %v12470_v48 }
 0x877   : > { %9850 = vmatpush1.bf16.msra.mxu0 %v9849_v54  ;;  %5975 = vmatmul.mubr.f32.vlgmr.msra.gmra.mrb[2].mxu1 %v12470_v48  ;;  %v3306_v48 = vld [vmem:[%s11116_s15 + $0x31b8] sm:$0xff] }
 0x878   : > { %10362 = vmatpush1.bf16.msra.mxu1 %v10361_v16  ;;  %9852 = vmatprep.subr.bf16.mxu0 %v9851_v55  ;;  %v10371_v12 = vpack.c.bf16 %v3314_v45, %v3306_v48  ;;  %v3362_v54 = vld [vmem:[%s11116_s15 + $0x3378] sm:$0xff]  ;;  %v9869_v16 = vpack.c.bf16 %v3343_v11, %v3335_v36  ;;  %v10381_v55 = vpack.c.bf16 %v3345_v61, %v3337_v38  ;;  %v3392_v48 = vld [vmem:[%s11116_s15 + $0x3468] sm:$0xff]  ;;  %v3415_v11 = vld [vmem:[%s11116_s15 + $0x3520] sm:$0xff] }
 0x879   : > { %10364 = vmatprep.subr.bf16.mxu1 %v10363_v2  ;;  %5477 = vmatprep.mubr.f32.mxu0 %v12625_v8  ;;  %v3353_v2 = vld [vmem:[%s11116_s15 + $0x3330] sm:$0xff]  ;;  %v10383_v57 = vpack.c.bf16 %v3362_v54, %v3354_v58  ;;  %v3386_v45 = vld [vmem:[%s11116_s15 + $0x3438] sm:$0xff]  ;;  %v9879_v7 = vpack.c.bf16 %v3392_v48, %v3384_v49  ;;  %v9887_v36 = vpack.c.bf16 %v3424_v25, %v3416_v19  ;;  %v3423_v38 = vld [vmem:[%s11116_s15 + $0x3560] sm:$0xff] }
 0x87a   : > { %6045 = vmatprep.mubr.f32.mxu1 %v12625_v8  ;;  %v3328_v8 = vld [vmem:[%s11116_s15 + $0x3268] sm:$0xff]  ;;  %v3434_v54 = vld [vmem:[%s11116_s15 + $0x35b8] sm:$0xff]  ;;  %v3457_v49 = vld [vmem:[%s11116_s15 + $0x3670] sm:$0xff] }
 0x87b   : > { %9854 = vmatpush1.bf16.msra.mxu0 %v9853_v22  ;;  %v9863_v56 = vpack.c.bf16 %v3328_v8, %v3320_v42  ;;  %v3378_v22 = vld [vmem:[%s11116_s15 + $0x33f8] sm:$0xff]  ;;  %v3393_v42 = vld [vmem:[%s11116_s15 + $0x3470] sm:$0xff]  ;;  %v3400_v8 = vld [vmem:[%s11116_s15 + $0x34a8] sm:$0xff] }
 0x87c   : > { %10366 = vmatpush1.bf16.msra.mxu1 %v10365_v0  ;;  %9856 = vmatprep.subr.bf16.mxu0 %v9855_v30  ;;  %v9873_v0 = vpack.c.bf16 %v3359_v43, %v3351_v1  ;;  %v10385_v30 = vpack.c.bf16 %v3361_v59, %v3353_v2  ;;  %v10387_v17 = vpack.c.bf16 %v3378_v22, %v3370_v4  ;;  %v3440_v58 = vld [vmem:[%s11116_s15 + $0x35e8] sm:$0xff]  ;;  %v3431_v43 = vld [vmem:[%s11116_s15 + $0x35a0] sm:$0xff]  ;;  %v3450_v22 = vld [vmem:[%s11116_s15 + $0x3638] sm:$0xff] }
 0x87d   : > { %10368 = vmatprep.subr.bf16.mxu1 %v10367_v50  ;;  %v3369_v50 = vld [vmem:[%s11116_s15 + $0x33b0] sm:$0xff]  ;;  %v9883_v62 = vpack.c.bf16 %v3408_v21, %v3400_v8  ;;  %v9891_v1 = vpack.c.bf16 %v3440_v58, %v3432_v46  ;;  %v3439_v2 = vld [vmem:[%s11116_s15 + $0x35e0] sm:$0xff]  ;;  %v3456_v4 = vld [vmem:[%s11116_s15 + $0x3668] sm:$0xff] }
 0x87e   : > { %v3464_v48 = vld [vmem:[%s11116_s15 + $0x36a8] sm:$0xff]  ;;  %v3473_v8 = vld [vmem:[%s11116_s15 + $0x36f0] sm:$0xff] }
 0x87f   : > { %9858 = vmatpush1.bf16.msra.mxu0 %v9857_v51  ;;  %v3394_v51 = vld [vmem:[%s11116_s15 + $0x3478] sm:$0xff]  ;;  %v3480_v21 = vld [vmem:[%s11116_s15 + $0x3728] sm:$0xff]  ;;  %v3489_v19 = vld [vmem:[%s11116_s15 + $0x3770] sm:$0xff] }
 0x880   : > { %10370 = vmatpush1.bf16.msra.mxu1 %v10369_v53  ;;  %9860 = vmatprep.subr.bf16.mxu0 %v9859_v6  ;;  %v9877_v53 = vpack.c.bf16 %v3375_v35, %v3367_v44  ;;  %v10389_v6 = vpack.c.bf16 %v3377_v47, %v3369_v50  ;;  %v10391_v14 = vpack.c.bf16 %v3394_v51, %v3386_v45  ;;  %v3447_v35 = vld [vmem:[%s11116_s15 + $0x3620] sm:$0xff]  ;;  %v3472_v45 = vld [vmem:[%s11116_s15 + $0x36e8] sm:$0xff]  ;;  %v3466_v51 = vld [vmem:[%s11116_s15 + $0x36b8] sm:$0xff] }
 0x881   : > { %10372 = vmatprep.subr.bf16.mxu1 %v10371_v12  ;;  %v3385_v12 = vld [vmem:[%s11116_s15 + $0x3430] sm:$0xff]  ;;  %v9895_v44 = vpack.c.bf16 %v3456_v4, %v3448_v60  ;;  %v3455_v50 = vld [vmem:[%s11116_s15 + $0x3660] sm:$0xff]  ;;  %v3496_v25 = vld [vmem:[%s11116_s15 + $0x37a8] sm:$0xff] }
 0x882   : > { %v3505_v46 = vld [vmem:[%s11116_s15 + $0x37f0] sm:$0xff]  ;;  %v3512_v58 = vld [vmem:[%s11116_s15 + $0x3828] sm:$0xff] }
 0x883   : > { %9862 = vmatpush1.bf16.msra.mxu0 %v9861_v28  ;;  %v3410_v28 = vld [vmem:[%s11116_s15 + $0x34f8] sm:$0xff]  ;;  %v3521_v60 = vld [vmem:[%s11116_s15 + $0x3870] sm:$0xff]  ;;  %v3528_v4 = vld [vmem:[%s11116_s15 + $0x38a8] sm:$0xff] }
 0x884   : > { %10374 = vmatpush1.bf16.msra.mxu1 %v10373_v52  ;;  %9864 = vmatprep.subr.bf16.mxu0 %v9863_v56  ;;  %v9881_v52 = vpack.c.bf16 %v3391_v10, %v3383_v9  ;;  %v10393_v56 = vpack.c.bf16 %v3393_v42, %v3385_v12  ;;  %v10395_v23 = vpack.c.bf16 %v3410_v28, %v3402_v27  ;;  %v3463_v10 = vld [vmem:[%s11116_s15 + $0x36a0] sm:$0xff]  ;;  %v3488_v27 = vld [vmem:[%s11116_s15 + $0x3768] sm:$0xff]  ;;  %v3482_v28 = vld [vmem:[%s11116_s15 + $0x3738] sm:$0xff] }
 0x885   : > { %10376 = vmatprep.subr.bf16.mxu1 %v10375_v32  ;;  %v3401_v32 = vld [vmem:[%s11116_s15 + $0x34b0] sm:$0xff]  ;;  %v9899_v9 = vpack.c.bf16 %v3472_v45, %v3464_v48  ;;  %v3471_v12 = vld [vmem:[%s11116_s15 + $0x36e0] sm:$0xff]  ;;  %v3544_v45 = vld [vmem:[%s11116_s15 + $0x3928] sm:$0xff] }
 0x886   : > { %v3537_v48 = vld [vmem:[%s11116_s15 + $0x38f0] sm:$0xff] }
 0x887   : > { %9866 = vmatpush1.bf16.msra.mxu0 %v9865_v5  ;;  %v3426_v5 = vld [vmem:[%s11116_s15 + $0x3578] sm:$0xff] }
 0x888   : > { %10378 = vmatpush1.bf16.msra.mxu1 %v10377_v33  ;;  %9868 = vmatprep.subr.bf16.mxu0 %v9867_v34  ;;  %v9885_v33 = vpack.c.bf16 %v3407_v31, %v3399_v13  ;;  %v10397_v34 = vpack.c.bf16 %v3409_v15, %v3401_v32  ;;  %v10399_v61 = vpack.c.bf16 %v3426_v5, %v3418_v29  ;;  %v3479_v31 = vld [vmem:[%s11116_s15 + $0x3720] sm:$0xff]  ;;  %v3504_v29 = vld [vmem:[%s11116_s15 + $0x37e8] sm:$0xff]  ;;  %v3498_v5 = vld [vmem:[%s11116_s15 + $0x37b8] sm:$0xff] }
 0x889   : > { %10380 = vmatprep.subr.bf16.mxu1 %v10379_v40  ;;  %v3417_v40 = vld [vmem:[%s11116_s15 + $0x3530] sm:$0xff]  ;;  %v9903_v13 = vpack.c.bf16 %v3488_v27, %v3480_v21  ;;  %v3487_v32 = vld [vmem:[%s11116_s15 + $0x3760] sm:$0xff]  ;;  %v3560_v27 = vld [vmem:[%s11116_s15 + $0x39a8] sm:$0xff] }
 0x88a   : > { %v3553_v21 = vld [vmem:[%s11116_s15 + $0x3970] sm:$0xff] }
 0x88b   : > { %9870 = vmatpush1.bf16.msra.mxu0 %v9869_v16  ;;  %v3442_v16 = vld [vmem:[%s11116_s15 + $0x35f8] sm:$0xff] }
 0x88c   : > { %10382 = vmatpush1.bf16.msra.mxu1 %v10381_v55  ;;  %9872 = vmatprep.subr.bf16.mxu0 %v9871_v20  ;;  %v9889_v55 = vpack.c.bf16 %v3423_v38, %v3415_v11  ;;  %v10401_v20 = vpack.c.bf16 %v3425_v41, %v3417_v40  ;;  %v10403_v59 = vpack.c.bf16 %v3442_v16, %v3434_v54  ;;  %v3495_v38 = vld [vmem:[%s11116_s15 + $0x37a0] sm:$0xff]  ;;  %v3520_v54 = vld [vmem:[%s11116_s15 + $0x3868] sm:$0xff]  ;;  %v3514_v16 = vld [vmem:[%s11116_s15 + $0x3838] sm:$0xff] }
 0x88d   : > { %10384 = vmatprep.subr.bf16.mxu1 %v10383_v57  ;;  %v3433_v57 = vld [vmem:[%s11116_s15 + $0x35b0] sm:$0xff]  ;;  %v9907_v11 = vpack.c.bf16 %v3504_v29, %v3496_v25  ;;  %v3503_v40 = vld [vmem:[%s11116_s15 + $0x37e0] sm:$0xff]  ;;  %v3576_v25 = vld [vmem:[%s11116_s15 + $0x3a28] sm:$0xff] }
 0x88e   : > { %v3578_v29 = vld [vmem:[%s11116_s15 + $0x3a38] sm:$0xff] }
 0x88f   : > { %9874 = vmatpush1.bf16.msra.mxu0 %v9873_v0  ;;  %v3458_v0 = vld [vmem:[%s11116_s15 + $0x3678] sm:$0xff] }
 0x890   : > { %10386 = vmatpush1.bf16.msra.mxu1 %v10385_v30  ;;  %9876 = vmatprep.subr.bf16.mxu0 %v9875_v26  ;;  %v9893_v30 = vpack.c.bf16 %v3439_v2, %v3431_v43  ;;  %v10405_v26 = vpack.c.bf16 %v3441_v18, %v3433_v57  ;;  %v10407_v47 = vpack.c.bf16 %v3458_v0, %v3450_v22  ;;  %v3511_v2 = vld [vmem:[%s11116_s15 + $0x3820] sm:$0xff]  ;;  %v3536_v22 = vld [vmem:[%s11116_s15 + $0x38e8] sm:$0xff]  ;;  %v3530_v0 = vld [vmem:[%s11116_s15 + $0x38b8] sm:$0xff] }
 0x891   : > { %10388 = vmatprep.subr.bf16.mxu1 %v10387_v17  ;;  %v3449_v17 = vld [vmem:[%s11116_s15 + $0x3630] sm:$0xff]  ;;  %v9911_v43 = vpack.c.bf16 %v3520_v54, %v3512_v58  ;;  %v3519_v57 = vld [vmem:[%s11116_s15 + $0x3860] sm:$0xff]  ;;  %v3600_v58 = vld [vmem:[%s11116_s15 + $0x3ae8] sm:$0xff] }
 0x892   : > { %v3594_v54 = vld [vmem:[%s11116_s15 + $0x3ab8] sm:$0xff] }
 0x893   : > { %9878 = vmatpush1.bf16.msra.mxu0 %v9877_v53  ;;  %v3474_v53 = vld [vmem:[%s11116_s15 + $0x36f8] sm:$0xff] }
 0x894   : > { %10390 = vmatpush1.bf16.msra.mxu1 %v10389_v6  ;;  %9880 = vmatprep.subr.bf16.mxu0 %v9879_v7  ;;  %v9897_v6 = vpack.c.bf16 %v3455_v50, %v3447_v35  ;;  %v10409_v7 = vpack.c.bf16 %v3457_v49, %v3449_v17  ;;  %v10411_v42 = vpack.c.bf16 %v3474_v53, %v3466_v51  ;;  %v3527_v50 = vld [vmem:[%s11116_s15 + $0x38a0] sm:$0xff]  ;;  %v3552_v51 = vld [vmem:[%s11116_s15 + $0x3968] sm:$0xff]  ;;  %v3546_v53 = vld [vmem:[%s11116_s15 + $0x3938] sm:$0xff] }
 0x895   : > { %10392 = vmatprep.subr.bf16.mxu1 %v10391_v14  ;;  %v3465_v14 = vld [vmem:[%s11116_s15 + $0x36b0] sm:$0xff]  ;;  %v9915_v35 = vpack.c.bf16 %v3536_v22, %v3528_v4  ;;  %v3535_v17 = vld [vmem:[%s11116_s15 + $0x38e0] sm:$0xff]  ;;  %v3616_v4 = vld [vmem:[%s11116_s15 + $0x3b68] sm:$0xff] }
 0x896   : > { %v3610_v22 = vld [vmem:[%s11116_s15 + $0x3b38] sm:$0xff] }
 0x897   : > { %9882 = vmatpush1.bf16.msra.mxu0 %v9881_v52  ;;  %v3490_v52 = vld [vmem:[%s11116_s15 + $0x3778] sm:$0xff] }
 0x898   : > { %10394 = vmatpush1.bf16.msra.mxu1 %v10393_v56  ;;  %9884 = vmatprep.subr.bf16.mxu0 %v9883_v62  ;;  %v9901_v56 = vpack.c.bf16 %v3471_v12, %v3463_v10  ;;  %v10413_v62 = vpack.c.bf16 %v3473_v8, %v3465_v14  ;;  %v10415_v15 = vpack.c.bf16 %v3490_v52, %v3482_v28  ;;  %v3543_v12 = vld [vmem:[%s11116_s15 + $0x3920] sm:$0xff]  ;;  %v3568_v28 = vld [vmem:[%s11116_s15 + $0x39e8] sm:$0xff]  ;;  %v3570_v52 = vld [vmem:[%s11116_s15 + $0x39f8] sm:$0xff] }
 0x899   : > { %10396 = vmatprep.subr.bf16.mxu1 %v10395_v23  ;;  %v3481_v23 = vld [vmem:[%s11116_s15 + $0x3730] sm:$0xff]  ;;  %v9919_v10 = vpack.c.bf16 %v3552_v51, %v3544_v45  ;;  %v3551_v14 = vld [vmem:[%s11116_s15 + $0x3960] sm:$0xff]  ;;  %v3632_v45 = vld [vmem:[%s11116_s15 + $0x3be8] sm:$0xff] }
 0x89a   : > { %v3626_v51 = vld [vmem:[%s11116_s15 + $0x3bb8] sm:$0xff] }
 0x89b   : > { %9886 = vmatpush1.bf16.msra.mxu0 %v9885_v33  ;;  %v3506_v33 = vld [vmem:[%s11116_s15 + $0x37f8] sm:$0xff] }
 0x89c   : > { %10398 = vmatpush1.bf16.msra.mxu1 %v10397_v34  ;;  %9888 = vmatprep.subr.bf16.mxu0 %v9887_v36  ;;  %v9905_v34 = vpack.c.bf16 %v3487_v32, %v3479_v31  ;;  %v10417_v36 = vpack.c.bf16 %v3489_v19, %v3481_v23  ;;  %v10419_v41 = vpack.c.bf16 %v3506_v33, %v3498_v5  ;;  %v3559_v31 = vld [vmem:[%s11116_s15 + $0x39a0] sm:$0xff]  ;;  %v3561_v23 = vld [vmem:[%s11116_s15 + $0x39b0] sm:$0xff]  ;;  %v3586_v5 = vld [vmem:[%s11116_s15 + $0x3a78] sm:$0xff] }
 0x89d   : > { %10400 = vmatprep.subr.bf16.mxu1 %v10399_v61  ;;  %v3497_v61 = vld [vmem:[%s11116_s15 + $0x37b0] sm:$0xff]  ;;  %v3567_v32 = vld [vmem:[%s11116_s15 + $0x39e0] sm:$0xff] }
 0x89e   : > { %v3569_v19 = vld [vmem:[%s11116_s15 + $0x39f0] sm:$0xff]  ;;  %v9925_v33 = vpack.c.bf16 %v3567_v32, %v3559_v31  ;;  %v3647_v31 = vld [vmem:[%s11116_s15 + $0x3c60] sm:$0xff] }
 0x89f   : > { %9890 = vmatpush1.bf16.msra.mxu0 %v9889_v55  ;;  %v3522_v55 = vld [vmem:[%s11116_s15 + $0x3878] sm:$0xff]  ;;  %v3641_v32 = vld [vmem:[%s11116_s15 + $0x3c30] sm:$0xff] }
 0x8a0   : > { %10402 = vmatpush1.bf16.msra.mxu1 %v10401_v20  ;;  %9892 = vmatprep.subr.bf16.mxu0 %v9891_v1  ;;  %v9909_v20 = vpack.c.bf16 %v3503_v40, %v3495_v38  ;;  %v10421_v1 = vpack.c.bf16 %v3505_v46, %v3497_v61  ;;  %v10423_v18 = vpack.c.bf16 %v3522_v55, %v3514_v16  ;;  %v3583_v38 = vld [vmem:[%s11116_s15 + $0x3a60] sm:$0xff]  ;;  %v3577_v40 = vld [vmem:[%s11116_s15 + $0x3a30] sm:$0xff]  ;;  %v3592_v46 = vld [vmem:[%s11116_s15 + $0x3aa8] sm:$0xff] }
 0x8a1   : > { %10404 = vmatprep.subr.bf16.mxu1 %v10403_v59  ;;  %v3513_v59 = vld [vmem:[%s11116_s15 + $0x3830] sm:$0xff]  ;;  %v10439_v61 = vpack.c.bf16 %v3586_v5, %v3578_v29  ;;  %v3602_v16 = vld [vmem:[%s11116_s15 + $0x3af8] sm:$0xff] }
 0x8a2   : > { %v3666_v29 = vld [vmem:[%s11116_s15 + $0x3cf8] sm:$0xff] }
 0x8a3   : > { %9894 = vmatpush1.bf16.msra.mxu0 %v9893_v30  ;;  %v3538_v30 = vld [vmem:[%s11116_s15 + $0x38f8] sm:$0xff] }
 0x8a4   : > { %10406 = vmatpush1.bf16.msra.mxu1 %v10405_v26  ;;  %9896 = vmatprep.subr.bf16.mxu0 %v9895_v44  ;;  %v9913_v26 = vpack.c.bf16 %v3519_v57, %v3511_v2  ;;  %v10425_v44 = vpack.c.bf16 %v3521_v60, %v3513_v59  ;;  %v10427_v49 = vpack.c.bf16 %v3538_v30, %v3530_v0  ;;  %v3599_v2 = vld [vmem:[%s11116_s15 + $0x3ae0] sm:$0xff]  ;;  %v3593_v57 = vld [vmem:[%s11116_s15 + $0x3ab0] sm:$0xff]  ;;  %v3608_v60 = vld [vmem:[%s11116_s15 + $0x3b28] sm:$0xff] }
 0x8a5   : > { %10408 = vmatprep.subr.bf16.mxu1 %v10407_v47  ;;  %v3529_v47 = vld [vmem:[%s11116_s15 + $0x38b0] sm:$0xff]  ;;  %v10443_v59 = vpack.c.bf16 %v3602_v16, %v3594_v54  ;;  %v3618_v0 = vld [vmem:[%s11116_s15 + $0x3b78] sm:$0xff] }
 0x8a6   : > { %v3682_v54 = vld [vmem:[%s11116_s15 + $0x3d78] sm:$0xff] }
 0x8a7   : > { %9898 = vmatpush1.bf16.msra.mxu0 %v9897_v6  ;;  %v3554_v6 = vld [vmem:[%s11116_s15 + $0x3978] sm:$0xff] }
 0x8a8   : > { %10410 = vmatpush1.bf16.msra.mxu1 %v10409_v7  ;;  %9900 = vmatprep.subr.bf16.mxu0 %v9899_v9  ;;  %v9917_v7 = vpack.c.bf16 %v3535_v17, %v3527_v50  ;;  %v10429_v9 = vpack.c.bf16 %v3537_v48, %v3529_v47  ;;  %v10431_v8 = vpack.c.bf16 %v3554_v6, %v3546_v53  ;;  %v3615_v50 = vld [vmem:[%s11116_s15 + $0x3b60] sm:$0xff]  ;;  %v3609_v17 = vld [vmem:[%s11116_s15 + $0x3b30] sm:$0xff]  ;;  %v3624_v48 = vld [vmem:[%s11116_s15 + $0x3ba8] sm:$0xff] }
 0x8a9   : > { %10412 = vmatprep.subr.bf16.mxu1 %v10411_v42  ;;  %v3545_v42 = vld [vmem:[%s11116_s15 + $0x3930] sm:$0xff]  ;;  %v10447_v47 = vpack.c.bf16 %v3618_v0, %v3610_v22  ;;  %v3634_v53 = vld [vmem:[%s11116_s15 + $0x3bf8] sm:$0xff] }
 0x8aa   : > { %v3698_v22 = vld [vmem:[%s11116_s15 + $0x3df8] sm:$0xff] }
 0x8ab   : > { %9902 = vmatpush1.bf16.msra.mxu0 %v9901_v56  ;;  %v9921_v56 = vpack.c.bf16 %v3551_v14, %v3543_v12  ;;  %v3631_v12 = vld [vmem:[%s11116_s15 + $0x3be0] sm:$0xff]  ;;  %v3625_v14 = vld [vmem:[%s11116_s15 + $0x3bb0] sm:$0xff] }
 0x8ac   : > { %10414 = vmatpush1.bf16.msra.mxu1 %v10413_v62  ;;  %9904 = vmatprep.subr.bf16.mxu0 %v9903_v13  ;;  %v10433_v62 = vpack.c.bf16 %v3553_v21, %v3545_v42  ;;  %v9923_v13 = vpack.c.bf16 %v3568_v28, %v3560_v27  ;;  %v10451_v42 = vpack.c.bf16 %v3634_v53, %v3626_v51  ;;  %v3640_v21 = vld [vmem:[%s11116_s15 + $0x3c28] sm:$0xff]  ;;  %v3642_v28 = vld [vmem:[%s11116_s15 + $0x3c38] sm:$0xff] }
 0x8ad   : > { %10416 = vmatprep.subr.bf16.mxu1 %v10415_v15  ;;  %v3648_v27 = vld [vmem:[%s11116_s15 + $0x3c68] sm:$0xff]  ;;  %v3714_v51 = vld [vmem:[%s11116_s15 + $0x3e78] sm:$0xff] }
 0x8af   : > { %9906 = vmatpush1.bf16.msra.mxu0 %v9905_v34  ;;  %v10437_v34 = vpack.c.bf16 %v3569_v19, %v3561_v23  ;;  %v3656_v19 = vld [vmem:[%s11116_s15 + $0x3ca8] sm:$0xff] }
 0x8b0   : > { %10418 = vmatpush1.bf16.msra.mxu1 %v10417_v36  ;;  %9908 = vmatprep.subr.bf16.mxu0 %v9907_v11  ;;  %v3575_v11 = vld [vmem:[%s11116_s15 + $0x3a20] sm:$0xff] }
 0x8b1   : > { %10420 = vmatprep.subr.bf16.mxu1 %v10419_v41  ;;  %v3585_v41 = vld [vmem:[%s11116_s15 + $0x3a70] sm:$0xff]  ;;  %v9929_v55 = vpack.c.bf16 %v3583_v38, %v3575_v11  ;;  %v3663_v11 = vld [vmem:[%s11116_s15 + $0x3ce0] sm:$0xff] }
 0x8b2   : > { %v3657_v38 = vld [vmem:[%s11116_s15 + $0x3cb0] sm:$0xff] }
 0x8b3   : > { %9910 = vmatpush1.bf16.msra.mxu0 %v9909_v20  ;;  %v10441_v20 = vpack.c.bf16 %v3585_v41, %v3577_v40  ;;  %v3672_v41 = vld [vmem:[%s11116_s15 + $0x3d28] sm:$0xff] }
 0x8b4   : > { %10422 = vmatpush1.bf16.msra.mxu1 %v10421_v1  ;;  %9912 = vmatprep.subr.bf16.mxu0 %v9911_v43  ;;  %v9931_v1 = vpack.c.bf16 %v3600_v58, %v3592_v46  ;;  %v3591_v43 = vld [vmem:[%s11116_s15 + $0x3aa0] sm:$0xff]  ;;  %v3680_v46 = vld [vmem:[%s11116_s15 + $0x3d68] sm:$0xff]  ;;  %v3674_v58 = vld [vmem:[%s11116_s15 + $0x3d38] sm:$0xff] }
 0x8b5   : > { %10424 = vmatprep.subr.bf16.mxu1 %v10423_v18  ;;  %v3601_v18 = vld [vmem:[%s11116_s15 + $0x3af0] sm:$0xff]  ;;  %v9933_v30 = vpack.c.bf16 %v3599_v2, %v3591_v43  ;;  %v3679_v43 = vld [vmem:[%s11116_s15 + $0x3d60] sm:$0xff] }
 0x8b6   : > { %5478 = vmatmul.mubr.f32.vlgmr.msra.gmra.mrb[2].mxu0 %v12613_v63  ;;  %v3673_v2 = vld [vmem:[%s11116_s15 + $0x3d30] sm:$0xff] }
 0x8b7   : > { %9914 = vmatpush1.bf16.msra.mxu0 %v9913_v26  ;;  %6046 = vmatmul.mubr.f32.vlgmr.msra.gmra.mrb[2].mxu1 %v12613_v63  ;;  %v3562_v63 = vld [vmem:[%s11116_s15 + $0x39b8] sm:$0xff]  ;;  %v10445_v26 = vpack.c.bf16 %v3601_v18, %v3593_v57  ;;  %v10463_v57 = vpack.c.bf16 %v3682_v54, %v3674_v58  ;;  %v3688_v18 = vld [vmem:[%s11116_s15 + $0x3da8] sm:$0xff] }
 0x8b8   : > { %10426 = vmatpush1.bf16.msra.mxu1 %v10425_v44  ;;  %9916 = vmatprep.subr.bf16.mxu0 %v9915_v35  ;;  %v10435_v15 = vpack.c.bf16 %v3570_v52, %v3562_v63  ;;  %v9935_v44 = vpack.c.bf16 %v3616_v4, %v3608_v60  ;;  %v3607_v35 = vld [vmem:[%s11116_s15 + $0x3b20] sm:$0xff]  ;;  %v3650_v63 = vld [vmem:[%s11116_s15 + $0x3c78] sm:$0xff]  ;;  %v3696_v60 = vld [vmem:[%s11116_s15 + $0x3de8] sm:$0xff] }
 0x8b9   : > { %10428 = vmatprep.subr.bf16.mxu1 %v10427_v49  ;;  %5548 = vmatprep.mubr.f32.mxu0 %v12766_v24  ;;  %v3617_v49 = vld [vmem:[%s11116_s15 + $0x3b70] sm:$0xff]  ;;  %v9937_v6 = vpack.c.bf16 %v3615_v50, %v3607_v35  ;;  %v10455_v23 = vpack.c.bf16 %v3650_v63, %v3642_v28  ;;  %v3690_v4 = vld [vmem:[%s11116_s15 + $0x3db8] sm:$0xff]  ;;  %v3695_v35 = vld [vmem:[%s11116_s15 + $0x3de0] sm:$0xff] }
 0x8ba   : > { %6116 = vmatprep.mubr.f32.mxu1 %v12766_v24  ;;  %v3584_v24 = vld [vmem:[%s11116_s15 + $0x3a68] sm:$0xff]  ;;  %v3689_v50 = vld [vmem:[%s11116_s15 + $0x3db0] sm:$0xff]  ;;  %v3730_v28 = vld [vmem:[%s11116_s15 + $0x3ef8] sm:$0xff] }
 0x8bb   : > { %9918 = vmatpush1.bf16.msra.mxu0 %v9917_v7  ;;  %v9927_v36 = vpack.c.bf16 %v3584_v24, %v3576_v25  ;;  %v10449_v7 = vpack.c.bf16 %v3617_v49, %v3609_v17  ;;  %v3664_v25 = vld [vmem:[%s11116_s15 + $0x3ce8] sm:$0xff]  ;;  %v3658_v24 = vld [vmem:[%s11116_s15 + $0x3cb8] sm:$0xff]  ;;  %v10467_v17 = vpack.c.bf16 %v3698_v22, %v3690_v4 }
 0x8bc   : > { %10430 = vmatpush1.bf16.msra.mxu1 %v10429_v9  ;;  %9920 = vmatprep.subr.bf16.mxu0 %v9919_v10  ;;  %v9939_v9 = vpack.c.bf16 %v3632_v45, %v3624_v48  ;;  %v3623_v10 = vld [vmem:[%s11116_s15 + $0x3ba0] sm:$0xff]  ;;  %v10459_v40 = vpack.c.bf16 %v3666_v29, %v3658_v24  ;;  %v3704_v49 = vld [vmem:[%s11116_s15 + $0x3e28] sm:$0xff]  ;;  %v3706_v45 = vld [vmem:[%s11116_s15 + $0x3e38] sm:$0xff] }
 0x8bd   : > { %10432 = vmatprep.subr.bf16.mxu1 %v10431_v8  ;;  %v3633_v8 = vld [vmem:[%s11116_s15 + $0x3bf0] sm:$0xff]  ;;  %v9941_v52 = vpack.c.bf16 %v3631_v12, %v3623_v10  ;;  %v3712_v48 = vld [vmem:[%s11116_s15 + $0x3e68] sm:$0xff]  ;;  %v3711_v10 = vld [vmem:[%s11116_s15 + $0x3e60] sm:$0xff] }
 0x8be   : > { %v3705_v12 = vld [vmem:[%s11116_s15 + $0x3e30] sm:$0xff]  ;;  %v3746_v24 = vld [vmem:[%s11116_s15 + $0x3f78] sm:$0xff] }
 0x8bf   : > { %9922 = vmatpush1.bf16.msra.mxu0 %v9921_v56  ;;  %v10453_v56 = vpack.c.bf16 %v3633_v8, %v3625_v14  ;;  %v10471_v14 = vpack.c.bf16 %v3714_v51, %v3706_v45  ;;  %v3720_v8 = vld [vmem:[%s11116_s15 + $0x3ea8] sm:$0xff]  ;;  %v3762_v58 = vld [vmem:[%s11116_s15 + $0x3ff8] sm:$0xff]  ;;  %v6357_v51 = vld [vmem:[%s15221_s7 + $0x320] sm:$0xff] (!%p7569_p5) }
 0x8c0   : > { %10434 = vmatpush1.bf16.msra.mxu1 %v10433_v62  ;;  %9924 = vmatprep.subr.bf16.mxu0 %v9923_v13  ;;  %v9943_v62 = vpack.c.bf16 %v3648_v27, %v3640_v21  ;;  %v3639_v13 = vld [vmem:[%s11116_s15 + $0x3c20] sm:$0xff]  ;;  %v3728_v21 = vld [vmem:[%s11116_s15 + $0x3ee8] sm:$0xff]  ;;  %v3722_v27 = vld [vmem:[%s11116_s15 + $0x3eb8] sm:$0xff] }
 0x8c1   : > { %10436 = vmatprep.subr.bf16.mxu1 %v10435_v15  ;;  %v3649_v15 = vld [vmem:[%s11116_s15 + $0x3c70] sm:$0xff]  ;;  %v9945_v5 = vpack.c.bf16 %v3647_v31, %v3639_v13  ;;  %v3727_v13 = vld [vmem:[%s11116_s15 + $0x3ee0] sm:$0xff] }
 0x8c2   : > { %v3721_v31 = vld [vmem:[%s11116_s15 + $0x3eb0] sm:$0xff] }
 0x8c3   : > { %9926 = vmatpush1.bf16.msra.mxu0 %v9925_v33  ;;  %v10457_v33 = vpack.c.bf16 %v3649_v15, %v3641_v32  ;;  %v10475_v32 = vpack.c.bf16 %v3730_v28, %v3722_v27  ;;  %v3736_v15 = vld [vmem:[%s11116_s15 + $0x3f28] sm:$0xff]  ;;  %v6363_v27 = vld [vmem:[%s15221_s7 + $0x350] sm:$0xff] (!%p7569_p5) }
 0x8c4   : > { %10438 = vmatpush1.bf16.msra.mxu1 %v10437_v34  ;;  %9928 = vmatprep.subr.bf16.mxu0 %v9927_v36  ;;  %v9947_v34 = vpack.c.bf16 %v3664_v25, %v3656_v19  ;;  %v3655_v36 = vld [vmem:[%s11116_s15 + $0x3ca0] sm:$0xff]  ;;  %v3744_v19 = vld [vmem:[%s11116_s15 + $0x3f68] sm:$0xff]  ;;  %v3738_v25 = vld [vmem:[%s11116_s15 + $0x3f38] sm:$0xff] }
 0x8c5   : > { %10440 = vmatprep.subr.bf16.mxu1 %v10439_v61  ;;  %v3665_v61 = vld [vmem:[%s11116_s15 + $0x3cf0] sm:$0xff]  ;;  %v9949_v16 = vpack.c.bf16 %v3663_v11, %v3655_v36  ;;  %v3743_v36 = vld [vmem:[%s11116_s15 + $0x3f60] sm:$0xff] }
 0x8c6   : > { %v3737_v11 = vld [vmem:[%s11116_s15 + $0x3f30] sm:$0xff] }
 0x8c7   : > { %9930 = vmatpush1.bf16.msra.mxu0 %v9929_v55  ;;  %v10461_v55 = vpack.c.bf16 %v3665_v61, %v3657_v38  ;;  %v10479_v38 = vpack.c.bf16 %v3746_v24, %v3738_v25  ;;  %v3752_v61 = vld [vmem:[%s11116_s15 + $0x3fa8] sm:$0xff]  ;;  %v6369_v24 = vld [vmem:[%s15221_s7 + $0x380] sm:$0xff] (!%p7569_p5) }
 0x8c8   : > { %10442 = vmatpush1.bf16.msra.mxu1 %v10441_v20  ;;  %9932 = vmatprep.subr.bf16.mxu0 %v9931_v1  ;;  %v9951_v20 = vpack.c.bf16 %v3680_v46, %v3672_v41  ;;  %v3671_v1 = vld [vmem:[%s11116_s15 + $0x3d20] sm:$0xff]  ;;  %v3760_v41 = vld [vmem:[%s11116_s15 + $0x3fe8] sm:$0xff]  ;;  %v3754_v46 = vld [vmem:[%s11116_s15 + $0x3fb8] sm:$0xff] }
 0x8c9   : > { %10444 = vmatprep.subr.bf16.mxu1 %v10443_v59  ;;  %v3681_v59 = vld [vmem:[%s11116_s15 + $0x3d70] sm:$0xff]  ;;  %v9953_v0 = vpack.c.bf16 %v3679_v43, %v3671_v1  ;;  %v3759_v1 = vld [vmem:[%s11116_s15 + $0x3fe0] sm:$0xff]  ;;  %v10483_v43 = vpack.c.bf16 %v3762_v58, %v3754_v46  ;;  %v6366_v25 = vld [vmem:[%s15221_s7 + $0x368] sm:$0xff] (!%p7569_p5) }
 0x8ca   : > { %v6375_v58 = vld [vmem:[%s15221_s7 + $0x3b0] sm:$0xff] (!%p7569_p5) }
 0x8cb   : > { %9934 = vmatpush1.bf16.msra.mxu0 %v9933_v30  ;;  %v10465_v30 = vpack.c.bf16 %v3681_v59, %v3673_v2  ;;  %v3753_v2 = vld [vmem:[%s11116_s15 + $0x3fb0] sm:$0xff] }
 0x8cc   : > { %10446 = vmatpush1.bf16.msra.mxu1 %v10445_v26  ;;  %9936 = vmatprep.subr.bf16.mxu0 %v9935_v44  ;;  %v9955_v26 = vpack.c.bf16 %v3696_v60, %v3688_v18  ;;  %v3687_v44 = vld [vmem:[%s11116_s15 + $0x3da0] sm:$0xff] }
 0x8cd   : > { %10448 = vmatprep.subr.bf16.mxu1 %v10447_v47  ;;  %v3697_v47 = vld [vmem:[%s11116_s15 + $0x3df0] sm:$0xff]  ;;  %v9957_v53 = vpack.c.bf16 %v3695_v35, %v3687_v44 }
 0x8cf   : > { %9938 = vmatpush1.bf16.msra.mxu0 %v9937_v6  ;;  %v10469_v6 = vpack.c.bf16 %v3697_v47, %v3689_v50  ;;  %v1706_v50 = vld [vmem:[#allocation3 + $0x8] sm:$0xff] }
 0x8d0   : > { %10450 = vmatpush1.bf16.msra.mxu1 %v10449_v7  ;;  %9940 = vmatprep.subr.bf16.mxu0 %v9939_v9  ;;  %v9959_v7 = vpack.c.bf16 %v3712_v48, %v3704_v49  ;;  %v3703_v9 = vld [vmem:[%s11116_s15 + $0x3e20] sm:$0xff]  ;;  %v6354_v48 = vld [vmem:[%s15221_s7 + $0x308] sm:$0xff] (!%p7569_p5) }
 0x8d1   : > { %10452 = vmatprep.subr.bf16.mxu1 %v10451_v42  ;;  %v3713_v42 = vld [vmem:[%s11116_s15 + $0x3e70] sm:$0xff]  ;;  %v9961_v63 = vpack.c.bf16 %v3711_v10, %v3703_v9  ;;  %v6261_v49 = vld [vmem:[%s15221_s7 + $0x20] sm:$0xff] (!%p7569_p5) }
 0x8d2   : > { %v6353_v10 = vld [vmem:[%s15221_s7 + $0x300] sm:$0xff] (!%p7569_p5) }
 0x8d3   : > { %9942 = vmatpush1.bf16.msra.mxu0 %v9941_v52  ;;  %v10473_v52 = vpack.c.bf16 %v3713_v42, %v3705_v12  ;;  %v6356_v12 = vld [vmem:[%s15221_s7 + $0x318] sm:$0xff] (!%p7569_p5) }
 0x8d4   : > { %10454 = vmatpush1.bf16.msra.mxu1 %v10453_v56  ;;  %9944 = vmatprep.subr.bf16.mxu0 %v9943_v62  ;;  %v9963_v56 = vpack.c.bf16 %v3728_v21, %v3720_v8  ;;  %v3719_v62 = vld [vmem:[%s11116_s15 + $0x3ea0] sm:$0xff]  ;;  %v10553_v42 = vpack.c.bf16 (!%p7569_p5), %v6356_v12, %v6353_v10  ;;  %v6267_v8 = vld [vmem:[%s15221_s7 + $0x50] sm:$0xff] (!%p7569_p5)  ;;  %v6360_v21 = vld [vmem:[%s15221_s7 + $0x338] sm:$0xff] (!%p7569_p5) }
 0x8d5   : > { %10456 = vmatprep.subr.bf16.mxu1 %v10455_v23  ;;  %v3729_v23 = vld [vmem:[%s11116_s15 + $0x3ef0] sm:$0xff]  ;;  %v9965_v29 = vpack.c.bf16 %v3727_v13, %v3719_v62  ;;  %v6297_v10 = vld [vmem:[%s15221_s7 + $0x140] sm:$0xff] (!%p7569_p5)  ;;  %v6390_v12 = vld [vmem:[%s15221_s7 + $0x428] sm:$0xff] (!%p7569_p5) }
 0x8d6   : > { %v6359_v62 = vld [vmem:[%s15221_s7 + $0x330] sm:$0xff] (!%p7569_p5) }
 0x8d7   : > { %9946 = vmatpush1.bf16.msra.mxu0 %v9945_v5  ;;  %v10477_v5 = vpack.c.bf16 %v3729_v23, %v3721_v31  ;;  %v6362_v31 = vld [vmem:[%s15221_s7 + $0x348] sm:$0xff] (!%p7569_p5)  ;;  %v6273_v23 = vld [vmem:[%s15221_s7 + $0x80] sm:$0xff] (!%p7569_p5) }
 0x8d8   : > { %10458 = vmatpush1.bf16.msra.mxu1 %v10457_v33  ;;  %9948 = vmatprep.subr.bf16.mxu0 %v9947_v34  ;;  %v9967_v33 = vpack.c.bf16 %v3744_v19, %v3736_v15  ;;  %v3735_v34 = vld [vmem:[%s11116_s15 + $0x3f20] sm:$0xff]  ;;  %v10557_v15 = vpack.c.bf16 (!%p7569_p5), %v6362_v31, %v6359_v62  ;;  %v6300_v62 = vld [vmem:[%s15221_s7 + $0x158] sm:$0xff] (!%p7569_p5) }
 0x8d9   : > { %10460 = vmatprep.subr.bf16.mxu1 %v10459_v40  ;;  %v3745_v40 = vld [vmem:[%s11116_s15 + $0x3f70] sm:$0xff]  ;;  %v9969_v54 = vpack.c.bf16 %v3743_v36, %v3735_v34  ;;  %v6365_v34 = vld [vmem:[%s15221_s7 + $0x360] sm:$0xff] (!%p7569_p5)  ;;  %v6368_v36 = vld [vmem:[%s15221_s7 + $0x378] sm:$0xff] (!%p7569_p5) }
 0x8da   : > { %v6396_v31 = vld [vmem:[%s15221_s7 + $0x458] sm:$0xff] (!%p7569_p5) }
 0x8db   : > { %9950 = vmatpush1.bf16.msra.mxu0 %v9949_v16  ;;  %v10481_v16 = vpack.c.bf16 %v3745_v40, %v3737_v11  ;;  %v6279_v40 = vld [vmem:[%s15221_s7 + $0xb0] sm:$0xff] (!%p7569_p5) }
 0x8dc   : > { %10462 = vmatpush1.bf16.msra.mxu1 %v10461_v55  ;;  %9952 = vmatprep.subr.bf16.mxu0 %v9951_v20  ;;  %v9971_v55 = vpack.c.bf16 %v3760_v41, %v3752_v61  ;;  %v3751_v20 = vld [vmem:[%s11116_s15 + $0x3fa0] sm:$0xff]  ;;  %v6372_v61 = vld [vmem:[%s15221_s7 + $0x398] sm:$0xff] (!%p7569_p5)  ;;  %v10561_v41 = vpack.c.bf16 (!%p7569_p5), %v6368_v36, %v6365_v34  ;;  %v6306_v34 = vld [vmem:[%s15221_s7 + $0x188] sm:$0xff] (!%p7569_p5) }
 0x8dd   : > { %10464 = vmatprep.subr.bf16.mxu1 %v10463_v57  ;;  %v3761_v57 = vld [vmem:[%s11116_s15 + $0x3ff0] sm:$0xff]  ;;  %v9973_v59 = vpack.c.bf16 %v3759_v1, %v3751_v20  ;;  %v6374_v1 = vld [vmem:[%s15221_s7 + $0x3a8] sm:$0xff] (!%p7569_p5)  ;;  %v6309_v36 = vld [vmem:[%s15221_s7 + $0x1a0] sm:$0xff] (!%p7569_p5) }
 0x8de   : > { %v10485_v18 = vpack.c.bf16 %v3761_v57, %v3753_v2  ;;  %v6371_v20 = vld [vmem:[%s15221_s7 + $0x390] sm:$0xff] (!%p7569_p5)  ;;  %v6285_v2 = vld [vmem:[%s15221_s7 + $0xe0] sm:$0xff] (!%p7569_p5)  ;;  %v6378_v57 = vld [vmem:[%s15221_s7 + $0x3c8] sm:$0xff] (!%p7569_p5) }
 0x8df   : > { %9954 = vmatpush1.bf16.msra.mxu0 %v9953_v0 }
 0x8e0   : > { %10466 = vmatpush1.bf16.msra.mxu1 %v10465_v30  ;;  %9956 = vmatprep.subr.bf16.mxu0 %v9955_v26 }
 0x8e1   : > { %10468 = vmatprep.subr.bf16.mxu1 %v10467_v17 }
 0x8e3   : > { %9958 = vmatpush1.bf16.msra.mxu0 %v9957_v53  ;;  %v6257_v53 = vld [vmem:[%s15221_s7] sm:$0xff] (!%p7569_p5) }
 0x8e4   : > { %10470 = vmatpush1.bf16.msra.mxu1 %v10469_v6  ;;  %9960 = vmatprep.subr.bf16.mxu0 %v9959_v7  ;;  %v6260_v6 = vld [vmem:[%s15221_s7 + $0x18] sm:$0xff] (!%p7569_p5)  ;;  %v10551_v7 = vpack.c.bf16 (!%p7569_p5), %v6357_v51, %v6354_v48  ;;  %v6290_v51 = vld [vmem:[%s15221_s7 + $0x108] sm:$0xff] (!%p7569_p5) }
 0x8e5   : > { %10472 = vmatprep.subr.bf16.mxu1 %v10471_v14  ;;  %v10489_v9 = vpack.c.bf16 (!%p7569_p5), %v6260_v6, %v6257_v53  ;;  %v6264_v14 = vld [vmem:[%s15221_s7 + $0x38] sm:$0xff] (!%p7569_p5)  ;;  %v6383_v53 = vld [vmem:[%s15221_s7 + $0x3f0] sm:$0xff] (!%p7569_p5) }
 0x8e6   : > { %v10491_v28 = vpack.c.bf16 (!%p7569_p5), %v6267_v8, %v6264_v14  ;;  %v6393_v14 = vld [vmem:[%s15221_s7 + $0x440] sm:$0xff] (!%p7569_p5) }
 0x8e7   : > { %9962 = vmatpush1.bf16.msra.mxu0 %v9961_v63  ;;  %v10555_v63 = vpack.c.bf16 (!%p7569_p5), %v6363_v27, %v6360_v21  ;;  %v6293_v27 = vld [vmem:[%s15221_s7 + $0x120] sm:$0xff] (!%p7569_p5) }
 0x8e8   : > { %10474 = vmatpush1.bf16.msra.mxu1 %v10473_v52  ;;  %9964 = vmatprep.subr.bf16.mxu0 %v9963_v56  ;;  %v6263_v52 = vld [vmem:[%s15221_s7 + $0x30] sm:$0xff] (!%p7569_p5)  ;;  %v6266_v56 = vld [vmem:[%s15221_s7 + $0x48] sm:$0xff] (!%p7569_p5) }
 0x8e9   : > { %10476 = vmatprep.subr.bf16.mxu1 %v10475_v32  ;;  %v10493_v13 = vpack.c.bf16 (!%p7569_p5), %v6266_v56, %v6263_v52  ;;  %v6270_v32 = vld [vmem:[%s15221_s7 + $0x68] sm:$0xff] (!%p7569_p5)  ;;  %v10575_v52 = vpack.c.bf16 (!%p7569_p5), %v6393_v14, %v6390_v12  ;;  %v6392_v56 = vld [vmem:[%s15221_s7 + $0x438] sm:$0xff] (!%p7569_p5)  ;;  %v6181_v12 = vsub.s32 (!%p7569_p5), 0, %v11822_v3 }
 0x8ea   : > { %v10495_v19 = vpack.c.bf16 (!%p7569_p5), %v6273_v23, %v6270_v32  ;;  %v6399_v32 = vld [vmem:[%s15221_s7 + $0x470] sm:$0xff] (!%p7569_p5) }
 0x8eb   : > { %9966 = vmatpush1.bf16.msra.mxu0 %v9965_v29  ;;  %v6269_v29 = vld [vmem:[%s15221_s7 + $0x60] sm:$0xff] (!%p7569_p5) }
 0x8ec   : > { %10478 = vmatpush1.bf16.msra.mxu1 %v10477_v5  ;;  %9968 = vmatprep.subr.bf16.mxu0 %v9967_v33  ;;  %v10559_v5 = vpack.c.bf16 (!%p7569_p5), %v6369_v24, %v6366_v25  ;;  %v6272_v33 = vld [vmem:[%s15221_s7 + $0x78] sm:$0xff] (!%p7569_p5)  ;;  %v6299_v25 = vld [vmem:[%s15221_s7 + $0x150] sm:$0xff] (!%p7569_p5)  ;;  %v6302_v24 = vld [vmem:[%s15221_s7 + $0x168] sm:$0xff] (!%p7569_p5) }
 0x8ed   : > { %10480 = vmatprep.subr.bf16.mxu1 %v10479_v38  ;;  %v10497_v11 = vpack.c.bf16 (!%p7569_p5), %v6272_v33, %v6269_v29  ;;  %v6276_v38 = vld [vmem:[%s15221_s7 + $0x98] sm:$0xff] (!%p7569_p5)  ;;  %v6395_v29 = vld [vmem:[%s15221_s7 + $0x450] sm:$0xff] (!%p7569_p5)  ;;  %v6398_v33 = vld [vmem:[%s15221_s7 + $0x468] sm:$0xff] (!%p7569_p5) }
 0x8ee   : > { %v10499_v46 = vpack.c.bf16 (!%p7569_p5), %v6279_v40, %v6276_v38  ;;  %v6405_v38 = vld [vmem:[%s15221_s7 + $0x4a0] sm:$0xff] (!%p7569_p5)  ;;  %v10517_v40 = vpack.c.bf16 (!%p7569_p5), %v6302_v24, %v6299_v25 }
 0x8ef   : > { %9970 = vmatpush1.bf16.msra.mxu0 %v9969_v54  ;;  %v6275_v54 = vld [vmem:[%s15221_s7 + $0x90] sm:$0xff] (!%p7569_p5)  ;;  %v14252_v25 = vld [vmem:[%s15220_s6] sm:$0xff] (!%p7569_p5) }
 0x8f0   : > { %10482 = vmatpush1.bf16.msra.mxu1 %v10481_v16  ;;  %9972 = vmatprep.subr.bf16.mxu0 %v9971_v55  ;;  %v6278_v16 = vld [vmem:[%s15221_s7 + $0xa8] sm:$0xff] (!%p7569_p5)  ;;  %v10563_v55 = vpack.c.bf16 (!%p7569_p5), %v6375_v58, %v6372_v61  ;;  %v10581_v61 = vpack.c.bf16 (!%p7569_p5), %v6398_v33, %v6395_v29  ;;  %v6308_v58 = vld [vmem:[%s15221_s7 + $0x198] sm:$0xff] (!%p7569_p5)  ;;  %v6182_v24 = vrot.slane (!%p7569_p5), %v14252_v25, %v6181_v12 }
 0x8f1   : > { %10484 = vmatprep.subr.bf16.mxu1 %v10483_v43  ;;  %v6282_v43 = vld [vmem:[%s15221_s7 + $0xc8] sm:$0xff] (!%p7569_p5) }
 0x8f3   : > { %9974 = vmatpush1.bf16.msra.mxu0 %v9973_v59  ;;  %v6381_v59 = vld [vmem:[%s15221_s7 + $0x3e0] sm:$0xff] (!%p7569_p5) }
 0x8f4   : > { %10486 = vmatpush1.bf16.msra.mxu1 %v10485_v18  ;;  %10552 = vmatprep.subr.bf16.mxu0 (!%p7569_p5), %v10551_v7  ;;  %v10501_v18 = vpack.c.bf16 (!%p7569_p5), %v6278_v16, %v6275_v54  ;;  %v6386_v7 = vld [vmem:[%s15221_s7 + $0x408] sm:$0xff] (!%p7569_p5)  ;;  %v6401_v54 = vld [vmem:[%s15221_s7 + $0x480] sm:$0xff] (!%p7569_p5) }
 0x8f5   : > { %v10573_v8 = vpack.c.bf16 (!%p7569_p5), %v6386_v7, %v6383_v53  ;;  %v6416_v53 = vld [vmem:[%s15221_s7 + $0x4f8] sm:$0xff] (!%p7569_p5)  ;;  %v6327_v7 = vld [vmem:[%s15221_s7 + $0x230] sm:$0xff] (!%p7569_p5) }
 0x8f6   : > { %5549 = vmatmul.mubr.f32.vlgmr.msra.gmra.mrb[2].mxu0 %v12754_v39 }
 0x8f7   : > { %6117 = vmatmul.mubr.f32.vlgmr.msra.gmra.mrb[2].mxu1 %v12754_v39  ;;  %v6258_v39 = vld [vmem:[%s15221_s7 + $0x8] sm:$0xff] (!%p7569_p5)  ;;  %10554 = vmatpush1.bf16.msra.mxu0 (!%p7569_p5), %v10553_v42 }
 0x8f8   : > { %v10487_v45 = vpack.c.bf16 (!%p7569_p5), %v6261_v49, %v6258_v39  ;;  %10556 = vmatprep.subr.bf16.mxu0 (!%p7569_p5), %v10555_v63  ;;  %v6389_v63 = vld [vmem:[%s15221_s7 + $0x420] sm:$0xff] (!%p7569_p5) }
 0x8fa   : > { %10488 = vmatprep.subr.bf16.mxu1 (!%p7569_p5), %v10487_v45  ;;  %v6287_v45 = vld [vmem:[%s15221_s7 + $0xf0] sm:$0xff] (!%p7569_p5) }
 0x8fb   : > { %10490 = vmatpush1.bf16.msra.mxu1 (!%p7569_p5), %v10489_v9  ;;  %10558 = vmatpush1.bf16.msra.mxu0 (!%p7569_p5), %v10557_v15  ;;  %v6294_v9 = vld [vmem:[%s15221_s7 + $0x128] sm:$0xff] (!%p7569_p5)  ;;  %v10509_v42 = vpack.c.bf16 (!%p7569_p5), %v6290_v51, %v6287_v45  ;;  %v10577_v15 = vpack.c.bf16 (!%p7569_p5), %v6392_v56, %v6389_v63  ;;  %v6413_v45 = vld [vmem:[%s15221_s7 + $0x4e0] sm:$0xff] (!%p7569_p5)  ;;  %v6419_v56 = vld [vmem:[%s15221_s7 + $0x510] sm:$0xff] (!%p7569_p5) }
 0x8fc   : > { %10492 = vmatprep.subr.bf16.mxu1 (!%p7569_p5), %v10491_v28  ;;  %10560 = vmatprep.subr.bf16.mxu0 (!%p7569_p5), %v10559_v5  ;;  %v10511_v21 = vpack.c.bf16 (!%p7569_p5), %v6297_v10, %v6294_v9  ;;  %v6296_v28 = vld [vmem:[%s15221_s7 + $0x138] sm:$0xff] (!%p7569_p5)  ;;  %v10579_v5 = vpack.c.bf16 (!%p7569_p5), %v6399_v32, %v6396_v31  ;;  %v6423_v10 = vld [vmem:[%s15221_s7 + $0x530] sm:$0xff] (!%p7569_p5)  ;;  %v10593_v63 = vpack.c.bf16 (!%p7569_p5), %v6416_v53, %v6413_v45  ;;  %v6330_v31 = vld [vmem:[%s15221_s7 + $0x248] sm:$0xff] (!%p7569_p5) }
 0x8fd   : > { %v10513_v23 = vpack.c.bf16 (!%p7569_p5), %v6296_v28, %v6293_v27  ;;  %v6420_v9 = vld [vmem:[%s15221_s7 + $0x518] sm:$0xff] (!%p7569_p5)  ;;  %v6189_v27 = vsub.s32 (!%p7569_p5), 2, %v11822_v3  ;;  %v6193_v28 = vsub.s32 (!%p7569_p5), 3, %v11822_v3  ;;  %v6333_v32 = vld [vmem:[%s15221_s7 + $0x260] sm:$0xff] (!%p7569_p5) }
 0x8fe   : > { %v6341_v45 = vld [vmem:[%s15221_s7 + $0x2a0] sm:$0xff] (!%p7569_p5) }
 0x8ff   : > { %10494 = vmatpush1.bf16.msra.mxu1 (!%p7569_p5), %v10493_v13  ;;  %10562 = vmatpush1.bf16.msra.mxu0 (!%p7569_p5), %v10561_v41  ;;  %v6303_v13 = vld [vmem:[%s15221_s7 + $0x170] sm:$0xff] (!%p7569_p5)  ;;  %v10519_v41 = vpack.c.bf16 (!%p7569_p5), %v6309_v36, %v6306_v34  ;;  %v6194_v33 = vrot.slane (!%p7569_p5), %v14252_v25, %v6193_v28  ;;  %v10535_v36 = vpack.c.bf16 (!%p7569_p5), %v6333_v32, %v6330_v31  ;;  %v6437_v53 = vld [vmem:[%s15221_s7 + $0x5a0] sm:$0xff] (!%p7569_p5) }
 0x900   : > { %10496 = vmatprep.subr.bf16.mxu1 (!%p7569_p5), %v10495_v19  ;;  %10564 = vmatprep.subr.bf16.mxu0 (!%p7569_p5), %v10563_v55  ;;  %v10515_v19 = vpack.c.bf16 (!%p7569_p5), %v6303_v13, %v6300_v62  ;;  %v6404_v55 = vld [vmem:[%s15221_s7 + $0x498] sm:$0xff] (!%p7569_p5)  ;;  %v10595_v62 = vpack.c.bf16 (!%p7569_p5), %v6423_v10, %v6420_v9  ;;  %v6422_v13 = vld [vmem:[%s15221_s7 + $0x528] sm:$0xff] (!%p7569_p5)  ;;  %v6351_v10 = vld [vmem:[%s15221_s7 + $0x2f0] sm:$0xff] (!%p7569_p5) }
 0x901   : > { %v10597_v34 = vpack.c.bf16 (!%p7569_p5), %v6422_v13, %v6419_v56  ;;  %v6348_v9 = vld [vmem:[%s15221_s7 + $0x2d8] sm:$0xff] (!%p7569_p5)  ;;  %v6350_v13 = vld [vmem:[%s15221_s7 + $0x2e8] sm:$0xff] (!%p7569_p5)  ;;  %v6443_v31 = vld [vmem:[%s15221_s7 + $0x5d0] sm:$0xff] (!%p7569_p5) }
 0x902   : > { %v10547_v56 = vpack.c.bf16 (!%p7569_p5), %v6351_v10, %v6348_v9  ;;  %v6465_v9 = vld [vmem:[%s15221_s7 + $0x680] sm:$0xff] (!%p7569_p5) }
 0x903   : > { %10498 = vmatpush1.bf16.msra.mxu1 (!%p7569_p5), %v10497_v11  ;;  %v6402_v11 = vld [vmem:[%s15221_s7 + $0x488] sm:$0xff] (!%p7569_p5) }
 0x904   : > { %10500 = vmatprep.subr.bf16.mxu1 (!%p7569_p5), %v10499_v46  ;;  %v6305_v46 = vld [vmem:[%s15221_s7 + $0x180] sm:$0xff] (!%p7569_p5)  ;;  %v10583_v16 = vpack.c.bf16 (!%p7569_p5), %v6405_v38, %v6402_v11  ;;  %v6332_v38 = vld [vmem:[%s15221_s7 + $0x258] sm:$0xff] (!%p7569_p5) }
 0x905   : > { %v6329_v11 = vld [vmem:[%s15221_s7 + $0x240] sm:$0xff] (!%p7569_p5) }
 0x907   : > { %10502 = vmatpush1.bf16.msra.mxu1 (!%p7569_p5), %v10501_v18 }
 0x9c9   : > { %v5550_v60 = vpop.f32.mrb[2].mxu0 }
 0x9ca   : > { %v6118_v4 = vpop.f32.mrb[2].mxu1  ;;  %v5552_v22 = vpop.f32.mrb[3].mxu0 }
 0x9cb   : > { %v6148_v0 = vcombine.low %v5550_v60, %v5552_v22  ;;  %v6120_v30 = vpop.f32.mrb[3].mxu1  ;;  %v10565_v60 = vpack.c.bf16 (!%p7569_p5), %v6374_v1, %v6371_v20  ;;  %v6281_v22 = vld [vmem:[%s15221_s7 + $0xc0] sm:$0xff] (!%p7569_p5)  ;;  %v6312_v20 = vld [vmem:[%s15221_s7 + $0x1b8] sm:$0xff] (!%p7569_p5)  ;;  %v6315_v1 = vld [vmem:[%s15221_s7 + $0x1d0] sm:$0xff] (!%p7569_p5) }
 0x9cc   : > { %v6149_v26 = vcombine.low %v6118_v4, %v6120_v30  ;;  %v10503_v4 = vpack.c.bf16 (!%p7569_p5), %v6285_v2, %v6282_v43  ;;  %v6377_v30 = vld [vmem:[%s15221_s7 + $0x3c0] sm:$0xff] (!%p7569_p5)  ;;  %v6408_v43 = vld [vmem:[%s15221_s7 + $0x4b8] sm:$0xff] (!%p7569_p5)  ;;  %v6411_v2 = vld [vmem:[%s15221_s7 + $0x4d0] sm:$0xff] (!%p7569_p5)  ;;  %v10523_v18 = vpack.c.bf16 (!%p7569_p5), %v6315_v1, %v6312_v20  ;;  %v10537_v1 = vpack.c.bf16 (!%p7569_p5), %v6332_v38, %v6329_v11 }
 0x9cd   : > { %v6156_v44 = vrot.slane %v6148_v0, %v11834_v37  ;;  %v6284_v0 = vld [vmem:[%s15221_s7 + $0xd8] sm:$0xff] (!%p7569_p5)  ;;  %10566 = vmatpush1.bf16.msra.mxu0 (!%p7569_p5), %v10565_v60  ;;  %v6311_v60 = vld [vmem:[%s15221_s7 + $0x1b0] sm:$0xff] (!%p7569_p5)  ;;  %v6197_v11 = vsub.s32 (!%p7569_p5), 4, %v11822_v3  ;;  %v6201_v38 = vsub.s32 (!%p7569_p5), 5, %v11822_v3 }
 0x9ce   : > { %v6163_v35 = vrot.slane %v6149_v26, %v11834_v37  ;;  %6174 = sbr.rel (%p7569_p5) target bundleno = 2932 (0xb74), region = 64  ;;  %v10567_v26 = vpack.c.bf16 (!%p7569_p5), %v6381_v59, %v6378_v57  ;;  %v10505_v39 = vpack.c.bf16 (!%p7569_p5), %v6284_v0, %v6281_v22  ;;  %10504 = vmatprep.subr.bf16.mxu1 (!%p7569_p5), %v10503_v4  ;;  %v10521_v57 = vpack.c.bf16 (!%p7569_p5), %v6308_v58, %v6305_v46  ;;  %v6314_v4 = vld [vmem:[%s15221_s7 + $0x1c8] sm:$0xff] (!%p7569_p5)  ;;  %v6407_v22 = vld [vmem:[%s15221_s7 + $0x4b0] sm:$0xff] (!%p7569_p5)  ;;  %v6336_v46 = vld [vmem:[%s15221_s7 + $0x278] sm:$0xff] (!%p7569_p5) }
 0x9cf   : > { %v10585_v59 = vpack.c.bf16 (!%p7569_p5), %v6404_v55, %v6401_v54  ;;  %v10587_v0 = vpack.c.bf16 (!%p7569_p5), %v6411_v2, %v6408_v43  ;;  %v6339_v58 = vld [vmem:[%s15221_s7 + $0x290] sm:$0xff] (!%p7569_p5)  ;;  %v6432_v55 = vld [vmem:[%s15221_s7 + $0x578] sm:$0xff] (!%p7569_p5) }
 0x9d0   : > { %v6164_v17 = vcombine.low %v6156_v44, %v6163_v35  ;;  %v6380_v44 = vld [vmem:[%s15221_s7 + $0x3d8] sm:$0xff] (!%p7569_p5)  ;;  %10568 = vmatprep.subr.bf16.mxu0 (!%p7569_p5), %v10567_v26  ;;  %10506 = vmatpush1.bf16.msra.mxu1 (!%p7569_p5), %v10505_v39  ;;  %v6318_v26 = vld [vmem:[%s15221_s7 + $0x1e8] sm:$0xff] (!%p7569_p5)  ;;  %v6435_v20 = vld [vmem:[%s15221_s7 + $0x590] sm:$0xff] (!%p7569_p5) }
 0x9d1   : > { %v6288_v35 = vld [vmem:[%s15221_s7 + $0xf8] sm:$0xff] (!%p7569_p5)  ;;  %v10569_v49 = vpack.c.bf16 (!%p7569_p5), %v6380_v44, %v6377_v30  ;;  %v6410_v30 = vld [vmem:[%s15221_s7 + $0x4c8] sm:$0xff] (!%p7569_p5)  ;;  %v6321_v44 = vld [vmem:[%s15221_s7 + $0x200] sm:$0xff] (!%p7569_p5) }
 0x9d2   : > { %v6168_v47 = vadd.f32 %v6164_v17, %v1706_v50  ;;  %v6291_v50 = vld [vmem:[%s15221_s7 + $0x110] sm:$0xff] (!%p7569_p5)  ;;  %v6384_v17 = vld [vmem:[%s15221_s7 + $0x3f8] sm:$0xff] (!%p7569_p5)  ;;  %v10527_v39 = vpack.c.bf16 (!%p7569_p5), %v6321_v44, %v6318_v26  ;;  %v6342_v26 = vld [vmem:[%s15221_s7 + $0x2a8] sm:$0xff] (!%p7569_p5) }
 0x9d3   : > { %v10507_v48 = vpack.c.bf16 (!%p7569_p5), %v6291_v50, %v6288_v35  ;;  %10570 = vmatpush1.bf16.msra.mxu0 (!%p7569_p5), %v10569_v49  ;;  %v6414_v35 = vld [vmem:[%s15221_s7 + $0x4e8] sm:$0xff] (!%p7569_p5)  ;;  %v6417_v50 = vld [vmem:[%s15221_s7 + $0x500] sm:$0xff] (!%p7569_p5)  ;;  %v6335_v43 = vld [vmem:[%s15221_s7 + $0x270] sm:$0xff] (!%p7569_p5) }
 0x9d4   : > { %6170 = vst [vmem:[#allocation3 + $0x8] sm:$0xff] %v6168_v47  ;;  %v6387_v47 = vld [vmem:[%s15221_s7 + $0x410] sm:$0xff] (!%p7569_p5)  ;;  %v6317_v49 = vld [vmem:[%s15221_s7 + $0x1e0] sm:$0xff] (!%p7569_p5)  ;;  %v10591_v51 = vpack.c.bf16 (!%p7569_p5), %v6417_v50, %v6414_v35  ;;  %v6438_v50 = vld [vmem:[%s15221_s7 + $0x5a8] sm:$0xff] (!%p7569_p5) }
 0x9d5   : > { %v10571_v6 = vpack.c.bf16 %v6387_v47, %v6384_v17  ;;  %10508 = vmatprep.subr.bf16.mxu1 %v10507_v48  ;;  %v10525_v17 = vpack.c.bf16 %v6314_v4, %v6311_v60  ;;  %v10589_v47 = vpack.c.bf16 %v6410_v30, %v6407_v22  ;;  %v6320_v48 = vld [vmem:[%s15221_s7 + $0x1f8] sm:$0xff]  ;;  %v6338_v60 = vld [vmem:[%s15221_s7 + $0x288] sm:$0xff]  ;;  %v6431_v4 = vld [vmem:[%s15221_s7 + $0x570] sm:$0xff] }
 0x9d6   : > { %10510 = vmatpush1.bf16.msra.mxu1 %v10509_v42  ;;  %v10529_v14 = vpack.c.bf16 %v6320_v48, %v6317_v49  ;;  %v6323_v42 = vld [vmem:[%s15221_s7 + $0x210] sm:$0xff]  ;;  %v6175_v22 = vld [vmem:[#allocation3] sm:$0xff]  ;;  %v6434_v30 = vld [vmem:[%s15221_s7 + $0x588] sm:$0xff] }
 0x9d7   : > { %10572 = vmatprep.subr.bf16.mxu0 %v10571_v6  ;;  %10512 = vmatprep.subr.bf16.mxu1 %v10511_v21  ;;  %v6324_v6 = vld [vmem:[%s15221_s7 + $0x218] sm:$0xff]  ;;  %v6185_v21 = vsub.s32 1, %v11822_v3  ;;  %v6345_v44 = vld [vmem:[%s15221_s7 + $0x2c0] sm:$0xff]  ;;  %v10605_v49 = vpack.c.bf16 %v6434_v30, %v6431_v4 }
 0x9d8   : > { %10574 = vmatpush1.bf16.msra.mxu0 %v10573_v8  ;;  %v6326_v8 = vld [vmem:[%s15221_s7 + $0x228] sm:$0xff]  ;;  %v10543_v48 = vpack.c.bf16 %v6345_v44, %v6342_v26  ;;  %v6456_v30 = vld [vmem:[%s15221_s7 + $0x638] sm:$0xff]  ;;  %v6265_v44 = vld [vmem:[%s15221_s7 + $0x40] sm:$0xff] }
 0x9d9   : > { %10576 = vmatprep.subr.bf16.mxu0 %v10575_v52  ;;  %v10531_v52 = vpack.c.bf16 %v6327_v7, %v6324_v6  ;;  %v6186_v29 = vrot.slane %v14252_v25, %v6185_v21  ;;  %v6440_v7 = vld [vmem:[%s15221_s7 + $0x5b8] sm:$0xff] }
 0x9da   : > { %10514 = vmatpush1.bf16.msra.mxu1 %v10513_v23  ;;  %v10533_v23 = vpack.c.bf16 %v6326_v8, %v6323_v42  ;;  %v6444_v42 = vld [vmem:[%s15221_s7 + $0x5d8] sm:$0xff]  ;;  %v6447_v8 = vld [vmem:[%s15221_s7 + $0x5f0] sm:$0xff] }
 0x9db   : > { %10516 = vmatprep.subr.bf16.mxu1 %v10515_v19  ;;  %v6429_v19 = vld [vmem:[%s15221_s7 + $0x560] sm:$0xff]  ;;  %v6211_v54 = vcombine.low %v6182_v24, %v6186_v29  ;;  %v10611_v32 = vpack.c.bf16 %v6447_v8, %v6444_v42  ;;  %v6450_v24 = vld [vmem:[%s15221_s7 + $0x608] sm:$0xff] }
 0x9dc   : > { %10578 = vmatpush1.bf16.msra.mxu0 %v10577_v15  ;;  %v6426_v15 = vld [vmem:[%s15221_s7 + $0x548] sm:$0xff]  ;;  %v6453_v29 = vld [vmem:[%s15221_s7 + $0x620] sm:$0xff] }
 0x9dd   : > { %10580 = vmatprep.subr.bf16.mxu0 %v10579_v5  ;;  %v6190_v5 = vrot.slane %v14252_v25, %v6189_v27  ;;  %v6219_v2 = vrot.slane %v6211_v54, %v11834_v37  ;;  %v6262_v54 = vld [vmem:[%s15221_s7 + $0x28] sm:$0xff] }
 0x9de   : > { %10518 = vmatpush1.bf16.msra.mxu1 %v10517_v40  ;;  %v6425_v40 = vld [vmem:[%s15221_s7 + $0x540] sm:$0xff]  ;;  %v6274_v42 = vld [vmem:[%s15221_s7 + $0x88] sm:$0xff] }
 0x9df   : > { %10520 = vmatprep.subr.bf16.mxu1 %v10519_v41  ;;  %v6428_v41 = vld [vmem:[%s15221_s7 + $0x558] sm:$0xff] }
 0x9e0   : > { %10582 = vmatpush1.bf16.msra.mxu0 %v10581_v61  ;;  %v10599_v61 = vpack.c.bf16 %v6429_v19, %v6426_v15  ;;  %v6307_v15 = vld [vmem:[%s15221_s7 + $0x190] sm:$0xff]  ;;  %v6310_v19 = vld [vmem:[%s15221_s7 + $0x1a8] sm:$0xff] }
 0x9e1   : > { %10584 = vmatprep.subr.bf16.mxu0 %v10583_v16  ;;  %v6212_v16 = vcombine.low %v6190_v5, %v6194_v33 }
 0x9e2   : > { %10522 = vmatpush1.bf16.msra.mxu1 %v10521_v57 }
 0x9e3   : > { %10524 = vmatprep.subr.bf16.mxu1 %v10523_v18  ;;  %v6226_v57 = vrot.slane %v6212_v16, %v11834_v37  ;;  %v10539_v18 = vpack.c.bf16 %v6339_v58, %v6336_v46  ;;  %v6259_v58 = vld [vmem:[%s15221_s7 + $0x10] sm:$0xff]  ;;  %v6198_v16 = vrot.slane %v14252_v25, %v6197_v11 }
 0x9e4   : > { %10586 = vmatpush1.bf16.msra.mxu0 %v10585_v59  ;;  %v10601_v59 = vpack.c.bf16 %v6428_v41, %v6425_v40  ;;  %v6205_v40 = vsub.s32 6, %v11822_v3 }
 0x9e5   : > { %10588 = vmatprep.subr.bf16.mxu0 %v10587_v0  ;;  %v10603_v0 = vpack.c.bf16 %v6435_v20, %v6432_v55  ;;  %v6227_v35 = vcombine.low %v6219_v2, %v6226_v57  ;;  %v6202_v55 = vrot.slane %v14252_v25, %v6201_v38  ;;  %v6316_v2 = vld [vmem:[%s15221_s7 + $0x1d8] sm:$0xff]  ;;  %v6467_v38 = vld [vmem:[%s15221_s7 + $0x690] sm:$0xff] }
 0x9e6   : > { %10526 = vmatpush1.bf16.msra.mxu1 %v10525_v17  ;;  %v6441_v17 = vld [vmem:[%s15221_s7 + $0x5c0] sm:$0xff]  ;;  %v6206_v57 = vrot.slane %v14252_v25, %v6205_v40  ;;  %v6470_v40 = vld [vmem:[%s15221_s7 + $0x6a8] sm:$0xff] }
 0x9e7   : > { %10528 = vmatprep.subr.bf16.mxu1 %v10527_v39  ;;  %v6247_v39 = vadd.f32 %v6227_v35, %v6175_v22  ;;  %v10607_v6 = vpack.c.bf16 %v6441_v17, %v6438_v50  ;;  %v6268_v35 = vld [vmem:[%s15221_s7 + $0x58] sm:$0xff] }
 0x9e8   : > { %10590 = vmatpush1.bf16.msra.mxu0 %v10589_v47  ;;  %v10541_v47 = vpack.c.bf16 %v6338_v60, %v6335_v43  ;;  %v6313_v43 = vld [vmem:[%s15221_s7 + $0x1c0] sm:$0xff]  ;;  %v6452_v60 = vld [vmem:[%s15221_s7 + $0x618] sm:$0xff] }
 0x9e9   : > { %10592 = vmatprep.subr.bf16.mxu0 %v10591_v51  ;;  %v6344_v51 = vld [vmem:[%s15221_s7 + $0x2b8] sm:$0xff]  ;;  %v10747_v26 = vpack.c.bf16 %v6316_v2, %v6313_v43  ;;  %v6337_v43 = vld [vmem:[%s15221_s7 + $0x280] sm:$0xff] }
 0x9ea   : > { %10530 = vmatpush1.bf16.msra.mxu1 %v10529_v14  ;;  %v6249_v14 = vand.u32 2147483647, %v6247_v39  ;;  %v10545_v28 = vpack.c.bf16 %v6344_v51, %v6341_v45  ;;  %v6455_v51 = vld [vmem:[%s15221_s7 + $0x630] sm:$0xff]  ;;  %v6340_v2 = vld [vmem:[%s15221_s7 + $0x298] sm:$0xff] }
 0x9eb   : > { %10532 = vmatprep.subr.bf16.mxu1 %v10531_v52  ;;  %v10609_v52 = vpack.c.bf16 %v6440_v7, %v6437_v53  ;;  %v6458_v53 = vld [vmem:[%s15221_s7 + $0x648] sm:$0xff] }
 0x9ec   : > { %10594 = vmatpush1.bf16.msra.mxu0 %v10593_v63  ;;  %v6251_v63 = vadd.f32 1.0, %v6249_v14  ;;  %v6462_v7 = vld [vmem:[%s15221_s7 + $0x668] sm:$0xff]  ;;  %v6271_v14 = vld [vmem:[%s15221_s7 + $0x70] sm:$0xff]  ;;  %v10621_v8 = vpack.c.bf16 %v6458_v53, %v6455_v51 }
 0x9ed   : > { %10596 = vmatprep.subr.bf16.mxu0 %v10595_v62  ;;  %v6347_v62 = vld [vmem:[%s15221_s7 + $0x2d0] sm:$0xff]  ;;  %v6482_v51 = vld [vmem:[%s15221_s7 + $0x708] sm:$0xff] }
 0x9ee   : > { %10534 = vmatpush1.bf16.msra.mxu1 %v10533_v23  ;;  %v6446_v23 = vld [vmem:[%s15221_s7 + $0x5e8] sm:$0xff]  ;;  %10994 = vrcp.f32 %v6251_v63  ;;  %v10549_v5 = vpack.c.bf16 %v6350_v13, %v6347_v62  ;;  %v6328_v63 = vld [vmem:[%s15221_s7 + $0x238] sm:$0xff]  ;;  %v10623_v62 = vpack.c.bf16 %v6465_v9, %v6462_v7  ;;  %v6461_v13 = vld [vmem:[%s15221_s7 + $0x660] sm:$0xff] }
 0x9ef   : > { %10536 = vmatprep.subr.bf16.mxu1 %v10535_v36  ;;  %v10613_v33 = vpack.c.bf16 %v6446_v23, %v6443_v31  ;;  %v10615_v36 = vpack.c.bf16 %v6453_v29, %v6450_v24  ;;  %v6464_v31 = vld [vmem:[%s15221_s7 + $0x678] sm:$0xff]  ;;  %v6277_v24 = vld [vmem:[%s15221_s7 + $0xa0] sm:$0xff] }
 0x9f0   : > { %10598 = vmatpush1.bf16.msra.mxu0 %v10597_v34  ;;  %v10743_v34 = vpack.c.bf16 %v6310_v19, %v6307_v15  ;;  %v6468_v23 = vld [vmem:[%s15221_s7 + $0x698] sm:$0xff]  ;;  %v6471_v15 = vld [vmem:[%s15221_s7 + $0x6b0] sm:$0xff]  ;;  %v6489_v7 = vld [vmem:[%s15221_s7 + $0x740] sm:$0xff] }
 0x9f1   : > { %10600 = vmatprep.subr.bf16.mxu0 %v10599_v61  ;;  %v6209_v61 = vsub.s32 7, %v11822_v3  ;;  %v6280_v29 = vld [vmem:[%s15221_s7 + $0xb8] sm:$0xff]  ;;  %v10627_v11 = vpack.c.bf16 %v6471_v15, %v6468_v23  ;;  %v6301_v23 = vld [vmem:[%s15221_s7 + $0x160] sm:$0xff] }
 0x9f2   : > { %10538 = vmatpush1.bf16.msra.mxu1 %v10537_v1  ;;  %v6304_v15 = vld [vmem:[%s15221_s7 + $0x178] sm:$0xff] }
 0x9f3   : > { %10540 = vmatprep.subr.bf16.mxu1 %v10539_v18  ;;  %v6449_v18 = vld [vmem:[%s15221_s7 + $0x600] sm:$0xff] }
 0x9f4   : > { %10602 = vmatpush1.bf16.msra.mxu0 %v10601_v59  ;;  %v6210_v59 = vrot.slane %v14252_v25, %v6209_v61  ;;  %v6459_v25 = vld [vmem:[%s15221_s7 + $0x650] sm:$0xff]  ;;  %v10617_v17 = vpack.c.bf16 %v6452_v60, %v6449_v18  ;;  %v10757_v61 = vpack.c.bf16 %v6280_v29, %v6277_v24  ;;  %v6473_v18 = vld [vmem:[%s15221_s7 + $0x6c0] sm:$0xff]  ;;  %v6476_v60 = vld [vmem:[%s15221_s7 + $0x6d8] sm:$0xff] }
 0x9f5   : > { %10604 = vmatprep.subr.bf16.mxu0 %v10603_v0  ;;  %v10745_v0 = vpack.c.bf16 %v6262_v54, %v6259_v58  ;;  %v10619_v45 = vpack.c.bf16 %v6459_v25, %v6456_v30  ;;  %v6283_v54 = vld [vmem:[%s15221_s7 + $0xd0] sm:$0xff]  ;;  %v6406_v29 = vld [vmem:[%s15221_s7 + $0x4a8] sm:$0xff] }
 0x9f6   : > { %10542 = vmatpush1.bf16.msra.mxu1 %v10541_v47  ;;  %v6319_v47 = vld [vmem:[%s15221_s7 + $0x1f0] sm:$0xff] }
 0x9f7   : > { %10544 = vmatprep.subr.bf16.mxu1 %v10543_v48  ;;  %v6229_v48 = vcombine.low %v6206_v57, %v6210_v59  ;;  %v6483_v30 = vld [vmem:[%s15221_s7 + $0x710] sm:$0xff] }
 0x9f8   : > { %10606 = vmatpush1.bf16.msra.mxu0 %v10605_v49  ;;  %v10995_v41 = vpop.eup %10994  ;;  %v6228_v49 = vcombine.low %v6198_v16, %v6202_v55  ;;  %v6286_v16 = vld [vmem:[%s15221_s7 + $0xe8] sm:$0xff]  ;;  %v6403_v24 = vld [vmem:[%s15221_s7 + $0x490] sm:$0xff] }
 0x9f9   : > { %10608 = vmatprep.subr.bf16.mxu0 %v10607_v6  ;;  %v6254_v46 = vmul.f32 %v10995_v41, %v6247_v39  ;;  %v6322_v39 = vld [vmem:[%s15221_s7 + $0x208] sm:$0xff]  ;;  %v10749_v6 = vpack.c.bf16 %v6268_v35, %v6265_v44  ;;  %v6289_v44 = vld [vmem:[%s15221_s7 + $0x100] sm:$0xff]  ;;  %v6292_v35 = vld [vmem:[%s15221_s7 + $0x118] sm:$0xff] }
 0x9fa   : > { %10546 = vmatpush1.bf16.msra.mxu1 %v10545_v28  ;;  %v10751_v10 = vpack.c.bf16 %v6322_v39, %v6319_v47  ;;  %v6325_v28 = vld [vmem:[%s15221_s7 + $0x220] sm:$0xff]  ;;  %v6474_v41 = vld [vmem:[%s15221_s7 + $0x6c8] sm:$0xff]  ;;  %v6343_v47 = vld [vmem:[%s15221_s7 + $0x2b0] sm:$0xff]  ;;  %v10765_v53 = vpack.c.bf16 %v6292_v35, %v6289_v44 }
 0x9fb   : > { %10548 = vmatprep.subr.bf16.mxu1 %v10547_v56  ;;  %v14375_v20 = vrot.slane %v6254_v46, %v11834_v37  ;;  %v6660_v1 = vcombine.high %v6254_v46, %v6254_v46  ;;  %v6243_v56 = vrot.slane %v6229_v48, %v11834_v37  ;;  %v10755_v19 = vpack.c.bf16 %v6328_v63, %v6325_v28  ;;  %v6477_v46 = vld [vmem:[%s15221_s7 + $0x6e0] sm:$0xff]  ;;  %v6176_v55 = vld [vmem:[#allocation3 + $0x8] sm:$0xff]  ;;  %v6352_v28 = vld [vmem:[%s15221_s7 + $0x2f8] sm:$0xff] }
 0x9fc   : > { %10610 = vmatpush1.bf16.msra.mxu0 %v10609_v52  ;;  %v6236_v52 = vrot.slane %v6228_v49, %v11834_v37  ;;  %v10631_v59 = vpack.c.bf16 %v6477_v46, %v6474_v41  ;;  %v6346_v39 = vld [vmem:[%s15221_s7 + $0x2c8] sm:$0xff] }
 0x9fd   : > { %10612 = vmatprep.subr.bf16.mxu0 %v10611_v32  ;;  %v6675_v4 = vcombine.high %v14375_v20, %v14375_v20  ;;  %v14394_v22 = vrot.slane %v6660_v1, %v11834_v37  ;;  %v10753_v32 = vpack.c.bf16 %v6274_v42, %v6271_v14  ;;  %v10629_v1 = vpack.c.bf16 %v6470_v40, %v6467_v38  ;;  %v6298_v14 = vld [vmem:[%s15221_s7 + $0x148] sm:$0xff]  ;;  %v6501_v38 = vld [vmem:[%s15221_s7 + $0x7a0] sm:$0xff] }
 0x9fe   : > { %10550 = vmatpush1.bf16.msra.mxu1 %v10549_v5  ;;  %v10625_v5 = vpack.c.bf16 %v6464_v31, %v6461_v13  ;;  %v10767_v9 = vpack.c.bf16 %v6346_v39, %v6343_v47  ;;  %v6492_v13 = vld [vmem:[%s15221_s7 + $0x758] sm:$0xff]  ;;  %v6495_v31 = vld [vmem:[%s15221_s7 + $0x770] sm:$0xff]  ;;  %v10775_v40 = vpack.c.bf16 %v6406_v29, %v6403_v24  ;;  %v6358_v41 = vld [vmem:[%s15221_s7 + $0x328] sm:$0xff] }
 0x9ff   : > { %10744 = vmatprep.subr.bf16.mxu1 %v10743_v34  ;;  %6766 = vmatprep.mubr.f32.mxu1 %v6675_v4  ;;  %v14410_v50 = vcombine.high %v14394_v22, %v14394_v22  ;;  %v6334_v34 = vld [vmem:[%s15221_s7 + $0x268] sm:$0xff]  ;;  %v6525_v29 = vld [vmem:[%s15221_s7 + $0x860] sm:$0xff] }
 0xa00   : > { %10614 = vmatpush1.bf16.msra.mxu0 %v10613_v33  ;;  %v6331_v33 = vld [vmem:[%s15221_s7 + $0x250] sm:$0xff]  ;;  %v6418_v44 = vld [vmem:[%s15221_s7 + $0x508] sm:$0xff] }
 0xa01   : > { %10616 = vmatprep.subr.bf16.mxu0 %v10615_v36  ;;  %6767 = vmatmul.mubr.f32.vlgmr.msra.gmra.mrb[0].mxu1 %v14375_v20  ;;  %v6244_v36 = vcombine.low %v6236_v52, %v6243_v56  ;;  %v10759_v58 = vpack.c.bf16 %v6334_v34, %v6331_v33  ;;  %v6485_v52 = vld [vmem:[%s15221_s7 + $0x720] sm:$0xff]  ;;  %v6488_v56 = vld [vmem:[%s15221_s7 + $0x738] sm:$0xff]  ;;  %v6491_v33 = vld [vmem:[%s15221_s7 + $0x750] sm:$0xff] }
 0xa02   : > { %6837 = vmatprep.mubr.f32.mxu0 %v14410_v50  ;;  %10746 = vmatpush3.bf16.msra.mxu1 %v10745_v0  ;;  %v6480_v0 = vld [vmem:[%s15221_s7 + $0x6f8] sm:$0xff]  ;;  %v6494_v34 = vld [vmem:[%s15221_s7 + $0x768] sm:$0xff] }
 0xa03   : > { %6838 = vmatmul.mubr.f32.vlgmr.msra.gmra.mrb[0].mxu0 %v14394_v22  ;;  %10748 = vmatprep.subr.bf16.mxu1 %v10747_v26  ;;  %v14495_v57 = vadd.f32 %v6244_v36, %v6176_v55  ;;  %v10763_v26 = vpack.c.bf16 %v6340_v2, %v6337_v43  ;;  %v10635_v48 = vpack.c.bf16 %v6483_v30, %v6480_v0  ;;  %v6500_v43 = vld [vmem:[%s15221_s7 + $0x798] sm:$0xff]  ;;  %v6361_v0 = vld [vmem:[%s15221_s7 + $0x340] sm:$0xff]  ;;  %v6506_v47 = vld [vmem:[%s15221_s7 + $0x7c8] sm:$0xff] }
 0xa04   : > { %10618 = vmatpush1.bf16.msra.mxu0 %v10617_v17  ;;  %7050 = vmatprep.mubr.f32.mxu1 %v6675_v4  ;;  %v10761_v4 = vpack.c.bf16 %v6286_v16, %v6283_v54  ;;  %v10633_v17 = vpack.c.bf16 %v6476_v60, %v6473_v18  ;;  %v10773_v36 = vpack.c.bf16 %v6304_v15, %v6301_v23  ;;  %v6409_v54 = vld [vmem:[%s15221_s7 + $0x4c0] sm:$0xff]  ;;  %v6412_v16 = vld [vmem:[%s15221_s7 + $0x4d8] sm:$0xff]  ;;  %v6507_v60 = vld [vmem:[%s15221_s7 + $0x7d0] sm:$0xff] }
 0xa05   : > { %10620 = vmatprep.subr.bf16.mxu0 %v10619_v45  ;;  %v6250_v25 = vand.u32 2147483647, %v14495_v57  ;;  %v6479_v45 = vld [vmem:[%s15221_s7 + $0x6f0] sm:$0xff]  ;;  %v6504_v18 = vld [vmem:[%s15221_s7 + $0x7b8] sm:$0xff]  ;;  %v6518_v15 = vld [vmem:[%s15221_s7 + $0x828] sm:$0xff] }
 0xa06   : > { %10750 = vmatpush3.bf16.msra.mxu1 %v10749_v6  ;;  %v6486_v6 = vld [vmem:[%s15221_s7 + $0x728] sm:$0xff]  ;;  %v10637_v42 = vpack.c.bf16 %v6482_v51, %v6479_v45  ;;  %v10651_v35 = vpack.c.bf16 %v6507_v60, %v6504_v18  ;;  %v6367_v51 = vld [vmem:[%s15221_s7 + $0x370] sm:$0xff] }
 0xa07   : > { %10752 = vmatprep.subr.bf16.mxu1 %v10751_v10  ;;  %v6252_v49 = vadd.f32 1.0, %v6250_v25  ;;  %v6295_v10 = vld [vmem:[%s15221_s7 + $0x130] sm:$0xff]  ;;  %v10639_v63 = vpack.c.bf16 %v6489_v7, %v6486_v6  ;;  %v6421_v7 = vld [vmem:[%s15221_s7 + $0x520] sm:$0xff]  ;;  %v6522_v24 = vld [vmem:[%s15221_s7 + $0x848] sm:$0xff] }
 0xa08   : > { %10622 = vmatpush1.bf16.msra.mxu0 %v10621_v8  ;;  %v6349_v8 = vld [vmem:[%s15221_s7 + $0x2e0] sm:$0xff]  ;;  %v6515_v23 = vld [vmem:[%s15221_s7 + $0x810] sm:$0xff]  ;;  %v6442_v18 = vld [vmem:[%s15221_s7 + $0x5c8] sm:$0xff] }
 0xa09   : > { %10624 = vmatprep.subr.bf16.mxu0 %v10623_v62  ;;  %10996 = vrcp.f32 %v6252_v49  ;;  %v10769_v62 = vpack.c.bf16 %v6298_v14, %v6295_v10  ;;  %v6509_v10 = vld [vmem:[%s15221_s7 + $0x7e0] sm:$0xff]  ;;  %v6512_v14 = vld [vmem:[%s15221_s7 + $0x7f8] sm:$0xff] }
 0xa0a   : > { %10754 = vmatpush3.bf16.msra.mxu1 %v10753_v32  ;;  %v10771_v32 = vpack.c.bf16 %v6352_v28, %v6349_v8  ;;  %v6516_v8 = vld [vmem:[%s15221_s7 + $0x818] sm:$0xff]  ;;  %v6519_v28 = vld [vmem:[%s15221_s7 + $0x830] sm:$0xff] }
 0xa0b   : > { %10756 = vmatprep.subr.bf16.mxu1 %v10755_v19  ;;  %v10641_v19 = vpack.c.bf16 %v6488_v56, %v6485_v52  ;;  %v6373_v52 = vld [vmem:[%s15221_s7 + $0x3a0] sm:$0xff]  ;;  %v6376_v56 = vld [vmem:[%s15221_s7 + $0x3b8] sm:$0xff] }
 0xa0c   : > { %10626 = vmatpush1.bf16.msra.mxu0 %v10625_v5  ;;  %v10643_v5 = vpack.c.bf16 %v6495_v31, %v6492_v13  ;;  %v6427_v13 = vld [vmem:[%s15221_s7 + $0x550] sm:$0xff]  ;;  %v6430_v31 = vld [vmem:[%s15221_s7 + $0x568] sm:$0xff] }
 0xa0d   : > { %10628 = vmatprep.subr.bf16.mxu0 %v10627_v11  ;;  %v6498_v11 = vld [vmem:[%s15221_s7 + $0x788] sm:$0xff] }
 0xa0e   : > { %10758 = vmatpush3.bf16.msra.mxu1 %v10757_v61  ;;  %v6355_v61 = vld [vmem:[%s15221_s7 + $0x310] sm:$0xff]  ;;  %v10647_v55 = vpack.c.bf16 %v6501_v38, %v6498_v11  ;;  %v6433_v11 = vld [vmem:[%s15221_s7 + $0x580] sm:$0xff]  ;;  %v6436_v38 = vld [vmem:[%s15221_s7 + $0x598] sm:$0xff] }
 0xa0f   : > { %10760 = vmatprep.subr.bf16.mxu1 %v10759_v58  ;;  %v10645_v58 = vpack.c.bf16 %v6494_v34, %v6491_v33  ;;  %v6379_v33 = vld [vmem:[%s15221_s7 + $0x3d0] sm:$0xff]  ;;  %v6382_v34 = vld [vmem:[%s15221_s7 + $0x3e8] sm:$0xff] }
 0xa10   : > { %10630 = vmatpush1.bf16.msra.mxu0 %v10629_v1  ;;  %v6497_v1 = vld [vmem:[%s15221_s7 + $0x780] sm:$0xff] }
 0xa11   : > { %10632 = vmatprep.subr.bf16.mxu0 %v10631_v59  ;;  %v10777_v59 = vpack.c.bf16 %v6358_v41, %v6355_v61  ;;  %v10649_v25 = vpack.c.bf16 %v6500_v43, %v6497_v1  ;;  %v6521_v61 = vld [vmem:[%s15221_s7 + $0x840] sm:$0xff]  ;;  %v6524_v41 = vld [vmem:[%s15221_s7 + $0x858] sm:$0xff] }
 0xa12   : > { %10762 = vmatpush3.bf16.msra.mxu1 %v10761_v4  ;;  %v10779_v4 = vpack.c.bf16 %v6412_v16, %v6409_v54  ;;  %v6531_v54 = vld [vmem:[%s15221_s7 + $0x890] sm:$0xff]  ;;  %v10795_v16 = vpack.c.bf16 %v6436_v38, %v6433_v11  ;;  %v6388_v1 = vld [vmem:[%s15221_s7 + $0x418] sm:$0xff]  ;;  %v10665_v43 = vpack.c.bf16 %v6524_v41, %v6521_v61  ;;  %v6457_v61 = vld [vmem:[%s15221_s7 + $0x640] sm:$0xff] }
 0xa13   : > { %10764 = vmatprep.subr.bf16.mxu1 %v10763_v26  ;;  %v10997_v46 = vpop.eup %10996  ;;  %v6415_v26 = vld [vmem:[%s15221_s7 + $0x4f0] sm:$0xff]  ;;  %v6552_v11 = vld [vmem:[%s15221_s7 + $0x938] sm:$0xff] }
 0xa14   : > { %10634 = vmatpush1.bf16.msra.mxu0 %v10633_v17  ;;  %v14601_v2 = vmul.f32 %v10997_v46, %v14495_v57  ;;  %v6364_v57 = vld [vmem:[%s15221_s7 + $0x358] sm:$0xff]  ;;  %v6503_v17 = vld [vmem:[%s15221_s7 + $0x7b0] sm:$0xff]  ;;  %v10783_v45 = vpack.c.bf16 %v6418_v44, %v6415_v26  ;;  %v10793_v46 = vpack.c.bf16 %v6382_v34, %v6379_v33  ;;  %v6537_v26 = vld [vmem:[%s15221_s7 + $0x8c0] sm:$0xff] }
 0xa15   : > { %10636 = vmatprep.subr.bf16.mxu0 %v10635_v48  ;;  %v10781_v49 = vpack.c.bf16 %v6364_v57, %v6361_v0  ;;  %v6510_v48 = vld [vmem:[%s15221_s7 + $0x7e8] sm:$0xff]  ;;  %v10653_v6 = vpack.c.bf16 %v6506_v47, %v6503_v17  ;;  %v6545_v33 = vld [vmem:[%s15221_s7 + $0x900] sm:$0xff]  ;;  %v6548_v34 = vld [vmem:[%s15221_s7 + $0x918] sm:$0xff] }
 0xa16   : > { %10766 = vmatpush3.bf16.msra.mxu1 %v10765_v53  ;;  %v14617_v30 = vrot.slane %v14601_v2, %v11834_v37  ;;  %v6370_v53 = vld [vmem:[%s15221_s7 + $0x388] sm:$0xff]  ;;  %v6555_v38 = vld [vmem:[%s15221_s7 + $0x950] sm:$0xff]  ;;  %v6460_v41 = vld [vmem:[%s15221_s7 + $0x658] sm:$0xff] }
 0xa17   : > { %10768 = vmatprep.subr.bf16.mxu1 %v10767_v9  ;;  %v6530_v0 = vld [vmem:[%s15221_s7 + $0x888] sm:$0xff] }
 0xa18   : > { %10638 = vmatpush1.bf16.msra.mxu0 %v10637_v42  ;;  %v14634_v39 = vcombine.high %v14617_v30, %v14617_v30  ;;  %v10785_v42 = vpack.c.bf16 %v6370_v53, %v6367_v51  ;;  %v6394_v17 = vld [vmem:[%s15221_s7 + $0x448] sm:$0xff]  ;;  %v6536_v51 = vld [vmem:[%s15221_s7 + $0x8b8] sm:$0xff] }
 0xa19   : > { %10640 = vmatprep.subr.bf16.mxu0 %v10639_v63 }
 0xa1a   : > { %10770 = vmatpush3.bf16.msra.mxu1 %v10769_v62  ;;  %6908 = vmatprep.mubr.f32.mxu0 %v14634_v39  ;;  %v10657_v62 = vpack.c.bf16 %v6512_v14, %v6509_v10  ;;  %v6400_v10 = vld [vmem:[%s15221_s7 + $0x478] sm:$0xff] }
 0xa1b   : > { %10772 = vmatprep.subr.bf16.mxu1 %v10771_v32  ;;  %v10659_v32 = vpack.c.bf16 %v6519_v28, %v6516_v8  ;;  %v6502_v8 = vld [vmem:[%s15221_s7 + $0x7a8] sm:$0xff]  ;;  %v6677_v28 = vcombine.high %v14601_v2, %v14601_v2  ;;  %v6549_v2 = vld [vmem:[%s15221_s7 + $0x920] sm:$0xff] }
 0xa1c   : > { %10642 = vmatpush1.bf16.msra.mxu0 %v10641_v19  ;;  %v10789_v19 = vpack.c.bf16 %v6376_v56, %v6373_v52  ;;  %v6539_v52 = vld [vmem:[%s15221_s7 + $0x8d0] sm:$0xff]  ;;  %v6542_v56 = vld [vmem:[%s15221_s7 + $0x8e8] sm:$0xff] }
 0xa1d   : > { %10644 = vmatprep.subr.bf16.mxu0 %v10643_v5  ;;  %v10791_v5 = vpack.c.bf16 %v6430_v31, %v6427_v13  ;;  %v6546_v13 = vld [vmem:[%s15221_s7 + $0x908] sm:$0xff] }
 0xa1e   : > { %10774 = vmatpush3.bf16.msra.mxu1 %v10773_v36  ;;  %v10661_v36 = vpack.c.bf16 %v6518_v15, %v6515_v23  ;;  %v6454_v23 = vld [vmem:[%s15221_s7 + $0x628] sm:$0xff]  ;;  %v10677_v15 = vpack.c.bf16 %v6542_v56, %v6539_v52  ;;  %v6529_v56 = vld [vmem:[%s15221_s7 + $0x880] sm:$0xff] }
 0xa1f   : > { %10776 = vmatprep.subr.bf16.mxu1 %v10775_v40  ;;  %v10663_v40 = vpack.c.bf16 %v6525_v29, %v6522_v24  ;;  %v6508_v24 = vld [vmem:[%s15221_s7 + $0x7d8] sm:$0xff]  ;;  %v14803_v29 = vrot.slane %v6677_v28, %v11834_v37  ;;  %v6475_v28 = vld [vmem:[%s15221_s7 + $0x6d0] sm:$0xff] }
 0xa20   : > { %10646 = vmatpush1.bf16.msra.mxu0 %v10645_v58  ;;  %v6528_v58 = vld [vmem:[%s15221_s7 + $0x878] sm:$0xff] }
 0xa21   : > { %10648 = vmatprep.subr.bf16.mxu0 %v10647_v55  ;;  %7051 = vmatmul.mubr.f32.vlgmr.msra.gmra.mrb[2].mxu1 %v14375_v20  ;;  %v6513_v20 = vld [vmem:[%s15221_s7 + $0x800] sm:$0xff]  ;;  %v10667_v60 = vpack.c.bf16 %v6531_v54, %v6528_v58  ;;  %v6511_v58 = vld [vmem:[%s15221_s7 + $0x7f0] sm:$0xff]  ;;  %v6514_v54 = vld [vmem:[%s15221_s7 + $0x808] sm:$0xff] }
 0xa22   : > { %10778 = vmatpush3.bf16.msra.mxu1 %v10777_v59  ;;  %7120 = vmatprep.mubr.f32.mxu1 %v14410_v50  ;;  %v6424_v50 = vld [vmem:[%s15221_s7 + $0x538] sm:$0xff]  ;;  %v10655_v9 = vpack.c.bf16 %v6513_v20, %v6510_v48  ;;  %v6385_v55 = vld [vmem:[%s15221_s7 + $0x400] sm:$0xff]  ;;  %v6439_v59 = vld [vmem:[%s15221_s7 + $0x5b0] sm:$0xff] }
 0xa23   : > { %10780 = vmatprep.subr.bf16.mxu1 %v10779_v4  ;;  %v10787_v63 = vpack.c.bf16 %v6424_v50, %v6421_v7  ;;  %v6527_v4 = vld [vmem:[%s15221_s7 + $0x870] sm:$0xff]  ;;  %v10797_v57 = vpack.c.bf16 %v6388_v1, %v6385_v55  ;;  %v10799_v44 = vpack.c.bf16 %v6442_v18, %v6439_v59  ;;  %v6448_v48 = vld [vmem:[%s15221_s7 + $0x5f8] sm:$0xff]  ;;  %v10683_v55 = vpack.c.bf16 %v6555_v38, %v6552_v11  ;;  %v6558_v18 = vld [vmem:[%s15221_s7 + $0x968] sm:$0xff] }
 0xa24   : > { %10650 = vmatpush1.bf16.msra.mxu0 %v10649_v25  ;;  %v6534_v25 = vld [vmem:[%s15221_s7 + $0x8a8] sm:$0xff]  ;;  %v10669_v47 = vpack.c.bf16 %v6530_v0, %v6527_v4  ;;  %v6543_v7 = vld [vmem:[%s15221_s7 + $0x8f0] sm:$0xff]  ;;  %v10813_v59 = vpack.c.bf16 %v6460_v41, %v6457_v61 }
 0xa25   : > { %10652 = vmatprep.subr.bf16.mxu0 %v10651_v35  ;;  %v6391_v35 = vld [vmem:[%s15221_s7 + $0x430] sm:$0xff]  ;;  %v10671_v20 = vpack.c.bf16 %v6537_v26, %v6534_v25  ;;  %v6466_v0 = vld [vmem:[%s15221_s7 + $0x688] sm:$0xff]  ;;  %v6517_v25 = vld [vmem:[%s15221_s7 + $0x820] sm:$0xff] }
 0xa26   : > { %10782 = vmatpush3.bf16.msra.mxu1 %v10781_v49  ;;  %v6445_v49 = vld [vmem:[%s15221_s7 + $0x5e0] sm:$0xff]  ;;  %v10801_v53 = vpack.c.bf16 %v6394_v17, %v6391_v35  ;;  %v6551_v1 = vld [vmem:[%s15221_s7 + $0x930] sm:$0xff]  ;;  %v6560_v35 = vld [vmem:[%s15221_s7 + $0x978] sm:$0xff] }
 0xa27   : > { %10784 = vmatprep.subr.bf16.mxu1 %v10783_v45  ;;  %v6533_v45 = vld [vmem:[%s15221_s7 + $0x8a0] sm:$0xff]  ;;  %v10803_v50 = vpack.c.bf16 %v6448_v48, %v6445_v49  ;;  %v6463_v4 = vld [vmem:[%s15221_s7 + $0x670] sm:$0xff]  ;;  %v6582_v41 = vld [vmem:[%s15221_s7 + $0xa28] sm:$0xff] }
 0xa28   : > { %10654 = vmatpush1.bf16.msra.mxu0 %v10653_v6  ;;  %v6540_v6 = vld [vmem:[%s15221_s7 + $0x8d8] sm:$0xff]  ;;  %v10673_v14 = vpack.c.bf16 %v6536_v51, %v6533_v45  ;;  %v10817_v17 = vpack.c.bf16 %v6466_v0, %v6463_v4  ;;  %v6567_v49 = vld [vmem:[%s15221_s7 + $0x9b0] sm:$0xff] }
 0xa29   : > { %10656 = vmatprep.subr.bf16.mxu0 %v10655_v9  ;;  %v6397_v9 = vld [vmem:[%s15221_s7 + $0x460] sm:$0xff]  ;;  %v6472_v45 = vld [vmem:[%s15221_s7 + $0x6b8] sm:$0xff]  ;;  %v6575_v38 = vld [vmem:[%s15221_s7 + $0x9f0] sm:$0xff] }
 0xa2a   : > { %10786 = vmatpush3.bf16.msra.mxu1 %v10785_v42  ;;  %v6499_v42 = vld [vmem:[%s15221_s7 + $0x790] sm:$0xff]  ;;  %v6588_v0 = vld [vmem:[%s15221_s7 + $0xa58] sm:$0xff] }
 0xa2b   : > { %10788 = vmatprep.subr.bf16.mxu1 %v10787_v63  ;;  %v10675_v63 = vpack.c.bf16 %v6543_v7, %v6540_v6  ;;  %v10807_v31 = vpack.c.bf16 %v6502_v8, %v6499_v42  ;;  %v6526_v6 = vld [vmem:[%s15221_s7 + $0x868] sm:$0xff]  ;;  %v6573_v42 = vld [vmem:[%s15221_s7 + $0x9e0] sm:$0xff] }
 0xa2c   : > { %10658 = vmatpush1.bf16.msra.mxu0 %v10657_v62  ;;  %v10805_v62 = vpack.c.bf16 %v6400_v10, %v6397_v9  ;;  %v6566_v9 = vld [vmem:[%s15221_s7 + $0x9a8] sm:$0xff] }
 0xa2d   : > { %10660 = vmatprep.subr.bf16.mxu0 %v10659_v32  ;;  %v6451_v32 = vld [vmem:[%s15221_s7 + $0x610] sm:$0xff] }
 0xa2e   : > { %10790 = vmatpush3.bf16.msra.mxu1 %v10789_v19  ;;  %v6505_v19 = vld [vmem:[%s15221_s7 + $0x7c0] sm:$0xff] }
 0xa2f   : > { %10792 = vmatprep.subr.bf16.mxu1 %v10791_v5  ;;  %v10679_v5 = vpack.c.bf16 %v6549_v2, %v6546_v13  ;;  %v6569_v2 = vld [vmem:[%s15221_s7 + $0x9c0] sm:$0xff] }
 0xa30   : > { %10662 = vmatpush1.bf16.msra.mxu0 %v10661_v36  ;;  %v10809_v36 = vpack.c.bf16 %v6454_v23, %v6451_v32  ;;  %v6576_v23 = vld [vmem:[%s15221_s7 + $0x9f8] sm:$0xff] }
 0xa31   : > { %10664 = vmatprep.subr.bf16.mxu0 %v10663_v40  ;;  %v10811_v40 = vpack.c.bf16 %v6508_v24, %v6505_v19  ;;  %v6481_v24 = vld [vmem:[%s15221_s7 + $0x700] sm:$0xff] }
 0xa32   : > { %10794 = vmatpush3.bf16.msra.mxu1 %v10793_v46  ;;  %v10681_v46 = vpack.c.bf16 %v6548_v34, %v6545_v33  ;;  %v6535_v34 = vld [vmem:[%s15221_s7 + $0x8b0] sm:$0xff] }
 0xa33   : > { %10796 = vmatprep.subr.bf16.mxu1 %v10795_v16  ;;  %v14831_v16 = vcombine.high %v14803_v29, %v14803_v29 }
 0xa34   : > { %10666 = vmatpush1.bf16.msra.mxu0 %v10665_v43  ;;  %v6554_v43 = vld [vmem:[%s15221_s7 + $0x948] sm:$0xff] }
 0xa35   : > { %10668 = vmatprep.subr.bf16.mxu0 %v10667_v60  ;;  %v6561_v60 = vld [vmem:[%s15221_s7 + $0x980] sm:$0xff] }
 0xa36   : > { %10798 = vmatpush3.bf16.msra.mxu1 %v10797_v57  ;;  %v10685_v57 = vpack.c.bf16 %v6554_v43, %v6551_v1  ;;  %v10687_v26 = vpack.c.bf16 %v6561_v60, %v6558_v18  ;;  %v6541_v43 = vld [vmem:[%s15221_s7 + $0x8e0] sm:$0xff] }
 0xa37   : > { %10800 = vmatprep.subr.bf16.mxu1 %v10799_v44  ;;  %v6557_v44 = vld [vmem:[%s15221_s7 + $0x960] sm:$0xff] }
 0xa38   : > { %10670 = vmatpush1.bf16.msra.mxu0 %v10669_v47  ;;  %v6564_v47 = vld [vmem:[%s15221_s7 + $0x998] sm:$0xff]  ;;  %v10689_v51 = vpack.c.bf16 %v6560_v35, %v6557_v44  ;;  %v6581_v60 = vld [vmem:[%s15221_s7 + $0xa20] sm:$0xff]  ;;  %v6595_v35 = vld [vmem:[%s15221_s7 + $0xa90] sm:$0xff] }
 0xa39   : > { %10672 = vmatprep.subr.bf16.mxu0 %v10671_v20  ;;  %v6469_v20 = vld [vmem:[%s15221_s7 + $0x6a0] sm:$0xff]  ;;  %v10691_v7 = vpack.c.bf16 %v6567_v49, %v6564_v47  ;;  %v6587_v49 = vld [vmem:[%s15221_s7 + $0xa50] sm:$0xff] }
 0xa3a   : > { %10802 = vmatpush3.bf16.msra.mxu1 %v10801_v53  ;;  %v6523_v53 = vld [vmem:[%s15221_s7 + $0x850] sm:$0xff]  ;;  %v10821_v10 = vpack.c.bf16 %v6472_v45, %v6469_v20  ;;  %v6594_v45 = vld [vmem:[%s15221_s7 + $0xa88] sm:$0xff] }
 0xa3b   : > { %10804 = vmatprep.subr.bf16.mxu1 %v10803_v50  ;;  %v6563_v50 = vld [vmem:[%s15221_s7 + $0x990] sm:$0xff]  ;;  %v10823_v8 = vpack.c.bf16 %v6526_v6, %v6523_v53 }
 0xa3c   : > { %10674 = vmatpush1.bf16.msra.mxu0 %v10673_v14  ;;  %v6570_v14 = vld [vmem:[%s15221_s7 + $0x9c8] sm:$0xff]  ;;  %v10693_v52 = vpack.c.bf16 %v6566_v9, %v6563_v50  ;;  %v6547_v6 = vld [vmem:[%s15221_s7 + $0x910] sm:$0xff]  ;;  %v6601_v9 = vld [vmem:[%s15221_s7 + $0xac0] sm:$0xff] }
 0xa3d   : > { %10676 = vmatprep.subr.bf16.mxu0 %v10675_v63  ;;  %v6478_v63 = vld [vmem:[%s15221_s7 + $0x6e8] sm:$0xff]  ;;  %v10695_v13 = vpack.c.bf16 %v6573_v42, %v6570_v14  ;;  %v6593_v42 = vld [vmem:[%s15221_s7 + $0xa80] sm:$0xff] }
 0xa3e   : > { %10806 = vmatpush3.bf16.msra.mxu1 %v10805_v62  ;;  %v6532_v62 = vld [vmem:[%s15221_s7 + $0x898] sm:$0xff]  ;;  %v10825_v32 = vpack.c.bf16 %v6478_v63, %v6475_v28 }
 0xa3f   : > { %10808 = vmatprep.subr.bf16.mxu1 %v10807_v31  ;;  %v6572_v31 = vld [vmem:[%s15221_s7 + $0x9d8] sm:$0xff]  ;;  %v10827_v19 = vpack.c.bf16 %v6532_v62, %v6529_v56  ;;  %v6553_v62 = vld [vmem:[%s15221_s7 + $0x940] sm:$0xff] }
 0xa40   : > { %10678 = vmatpush1.bf16.msra.mxu0 %v10677_v15  ;;  %v6579_v15 = vld [vmem:[%s15221_s7 + $0xa10] sm:$0xff]  ;;  %v10697_v33 = vpack.c.bf16 %v6572_v31, %v6569_v2  ;;  %v6600_v63 = vld [vmem:[%s15221_s7 + $0xab8] sm:$0xff] }
 0xa41   : > { %10680 = vmatprep.subr.bf16.mxu0 %v10679_v5  ;;  %7121 = vmatmul.mubr.f32.vlgmr.msra.gmra.mrb[4].mxu1 %v14394_v22  ;;  %v10815_v22 = vpack.c.bf16 %v6514_v54, %v6511_v58  ;;  %v6484_v5 = vld [vmem:[%s15221_s7 + $0x718] sm:$0xff]  ;;  %v10699_v11 = vpack.c.bf16 %v6579_v15, %v6576_v23  ;;  %v6487_v54 = vld [vmem:[%s15221_s7 + $0x730] sm:$0xff] }
 0xa42   : > { %10810 = vmatpush3.bf16.msra.mxu1 %v10809_v36  ;;  %7190 = vmatprep.mubr.f32.mxu1 %v14634_v39  ;;  %v6520_v39 = vld [vmem:[%s15221_s7 + $0x838] sm:$0xff]  ;;  %v6538_v36 = vld [vmem:[%s15221_s7 + $0x8c8] sm:$0xff]  ;;  %v10829_v61 = vpack.c.bf16 %v6484_v5, %v6481_v24  ;;  %v6607_v31 = vld [vmem:[%s15221_s7 + $0xaf0] sm:$0xff] }
 0xa43   : > { %6909 = vmatmul.mubr.f32.vlgmr.msra.gmra.mrb[0].mxu0 %v14617_v30  ;;  %10812 = vmatprep.subr.bf16.mxu1 %v10811_v40  ;;  %v10819_v48 = vpack.c.bf16 %v6520_v39, %v6517_v25  ;;  %v6578_v40 = vld [vmem:[%s15221_s7 + $0xa08] sm:$0xff]  ;;  %v10831_v58 = vpack.c.bf16 %v6538_v36, %v6535_v34  ;;  %v6493_v39 = vld [vmem:[%s15221_s7 + $0x760] sm:$0xff]  ;;  %v6599_v15 = vld [vmem:[%s15221_s7 + $0xab0] sm:$0xff] }
 0xa44   : > { %10682 = vmatpush1.bf16.msra.mxu0 %v10681_v46  ;;  %6979 = vmatprep.mubr.f32.mxu0 %v14831_v16  ;;  %v6585_v46 = vld [vmem:[%s15221_s7 + $0xa40] sm:$0xff]  ;;  %v10701_v1 = vpack.c.bf16 %v6578_v40, %v6575_v38  ;;  %v6606_v5 = vld [vmem:[%s15221_s7 + $0xae8] sm:$0xff]  ;;  %v6559_v34 = vld [vmem:[%s15221_s7 + $0x970] sm:$0xff] }
 0xa45   : > { %10684 = vmatprep.subr.bf16.mxu0 %v10683_v55  ;;  %v6490_v55 = vld [vmem:[%s15221_s7 + $0x748] sm:$0xff]  ;;  %v10703_v18 = vpack.c.bf16 %v6585_v46, %v6582_v41  ;;  %v6613_v38 = vld [vmem:[%s15221_s7 + $0xb20] sm:$0xff]  ;;  %v6608_v41 = vld [vmem:[%s15221_s7 + $0xaf8] sm:$0xff] }
 0xa46   : > { %10814 = vmatpush3.bf16.msra.mxu1 %v10813_v59  ;;  %v6544_v59 = vld [vmem:[%s15221_s7 + $0x8f8] sm:$0xff]  ;;  %v10833_v4 = vpack.c.bf16 %v6490_v55, %v6487_v54  ;;  %v6562_v36 = vld [vmem:[%s15221_s7 + $0x988] sm:$0xff]  ;;  %v6615_v54 = vld [vmem:[%s15221_s7 + $0xb30] sm:$0xff] }
 0xa47   : > { %10816 = vmatprep.subr.bf16.mxu1 %v10815_v22  ;;  %v6584_v22 = vld [vmem:[%s15221_s7 + $0xa38] sm:$0xff]  ;;  %v10835_v25 = vpack.c.bf16 %v6544_v59, %v6541_v43  ;;  %v10849_v46 = vpack.c.bf16 %v6562_v36, %v6559_v34  ;;  %v6639_v34 = vld [vmem:[%s15221_s7 + $0xbf0] sm:$0xff] }
 0xa48   : > { %10686 = vmatpush1.bf16.msra.mxu0 %v10685_v57  ;;  %v6591_v57 = vld [vmem:[%s15221_s7 + $0xa70] sm:$0xff]  ;;  %v10705_v44 = vpack.c.bf16 %v6584_v22, %v6581_v60  ;;  %v6568_v43 = vld [vmem:[%s15221_s7 + $0x9b8] sm:$0xff]  ;;  %v6622_v60 = vld [vmem:[%s15221_s7 + $0xb68] sm:$0xff] }
 0xa49   : > { %10688 = vmatprep.subr.bf16.mxu0 %v10687_v26  ;;  %v6496_v26 = vld [vmem:[%s15221_s7 + $0x778] sm:$0xff]  ;;  %v10707_v47 = vpack.c.bf16 %v6591_v57, %v6588_v0  ;;  %v6614_v0 = vld [vmem:[%s15221_s7 + $0xb28] sm:$0xff] }
 0xa4a   : > { %10818 = vmatpush3.bf16.msra.mxu1 %v10817_v17  ;;  %v6598_v17 = vld [vmem:[%s15221_s7 + $0xaa8] sm:$0xff]  ;;  %v10837_v20 = vpack.c.bf16 %v6496_v26, %v6493_v39  ;;  %v6621_v39 = vld [vmem:[%s15221_s7 + $0xb60] sm:$0xff] }
 0xa4b   : > { %10820 = vmatprep.subr.bf16.mxu1 %v10819_v48  ;;  %v6590_v48 = vld [vmem:[%s15221_s7 + $0xa68] sm:$0xff]  ;;  %v10839_v53 = vpack.c.bf16 %v6598_v17, %v6595_v35 }
 0xa4c   : > { %10690 = vmatpush1.bf16.msra.mxu0 %v10689_v51  ;;  %v6597_v51 = vld [vmem:[%s15221_s7 + $0xaa0] sm:$0xff]  ;;  %v10709_v50 = vpack.c.bf16 %v6590_v48, %v6587_v49  ;;  %v6574_v35 = vld [vmem:[%s15221_s7 + $0x9e8] sm:$0xff]  ;;  %v6628_v49 = vld [vmem:[%s15221_s7 + $0xb98] sm:$0xff] }
 0xa4d   : > { %10692 = vmatprep.subr.bf16.mxu0 %v10691_v7  ;;  %v6550_v7 = vld [vmem:[%s15221_s7 + $0x928] sm:$0xff]  ;;  %v10711_v14 = vpack.c.bf16 %v6597_v51, %v6594_v45  ;;  %v6620_v45 = vld [vmem:[%s15221_s7 + $0xb58] sm:$0xff] }
 0xa4e   : > { %10822 = vmatpush3.bf16.msra.mxu1 %v10821_v10  ;;  %v6604_v10 = vld [vmem:[%s15221_s7 + $0xad8] sm:$0xff]  ;;  %v10841_v28 = vpack.c.bf16 %v6550_v7, %v6547_v6  ;;  %v6627_v6 = vld [vmem:[%s15221_s7 + $0xb90] sm:$0xff] }
 0xa4f   : > { %10824 = vmatprep.subr.bf16.mxu1 %v10823_v8  ;;  %v6596_v8 = vld [vmem:[%s15221_s7 + $0xa98] sm:$0xff]  ;;  %v10843_v56 = vpack.c.bf16 %v6604_v10, %v6601_v9 }
 0xa50   : > { %10694 = vmatpush1.bf16.msra.mxu0 %v10693_v52  ;;  %v6603_v52 = vld [vmem:[%s15221_s7 + $0xad0] sm:$0xff]  ;;  %v10713_v2 = vpack.c.bf16 %v6596_v8, %v6593_v42  ;;  %v6580_v9 = vld [vmem:[%s15221_s7 + $0xa18] sm:$0xff]  ;;  %v6634_v42 = vld [vmem:[%s15221_s7 + $0xbc8] sm:$0xff] }
 0xa51   : > { %10696 = vmatprep.subr.bf16.mxu0 %v10695_v13  ;;  %v6556_v13 = vld [vmem:[%s15221_s7 + $0x958] sm:$0xff]  ;;  %v10715_v23 = vpack.c.bf16 %v6603_v52, %v6600_v63  ;;  %v6626_v63 = vld [vmem:[%s15221_s7 + $0xb88] sm:$0xff] }
 0xa52   : > { %10826 = vmatpush3.bf16.msra.mxu1 %v10825_v32  ;;  %v6610_v32 = vld [vmem:[%s15221_s7 + $0xb08] sm:$0xff]  ;;  %v10845_v24 = vpack.c.bf16 %v6556_v13, %v6553_v62  ;;  %v6633_v62 = vld [vmem:[%s15221_s7 + $0xbc0] sm:$0xff] }
 0xa53   : > { %10828 = vmatprep.subr.bf16.mxu1 %v10827_v19  ;;  %v6602_v19 = vld [vmem:[%s15221_s7 + $0xac8] sm:$0xff] }
 0xa54   : > { %10698 = vmatpush1.bf16.msra.mxu0 %v10697_v33  ;;  %v6609_v33 = vld [vmem:[%s15221_s7 + $0xb00] sm:$0xff] }
 0xa55   : > { %10700 = vmatprep.subr.bf16.mxu0 %v10699_v11  ;;  %v10717_v11 = vpack.c.bf16 %v6602_v19, %v6599_v15  ;;  %v10719_v40 = vpack.c.bf16 %v6609_v33, %v6606_v5  ;;  %v6640_v15 = vld [vmem:[%s15221_s7 + $0xbf8] sm:$0xff] }
 0xa56   : > { %10830 = vmatpush3.bf16.msra.mxu1 %v10829_v61  ;;  %v6605_v61 = vld [vmem:[%s15221_s7 + $0xae0] sm:$0xff]  ;;  %v6632_v5 = vld [vmem:[%s15221_s7 + $0xbb8] sm:$0xff] }
 0xa57   : > { %10832 = vmatprep.subr.bf16.mxu1 %v10831_v58  ;;  %v6612_v58 = vld [vmem:[%s15221_s7 + $0xb18] sm:$0xff]  ;;  %v10721_v59 = vpack.c.bf16 %v6608_v41, %v6605_v61  ;;  %v6635_v61 = vld [vmem:[%s15221_s7 + $0xbd0] sm:$0xff]  ;;  %v6638_v41 = vld [vmem:[%s15221_s7 + $0xbe8] sm:$0xff] }
 0xa58   : > { %10702 = vmatpush1.bf16.msra.mxu0 %v10701_v1  ;;  %v6565_v1 = vld [vmem:[%s15221_s7 + $0x9a0] sm:$0xff]  ;;  %v10723_v22 = vpack.c.bf16 %v6615_v54, %v6612_v58  ;;  %v10741_v58 = vpack.c.bf16 %v6638_v41, %v6635_v61 }
 0xa59   : > { %10704 = vmatprep.subr.bf16.mxu0 %v10703_v18  ;;  %v6619_v18 = vld [vmem:[%s15221_s7 + $0xb50] sm:$0xff]  ;;  %v10853_v57 = vpack.c.bf16 %v6568_v43, %v6565_v1 }
 0xa5a   : > { %10834 = vmatpush3.bf16.msra.mxu1 %v10833_v4  ;;  %v6611_v4 = vld [vmem:[%s15221_s7 + $0xb10] sm:$0xff]  ;;  %v10855_v26 = vpack.c.bf16 %v6622_v60, %v6619_v18  ;;  %v6641_v18 = vld [vmem:[%s15222_s8] sm:$0x7] }
 0xa5b   : > { %10836 = vmatprep.subr.bf16.mxu1 %v10835_v25  ;;  %v6618_v25 = vld [vmem:[%s15221_s7 + $0xb48] sm:$0xff]  ;;  %v10725_v17 = vpack.c.bf16 %v6614_v0, %v6611_v4  ;;  %v6654_v60 = vrot.slane %v6641_v18, %v6189_v27 }
 0xa5c   : > { %10706 = vmatpush1.bf16.msra.mxu0 %v10705_v44  ;;  %v6571_v44 = vld [vmem:[%s15221_s7 + $0x9d0] sm:$0xff]  ;;  %v10727_v48 = vpack.c.bf16 %v6621_v39, %v6618_v25 }
 0xa5d   : > { %10708 = vmatprep.subr.bf16.mxu0 %v10707_v47  ;;  %v6625_v47 = vld [vmem:[%s15221_s7 + $0xb80] sm:$0xff]  ;;  %v10857_v51 = vpack.c.bf16 %v6574_v35, %v6571_v44  ;;  %v6646_v35 = vrot.slane %v6641_v18, %v6181_v12 }
 0xa5e   : > { %10838 = vmatpush3.bf16.msra.mxu1 %v10837_v20  ;;  %v6617_v20 = vld [vmem:[%s15221_s7 + $0xb40] sm:$0xff]  ;;  %v10859_v7 = vpack.c.bf16 %v6628_v49, %v6625_v47 }
 0xa5f   : > { %10840 = vmatprep.subr.bf16.mxu1 %v10839_v53  ;;  %v6624_v53 = vld [vmem:[%s15221_s7 + $0xb78] sm:$0xff]  ;;  %v10729_v10 = vpack.c.bf16 %v6620_v45, %v6617_v20 }
 0xa60   : > { %10710 = vmatpush1.bf16.msra.mxu0 %v10709_v50  ;;  %v6577_v50 = vld [vmem:[%s15221_s7 + $0xa00] sm:$0xff]  ;;  %v10731_v8 = vpack.c.bf16 %v6627_v6, %v6624_v53 }
 0xa61   : > { %10712 = vmatprep.subr.bf16.mxu0 %v10711_v14  ;;  %7191 = vmatmul.mubr.f32.vlgmr.msra.gmra.mrb[6].mxu1 %v14617_v30  ;;  %v10847_v30 = vpack.c.bf16 %v6610_v32, %v6607_v31  ;;  %v6631_v14 = vld [vmem:[%s15221_s7 + $0xbb0] sm:$0xff]  ;;  %v10861_v52 = vpack.c.bf16 %v6580_v9, %v6577_v50  ;;  %v6586_v31 = vld [vmem:[%s15221_s7 + $0xa48] sm:$0xff] }
 0xa62   : > { %10842 = vmatpush3.bf16.msra.mxu1 %v10841_v28  ;;  %7260 = vmatprep.mubr.f32.mxu1 %v14831_v16  ;;  %v6616_v16 = vld [vmem:[%s15221_s7 + $0xb38] sm:$0xff]  ;;  %v6623_v28 = vld [vmem:[%s15221_s7 + $0xb70] sm:$0xff]  ;;  %v10863_v13 = vpack.c.bf16 %v6634_v42, %v6631_v14 }
 0xa63   : > { %10844 = vmatprep.subr.bf16.mxu1 %v10843_v56  ;;  %v10851_v55 = vpack.c.bf16 %v6616_v16, %v6613_v38  ;;  %v6630_v56 = vld [vmem:[%s15221_s7 + $0xba8] sm:$0xff]  ;;  %v10733_v32 = vpack.c.bf16 %v6626_v63, %v6623_v28  ;;  %v6592_v38 = vld [vmem:[%s15221_s7 + $0xa78] sm:$0xff] }
 0xa64   : > { %10714 = vmatpush1.bf16.msra.mxu0 %v10713_v2  ;;  %v6583_v2 = vld [vmem:[%s15221_s7 + $0xa30] sm:$0xff]  ;;  %v10735_v19 = vpack.c.bf16 %v6633_v62, %v6630_v56 }
 0xa65   : > { %10716 = vmatprep.subr.bf16.mxu0 %v10715_v23  ;;  %v6637_v23 = vld [vmem:[%s15221_s7 + $0xbe0] sm:$0xff]  ;;  %v10865_v33 = vpack.c.bf16 %v6586_v31, %v6583_v2 }
 0xa66   : > { %10846 = vmatpush3.bf16.msra.mxu1 %v10845_v24  ;;  %v6629_v24 = vld [vmem:[%s15221_s7 + $0xba0] sm:$0xff]  ;;  %v10867_v36 = vpack.c.bf16 %v6640_v15, %v6637_v23 }
 0xa67   : > { %10848 = vmatprep.subr.bf16.mxu1 %v10847_v30  ;;  %v6636_v30 = vld [vmem:[%s15221_s7 + $0xbd8] sm:$0xff]  ;;  %v10737_v16 = vpack.c.bf16 %v6632_v5, %v6629_v24 }
 0xa68   : > { %10718 = vmatpush1.bf16.msra.mxu0 %v10717_v11  ;;  %v6589_v11 = vld [vmem:[%s15221_s7 + $0xa60] sm:$0xff] }
 0xa69   : > { %10720 = vmatprep.subr.bf16.mxu0 %v10719_v40  ;;  %v10739_v40 = vpack.c.bf16 %v6639_v34, %v6636_v30 }
 0xa6a   : > { %10850 = vmatpush3.bf16.msra.mxu1 %v10849_v46  ;;  %v10869_v46 = vpack.c.bf16 %v6592_v38, %v6589_v11 }
 0xa6b   : > { %10852 = vmatprep.subr.bf16.mxu1 %v10851_v55 }
 0xa6c   : > { %10722 = vmatpush1.bf16.msra.mxu0 %v10721_v59 }
 0xa6d   : > { %10724 = vmatprep.subr.bf16.mxu0 %v10723_v22 }
 0xa6e   : > { %10854 = vmatpush3.bf16.msra.mxu1 %v10853_v57 }
 0xa6f   : > { %10856 = vmatprep.subr.bf16.mxu1 %v10855_v26 }
 0xa70   : > { %10726 = vmatpush1.bf16.msra.mxu0 %v10725_v17  ;;  %v6650_v17 = vrot.slane %v6641_v18, %v6185_v21 }
 0xa71   : > { %10728 = vmatprep.subr.bf16.mxu0 %v10727_v48 }
 0xa72   : > { %10858 = vmatpush3.bf16.msra.mxu1 %v10857_v51 }
 0xa73   : > { %10860 = vmatprep.subr.bf16.mxu1 %v10859_v7 }
 0xa74   : > { %10730 = vmatpush1.bf16.msra.mxu0 %v10729_v10 }
 0xa75   : > { %10732 = vmatprep.subr.bf16.mxu0 %v10731_v8 }
 0xa76   : > { %10862 = vmatpush3.bf16.msra.mxu1 %v10861_v52 }
 0xa77   : > { %10864 = vmatprep.subr.bf16.mxu1 %v10863_v13 }
 0xa78   : > { %10734 = vmatpush1.bf16.msra.mxu0 %v10733_v32 }
 0xa79   : > { %10736 = vmatprep.subr.bf16.mxu0 %v10735_v19 }
 0xa7a   : > { %10866 = vmatpush3.bf16.msra.mxu1 %v10865_v33 }
 0xa7b   : > { %10868 = vmatprep.subr.bf16.mxu1 %v10867_v36 }
 0xa7c   : > { %10738 = vmatpush1.bf16.msra.mxu0 %v10737_v16 }
 0xa7d   : > { %10740 = vmatprep.subr.bf16.mxu0 %v10739_v40 }
 0xa7e   : > { %10870 = vmatpush3.bf16.msra.mxu1 %v10869_v46 }
 0xa80   : > { %10742 = vmatpush1.bf16.msra.mxu0 %v10741_v58 }
 0xa81   : > { %7261 = vmatmul.mubr.f32.vlgmr.msra.gmra.mrb[8].mxu1 %v14803_v29 }
 0xa83   : > { %6980 = vmatmul.mubr.f32.vlgmr.msra.gmra.mrb[0].mxu0 %v14803_v29 }
 0xad4   : > { %v6768_v54 = vpop.f32.mrb[0].mxu1 }
 0xad5   : > { %v6770_v55 = vpop.f32.mrb[1].mxu1  ;;  %v6769_v49 = vadd.f32 %v6768_v54, %v6646_v35 }
 0xad6   : > { %v6771_v20 = vadd.f32 %v6770_v55, %v6650_v17 }
 0xaf4   : > { %v7767_v1 = vpop.f32.mrb[2].mxu1 }
 0xaf5   : > { %v7768_v43 = vpop.f32.mrb[3].mxu1 }
 0xaf6   : > { %v7769_v59 = vadd.f32 %v7768_v43, %v7767_v1 }
 0xaf8   : > { %v7053_v0 = vadd.f32 %v7769_v59, %v6654_v60 }
 0xb14   : > { %v7802_v22 = vpop.f32.mrb[4].mxu1 }
 0xb15   : > { %v7803_v4 = vpop.f32.mrb[5].mxu1 }
 0xb16   : > { %v7804_v57 = vadd.f32 %v7803_v4, %v7802_v22 }
 0xb18   : > { %v7123_v25 = vadd.f32 %v7804_v57, %v7053_v0 }
 0xb34   : > { %v7837_v39 = vpop.f32.mrb[6].mxu1 }
 0xb35   : > { %v7838_v26 = vpop.f32.mrb[7].mxu1 }
 0xb36   : > { %v7839_v29 = vadd.f32 %v7838_v26, %v7837_v39 }
 0xb38   : > { %v7193_v44 = vadd.f32 %v7839_v29, %v7123_v25 }
 0xb54   : > { %v7872_v47 = vpop.f32.mrb[8].mxu1 }
 0xb55   : > { %v7873_v48 = vpop.f32.mrb[9].mxu1 }
 0xb56   : > { %v6981_v27 = vpop.f32.mrb[0].mxu0  ;;  %v7874_v45 = vadd.f32 %v7873_v48, %v7872_v47 }
 0xb57   : > { %v10928_v51 = vadd.f32 %v6981_v27, %v6769_v49  ;;  %v6983_v53 = vpop.f32.mrb[1].mxu0 }
 0xb58   : > { %v10930_v6 = vadd.f32 %v6983_v53, %v6771_v20  ;;  %v7263_v7 = vadd.f32 %v7874_v45, %v7193_v44 }
 0xb59   : > { %v7266_v50 = vand.u32 2147483647, %v10928_v51 }
 0xb5a   : > { %v7267_v9 = vand.u32 2147483647, %v10930_v6  ;;  %v7268_v10 = vand.u32 2147483647, %v7263_v7 }
 0xb5b   : > { %v7269_v14 = vadd.f32 1.0, %v7266_v50 }
 0xb5c   : > { %v7270_v42 = vadd.f32 1.0, %v7267_v9  ;;  %v7271_v8 = vadd.f32 1.0, %v7268_v10 }
 0xb5d   : > { %10998 = vrcp.f32 %v7269_v14 }
 0xb5e   : > { %11000 = vrcp.f32 %v7270_v42 }
 0xb5f   : > { %11002 = vrcp.f32 %v7271_v8 }
 0xb67   : > { %v10999_v3 = vpop.eup %10998 }
 0xb68   : > { %v11001_v12 = vpop.eup %11000  ;;  %v7273_v21 = vmul.f32 %v10999_v3, %v10928_v51 }
 0xb69   : > { %v11003_v28 = vpop.eup %11002  ;;  %v7275_v63 = vmul.f32 %v11001_v12, %v10930_v6 }
 0xb6a   : > { %v7278_v52 = vmul.f32 10.0, %v7273_v21  ;;  %v7277_v56 = vmul.f32 %v11003_v28, %v7263_v7 }
 0xb6b   : > { %v7279_v62 = vmul.f32 10.0, %v7275_v63 }
 0xb6c   : > { %v7280_v13 = vmul.f32 10.0, %v7277_v56 }
 0xb6d   : > { %v7284_v2 = vcombine.low %v7278_v52, %v7279_v62 }
 0xb6e   : > { %v7298_v31 = vrot.slane %v7280_v13, %v11834_v37 }
 0xb6f   : > { %v7291_v32 = vrot.slane %v7284_v2, %v11834_v37 }
 0xb71   : > { %v7299_v23 = vcombine.low %v7291_v32, %v7298_v31 }
 0xb73   : > { %7301 = vst [vmem:[#allocation4] sm:$0x3f] %v7299_v23 }
 0xb74 PF: > { %p10939_p6 = scmp.eq.s32.totalorder %s11108_s10, 1  ;;  %s11051_s23 = smov [#allocation4]  }
 0xb75   : > { %s7309_s24 = sshll.u32 %s11051_s23, 4  ;;  %s7310_s24 = int_to_ptr.vmem [resolvable:$true] %s7309_s24 }
 0xb76   : > { %s11004_s25 = scalar_lea.vmem %s7310_s24, 96  ;;  %p11011_p10 = scmp.lt.s32.totalorder %s7310_s24, %s7310_s24 }
 0xb77   : > { %p11005_p7 = scmp.ne.s32.totalorder %s7310_s24, %s11004_s25  ;;  %p11012_p11 = scmp.lt.s32.totalorder %s11004_s25, %s11004_s25 }
 0xb79   : > { %p11006_p8 = pnand %p11005_p7, %p10939_p6  ;;  %p11013_p12 = por %p11012_p11, %p11011_p10 }
 0xb7b   : > { %p11007_p9 = pneg %p11006_p8 }
 0xb7d   : > { %p11014_p13 = pnand %p11013_p12, %p11007_p9 }
 0xb7f   : > { %11017 = shalt.err (!%p11014_p13)
}
 0xb80   : > { %s11018_s28 = scalar_lea.hbm %s15223_s9, 96 }
 0xb81   : > { %p11019_p0 = scmp.ne.s32.totalorder %s15223_s9, %s11018_s28  ;;  %p11024_p3 = scmp.lt.u32.totalorder %s11018_s28, %s15223_s9 }
 0xb83   : > { %p11020_p1 = pnand %p11019_p0, %p10939_p6 }
 0xb85   : > { %p11021_p2 = pneg %p11020_p1 }
 0xb87   : > { %p11026_p4 = pnand %p11024_p3, %p11021_p2 }
 0xb89   : > { %11029 = shalt.err (!%p11026_p4)
}
 0xb8a   : > { %10936 = dma.vmem_to_hbm [thread:$0]  (%p10939_p6), %s7310_s24, 96, %s15223_s9, [#allocation5]  }
 0xb8b   : > { %11035 = dma.done.wait (%p10939_p6), [#allocation5], 96  }
 0xb8c   : > { %11037 = vsyncadd (%p10939_p6), [#allocation5], 4294967200 }
 0xb8d PF: > { %s20_s30 = sadd.s32 1, %s11040_s30  }
 0xb8e   : > { %p17_p5 = scmp.ge.s32.totalorder %s20_s30, 4  }
 0xb90   :  { %19 = sbr.rel (!%p17_p5) target bundleno = 1 (0x1), region = 92 }
 0xb97   :  { %7322 = vsyncpa [#allocation5], 1 }
 0xb98   :  { %7324 = vsyncpa [#allocation5 + $0x1], 1 }

</bundles_post_ra>
